<compile_context>
chip_gen: v5e
topology: v5e:2x2
jax: 0.10.0
libtpu: 0.0.40
codegen_flags: <defaults>
</compile_context>

<pallas_src>
import math

import jax
import jax.numpy as jnp
from jax.experimental import pallas as pl
from jax.experimental.pallas import tpu as pltpu

# ----------------------------- config ---------------------------------------
HIDDEN = 32                      # __C['hidden_size']
NUM_HEADS = 4                    # __C['multi_head']
HEAD_DIM = HIDDEN // NUM_HEADS   # __C['hidden_size_head']
FFN_MID = HIDDEN * 4
NUM_LAYERS = 2                   # __C['transformer_num_layers']
LN_EPS = 1e-6
ATT_SCALE = 1.0 / math.sqrt(HEAD_DIM)

PARAM_NAMES = (
    # encoder (SA) stacks
    'e_aw', 'e_ab', 'e_w1', 'e_b1', 'e_w2', 'e_b2', 'e_g', 'e_bt',
    # decoder (SGA) stacks
    'd_aw1', 'd_ab1', 'd_aw2', 'd_ab2',
    'd_w1', 'd_b1', 'd_w2', 'd_b2', 'd_g', 'd_bt',
)
# weight matrices fed to the MXU (cast to bf16 in the wrapper); biases/LN stay f32
_BF16_WEIGHTS = frozenset({'e_aw', 'e_w1', 'e_w2', 'd_aw1', 'd_aw2', 'd_w1', 'd_w2'})


# --------------------------- in-kernel helpers --------------------------------

def _fold_heads(t2, b, s):
    """(b*s, H) f32 -> (NH*b, s, DH) bf16; heads folded head-major into batch dim."""
    t3 = t2.reshape(b, s, HIDDEN)
    folded = jnp.concatenate(
        [t3[:, :, h * HEAD_DIM:(h + 1) * HEAD_DIM] for h in range(NUM_HEADS)], axis=0)
    return folded.astype(jnp.bfloat16)


def _mhatt(xq, xkv, bias_h, aw, ab):
    """Multi-head attention with all heads batched into one score/softmax/ctx chain.

    xq: (b, Sq, H) f32 query-side input; xkv: (b, Sk, H) f32 key/value-side input.
    bias_h: (NH*b, 1, Sk) f32 additive mask bias (-1e9 on masked keys), head-major.
    aw: (4, H, H) bf16 stacked [wq, wk, wv, w_merge]; ab: (4, H) f32 biases.
    """
    b, sq, _ = xq.shape
    sk = xkv.shape[1]
    xq2 = xq.reshape(b * sq, HIDDEN).astype(jnp.bfloat16)
    xkv2 = xkv.reshape(b * sk, HIDDEN).astype(jnp.bfloat16)

    # three lane-dense N=32 projections (f32 accumulation, f32 bias add)
    q2 = jnp.dot(xq2, aw[0], preferred_element_type=jnp.float32) + ab[0:1]
    k2 = jnp.dot(xkv2, aw[1], preferred_element_type=jnp.float32) + ab[1:2]
    v2 = jnp.dot(xkv2, aw[2], preferred_element_type=jnp.float32) + ab[2:3]

    qh = _fold_heads(q2, b, sq)          # (NH*b, sq, DH) bf16
    kh = _fold_heads(k2, b, sk)
    vh = _fold_heads(v2, b, sk)

    # single batched score / softmax / context chain for all heads
    s = jnp.einsum('bqd,bkd->bqk', qh, kh, preferred_element_type=jnp.float32)
    s = s * ATT_SCALE + bias_h                      # additive mask (== masked_fill post-softmax)
    s = s - jnp.max(s, axis=-1, keepdims=True)
    p = jnp.exp(s)
    p = p * pl.reciprocal(jnp.sum(p, axis=-1, keepdims=True), approx=True)
    ctx = jnp.einsum('bqk,bkd->bqd', p.astype(jnp.bfloat16), vh,
                     preferred_element_type=jnp.float32)          # (NH*b, sq, DH)

    # merge heads back along lanes (torch transpose(1,2).view ordering) + merge linear
    ctx = jnp.concatenate([ctx[h * b:(h + 1) * b] for h in range(NUM_HEADS)], axis=-1)
    out = jnp.dot(ctx.reshape(b * sq, HIDDEN).astype(jnp.bfloat16), aw[3],
                  preferred_element_type=jnp.float32) + ab[3:4]
    return out.reshape(b, sq, HIDDEN)


def _add_layernorm(x3, r3, gamma, beta):
    """visdial LayerNorm(x + residual): unbiased std, gamma*(x-mean)/(std+eps)+beta."""
    b, s, h = x3.shape
    y = (x3 + r3).reshape(b * s, h)
    mean = jnp.mean(y, axis=-1, keepdims=True)
    d = y - mean
    var = jnp.sum(d * d, axis=-1, keepdims=True) * (1.0 / (h - 1))   # torch unbiased std
    inv = pl.reciprocal(jnp.sqrt(var) + LN_EPS, approx=True)         # EUP, not VALU divide
    return (gamma * (d * inv) + beta).reshape(b, s, h)


def _ffn(x3, w1, b1, w2, b2):
    b, s, h = x3.shape
    t = jnp.dot(x3.reshape(b * s, h).astype(jnp.bfloat16), w1,
                preferred_element_type=jnp.float32) + b1
    t = jnp.maximum(t, 0.0)                          # ReLU (dropout = eval identity)
    o = jnp.dot(t.astype(jnp.bfloat16), w2, preferred_element_type=jnp.float32) + b2
    return o.reshape(b, s, h)


# ------------------------------ fused kernel ----------------------------------

def _node_embedding_kernel(
        x_ref, y_ref, xb_ref, yb_ref,
        e_aw, e_ab, e_w1, e_b1, e_w2, e_b2, e_g, e_bt,
        d_aw1, d_ab1, d_aw2, d_ab2,
        d_w1, d_b1, d_w2, d_b2, d_g, d_bt,
        xo_ref, yo_ref):
    x = x_ref[...]          # (TB, SX, H) f32
    y = y_ref[...]          # (TB, SY, H) f32

    # additive mask biases, broadcast over heads ONCE per kernel (head-major folding)
    xbh = jnp.concatenate([xb_ref[...]] * NUM_HEADS, axis=0)   # (NH*TB, 1, SX)
    ybh = jnp.concatenate([yb_ref[...]] * NUM_HEADS, axis=0)   # (NH*TB, 1, SY)

    # ---- encoder: x = SA_l(x, x_mask) ----
    for l in range(NUM_LAYERS):
        g, bt = e_g[l], e_bt[l]
        a = _mhatt(x, x, xbh, e_aw[l], e_ab[l])
        x = _add_layernorm(x, a, g[0:1], bt[0:1])
        f = _ffn(x, e_w1[l], e_b1[l], e_w2[l], e_b2[l])
        x = _add_layernorm(x, f, g[1:2], bt[1:2])

    # ---- decoder: y = SGA_l(y, x, y_mask, x_mask) ----
    for l in range(NUM_LAYERS):
        g, bt = d_g[l], d_bt[l]
        a = _mhatt(y, y, ybh, d_aw1[l], d_ab1[l])
        y = _add_layernorm(y, a, g[0:1], bt[0:1])
        a = _mhatt(y, x, xbh, d_aw2[l], d_ab2[l])
        y = _add_layernorm(y, a, g[1:2], bt[1:2])
        f = _ffn(y, d_w1[l], d_b1[l], d_w2[l], d_b2[l])
        y = _add_layernorm(y, f, g[2:3], bt[2:3])

    # TODO(synk): outputs keep their natural (.., S, 32) layout; a lane-dense (B, S*H)
    # slab store would need an in-kernel relayout that costs more than it saves here.
    xo_ref[...] = x
    yo_ref[...] = y


def node_embedding_forward(params, x, y, x_mask, y_mask, *, batch_tile=None):
    """NodeEmbeddingModule.forward: whole stack in a single pallas_call (batch grid)."""
    B, SX, H = x.shape
    SY = y.shape[1]
    TB = B if batch_tile is None else batch_tile
    assert B % TB == 0, "batch_tile must divide batch"
    nb = B // TB

    # additive mask bias, hoisted out of the kernel entirely (1.0 == masked key)
    xbias = x_mask.reshape(B, 1, SX).astype(jnp.float32) * (-1e9)
    ybias = y_mask.reshape(B, 1, SY).astype(jnp.float32) * (-1e9)

    # MXU operands in bf16; biases / LN params stay f32
    w = [params[n].astype(jnp.bfloat16) if n in _BF16_WEIGHTS else params[n]
         for n in PARAM_NAMES]

    def _resident(a):   # whole weight array VMEM-resident across grid steps
        return pl.BlockSpec(a.shape, lambda b, _nd=a.ndim: (0,) * _nd)

    def _act(s):
        return pl.BlockSpec((TB, s, H), lambda b: (b, 0, 0))

    grid_spec = pltpu.PrefetchScalarGridSpec(
        num_scalar_prefetch=0,
        grid=(nb,),
        in_specs=[_act(SX), _act(SY),
                  pl.BlockSpec((TB, 1, SX), lambda b: (b, 0, 0)),
                  pl.BlockSpec((TB, 1, SY), lambda b: (b, 0, 0))]
                 + [_resident(a) for a in w],
        out_specs=(_act(SX), _act(SY)),
    )

    x_out, y_out = pl.pallas_call(
        _node_embedding_kernel,
        grid_spec=grid_spec,
        out_shape=(jax.ShapeDtypeStruct((B, SX, H), jnp.float32),
                   jax.ShapeDtypeStruct((B, SY, H), jnp.float32)),
        compiler_params=pltpu.CompilerParams(dimension_semantics=("parallel",)),
    )(x, y, xbias, ybias, *w)
    return x_out, y_out


# ------------------------------ param init ------------------------------------

class _KeyGen:
    def __init__(self, key):
        self._key = key

    def __call__(self):
        self._key, sub = jax.random.split(self._key)
        return sub


def _init_att(kg):
    w = jax.random.normal(kg(), (4, HIDDEN, HIDDEN), jnp.float32) * 0.05  # [q, k, v, merge]
    b = jnp.zeros((4, HIDDEN), jnp.float32)
    return w, b


def _init_ffn(kg):
    w1 = jax.random.normal(kg(), (HIDDEN, FFN_MID), jnp.float32) * 0.05
    b1 = jnp.zeros((1, FFN_MID), jnp.float32)
    w2 = jax.random.normal(kg(), (FFN_MID, HIDDEN), jnp.float32) * 0.05
    b2 = jnp.zeros((1, HIDDEN), jnp.float32)
    return w1, b1, w2, b2


def init_params(key):
    kg = _KeyGen(key)
    p = {n: [] for n in PARAM_NAMES}
    for _ in range(NUM_LAYERS):       # encoder SA layers
        aw, ab = _init_att(kg)
        w1, b1, w2, b2 = _init_ffn(kg)
        p['e_aw'].append(aw); p['e_ab'].append(ab)
        p['e_w1'].append(w1); p['e_b1'].append(b1)
        p['e_w2'].append(w2); p['e_b2'].append(b2)
        p['e_g'].append(jnp.ones((2, HIDDEN), jnp.float32))
        p['e_bt'].append(jnp.zeros((2, HIDDEN), jnp.float32))
    for _ in range(NUM_LAYERS):       # decoder SGA layers
        aw1, ab1 = _init_att(kg)
        aw2, ab2 = _init_att(kg)
        w1, b1, w2, b2 = _init_ffn(kg)
        p['d_aw1'].append(aw1); p['d_ab1'].append(ab1)
        p['d_aw2'].append(aw2); p['d_ab2'].append(ab2)
        p['d_w1'].append(w1); p['d_b1'].append(b1)
        p['d_w2'].append(w2); p['d_b2'].append(b2)
        p['d_g'].append(jnp.ones((3, HIDDEN), jnp.float32))
        p['d_bt'].append(jnp.zeros((3, HIDDEN), jnp.float32))
    return {n: jnp.stack(v) for n, v in p.items()}


# --------------------------------- main ----------------------------------------

if __name__ == "__main__":
    B, SX, SY = 2, 8, 8

    root = jax.random.PRNGKey(0)
    k_params, k_x, k_y = jax.random.split(root, 3)

    params = init_params(k_params)

    x = jax.random.normal(k_x, (B, SX, HIDDEN), jnp.float32)
    y = jax.random.normal(k_y, (B, SY, HIDDEN), jnp.float32)

    # masks: 1.0 == masked-out key position, shaped (B, 1, 1, S) like PyTorch
    x_mask = jnp.zeros((B, 1, 1, SX), jnp.float32).at[1, 0, 0, SX - 2:].set(1.0)
    y_mask = jnp.zeros((B, 1, 1, SY), jnp.float32).at[1, 0, 0, SY - 3:].set(1.0)

    fwd = jax.jit(node_embedding_forward)
    x_out, y_out = fwd(params, x, y, x_mask, y_mask)
    jax.block_until_ready((x_out, y_out))

    assert x_out.shape == (B, SX, HIDDEN) and y_out.shape == (B, SY, HIDDEN)
    assert bool(jnp.all(jnp.isfinite(x_out))) and bool(jnp.all(jnp.isfinite(y_out)))
    print("KERNEL_OK")
</pallas_src>

<mosaic_0001>
module attributes {stable_mosaic.version = 11 : i64} {
  func.func @_node_embedding_kernel(%arg0: i32, %arg1: memref<2x8x32xf32, #tpu.memory_space<vmem>>, %arg2: memref<2x8x32xf32, #tpu.memory_space<vmem>>, %arg3: memref<2x1x8xf32, #tpu.memory_space<vmem>>, %arg4: memref<2x1x8xf32, #tpu.memory_space<vmem>>, %arg5: memref<2x4x32x32xbf16, #tpu.memory_space<vmem>>, %arg6: memref<2x4x32xf32, #tpu.memory_space<vmem>>, %arg7: memref<2x32x128xbf16, #tpu.memory_space<vmem>>, %arg8: memref<2x1x128xf32, #tpu.memory_space<vmem>>, %arg9: memref<2x128x32xbf16, #tpu.memory_space<vmem>>, %arg10: memref<2x1x32xf32, #tpu.memory_space<vmem>>, %arg11: memref<2x2x32xf32, #tpu.memory_space<vmem>>, %arg12: memref<2x2x32xf32, #tpu.memory_space<vmem>>, %arg13: memref<2x4x32x32xbf16, #tpu.memory_space<vmem>>, %arg14: memref<2x4x32xf32, #tpu.memory_space<vmem>>, %arg15: memref<2x4x32x32xbf16, #tpu.memory_space<vmem>>, %arg16: memref<2x4x32xf32, #tpu.memory_space<vmem>>, %arg17: memref<2x32x128xbf16, #tpu.memory_space<vmem>>, %arg18: memref<2x1x128xf32, #tpu.memory_space<vmem>>, %arg19: memref<2x128x32xbf16, #tpu.memory_space<vmem>>, %arg20: memref<2x1x32xf32, #tpu.memory_space<vmem>>, %arg21: memref<2x3x32xf32, #tpu.memory_space<vmem>>, %arg22: memref<2x3x32xf32, #tpu.memory_space<vmem>>, %arg23: memref<2x8x32xf32, #tpu.memory_space<vmem>>, %arg24: memref<2x8x32xf32, #tpu.memory_space<vmem>>) attributes {dimension_semantics = [#tpu.dimension_semantics<parallel>], iteration_bounds = array<i64: 1>, scalar_prefetch = 0 : i64, scratch_operands = 0 : i64, tpu.core_type = #tpu.core_type<tc>, window_params = [{transform_indices = @transform_0, window_bounds = array<i64: 2, 8, 32>}, {transform_indices = @transform_1, window_bounds = array<i64: 2, 8, 32>}, {transform_indices = @transform_2, window_bounds = array<i64: 2, 1, 8>}, {transform_indices = @transform_3, window_bounds = array<i64: 2, 1, 8>}, {pipeline_mode = #tpu.pipeline_mode<synchronous>, transform_indices = @transform_4, window_bounds = array<i64: 2, 4, 32, 32>}, {pipeline_mode = #tpu.pipeline_mode<synchronous>, transform_indices = @transform_5, window_bounds = array<i64: 2, 4, 32>}, {pipeline_mode = #tpu.pipeline_mode<synchronous>, transform_indices = @transform_6, window_bounds = array<i64: 2, 32, 128>}, {pipeline_mode = #tpu.pipeline_mode<synchronous>, transform_indices = @transform_7, window_bounds = array<i64: 2, 1, 128>}, {pipeline_mode = #tpu.pipeline_mode<synchronous>, transform_indices = @transform_8, window_bounds = array<i64: 2, 128, 32>}, {pipeline_mode = #tpu.pipeline_mode<synchronous>, transform_indices = @transform_9, window_bounds = array<i64: 2, 1, 32>}, {pipeline_mode = #tpu.pipeline_mode<synchronous>, transform_indices = @transform_10, window_bounds = array<i64: 2, 2, 32>}, {pipeline_mode = #tpu.pipeline_mode<synchronous>, transform_indices = @transform_11, window_bounds = array<i64: 2, 2, 32>}, {pipeline_mode = #tpu.pipeline_mode<synchronous>, transform_indices = @transform_12, window_bounds = array<i64: 2, 4, 32, 32>}, {pipeline_mode = #tpu.pipeline_mode<synchronous>, transform_indices = @transform_13, window_bounds = array<i64: 2, 4, 32>}, {pipeline_mode = #tpu.pipeline_mode<synchronous>, transform_indices = @transform_14, window_bounds = array<i64: 2, 4, 32, 32>}, {pipeline_mode = #tpu.pipeline_mode<synchronous>, transform_indices = @transform_15, window_bounds = array<i64: 2, 4, 32>}, {pipeline_mode = #tpu.pipeline_mode<synchronous>, transform_indices = @transform_16, window_bounds = array<i64: 2, 32, 128>}, {pipeline_mode = #tpu.pipeline_mode<synchronous>, transform_indices = @transform_17, window_bounds = array<i64: 2, 1, 128>}, {pipeline_mode = #tpu.pipeline_mode<synchronous>, transform_indices = @transform_18, window_bounds = array<i64: 2, 128, 32>}, {pipeline_mode = #tpu.pipeline_mode<synchronous>, transform_indices = @transform_19, window_bounds = array<i64: 2, 1, 32>}, {pipeline_mode = #tpu.pipeline_mode<synchronous>, transform_indices = @transform_20, window_bounds = array<i64: 2, 3, 32>}, {pipeline_mode = #tpu.pipeline_mode<synchronous>, transform_indices = @transform_21, window_bounds = array<i64: 2, 3, 32>}, {transform_indices = @transform_22, window_bounds = array<i64: 2, 8, 32>}, {transform_indices = @transform_23, window_bounds = array<i64: 2, 8, 32>}]} {
    %c0 = arith.constant 0 : index
    %c0_0 = arith.constant 0 : index
    %c0_1 = arith.constant 0 : index
    %0 = vector.load %arg1[%c0, %c0_0, %c0_1] : memref<2x8x32xf32, #tpu.memory_space<vmem>>, vector<2x8x32xf32>
    %c0_2 = arith.constant 0 : index
    %c0_3 = arith.constant 0 : index
    %c0_4 = arith.constant 0 : index
    %1 = vector.load %arg2[%c0_2, %c0_3, %c0_4] : memref<2x8x32xf32, #tpu.memory_space<vmem>>, vector<2x8x32xf32>
    %c0_5 = arith.constant 0 : index
    %c0_6 = arith.constant 0 : index
    %c0_7 = arith.constant 0 : index
    %2 = vector.load %arg3[%c0_5, %c0_6, %c0_7] : memref<2x1x8xf32, #tpu.memory_space<vmem>>, vector<2x1x8xf32>
    %3 = tpu.concatenate %2, %2, %2, %2 in 0 : vector<2x1x8xf32>, vector<2x1x8xf32>, vector<2x1x8xf32>, vector<2x1x8xf32> -> vector<8x1x8xf32>
    %c0_8 = arith.constant 0 : index
    %c0_9 = arith.constant 0 : index
    %c0_10 = arith.constant 0 : index
    %4 = vector.load %arg4[%c0_8, %c0_9, %c0_10] : memref<2x1x8xf32, #tpu.memory_space<vmem>>, vector<2x1x8xf32>
    %5 = tpu.concatenate %4, %4, %4, %4 in 0 : vector<2x1x8xf32>, vector<2x1x8xf32>, vector<2x1x8xf32>, vector<2x1x8xf32> -> vector<8x1x8xf32>
    %c0_11 = arith.constant 0 : index
    %c0_12 = arith.constant 0 : index
    %c0_13 = arith.constant 0 : index
    %6 = vector.load %arg11[%c0_11, %c0_12, %c0_13] : memref<2x2x32xf32, #tpu.memory_space<vmem>>, vector<1x2x32xf32>
    %7 = vector.shape_cast %6 : vector<1x2x32xf32> to vector<2x32xf32>
    %c0_14 = arith.constant 0 : index
    %c0_15 = arith.constant 0 : index
    %c0_16 = arith.constant 0 : index
    %8 = vector.load %arg12[%c0_14, %c0_15, %c0_16] : memref<2x2x32xf32, #tpu.memory_space<vmem>>, vector<1x2x32xf32>
    %9 = vector.shape_cast %8 : vector<1x2x32xf32> to vector<2x32xf32>
    %c0_17 = arith.constant 0 : index
    %c0_18 = arith.constant 0 : index
    %c0_19 = arith.constant 0 : index
    %c0_20 = arith.constant 0 : index
    %10 = vector.load %arg5[%c0_17, %c0_18, %c0_19, %c0_20] : memref<2x4x32x32xbf16, #tpu.memory_space<vmem>>, vector<1x4x32x32xbf16>
    %11 = vector.shape_cast %10 : vector<1x4x32x32xbf16> to vector<4x32x32xbf16>
    %c0_21 = arith.constant 0 : index
    %c0_22 = arith.constant 0 : index
    %c0_23 = arith.constant 0 : index
    %12 = vector.load %arg6[%c0_21, %c0_22, %c0_23] : memref<2x4x32xf32, #tpu.memory_space<vmem>>, vector<1x4x32xf32>
    %13 = vector.shape_cast %12 : vector<1x4x32xf32> to vector<4x32xf32>
    %14 = vector.shape_cast %0 : vector<2x8x32xf32> to vector<16x32xf32>
    %15 = arith.truncf %14 : vector<16x32xf32> to vector<16x32xbf16>
    %16 = vector.shape_cast %0 : vector<2x8x32xf32> to vector<16x32xf32>
    %17 = arith.truncf %16 : vector<16x32xf32> to vector<16x32xbf16>
    %18 = vector.extract_strided_slice %11 {offsets = [0, 0, 0], sizes = [1, 32, 32], strides = [1, 1, 1]} : vector<4x32x32xbf16> to vector<1x32x32xbf16>
    %19 = vector.shape_cast %18 : vector<1x32x32xbf16> to vector<32x32xbf16>
    %cst = arith.constant dense<0.000000e+00> : vector<16x32xf32>
    %20 = tpu.matmul %15, %19, %cst {dimension_numbers = #tpu.dot_dimension_numbers<[1], [0], [0], [1], [0, 0, 1, 1], [], []>} : vector<16x32xbf16>, vector<32x32xbf16>, vector<16x32xf32> -> vector<16x32xf32>
    %21 = vector.extract_strided_slice %13 {offsets = [0, 0], sizes = [1, 32], strides = [1, 1]} : vector<4x32xf32> to vector<1x32xf32>
    %22 = vector.broadcast %21 : vector<1x32xf32> to vector<16x32xf32>
    %23 = arith.addf %20, %22 : vector<16x32xf32>
    %24 = vector.extract_strided_slice %11 {offsets = [1, 0, 0], sizes = [1, 32, 32], strides = [1, 1, 1]} : vector<4x32x32xbf16> to vector<1x32x32xbf16>
    %25 = vector.shape_cast %24 : vector<1x32x32xbf16> to vector<32x32xbf16>
    %cst_24 = arith.constant dense<0.000000e+00> : vector<16x32xf32>
    %26 = tpu.matmul %17, %25, %cst_24 {dimension_numbers = #tpu.dot_dimension_numbers<[1], [0], [0], [1], [0, 0, 1, 1], [], []>} : vector<16x32xbf16>, vector<32x32xbf16>, vector<16x32xf32> -> vector<16x32xf32>
    %27 = vector.extract_strided_slice %13 {offsets = [1, 0], sizes = [1, 32], strides = [1, 1]} : vector<4x32xf32> to vector<1x32xf32>
    %28 = vector.broadcast %27 : vector<1x32xf32> to vector<16x32xf32>
    %29 = arith.addf %26, %28 : vector<16x32xf32>
    %30 = vector.extract_strided_slice %11 {offsets = [2, 0, 0], sizes = [1, 32, 32], strides = [1, 1, 1]} : vector<4x32x32xbf16> to vector<1x32x32xbf16>
    %31 = vector.shape_cast %30 : vector<1x32x32xbf16> to vector<32x32xbf16>
    %cst_25 = arith.constant dense<0.000000e+00> : vector<16x32xf32>
    %32 = tpu.matmul %17, %31, %cst_25 {dimension_numbers = #tpu.dot_dimension_numbers<[1], [0], [0], [1], [0, 0, 1, 1], [], []>} : vector<16x32xbf16>, vector<32x32xbf16>, vector<16x32xf32> -> vector<16x32xf32>
    %33 = vector.extract_strided_slice %13 {offsets = [2, 0], sizes = [1, 32], strides = [1, 1]} : vector<4x32xf32> to vector<1x32xf32>
    %34 = vector.broadcast %33 : vector<1x32xf32> to vector<16x32xf32>
    %35 = arith.addf %32, %34 : vector<16x32xf32>
    %36 = vector.shape_cast %23 : vector<16x32xf32> to vector<2x8x32xf32>
    %37 = vector.extract_strided_slice %36 {offsets = [0, 0, 0], sizes = [2, 8, 8], strides = [1, 1, 1]} : vector<2x8x32xf32> to vector<2x8x8xf32>
    %38 = vector.extract_strided_slice %36 {offsets = [0, 0, 8], sizes = [2, 8, 8], strides = [1, 1, 1]} : vector<2x8x32xf32> to vector<2x8x8xf32>
    %39 = vector.extract_strided_slice %36 {offsets = [0, 0, 16], sizes = [2, 8, 8], strides = [1, 1, 1]} : vector<2x8x32xf32> to vector<2x8x8xf32>
    %40 = vector.extract_strided_slice %36 {offsets = [0, 0, 24], sizes = [2, 8, 8], strides = [1, 1, 1]} : vector<2x8x32xf32> to vector<2x8x8xf32>
    %41 = tpu.concatenate %37, %38, %39, %40 in 0 : vector<2x8x8xf32>, vector<2x8x8xf32>, vector<2x8x8xf32>, vector<2x8x8xf32> -> vector<8x8x8xf32>
    %42 = arith.truncf %41 : vector<8x8x8xf32> to vector<8x8x8xbf16>
    %43 = vector.shape_cast %29 : vector<16x32xf32> to vector<2x8x32xf32>
    %44 = vector.extract_strided_slice %43 {offsets = [0, 0, 0], sizes = [2, 8, 8], strides = [1, 1, 1]} : vector<2x8x32xf32> to vector<2x8x8xf32>
    %45 = vector.extract_strided_slice %43 {offsets = [0, 0, 8], sizes = [2, 8, 8], strides = [1, 1, 1]} : vector<2x8x32xf32> to vector<2x8x8xf32>
    %46 = vector.extract_strided_slice %43 {offsets = [0, 0, 16], sizes = [2, 8, 8], strides = [1, 1, 1]} : vector<2x8x32xf32> to vector<2x8x8xf32>
    %47 = vector.extract_strided_slice %43 {offsets = [0, 0, 24], sizes = [2, 8, 8], strides = [1, 1, 1]} : vector<2x8x32xf32> to vector<2x8x8xf32>
    %48 = tpu.concatenate %44, %45, %46, %47 in 0 : vector<2x8x8xf32>, vector<2x8x8xf32>, vector<2x8x8xf32>, vector<2x8x8xf32> -> vector<8x8x8xf32>
    %49 = arith.truncf %48 : vector<8x8x8xf32> to vector<8x8x8xbf16>
    %50 = vector.shape_cast %35 : vector<16x32xf32> to vector<2x8x32xf32>
    %51 = vector.extract_strided_slice %50 {offsets = [0, 0, 0], sizes = [2, 8, 8], strides = [1, 1, 1]} : vector<2x8x32xf32> to vector<2x8x8xf32>
    %52 = vector.extract_strided_slice %50 {offsets = [0, 0, 8], sizes = [2, 8, 8], strides = [1, 1, 1]} : vector<2x8x32xf32> to vector<2x8x8xf32>
    %53 = vector.extract_strided_slice %50 {offsets = [0, 0, 16], sizes = [2, 8, 8], strides = [1, 1, 1]} : vector<2x8x32xf32> to vector<2x8x8xf32>
    %54 = vector.extract_strided_slice %50 {offsets = [0, 0, 24], sizes = [2, 8, 8], strides = [1, 1, 1]} : vector<2x8x32xf32> to vector<2x8x8xf32>
    %55 = tpu.concatenate %51, %52, %53, %54 in 0 : vector<2x8x8xf32>, vector<2x8x8xf32>, vector<2x8x8xf32>, vector<2x8x8xf32> -> vector<8x8x8xf32>
    %56 = arith.truncf %55 : vector<8x8x8xf32> to vector<8x8x8xbf16>
    "tpu.trace_start"() <{level = 10 : i32, message = "bqd,bkd->bqk"}> : () -> ()
    %cst_26 = arith.constant dense<0.000000e+00> : vector<8x8x8xf32>
    %57 = tpu.matmul %42, %49, %cst_26 {dimension_numbers = #tpu.dot_dimension_numbers<[2], [2], [1], [1], [0, 0, 0, 1, 1, 1], [0], [0]>} : vector<8x8x8xbf16>, vector<8x8x8xbf16>, vector<8x8x8xf32> -> vector<8x8x8xf32>
    "tpu.trace_stop"() : () -> ()
    %cst_27 = arith.constant 0.353553385 : f32
    %58 = vector.broadcast %cst_27 : f32 to vector<8x8x8xf32>
    %59 = arith.mulf %57, %58 : vector<8x8x8xf32>
    %60 = vector.broadcast %3 : vector<8x1x8xf32> to vector<8x8x8xf32>
    %61 = arith.addf %59, %60 : vector<8x8x8xf32>
    %cst_28 = arith.constant dense<0xFF800000> : vector<8x8xf32>
    %62 = vector.multi_reduction <maximumf>, %61, %cst_28 [2] : vector<8x8x8xf32> to vector<8x8xf32>
    %63 = vector.shape_cast %62 : vector<8x8xf32> to vector<8x8x1xf32>
    %64 = vector.broadcast %63 : vector<8x8x1xf32> to vector<8x8x8xf32>
    %65 = arith.subf %61, %64 : vector<8x8x8xf32>
    %66 = math.exp %65 : vector<8x8x8xf32>
    %cst_29 = arith.constant dense<0.000000e+00> : vector<8x8xf32>
    %67 = vector.multi_reduction <add>, %66, %cst_29 [2] : vector<8x8x8xf32> to vector<8x8xf32>
    %68 = vector.shape_cast %67 : vector<8x8xf32> to vector<8x8x1xf32>
    %69 = tpu.reciprocal %68 {approx = true} : vector<8x8x1xf32> -> vector<8x8x1xf32>
    %70 = vector.broadcast %69 : vector<8x8x1xf32> to vector<8x8x8xf32>
    %71 = arith.mulf %66, %70 : vector<8x8x8xf32>
    %72 = arith.truncf %71 : vector<8x8x8xf32> to vector<8x8x8xbf16>
    "tpu.trace_start"() <{level = 10 : i32, message = "bqk,bkd->bqd"}> : () -> ()
    %cst_30 = arith.constant dense<0.000000e+00> : vector<8x8x8xf32>
    %73 = tpu.matmul %72, %56, %cst_30 {dimension_numbers = #tpu.dot_dimension_numbers<[2], [1], [1], [2], [0, 0, 0, 1, 1, 2], [0], [0]>} : vector<8x8x8xbf16>, vector<8x8x8xbf16>, vector<8x8x8xf32> -> vector<8x8x8xf32>
    "tpu.trace_stop"() : () -> ()
    %74 = vector.extract_strided_slice %73 {offsets = [0, 0, 0], sizes = [2, 8, 8], strides = [1, 1, 1]} : vector<8x8x8xf32> to vector<2x8x8xf32>
    %75 = vector.extract_strided_slice %73 {offsets = [2, 0, 0], sizes = [2, 8, 8], strides = [1, 1, 1]} : vector<8x8x8xf32> to vector<2x8x8xf32>
    %76 = vector.extract_strided_slice %73 {offsets = [4, 0, 0], sizes = [2, 8, 8], strides = [1, 1, 1]} : vector<8x8x8xf32> to vector<2x8x8xf32>
    %77 = vector.extract_strided_slice %73 {offsets = [6, 0, 0], sizes = [2, 8, 8], strides = [1, 1, 1]} : vector<8x8x8xf32> to vector<2x8x8xf32>
    %78 = tpu.concatenate %74, %75, %76, %77 in 2 : vector<2x8x8xf32>, vector<2x8x8xf32>, vector<2x8x8xf32>, vector<2x8x8xf32> -> vector<2x8x32xf32>
    %79 = vector.shape_cast %78 : vector<2x8x32xf32> to vector<16x32xf32>
    %80 = arith.truncf %79 : vector<16x32xf32> to vector<16x32xbf16>
    %81 = vector.extract_strided_slice %11 {offsets = [3, 0, 0], sizes = [1, 32, 32], strides = [1, 1, 1]} : vector<4x32x32xbf16> to vector<1x32x32xbf16>
    %82 = vector.shape_cast %81 : vector<1x32x32xbf16> to vector<32x32xbf16>
    %cst_31 = arith.constant dense<0.000000e+00> : vector<16x32xf32>
    %83 = tpu.matmul %80, %82, %cst_31 {dimension_numbers = #tpu.dot_dimension_numbers<[1], [0], [0], [1], [0, 0, 1, 1], [], []>} : vector<16x32xbf16>, vector<32x32xbf16>, vector<16x32xf32> -> vector<16x32xf32>
    %84 = vector.extract_strided_slice %13 {offsets = [3, 0], sizes = [1, 32], strides = [1, 1]} : vector<4x32xf32> to vector<1x32xf32>
    %85 = vector.broadcast %84 : vector<1x32xf32> to vector<16x32xf32>
    %86 = arith.addf %83, %85 : vector<16x32xf32>
    %87 = vector.shape_cast %86 : vector<16x32xf32> to vector<2x8x32xf32>
    %88 = vector.extract_strided_slice %7 {offsets = [0, 0], sizes = [1, 32], strides = [1, 1]} : vector<2x32xf32> to vector<1x32xf32>
    %89 = vector.extract_strided_slice %9 {offsets = [0, 0], sizes = [1, 32], strides = [1, 1]} : vector<2x32xf32> to vector<1x32xf32>
    %90 = arith.addf %0, %87 : vector<2x8x32xf32>
    %91 = vector.shape_cast %90 : vector<2x8x32xf32> to vector<16x32xf32>
    %cst_32 = arith.constant dense<0.000000e+00> : vector<16xf32>
    %92 = vector.multi_reduction <add>, %91, %cst_32 [1] : vector<16x32xf32> to vector<16xf32>
    %93 = vector.shape_cast %92 : vector<16xf32> to vector<16x1xf32>
    %cst_33 = arith.constant 3.200000e+01 : f32
    %94 = vector.broadcast %cst_33 : f32 to vector<16x1xf32>
    %95 = arith.divf %93, %94 : vector<16x1xf32>
    %96 = vector.broadcast %95 : vector<16x1xf32> to vector<16x32xf32>
    %97 = arith.subf %91, %96 : vector<16x32xf32>
    %98 = arith.mulf %97, %97 : vector<16x32xf32>
    %cst_34 = arith.constant dense<0.000000e+00> : vector<16xf32>
    %99 = vector.multi_reduction <add>, %98, %cst_34 [1] : vector<16x32xf32> to vector<16xf32>
    %100 = vector.shape_cast %99 : vector<16xf32> to vector<16x1xf32>
    %cst_35 = arith.constant 0.0322580636 : f32
    %101 = vector.broadcast %cst_35 : f32 to vector<16x1xf32>
    %102 = arith.mulf %100, %101 : vector<16x1xf32>
    %103 = math.sqrt %102 : vector<16x1xf32>
    %cst_36 = arith.constant 9.99999997E-7 : f32
    %104 = vector.broadcast %cst_36 : f32 to vector<16x1xf32>
    %105 = arith.addf %103, %104 : vector<16x1xf32>
    %106 = tpu.reciprocal %105 {approx = true} : vector<16x1xf32> -> vector<16x1xf32>
    %107 = vector.broadcast %106 : vector<16x1xf32> to vector<16x32xf32>
    %108 = arith.mulf %97, %107 : vector<16x32xf32>
    %109 = vector.broadcast %88 : vector<1x32xf32> to vector<16x32xf32>
    %110 = arith.mulf %109, %108 : vector<16x32xf32>
    %111 = vector.broadcast %89 : vector<1x32xf32> to vector<16x32xf32>
    %112 = arith.addf %110, %111 : vector<16x32xf32>
    %113 = vector.shape_cast %112 : vector<16x32xf32> to vector<2x8x32xf32>
    %c0_37 = arith.constant 0 : index
    %c0_38 = arith.constant 0 : index
    %c0_39 = arith.constant 0 : index
    %114 = vector.load %arg7[%c0_37, %c0_38, %c0_39] : memref<2x32x128xbf16, #tpu.memory_space<vmem>>, vector<1x32x128xbf16>
    %115 = vector.shape_cast %114 : vector<1x32x128xbf16> to vector<32x128xbf16>
    %c0_40 = arith.constant 0 : index
    %c0_41 = arith.constant 0 : index
    %c0_42 = arith.constant 0 : index
    %116 = vector.load %arg8[%c0_40, %c0_41, %c0_42] : memref<2x1x128xf32, #tpu.memory_space<vmem>>, vector<1x1x128xf32>
    %117 = vector.shape_cast %116 : vector<1x1x128xf32> to vector<1x128xf32>
    %c0_43 = arith.constant 0 : index
    %c0_44 = arith.constant 0 : index
    %c0_45 = arith.constant 0 : index
    %118 = vector.load %arg9[%c0_43, %c0_44, %c0_45] : memref<2x128x32xbf16, #tpu.memory_space<vmem>>, vector<1x128x32xbf16>
    %119 = vector.shape_cast %118 : vector<1x128x32xbf16> to vector<128x32xbf16>
    %c0_46 = arith.constant 0 : index
    %c0_47 = arith.constant 0 : index
    %c0_48 = arith.constant 0 : index
    %120 = vector.load %arg10[%c0_46, %c0_47, %c0_48] : memref<2x1x32xf32, #tpu.memory_space<vmem>>, vector<1x1x32xf32>
    %121 = vector.shape_cast %120 : vector<1x1x32xf32> to vector<1x32xf32>
    %122 = vector.shape_cast %113 : vector<2x8x32xf32> to vector<16x32xf32>
    %123 = arith.truncf %122 : vector<16x32xf32> to vector<16x32xbf16>
    %cst_49 = arith.constant dense<0.000000e+00> : vector<16x128xf32>
    %124 = tpu.matmul %123, %115, %cst_49 {dimension_numbers = #tpu.dot_dimension_numbers<[1], [0], [0], [1], [0, 0, 1, 1], [], []>} : vector<16x32xbf16>, vector<32x128xbf16>, vector<16x128xf32> -> vector<16x128xf32>
    %125 = vector.broadcast %117 : vector<1x128xf32> to vector<16x128xf32>
    %126 = arith.addf %124, %125 : vector<16x128xf32>
    %cst_50 = arith.constant 0.000000e+00 : f32
    %127 = vector.broadcast %cst_50 : f32 to vector<16x128xf32>
    %128 = arith.maximumf %126, %127 : vector<16x128xf32>
    %129 = arith.truncf %128 : vector<16x128xf32> to vector<16x128xbf16>
    %cst_51 = arith.constant dense<0.000000e+00> : vector<16x32xf32>
    %130 = tpu.matmul %129, %119, %cst_51 {dimension_numbers = #tpu.dot_dimension_numbers<[1], [0], [0], [1], [0, 0, 1, 1], [], []>} : vector<16x128xbf16>, vector<128x32xbf16>, vector<16x32xf32> -> vector<16x32xf32>
    %131 = vector.broadcast %121 : vector<1x32xf32> to vector<16x32xf32>
    %132 = arith.addf %130, %131 : vector<16x32xf32>
    %133 = vector.shape_cast %132 : vector<16x32xf32> to vector<2x8x32xf32>
    %134 = vector.extract_strided_slice %7 {offsets = [1, 0], sizes = [1, 32], strides = [1, 1]} : vector<2x32xf32> to vector<1x32xf32>
    %135 = vector.extract_strided_slice %9 {offsets = [1, 0], sizes = [1, 32], strides = [1, 1]} : vector<2x32xf32> to vector<1x32xf32>
    %136 = arith.addf %113, %133 : vector<2x8x32xf32>
    %137 = vector.shape_cast %136 : vector<2x8x32xf32> to vector<16x32xf32>
    %cst_52 = arith.constant dense<0.000000e+00> : vector<16xf32>
    %138 = vector.multi_reduction <add>, %137, %cst_52 [1] : vector<16x32xf32> to vector<16xf32>
    %139 = vector.shape_cast %138 : vector<16xf32> to vector<16x1xf32>
    %cst_53 = arith.constant 3.200000e+01 : f32
    %140 = vector.broadcast %cst_53 : f32 to vector<16x1xf32>
    %141 = arith.divf %139, %140 : vector<16x1xf32>
    %142 = vector.broadcast %141 : vector<16x1xf32> to vector<16x32xf32>
    %143 = arith.subf %137, %142 : vector<16x32xf32>
    %144 = arith.mulf %143, %143 : vector<16x32xf32>
    %cst_54 = arith.constant dense<0.000000e+00> : vector<16xf32>
    %145 = vector.multi_reduction <add>, %144, %cst_54 [1] : vector<16x32xf32> to vector<16xf32>
    %146 = vector.shape_cast %145 : vector<16xf32> to vector<16x1xf32>
    %cst_55 = arith.constant 0.0322580636 : f32
    %147 = vector.broadcast %cst_55 : f32 to vector<16x1xf32>
    %148 = arith.mulf %146, %147 : vector<16x1xf32>
    %149 = math.sqrt %148 : vector<16x1xf32>
    %cst_56 = arith.constant 9.99999997E-7 : f32
    %150 = vector.broadcast %cst_56 : f32 to vector<16x1xf32>
    %151 = arith.addf %149, %150 : vector<16x1xf32>
    %152 = tpu.reciprocal %151 {approx = true} : vector<16x1xf32> -> vector<16x1xf32>
    %153 = vector.broadcast %152 : vector<16x1xf32> to vector<16x32xf32>
    %154 = arith.mulf %143, %153 : vector<16x32xf32>
    %155 = vector.broadcast %134 : vector<1x32xf32> to vector<16x32xf32>
    %156 = arith.mulf %155, %154 : vector<16x32xf32>
    %157 = vector.broadcast %135 : vector<1x32xf32> to vector<16x32xf32>
    %158 = arith.addf %156, %157 : vector<16x32xf32>
    %159 = vector.shape_cast %158 : vector<16x32xf32> to vector<2x8x32xf32>
    %c1 = arith.constant 1 : index
    %c0_57 = arith.constant 0 : index
    %c0_58 = arith.constant 0 : index
    %160 = vector.load %arg11[%c1, %c0_57, %c0_58] : memref<2x2x32xf32, #tpu.memory_space<vmem>>, vector<1x2x32xf32>
    %161 = vector.shape_cast %160 : vector<1x2x32xf32> to vector<2x32xf32>
    %c1_59 = arith.constant 1 : index
    %c0_60 = arith.constant 0 : index
    %c0_61 = arith.constant 0 : index
    %162 = vector.load %arg12[%c1_59, %c0_60, %c0_61] : memref<2x2x32xf32, #tpu.memory_space<vmem>>, vector<1x2x32xf32>
    %163 = vector.shape_cast %162 : vector<1x2x32xf32> to vector<2x32xf32>
    %c1_62 = arith.constant 1 : index
    %c0_63 = arith.constant 0 : index
    %c0_64 = arith.constant 0 : index
    %c0_65 = arith.constant 0 : index
    %164 = vector.load %arg5[%c1_62, %c0_63, %c0_64, %c0_65] : memref<2x4x32x32xbf16, #tpu.memory_space<vmem>>, vector<1x4x32x32xbf16>
    %165 = vector.shape_cast %164 : vector<1x4x32x32xbf16> to vector<4x32x32xbf16>
    %c1_66 = arith.constant 1 : index
    %c0_67 = arith.constant 0 : index
    %c0_68 = arith.constant 0 : index
    %166 = vector.load %arg6[%c1_66, %c0_67, %c0_68] : memref<2x4x32xf32, #tpu.memory_space<vmem>>, vector<1x4x32xf32>
    %167 = vector.shape_cast %166 : vector<1x4x32xf32> to vector<4x32xf32>
    %168 = vector.shape_cast %159 : vector<2x8x32xf32> to vector<16x32xf32>
    %169 = arith.truncf %168 : vector<16x32xf32> to vector<16x32xbf16>
    %170 = vector.shape_cast %159 : vector<2x8x32xf32> to vector<16x32xf32>
    %171 = arith.truncf %170 : vector<16x32xf32> to vector<16x32xbf16>
    %172 = vector.extract_strided_slice %165 {offsets = [0, 0, 0], sizes = [1, 32, 32], strides = [1, 1, 1]} : vector<4x32x32xbf16> to vector<1x32x32xbf16>
    %173 = vector.shape_cast %172 : vector<1x32x32xbf16> to vector<32x32xbf16>
    %cst_69 = arith.constant dense<0.000000e+00> : vector<16x32xf32>
    %174 = tpu.matmul %169, %173, %cst_69 {dimension_numbers = #tpu.dot_dimension_numbers<[1], [0], [0], [1], [0, 0, 1, 1], [], []>} : vector<16x32xbf16>, vector<32x32xbf16>, vector<16x32xf32> -> vector<16x32xf32>
    %175 = vector.extract_strided_slice %167 {offsets = [0, 0], sizes = [1, 32], strides = [1, 1]} : vector<4x32xf32> to vector<1x32xf32>
    %176 = vector.broadcast %175 : vector<1x32xf32> to vector<16x32xf32>
    %177 = arith.addf %174, %176 : vector<16x32xf32>
    %178 = vector.extract_strided_slice %165 {offsets = [1, 0, 0], sizes = [1, 32, 32], strides = [1, 1, 1]} : vector<4x32x32xbf16> to vector<1x32x32xbf16>
    %179 = vector.shape_cast %178 : vector<1x32x32xbf16> to vector<32x32xbf16>
    %cst_70 = arith.constant dense<0.000000e+00> : vector<16x32xf32>
    %180 = tpu.matmul %171, %179, %cst_70 {dimension_numbers = #tpu.dot_dimension_numbers<[1], [0], [0], [1], [0, 0, 1, 1], [], []>} : vector<16x32xbf16>, vector<32x32xbf16>, vector<16x32xf32> -> vector<16x32xf32>
    %181 = vector.extract_strided_slice %167 {offsets = [1, 0], sizes = [1, 32], strides = [1, 1]} : vector<4x32xf32> to vector<1x32xf32>
    %182 = vector.broadcast %181 : vector<1x32xf32> to vector<16x32xf32>
    %183 = arith.addf %180, %182 : vector<16x32xf32>
    %184 = vector.extract_strided_slice %165 {offsets = [2, 0, 0], sizes = [1, 32, 32], strides = [1, 1, 1]} : vector<4x32x32xbf16> to vector<1x32x32xbf16>
    %185 = vector.shape_cast %184 : vector<1x32x32xbf16> to vector<32x32xbf16>
    %cst_71 = arith.constant dense<0.000000e+00> : vector<16x32xf32>
    %186 = tpu.matmul %171, %185, %cst_71 {dimension_numbers = #tpu.dot_dimension_numbers<[1], [0], [0], [1], [0, 0, 1, 1], [], []>} : vector<16x32xbf16>, vector<32x32xbf16>, vector<16x32xf32> -> vector<16x32xf32>
    %187 = vector.extract_strided_slice %167 {offsets = [2, 0], sizes = [1, 32], strides = [1, 1]} : vector<4x32xf32> to vector<1x32xf32>
    %188 = vector.broadcast %187 : vector<1x32xf32> to vector<16x32xf32>
    %189 = arith.addf %186, %188 : vector<16x32xf32>
    %190 = vector.shape_cast %177 : vector<16x32xf32> to vector<2x8x32xf32>
    %191 = vector.extract_strided_slice %190 {offsets = [0, 0, 0], sizes = [2, 8, 8], strides = [1, 1, 1]} : vector<2x8x32xf32> to vector<2x8x8xf32>
    %192 = vector.extract_strided_slice %190 {offsets = [0, 0, 8], sizes = [2, 8, 8], strides = [1, 1, 1]} : vector<2x8x32xf32> to vector<2x8x8xf32>
    %193 = vector.extract_strided_slice %190 {offsets = [0, 0, 16], sizes = [2, 8, 8], strides = [1, 1, 1]} : vector<2x8x32xf32> to vector<2x8x8xf32>
    %194 = vector.extract_strided_slice %190 {offsets = [0, 0, 24], sizes = [2, 8, 8], strides = [1, 1, 1]} : vector<2x8x32xf32> to vector<2x8x8xf32>
    %195 = tpu.concatenate %191, %192, %193, %194 in 0 : vector<2x8x8xf32>, vector<2x8x8xf32>, vector<2x8x8xf32>, vector<2x8x8xf32> -> vector<8x8x8xf32>
    %196 = arith.truncf %195 : vector<8x8x8xf32> to vector<8x8x8xbf16>
    %197 = vector.shape_cast %183 : vector<16x32xf32> to vector<2x8x32xf32>
    %198 = vector.extract_strided_slice %197 {offsets = [0, 0, 0], sizes = [2, 8, 8], strides = [1, 1, 1]} : vector<2x8x32xf32> to vector<2x8x8xf32>
    %199 = vector.extract_strided_slice %197 {offsets = [0, 0, 8], sizes = [2, 8, 8], strides = [1, 1, 1]} : vector<2x8x32xf32> to vector<2x8x8xf32>
    %200 = vector.extract_strided_slice %197 {offsets = [0, 0, 16], sizes = [2, 8, 8], strides = [1, 1, 1]} : vector<2x8x32xf32> to vector<2x8x8xf32>
    %201 = vector.extract_strided_slice %197 {offsets = [0, 0, 24], sizes = [2, 8, 8], strides = [1, 1, 1]} : vector<2x8x32xf32> to vector<2x8x8xf32>
    %202 = tpu.concatenate %198, %199, %200, %201 in 0 : vector<2x8x8xf32>, vector<2x8x8xf32>, vector<2x8x8xf32>, vector<2x8x8xf32> -> vector<8x8x8xf32>
    %203 = arith.truncf %202 : vector<8x8x8xf32> to vector<8x8x8xbf16>
    %204 = vector.shape_cast %189 : vector<16x32xf32> to vector<2x8x32xf32>
    %205 = vector.extract_strided_slice %204 {offsets = [0, 0, 0], sizes = [2, 8, 8], strides = [1, 1, 1]} : vector<2x8x32xf32> to vector<2x8x8xf32>
    %206 = vector.extract_strided_slice %204 {offsets = [0, 0, 8], sizes = [2, 8, 8], strides = [1, 1, 1]} : vector<2x8x32xf32> to vector<2x8x8xf32>
    %207 = vector.extract_strided_slice %204 {offsets = [0, 0, 16], sizes = [2, 8, 8], strides = [1, 1, 1]} : vector<2x8x32xf32> to vector<2x8x8xf32>
    %208 = vector.extract_strided_slice %204 {offsets = [0, 0, 24], sizes = [2, 8, 8], strides = [1, 1, 1]} : vector<2x8x32xf32> to vector<2x8x8xf32>
    %209 = tpu.concatenate %205, %206, %207, %208 in 0 : vector<2x8x8xf32>, vector<2x8x8xf32>, vector<2x8x8xf32>, vector<2x8x8xf32> -> vector<8x8x8xf32>
    %210 = arith.truncf %209 : vector<8x8x8xf32> to vector<8x8x8xbf16>
    "tpu.trace_start"() <{level = 10 : i32, message = "bqd,bkd->bqk"}> : () -> ()
    %cst_72 = arith.constant dense<0.000000e+00> : vector<8x8x8xf32>
    %211 = tpu.matmul %196, %203, %cst_72 {dimension_numbers = #tpu.dot_dimension_numbers<[2], [2], [1], [1], [0, 0, 0, 1, 1, 1], [0], [0]>} : vector<8x8x8xbf16>, vector<8x8x8xbf16>, vector<8x8x8xf32> -> vector<8x8x8xf32>
    "tpu.trace_stop"() : () -> ()
    %cst_73 = arith.constant 0.353553385 : f32
    %212 = vector.broadcast %cst_73 : f32 to vector<8x8x8xf32>
    %213 = arith.mulf %211, %212 : vector<8x8x8xf32>
    %214 = vector.broadcast %3 : vector<8x1x8xf32> to vector<8x8x8xf32>
    %215 = arith.addf %213, %214 : vector<8x8x8xf32>
    %cst_74 = arith.constant dense<0xFF800000> : vector<8x8xf32>
    %216 = vector.multi_reduction <maximumf>, %215, %cst_74 [2] : vector<8x8x8xf32> to vector<8x8xf32>
    %217 = vector.shape_cast %216 : vector<8x8xf32> to vector<8x8x1xf32>
    %218 = vector.broadcast %217 : vector<8x8x1xf32> to vector<8x8x8xf32>
    %219 = arith.subf %215, %218 : vector<8x8x8xf32>
    %220 = math.exp %219 : vector<8x8x8xf32>
    %cst_75 = arith.constant dense<0.000000e+00> : vector<8x8xf32>
    %221 = vector.multi_reduction <add>, %220, %cst_75 [2] : vector<8x8x8xf32> to vector<8x8xf32>
    %222 = vector.shape_cast %221 : vector<8x8xf32> to vector<8x8x1xf32>
    %223 = tpu.reciprocal %222 {approx = true} : vector<8x8x1xf32> -> vector<8x8x1xf32>
    %224 = vector.broadcast %223 : vector<8x8x1xf32> to vector<8x8x8xf32>
    %225 = arith.mulf %220, %224 : vector<8x8x8xf32>
    %226 = arith.truncf %225 : vector<8x8x8xf32> to vector<8x8x8xbf16>
    "tpu.trace_start"() <{level = 10 : i32, message = "bqk,bkd->bqd"}> : () -> ()
    %cst_76 = arith.constant dense<0.000000e+00> : vector<8x8x8xf32>
    %227 = tpu.matmul %226, %210, %cst_76 {dimension_numbers = #tpu.dot_dimension_numbers<[2], [1], [1], [2], [0, 0, 0, 1, 1, 2], [0], [0]>} : vector<8x8x8xbf16>, vector<8x8x8xbf16>, vector<8x8x8xf32> -> vector<8x8x8xf32>
    "tpu.trace_stop"() : () -> ()
    %228 = vector.extract_strided_slice %227 {offsets = [0, 0, 0], sizes = [2, 8, 8], strides = [1, 1, 1]} : vector<8x8x8xf32> to vector<2x8x8xf32>
    %229 = vector.extract_strided_slice %227 {offsets = [2, 0, 0], sizes = [2, 8, 8], strides = [1, 1, 1]} : vector<8x8x8xf32> to vector<2x8x8xf32>
    %230 = vector.extract_strided_slice %227 {offsets = [4, 0, 0], sizes = [2, 8, 8], strides = [1, 1, 1]} : vector<8x8x8xf32> to vector<2x8x8xf32>
    %231 = vector.extract_strided_slice %227 {offsets = [6, 0, 0], sizes = [2, 8, 8], strides = [1, 1, 1]} : vector<8x8x8xf32> to vector<2x8x8xf32>
    %232 = tpu.concatenate %228, %229, %230, %231 in 2 : vector<2x8x8xf32>, vector<2x8x8xf32>, vector<2x8x8xf32>, vector<2x8x8xf32> -> vector<2x8x32xf32>
    %233 = vector.shape_cast %232 : vector<2x8x32xf32> to vector<16x32xf32>
    %234 = arith.truncf %233 : vector<16x32xf32> to vector<16x32xbf16>
    %235 = vector.extract_strided_slice %165 {offsets = [3, 0, 0], sizes = [1, 32, 32], strides = [1, 1, 1]} : vector<4x32x32xbf16> to vector<1x32x32xbf16>
    %236 = vector.shape_cast %235 : vector<1x32x32xbf16> to vector<32x32xbf16>
    %cst_77 = arith.constant dense<0.000000e+00> : vector<16x32xf32>
    %237 = tpu.matmul %234, %236, %cst_77 {dimension_numbers = #tpu.dot_dimension_numbers<[1], [0], [0], [1], [0, 0, 1, 1], [], []>} : vector<16x32xbf16>, vector<32x32xbf16>, vector<16x32xf32> -> vector<16x32xf32>
    %238 = vector.extract_strided_slice %167 {offsets = [3, 0], sizes = [1, 32], strides = [1, 1]} : vector<4x32xf32> to vector<1x32xf32>
    %239 = vector.broadcast %238 : vector<1x32xf32> to vector<16x32xf32>
    %240 = arith.addf %237, %239 : vector<16x32xf32>
    %241 = vector.shape_cast %240 : vector<16x32xf32> to vector<2x8x32xf32>
    %242 = vector.extract_strided_slice %161 {offsets = [0, 0], sizes = [1, 32], strides = [1, 1]} : vector<2x32xf32> to vector<1x32xf32>
    %243 = vector.extract_strided_slice %163 {offsets = [0, 0], sizes = [1, 32], strides = [1, 1]} : vector<2x32xf32> to vector<1x32xf32>
    %244 = arith.addf %159, %241 : vector<2x8x32xf32>
    %245 = vector.shape_cast %244 : vector<2x8x32xf32> to vector<16x32xf32>
    %cst_78 = arith.constant dense<0.000000e+00> : vector<16xf32>
    %246 = vector.multi_reduction <add>, %245, %cst_78 [1] : vector<16x32xf32> to vector<16xf32>
    %247 = vector.shape_cast %246 : vector<16xf32> to vector<16x1xf32>
    %cst_79 = arith.constant 3.200000e+01 : f32
    %248 = vector.broadcast %cst_79 : f32 to vector<16x1xf32>
    %249 = arith.divf %247, %248 : vector<16x1xf32>
    %250 = vector.broadcast %249 : vector<16x1xf32> to vector<16x32xf32>
    %251 = arith.subf %245, %250 : vector<16x32xf32>
    %252 = arith.mulf %251, %251 : vector<16x32xf32>
    %cst_80 = arith.constant dense<0.000000e+00> : vector<16xf32>
    %253 = vector.multi_reduction <add>, %252, %cst_80 [1] : vector<16x32xf32> to vector<16xf32>
    %254 = vector.shape_cast %253 : vector<16xf32> to vector<16x1xf32>
    %cst_81 = arith.constant 0.0322580636 : f32
    %255 = vector.broadcast %cst_81 : f32 to vector<16x1xf32>
    %256 = arith.mulf %254, %255 : vector<16x1xf32>
    %257 = math.sqrt %256 : vector<16x1xf32>
    %cst_82 = arith.constant 9.99999997E-7 : f32
    %258 = vector.broadcast %cst_82 : f32 to vector<16x1xf32>
    %259 = arith.addf %257, %258 : vector<16x1xf32>
    %260 = tpu.reciprocal %259 {approx = true} : vector<16x1xf32> -> vector<16x1xf32>
    %261 = vector.broadcast %260 : vector<16x1xf32> to vector<16x32xf32>
    %262 = arith.mulf %251, %261 : vector<16x32xf32>
    %263 = vector.broadcast %242 : vector<1x32xf32> to vector<16x32xf32>
    %264 = arith.mulf %263, %262 : vector<16x32xf32>
    %265 = vector.broadcast %243 : vector<1x32xf32> to vector<16x32xf32>
    %266 = arith.addf %264, %265 : vector<16x32xf32>
    %267 = vector.shape_cast %266 : vector<16x32xf32> to vector<2x8x32xf32>
    %c1_83 = arith.constant 1 : index
    %c0_84 = arith.constant 0 : index
    %c0_85 = arith.constant 0 : index
    %268 = vector.load %arg7[%c1_83, %c0_84, %c0_85] : memref<2x32x128xbf16, #tpu.memory_space<vmem>>, vector<1x32x128xbf16>
    %269 = vector.shape_cast %268 : vector<1x32x128xbf16> to vector<32x128xbf16>
    %c1_86 = arith.constant 1 : index
    %c0_87 = arith.constant 0 : index
    %c0_88 = arith.constant 0 : index
    %270 = vector.load %arg8[%c1_86, %c0_87, %c0_88] : memref<2x1x128xf32, #tpu.memory_space<vmem>>, vector<1x1x128xf32>
    %271 = vector.shape_cast %270 : vector<1x1x128xf32> to vector<1x128xf32>
    %c1_89 = arith.constant 1 : index
    %c0_90 = arith.constant 0 : index
    %c0_91 = arith.constant 0 : index
    %272 = vector.load %arg9[%c1_89, %c0_90, %c0_91] : memref<2x128x32xbf16, #tpu.memory_space<vmem>>, vector<1x128x32xbf16>
    %273 = vector.shape_cast %272 : vector<1x128x32xbf16> to vector<128x32xbf16>
    %c1_92 = arith.constant 1 : index
    %c0_93 = arith.constant 0 : index
    %c0_94 = arith.constant 0 : index
    %274 = vector.load %arg10[%c1_92, %c0_93, %c0_94] : memref<2x1x32xf32, #tpu.memory_space<vmem>>, vector<1x1x32xf32>
    %275 = vector.shape_cast %274 : vector<1x1x32xf32> to vector<1x32xf32>
    %276 = vector.shape_cast %267 : vector<2x8x32xf32> to vector<16x32xf32>
    %277 = arith.truncf %276 : vector<16x32xf32> to vector<16x32xbf16>
    %cst_95 = arith.constant dense<0.000000e+00> : vector<16x128xf32>
    %278 = tpu.matmul %277, %269, %cst_95 {dimension_numbers = #tpu.dot_dimension_numbers<[1], [0], [0], [1], [0, 0, 1, 1], [], []>} : vector<16x32xbf16>, vector<32x128xbf16>, vector<16x128xf32> -> vector<16x128xf32>
    %279 = vector.broadcast %271 : vector<1x128xf32> to vector<16x128xf32>
    %280 = arith.addf %278, %279 : vector<16x128xf32>
    %cst_96 = arith.constant 0.000000e+00 : f32
    %281 = vector.broadcast %cst_96 : f32 to vector<16x128xf32>
    %282 = arith.maximumf %280, %281 : vector<16x128xf32>
    %283 = arith.truncf %282 : vector<16x128xf32> to vector<16x128xbf16>
    %cst_97 = arith.constant dense<0.000000e+00> : vector<16x32xf32>
    %284 = tpu.matmul %283, %273, %cst_97 {dimension_numbers = #tpu.dot_dimension_numbers<[1], [0], [0], [1], [0, 0, 1, 1], [], []>} : vector<16x128xbf16>, vector<128x32xbf16>, vector<16x32xf32> -> vector<16x32xf32>
    %285 = vector.broadcast %275 : vector<1x32xf32> to vector<16x32xf32>
    %286 = arith.addf %284, %285 : vector<16x32xf32>
    %287 = vector.shape_cast %286 : vector<16x32xf32> to vector<2x8x32xf32>
    %288 = vector.extract_strided_slice %161 {offsets = [1, 0], sizes = [1, 32], strides = [1, 1]} : vector<2x32xf32> to vector<1x32xf32>
    %289 = vector.extract_strided_slice %163 {offsets = [1, 0], sizes = [1, 32], strides = [1, 1]} : vector<2x32xf32> to vector<1x32xf32>
    %290 = arith.addf %267, %287 : vector<2x8x32xf32>
    %291 = vector.shape_cast %290 : vector<2x8x32xf32> to vector<16x32xf32>
    %cst_98 = arith.constant dense<0.000000e+00> : vector<16xf32>
    %292 = vector.multi_reduction <add>, %291, %cst_98 [1] : vector<16x32xf32> to vector<16xf32>
    %293 = vector.shape_cast %292 : vector<16xf32> to vector<16x1xf32>
    %cst_99 = arith.constant 3.200000e+01 : f32
    %294 = vector.broadcast %cst_99 : f32 to vector<16x1xf32>
    %295 = arith.divf %293, %294 : vector<16x1xf32>
    %296 = vector.broadcast %295 : vector<16x1xf32> to vector<16x32xf32>
    %297 = arith.subf %291, %296 : vector<16x32xf32>
    %298 = arith.mulf %297, %297 : vector<16x32xf32>
    %cst_100 = arith.constant dense<0.000000e+00> : vector<16xf32>
    %299 = vector.multi_reduction <add>, %298, %cst_100 [1] : vector<16x32xf32> to vector<16xf32>
    %300 = vector.shape_cast %299 : vector<16xf32> to vector<16x1xf32>
    %cst_101 = arith.constant 0.0322580636 : f32
    %301 = vector.broadcast %cst_101 : f32 to vector<16x1xf32>
    %302 = arith.mulf %300, %301 : vector<16x1xf32>
    %303 = math.sqrt %302 : vector<16x1xf32>
    %cst_102 = arith.constant 9.99999997E-7 : f32
    %304 = vector.broadcast %cst_102 : f32 to vector<16x1xf32>
    %305 = arith.addf %303, %304 : vector<16x1xf32>
    %306 = tpu.reciprocal %305 {approx = true} : vector<16x1xf32> -> vector<16x1xf32>
    %307 = vector.broadcast %306 : vector<16x1xf32> to vector<16x32xf32>
    %308 = arith.mulf %297, %307 : vector<16x32xf32>
    %309 = vector.broadcast %288 : vector<1x32xf32> to vector<16x32xf32>
    %310 = arith.mulf %309, %308 : vector<16x32xf32>
    %311 = vector.broadcast %289 : vector<1x32xf32> to vector<16x32xf32>
    %312 = arith.addf %310, %311 : vector<16x32xf32>
    %313 = vector.shape_cast %312 : vector<16x32xf32> to vector<2x8x32xf32>
    %c0_103 = arith.constant 0 : index
    %c0_104 = arith.constant 0 : index
    %c0_105 = arith.constant 0 : index
    %314 = vector.load %arg21[%c0_103, %c0_104, %c0_105] : memref<2x3x32xf32, #tpu.memory_space<vmem>>, vector<1x3x32xf32>
    %315 = vector.shape_cast %314 : vector<1x3x32xf32> to vector<3x32xf32>
    %c0_106 = arith.constant 0 : index
    %c0_107 = arith.constant 0 : index
    %c0_108 = arith.constant 0 : index
    %316 = vector.load %arg22[%c0_106, %c0_107, %c0_108] : memref<2x3x32xf32, #tpu.memory_space<vmem>>, vector<1x3x32xf32>
    %317 = vector.shape_cast %316 : vector<1x3x32xf32> to vector<3x32xf32>
    %c0_109 = arith.constant 0 : index
    %c0_110 = arith.constant 0 : index
    %c0_111 = arith.constant 0 : index
    %c0_112 = arith.constant 0 : index
    %318 = vector.load %arg13[%c0_109, %c0_110, %c0_111, %c0_112] : memref<2x4x32x32xbf16, #tpu.memory_space<vmem>>, vector<1x4x32x32xbf16>
    %319 = vector.shape_cast %318 : vector<1x4x32x32xbf16> to vector<4x32x32xbf16>
    %c0_113 = arith.constant 0 : index
    %c0_114 = arith.constant 0 : index
    %c0_115 = arith.constant 0 : index
    %320 = vector.load %arg14[%c0_113, %c0_114, %c0_115] : memref<2x4x32xf32, #tpu.memory_space<vmem>>, vector<1x4x32xf32>
    %321 = vector.shape_cast %320 : vector<1x4x32xf32> to vector<4x32xf32>
    %322 = vector.shape_cast %1 : vector<2x8x32xf32> to vector<16x32xf32>
    %323 = arith.truncf %322 : vector<16x32xf32> to vector<16x32xbf16>
    %324 = vector.shape_cast %1 : vector<2x8x32xf32> to vector<16x32xf32>
    %325 = arith.truncf %324 : vector<16x32xf32> to vector<16x32xbf16>
    %326 = vector.extract_strided_slice %319 {offsets = [0, 0, 0], sizes = [1, 32, 32], strides = [1, 1, 1]} : vector<4x32x32xbf16> to vector<1x32x32xbf16>
    %327 = vector.shape_cast %326 : vector<1x32x32xbf16> to vector<32x32xbf16>
    %cst_116 = arith.constant dense<0.000000e+00> : vector<16x32xf32>
    %328 = tpu.matmul %323, %327, %cst_116 {dimension_numbers = #tpu.dot_dimension_numbers<[1], [0], [0], [1], [0, 0, 1, 1], [], []>} : vector<16x32xbf16>, vector<32x32xbf16>, vector<16x32xf32> -> vector<16x32xf32>
    %329 = vector.extract_strided_slice %321 {offsets = [0, 0], sizes = [1, 32], strides = [1, 1]} : vector<4x32xf32> to vector<1x32xf32>
    %330 = vector.broadcast %329 : vector<1x32xf32> to vector<16x32xf32>
    %331 = arith.addf %328, %330 : vector<16x32xf32>
    %332 = vector.extract_strided_slice %319 {offsets = [1, 0, 0], sizes = [1, 32, 32], strides = [1, 1, 1]} : vector<4x32x32xbf16> to vector<1x32x32xbf16>
    %333 = vector.shape_cast %332 : vector<1x32x32xbf16> to vector<32x32xbf16>
    %cst_117 = arith.constant dense<0.000000e+00> : vector<16x32xf32>
    %334 = tpu.matmul %325, %333, %cst_117 {dimension_numbers = #tpu.dot_dimension_numbers<[1], [0], [0], [1], [0, 0, 1, 1], [], []>} : vector<16x32xbf16>, vector<32x32xbf16>, vector<16x32xf32> -> vector<16x32xf32>
    %335 = vector.extract_strided_slice %321 {offsets = [1, 0], sizes = [1, 32], strides = [1, 1]} : vector<4x32xf32> to vector<1x32xf32>
    %336 = vector.broadcast %335 : vector<1x32xf32> to vector<16x32xf32>
    %337 = arith.addf %334, %336 : vector<16x32xf32>
    %338 = vector.extract_strided_slice %319 {offsets = [2, 0, 0], sizes = [1, 32, 32], strides = [1, 1, 1]} : vector<4x32x32xbf16> to vector<1x32x32xbf16>
    %339 = vector.shape_cast %338 : vector<1x32x32xbf16> to vector<32x32xbf16>
    %cst_118 = arith.constant dense<0.000000e+00> : vector<16x32xf32>
    %340 = tpu.matmul %325, %339, %cst_118 {dimension_numbers = #tpu.dot_dimension_numbers<[1], [0], [0], [1], [0, 0, 1, 1], [], []>} : vector<16x32xbf16>, vector<32x32xbf16>, vector<16x32xf32> -> vector<16x32xf32>
    %341 = vector.extract_strided_slice %321 {offsets = [2, 0], sizes = [1, 32], strides = [1, 1]} : vector<4x32xf32> to vector<1x32xf32>
    %342 = vector.broadcast %341 : vector<1x32xf32> to vector<16x32xf32>
    %343 = arith.addf %340, %342 : vector<16x32xf32>
    %344 = vector.shape_cast %331 : vector<16x32xf32> to vector<2x8x32xf32>
    %345 = vector.extract_strided_slice %344 {offsets = [0, 0, 0], sizes = [2, 8, 8], strides = [1, 1, 1]} : vector<2x8x32xf32> to vector<2x8x8xf32>
    %346 = vector.extract_strided_slice %344 {offsets = [0, 0, 8], sizes = [2, 8, 8], strides = [1, 1, 1]} : vector<2x8x32xf32> to vector<2x8x8xf32>
    %347 = vector.extract_strided_slice %344 {offsets = [0, 0, 16], sizes = [2, 8, 8], strides = [1, 1, 1]} : vector<2x8x32xf32> to vector<2x8x8xf32>
    %348 = vector.extract_strided_slice %344 {offsets = [0, 0, 24], sizes = [2, 8, 8], strides = [1, 1, 1]} : vector<2x8x32xf32> to vector<2x8x8xf32>
    %349 = tpu.concatenate %345, %346, %347, %348 in 0 : vector<2x8x8xf32>, vector<2x8x8xf32>, vector<2x8x8xf32>, vector<2x8x8xf32> -> vector<8x8x8xf32>
    %350 = arith.truncf %349 : vector<8x8x8xf32> to vector<8x8x8xbf16>
    %351 = vector.shape_cast %337 : vector<16x32xf32> to vector<2x8x32xf32>
    %352 = vector.extract_strided_slice %351 {offsets = [0, 0, 0], sizes = [2, 8, 8], strides = [1, 1, 1]} : vector<2x8x32xf32> to vector<2x8x8xf32>
    %353 = vector.extract_strided_slice %351 {offsets = [0, 0, 8], sizes = [2, 8, 8], strides = [1, 1, 1]} : vector<2x8x32xf32> to vector<2x8x8xf32>
    %354 = vector.extract_strided_slice %351 {offsets = [0, 0, 16], sizes = [2, 8, 8], strides = [1, 1, 1]} : vector<2x8x32xf32> to vector<2x8x8xf32>
    %355 = vector.extract_strided_slice %351 {offsets = [0, 0, 24], sizes = [2, 8, 8], strides = [1, 1, 1]} : vector<2x8x32xf32> to vector<2x8x8xf32>
    %356 = tpu.concatenate %352, %353, %354, %355 in 0 : vector<2x8x8xf32>, vector<2x8x8xf32>, vector<2x8x8xf32>, vector<2x8x8xf32> -> vector<8x8x8xf32>
    %357 = arith.truncf %356 : vector<8x8x8xf32> to vector<8x8x8xbf16>
    %358 = vector.shape_cast %343 : vector<16x32xf32> to vector<2x8x32xf32>
    %359 = vector.extract_strided_slice %358 {offsets = [0, 0, 0], sizes = [2, 8, 8], strides = [1, 1, 1]} : vector<2x8x32xf32> to vector<2x8x8xf32>
    %360 = vector.extract_strided_slice %358 {offsets = [0, 0, 8], sizes = [2, 8, 8], strides = [1, 1, 1]} : vector<2x8x32xf32> to vector<2x8x8xf32>
    %361 = vector.extract_strided_slice %358 {offsets = [0, 0, 16], sizes = [2, 8, 8], strides = [1, 1, 1]} : vector<2x8x32xf32> to vector<2x8x8xf32>
    %362 = vector.extract_strided_slice %358 {offsets = [0, 0, 24], sizes = [2, 8, 8], strides = [1, 1, 1]} : vector<2x8x32xf32> to vector<2x8x8xf32>
    %363 = tpu.concatenate %359, %360, %361, %362 in 0 : vector<2x8x8xf32>, vector<2x8x8xf32>, vector<2x8x8xf32>, vector<2x8x8xf32> -> vector<8x8x8xf32>
    %364 = arith.truncf %363 : vector<8x8x8xf32> to vector<8x8x8xbf16>
    "tpu.trace_start"() <{level = 10 : i32, message = "bqd,bkd->bqk"}> : () -> ()
    %cst_119 = arith.constant dense<0.000000e+00> : vector<8x8x8xf32>
    %365 = tpu.matmul %350, %357, %cst_119 {dimension_numbers = #tpu.dot_dimension_numbers<[2], [2], [1], [1], [0, 0, 0, 1, 1, 1], [0], [0]>} : vector<8x8x8xbf16>, vector<8x8x8xbf16>, vector<8x8x8xf32> -> vector<8x8x8xf32>
    "tpu.trace_stop"() : () -> ()
    %cst_120 = arith.constant 0.353553385 : f32
    %366 = vector.broadcast %cst_120 : f32 to vector<8x8x8xf32>
    %367 = arith.mulf %365, %366 : vector<8x8x8xf32>
    %368 = vector.broadcast %5 : vector<8x1x8xf32> to vector<8x8x8xf32>
    %369 = arith.addf %367, %368 : vector<8x8x8xf32>
    %cst_121 = arith.constant dense<0xFF800000> : vector<8x8xf32>
    %370 = vector.multi_reduction <maximumf>, %369, %cst_121 [2] : vector<8x8x8xf32> to vector<8x8xf32>
    %371 = vector.shape_cast %370 : vector<8x8xf32> to vector<8x8x1xf32>
    %372 = vector.broadcast %371 : vector<8x8x1xf32> to vector<8x8x8xf32>
    %373 = arith.subf %369, %372 : vector<8x8x8xf32>
    %374 = math.exp %373 : vector<8x8x8xf32>
    %cst_122 = arith.constant dense<0.000000e+00> : vector<8x8xf32>
    %375 = vector.multi_reduction <add>, %374, %cst_122 [2] : vector<8x8x8xf32> to vector<8x8xf32>
    %376 = vector.shape_cast %375 : vector<8x8xf32> to vector<8x8x1xf32>
    %377 = tpu.reciprocal %376 {approx = true} : vector<8x8x1xf32> -> vector<8x8x1xf32>
    %378 = vector.broadcast %377 : vector<8x8x1xf32> to vector<8x8x8xf32>
    %379 = arith.mulf %374, %378 : vector<8x8x8xf32>
    %380 = arith.truncf %379 : vector<8x8x8xf32> to vector<8x8x8xbf16>
    "tpu.trace_start"() <{level = 10 : i32, message = "bqk,bkd->bqd"}> : () -> ()
    %cst_123 = arith.constant dense<0.000000e+00> : vector<8x8x8xf32>
    %381 = tpu.matmul %380, %364, %cst_123 {dimension_numbers = #tpu.dot_dimension_numbers<[2], [1], [1], [2], [0, 0, 0, 1, 1, 2], [0], [0]>} : vector<8x8x8xbf16>, vector<8x8x8xbf16>, vector<8x8x8xf32> -> vector<8x8x8xf32>
    "tpu.trace_stop"() : () -> ()
    %382 = vector.extract_strided_slice %381 {offsets = [0, 0, 0], sizes = [2, 8, 8], strides = [1, 1, 1]} : vector<8x8x8xf32> to vector<2x8x8xf32>
    %383 = vector.extract_strided_slice %381 {offsets = [2, 0, 0], sizes = [2, 8, 8], strides = [1, 1, 1]} : vector<8x8x8xf32> to vector<2x8x8xf32>
    %384 = vector.extract_strided_slice %381 {offsets = [4, 0, 0], sizes = [2, 8, 8], strides = [1, 1, 1]} : vector<8x8x8xf32> to vector<2x8x8xf32>
    %385 = vector.extract_strided_slice %381 {offsets = [6, 0, 0], sizes = [2, 8, 8], strides = [1, 1, 1]} : vector<8x8x8xf32> to vector<2x8x8xf32>
    %386 = tpu.concatenate %382, %383, %384, %385 in 2 : vector<2x8x8xf32>, vector<2x8x8xf32>, vector<2x8x8xf32>, vector<2x8x8xf32> -> vector<2x8x32xf32>
    %387 = vector.shape_cast %386 : vector<2x8x32xf32> to vector<16x32xf32>
    %388 = arith.truncf %387 : vector<16x32xf32> to vector<16x32xbf16>
    %389 = vector.extract_strided_slice %319 {offsets = [3, 0, 0], sizes = [1, 32, 32], strides = [1, 1, 1]} : vector<4x32x32xbf16> to vector<1x32x32xbf16>
    %390 = vector.shape_cast %389 : vector<1x32x32xbf16> to vector<32x32xbf16>
    %cst_124 = arith.constant dense<0.000000e+00> : vector<16x32xf32>
    %391 = tpu.matmul %388, %390, %cst_124 {dimension_numbers = #tpu.dot_dimension_numbers<[1], [0], [0], [1], [0, 0, 1, 1], [], []>} : vector<16x32xbf16>, vector<32x32xbf16>, vector<16x32xf32> -> vector<16x32xf32>
    %392 = vector.extract_strided_slice %321 {offsets = [3, 0], sizes = [1, 32], strides = [1, 1]} : vector<4x32xf32> to vector<1x32xf32>
    %393 = vector.broadcast %392 : vector<1x32xf32> to vector<16x32xf32>
    %394 = arith.addf %391, %393 : vector<16x32xf32>
    %395 = vector.shape_cast %394 : vector<16x32xf32> to vector<2x8x32xf32>
    %396 = vector.extract_strided_slice %315 {offsets = [0, 0], sizes = [1, 32], strides = [1, 1]} : vector<3x32xf32> to vector<1x32xf32>
    %397 = vector.extract_strided_slice %317 {offsets = [0, 0], sizes = [1, 32], strides = [1, 1]} : vector<3x32xf32> to vector<1x32xf32>
    %398 = arith.addf %1, %395 : vector<2x8x32xf32>
    %399 = vector.shape_cast %398 : vector<2x8x32xf32> to vector<16x32xf32>
    %cst_125 = arith.constant dense<0.000000e+00> : vector<16xf32>
    %400 = vector.multi_reduction <add>, %399, %cst_125 [1] : vector<16x32xf32> to vector<16xf32>
    %401 = vector.shape_cast %400 : vector<16xf32> to vector<16x1xf32>
    %cst_126 = arith.constant 3.200000e+01 : f32
    %402 = vector.broadcast %cst_126 : f32 to vector<16x1xf32>
    %403 = arith.divf %401, %402 : vector<16x1xf32>
    %404 = vector.broadcast %403 : vector<16x1xf32> to vector<16x32xf32>
    %405 = arith.subf %399, %404 : vector<16x32xf32>
    %406 = arith.mulf %405, %405 : vector<16x32xf32>
    %cst_127 = arith.constant dense<0.000000e+00> : vector<16xf32>
    %407 = vector.multi_reduction <add>, %406, %cst_127 [1] : vector<16x32xf32> to vector<16xf32>
    %408 = vector.shape_cast %407 : vector<16xf32> to vector<16x1xf32>
    %cst_128 = arith.constant 0.0322580636 : f32
    %409 = vector.broadcast %cst_128 : f32 to vector<16x1xf32>
    %410 = arith.mulf %408, %409 : vector<16x1xf32>
    %411 = math.sqrt %410 : vector<16x1xf32>
    %cst_129 = arith.constant 9.99999997E-7 : f32
    %412 = vector.broadcast %cst_129 : f32 to vector<16x1xf32>
    %413 = arith.addf %411, %412 : vector<16x1xf32>
    %414 = tpu.reciprocal %413 {approx = true} : vector<16x1xf32> -> vector<16x1xf32>
    %415 = vector.broadcast %414 : vector<16x1xf32> to vector<16x32xf32>
    %416 = arith.mulf %405, %415 : vector<16x32xf32>
    %417 = vector.broadcast %396 : vector<1x32xf32> to vector<16x32xf32>
    %418 = arith.mulf %417, %416 : vector<16x32xf32>
    %419 = vector.broadcast %397 : vector<1x32xf32> to vector<16x32xf32>
    %420 = arith.addf %418, %419 : vector<16x32xf32>
    %421 = vector.shape_cast %420 : vector<16x32xf32> to vector<2x8x32xf32>
    %c0_130 = arith.constant 0 : index
    %c0_131 = arith.constant 0 : index
    %c0_132 = arith.constant 0 : index
    %c0_133 = arith.constant 0 : index
    %422 = vector.load %arg15[%c0_130, %c0_131, %c0_132, %c0_133] : memref<2x4x32x32xbf16, #tpu.memory_space<vmem>>, vector<1x4x32x32xbf16>
    %423 = vector.shape_cast %422 : vector<1x4x32x32xbf16> to vector<4x32x32xbf16>
    %c0_134 = arith.constant 0 : index
    %c0_135 = arith.constant 0 : index
    %c0_136 = arith.constant 0 : index
    %424 = vector.load %arg16[%c0_134, %c0_135, %c0_136] : memref<2x4x32xf32, #tpu.memory_space<vmem>>, vector<1x4x32xf32>
    %425 = vector.shape_cast %424 : vector<1x4x32xf32> to vector<4x32xf32>
    %426 = vector.shape_cast %421 : vector<2x8x32xf32> to vector<16x32xf32>
    %427 = arith.truncf %426 : vector<16x32xf32> to vector<16x32xbf16>
    %428 = vector.shape_cast %313 : vector<2x8x32xf32> to vector<16x32xf32>
    %429 = arith.truncf %428 : vector<16x32xf32> to vector<16x32xbf16>
    %430 = vector.extract_strided_slice %423 {offsets = [0, 0, 0], sizes = [1, 32, 32], strides = [1, 1, 1]} : vector<4x32x32xbf16> to vector<1x32x32xbf16>
    %431 = vector.shape_cast %430 : vector<1x32x32xbf16> to vector<32x32xbf16>
    %cst_137 = arith.constant dense<0.000000e+00> : vector<16x32xf32>
    %432 = tpu.matmul %427, %431, %cst_137 {dimension_numbers = #tpu.dot_dimension_numbers<[1], [0], [0], [1], [0, 0, 1, 1], [], []>} : vector<16x32xbf16>, vector<32x32xbf16>, vector<16x32xf32> -> vector<16x32xf32>
    %433 = vector.extract_strided_slice %425 {offsets = [0, 0], sizes = [1, 32], strides = [1, 1]} : vector<4x32xf32> to vector<1x32xf32>
    %434 = vector.broadcast %433 : vector<1x32xf32> to vector<16x32xf32>
    %435 = arith.addf %432, %434 : vector<16x32xf32>
    %436 = vector.extract_strided_slice %423 {offsets = [1, 0, 0], sizes = [1, 32, 32], strides = [1, 1, 1]} : vector<4x32x32xbf16> to vector<1x32x32xbf16>
    %437 = vector.shape_cast %436 : vector<1x32x32xbf16> to vector<32x32xbf16>
    %cst_138 = arith.constant dense<0.000000e+00> : vector<16x32xf32>
    %438 = tpu.matmul %429, %437, %cst_138 {dimension_numbers = #tpu.dot_dimension_numbers<[1], [0], [0], [1], [0, 0, 1, 1], [], []>} : vector<16x32xbf16>, vector<32x32xbf16>, vector<16x32xf32> -> vector<16x32xf32>
    %439 = vector.extract_strided_slice %425 {offsets = [1, 0], sizes = [1, 32], strides = [1, 1]} : vector<4x32xf32> to vector<1x32xf32>
    %440 = vector.broadcast %439 : vector<1x32xf32> to vector<16x32xf32>
    %441 = arith.addf %438, %440 : vector<16x32xf32>
    %442 = vector.extract_strided_slice %423 {offsets = [2, 0, 0], sizes = [1, 32, 32], strides = [1, 1, 1]} : vector<4x32x32xbf16> to vector<1x32x32xbf16>
    %443 = vector.shape_cast %442 : vector<1x32x32xbf16> to vector<32x32xbf16>
    %cst_139 = arith.constant dense<0.000000e+00> : vector<16x32xf32>
    %444 = tpu.matmul %429, %443, %cst_139 {dimension_numbers = #tpu.dot_dimension_numbers<[1], [0], [0], [1], [0, 0, 1, 1], [], []>} : vector<16x32xbf16>, vector<32x32xbf16>, vector<16x32xf32> -> vector<16x32xf32>
    %445 = vector.extract_strided_slice %425 {offsets = [2, 0], sizes = [1, 32], strides = [1, 1]} : vector<4x32xf32> to vector<1x32xf32>
    %446 = vector.broadcast %445 : vector<1x32xf32> to vector<16x32xf32>
    %447 = arith.addf %444, %446 : vector<16x32xf32>
    %448 = vector.shape_cast %435 : vector<16x32xf32> to vector<2x8x32xf32>
    %449 = vector.extract_strided_slice %448 {offsets = [0, 0, 0], sizes = [2, 8, 8], strides = [1, 1, 1]} : vector<2x8x32xf32> to vector<2x8x8xf32>
    %450 = vector.extract_strided_slice %448 {offsets = [0, 0, 8], sizes = [2, 8, 8], strides = [1, 1, 1]} : vector<2x8x32xf32> to vector<2x8x8xf32>
    %451 = vector.extract_strided_slice %448 {offsets = [0, 0, 16], sizes = [2, 8, 8], strides = [1, 1, 1]} : vector<2x8x32xf32> to vector<2x8x8xf32>
    %452 = vector.extract_strided_slice %448 {offsets = [0, 0, 24], sizes = [2, 8, 8], strides = [1, 1, 1]} : vector<2x8x32xf32> to vector<2x8x8xf32>
    %453 = tpu.concatenate %449, %450, %451, %452 in 0 : vector<2x8x8xf32>, vector<2x8x8xf32>, vector<2x8x8xf32>, vector<2x8x8xf32> -> vector<8x8x8xf32>
    %454 = arith.truncf %453 : vector<8x8x8xf32> to vector<8x8x8xbf16>
    %455 = vector.shape_cast %441 : vector<16x32xf32> to vector<2x8x32xf32>
    %456 = vector.extract_strided_slice %455 {offsets = [0, 0, 0], sizes = [2, 8, 8], strides = [1, 1, 1]} : vector<2x8x32xf32> to vector<2x8x8xf32>
    %457 = vector.extract_strided_slice %455 {offsets = [0, 0, 8], sizes = [2, 8, 8], strides = [1, 1, 1]} : vector<2x8x32xf32> to vector<2x8x8xf32>
    %458 = vector.extract_strided_slice %455 {offsets = [0, 0, 16], sizes = [2, 8, 8], strides = [1, 1, 1]} : vector<2x8x32xf32> to vector<2x8x8xf32>
    %459 = vector.extract_strided_slice %455 {offsets = [0, 0, 24], sizes = [2, 8, 8], strides = [1, 1, 1]} : vector<2x8x32xf32> to vector<2x8x8xf32>
    %460 = tpu.concatenate %456, %457, %458, %459 in 0 : vector<2x8x8xf32>, vector<2x8x8xf32>, vector<2x8x8xf32>, vector<2x8x8xf32> -> vector<8x8x8xf32>
    %461 = arith.truncf %460 : vector<8x8x8xf32> to vector<8x8x8xbf16>
    %462 = vector.shape_cast %447 : vector<16x32xf32> to vector<2x8x32xf32>
    %463 = vector.extract_strided_slice %462 {offsets = [0, 0, 0], sizes = [2, 8, 8], strides = [1, 1, 1]} : vector<2x8x32xf32> to vector<2x8x8xf32>
    %464 = vector.extract_strided_slice %462 {offsets = [0, 0, 8], sizes = [2, 8, 8], strides = [1, 1, 1]} : vector<2x8x32xf32> to vector<2x8x8xf32>
    %465 = vector.extract_strided_slice %462 {offsets = [0, 0, 16], sizes = [2, 8, 8], strides = [1, 1, 1]} : vector<2x8x32xf32> to vector<2x8x8xf32>
    %466 = vector.extract_strided_slice %462 {offsets = [0, 0, 24], sizes = [2, 8, 8], strides = [1, 1, 1]} : vector<2x8x32xf32> to vector<2x8x8xf32>
    %467 = tpu.concatenate %463, %464, %465, %466 in 0 : vector<2x8x8xf32>, vector<2x8x8xf32>, vector<2x8x8xf32>, vector<2x8x8xf32> -> vector<8x8x8xf32>
    %468 = arith.truncf %467 : vector<8x8x8xf32> to vector<8x8x8xbf16>
    "tpu.trace_start"() <{level = 10 : i32, message = "bqd,bkd->bqk"}> : () -> ()
    %cst_140 = arith.constant dense<0.000000e+00> : vector<8x8x8xf32>
    %469 = tpu.matmul %454, %461, %cst_140 {dimension_numbers = #tpu.dot_dimension_numbers<[2], [2], [1], [1], [0, 0, 0, 1, 1, 1], [0], [0]>} : vector<8x8x8xbf16>, vector<8x8x8xbf16>, vector<8x8x8xf32> -> vector<8x8x8xf32>
    "tpu.trace_stop"() : () -> ()
    %cst_141 = arith.constant 0.353553385 : f32
    %470 = vector.broadcast %cst_141 : f32 to vector<8x8x8xf32>
    %471 = arith.mulf %469, %470 : vector<8x8x8xf32>
    %472 = vector.broadcast %3 : vector<8x1x8xf32> to vector<8x8x8xf32>
    %473 = arith.addf %471, %472 : vector<8x8x8xf32>
    %cst_142 = arith.constant dense<0xFF800000> : vector<8x8xf32>
    %474 = vector.multi_reduction <maximumf>, %473, %cst_142 [2] : vector<8x8x8xf32> to vector<8x8xf32>
    %475 = vector.shape_cast %474 : vector<8x8xf32> to vector<8x8x1xf32>
    %476 = vector.broadcast %475 : vector<8x8x1xf32> to vector<8x8x8xf32>
    %477 = arith.subf %473, %476 : vector<8x8x8xf32>
    %478 = math.exp %477 : vector<8x8x8xf32>
    %cst_143 = arith.constant dense<0.000000e+00> : vector<8x8xf32>
    %479 = vector.multi_reduction <add>, %478, %cst_143 [2] : vector<8x8x8xf32> to vector<8x8xf32>
    %480 = vector.shape_cast %479 : vector<8x8xf32> to vector<8x8x1xf32>
    %481 = tpu.reciprocal %480 {approx = true} : vector<8x8x1xf32> -> vector<8x8x1xf32>
    %482 = vector.broadcast %481 : vector<8x8x1xf32> to vector<8x8x8xf32>
    %483 = arith.mulf %478, %482 : vector<8x8x8xf32>
    %484 = arith.truncf %483 : vector<8x8x8xf32> to vector<8x8x8xbf16>
    "tpu.trace_start"() <{level = 10 : i32, message = "bqk,bkd->bqd"}> : () -> ()
    %cst_144 = arith.constant dense<0.000000e+00> : vector<8x8x8xf32>
    %485 = tpu.matmul %484, %468, %cst_144 {dimension_numbers = #tpu.dot_dimension_numbers<[2], [1], [1], [2], [0, 0, 0, 1, 1, 2], [0], [0]>} : vector<8x8x8xbf16>, vector<8x8x8xbf16>, vector<8x8x8xf32> -> vector<8x8x8xf32>
    "tpu.trace_stop"() : () -> ()
    %486 = vector.extract_strided_slice %485 {offsets = [0, 0, 0], sizes = [2, 8, 8], strides = [1, 1, 1]} : vector<8x8x8xf32> to vector<2x8x8xf32>
    %487 = vector.extract_strided_slice %485 {offsets = [2, 0, 0], sizes = [2, 8, 8], strides = [1, 1, 1]} : vector<8x8x8xf32> to vector<2x8x8xf32>
    %488 = vector.extract_strided_slice %485 {offsets = [4, 0, 0], sizes = [2, 8, 8], strides = [1, 1, 1]} : vector<8x8x8xf32> to vector<2x8x8xf32>
    %489 = vector.extract_strided_slice %485 {offsets = [6, 0, 0], sizes = [2, 8, 8], strides = [1, 1, 1]} : vector<8x8x8xf32> to vector<2x8x8xf32>
    %490 = tpu.concatenate %486, %487, %488, %489 in 2 : vector<2x8x8xf32>, vector<2x8x8xf32>, vector<2x8x8xf32>, vector<2x8x8xf32> -> vector<2x8x32xf32>
    %491 = vector.shape_cast %490 : vector<2x8x32xf32> to vector<16x32xf32>
    %492 = arith.truncf %491 : vector<16x32xf32> to vector<16x32xbf16>
    %493 = vector.extract_strided_slice %423 {offsets = [3, 0, 0], sizes = [1, 32, 32], strides = [1, 1, 1]} : vector<4x32x32xbf16> to vector<1x32x32xbf16>
    %494 = vector.shape_cast %493 : vector<1x32x32xbf16> to vector<32x32xbf16>
    %cst_145 = arith.constant dense<0.000000e+00> : vector<16x32xf32>
    %495 = tpu.matmul %492, %494, %cst_145 {dimension_numbers = #tpu.dot_dimension_numbers<[1], [0], [0], [1], [0, 0, 1, 1], [], []>} : vector<16x32xbf16>, vector<32x32xbf16>, vector<16x32xf32> -> vector<16x32xf32>
    %496 = vector.extract_strided_slice %425 {offsets = [3, 0], sizes = [1, 32], strides = [1, 1]} : vector<4x32xf32> to vector<1x32xf32>
    %497 = vector.broadcast %496 : vector<1x32xf32> to vector<16x32xf32>
    %498 = arith.addf %495, %497 : vector<16x32xf32>
    %499 = vector.shape_cast %498 : vector<16x32xf32> to vector<2x8x32xf32>
    %500 = vector.extract_strided_slice %315 {offsets = [1, 0], sizes = [1, 32], strides = [1, 1]} : vector<3x32xf32> to vector<1x32xf32>
    %501 = vector.extract_strided_slice %317 {offsets = [1, 0], sizes = [1, 32], strides = [1, 1]} : vector<3x32xf32> to vector<1x32xf32>
    %502 = arith.addf %421, %499 : vector<2x8x32xf32>
    %503 = vector.shape_cast %502 : vector<2x8x32xf32> to vector<16x32xf32>
    %cst_146 = arith.constant dense<0.000000e+00> : vector<16xf32>
    %504 = vector.multi_reduction <add>, %503, %cst_146 [1] : vector<16x32xf32> to vector<16xf32>
    %505 = vector.shape_cast %504 : vector<16xf32> to vector<16x1xf32>
    %cst_147 = arith.constant 3.200000e+01 : f32
    %506 = vector.broadcast %cst_147 : f32 to vector<16x1xf32>
    %507 = arith.divf %505, %506 : vector<16x1xf32>
    %508 = vector.broadcast %507 : vector<16x1xf32> to vector<16x32xf32>
    %509 = arith.subf %503, %508 : vector<16x32xf32>
    %510 = arith.mulf %509, %509 : vector<16x32xf32>
    %cst_148 = arith.constant dense<0.000000e+00> : vector<16xf32>
    %511 = vector.multi_reduction <add>, %510, %cst_148 [1] : vector<16x32xf32> to vector<16xf32>
    %512 = vector.shape_cast %511 : vector<16xf32> to vector<16x1xf32>
    %cst_149 = arith.constant 0.0322580636 : f32
    %513 = vector.broadcast %cst_149 : f32 to vector<16x1xf32>
    %514 = arith.mulf %512, %513 : vector<16x1xf32>
    %515 = math.sqrt %514 : vector<16x1xf32>
    %cst_150 = arith.constant 9.99999997E-7 : f32
    %516 = vector.broadcast %cst_150 : f32 to vector<16x1xf32>
    %517 = arith.addf %515, %516 : vector<16x1xf32>
    %518 = tpu.reciprocal %517 {approx = true} : vector<16x1xf32> -> vector<16x1xf32>
    %519 = vector.broadcast %518 : vector<16x1xf32> to vector<16x32xf32>
    %520 = arith.mulf %509, %519 : vector<16x32xf32>
    %521 = vector.broadcast %500 : vector<1x32xf32> to vector<16x32xf32>
    %522 = arith.mulf %521, %520 : vector<16x32xf32>
    %523 = vector.broadcast %501 : vector<1x32xf32> to vector<16x32xf32>
    %524 = arith.addf %522, %523 : vector<16x32xf32>
    %525 = vector.shape_cast %524 : vector<16x32xf32> to vector<2x8x32xf32>
    %c0_151 = arith.constant 0 : index
    %c0_152 = arith.constant 0 : index
    %c0_153 = arith.constant 0 : index
    %526 = vector.load %arg17[%c0_151, %c0_152, %c0_153] : memref<2x32x128xbf16, #tpu.memory_space<vmem>>, vector<1x32x128xbf16>
    %527 = vector.shape_cast %526 : vector<1x32x128xbf16> to vector<32x128xbf16>
    %c0_154 = arith.constant 0 : index
    %c0_155 = arith.constant 0 : index
    %c0_156 = arith.constant 0 : index
    %528 = vector.load %arg18[%c0_154, %c0_155, %c0_156] : memref<2x1x128xf32, #tpu.memory_space<vmem>>, vector<1x1x128xf32>
    %529 = vector.shape_cast %528 : vector<1x1x128xf32> to vector<1x128xf32>
    %c0_157 = arith.constant 0 : index
    %c0_158 = arith.constant 0 : index
    %c0_159 = arith.constant 0 : index
    %530 = vector.load %arg19[%c0_157, %c0_158, %c0_159] : memref<2x128x32xbf16, #tpu.memory_space<vmem>>, vector<1x128x32xbf16>
    %531 = vector.shape_cast %530 : vector<1x128x32xbf16> to vector<128x32xbf16>
    %c0_160 = arith.constant 0 : index
    %c0_161 = arith.constant 0 : index
    %c0_162 = arith.constant 0 : index
    %532 = vector.load %arg20[%c0_160, %c0_161, %c0_162] : memref<2x1x32xf32, #tpu.memory_space<vmem>>, vector<1x1x32xf32>
    %533 = vector.shape_cast %532 : vector<1x1x32xf32> to vector<1x32xf32>
    %534 = vector.shape_cast %525 : vector<2x8x32xf32> to vector<16x32xf32>
    %535 = arith.truncf %534 : vector<16x32xf32> to vector<16x32xbf16>
    %cst_163 = arith.constant dense<0.000000e+00> : vector<16x128xf32>
    %536 = tpu.matmul %535, %527, %cst_163 {dimension_numbers = #tpu.dot_dimension_numbers<[1], [0], [0], [1], [0, 0, 1, 1], [], []>} : vector<16x32xbf16>, vector<32x128xbf16>, vector<16x128xf32> -> vector<16x128xf32>
    %537 = vector.broadcast %529 : vector<1x128xf32> to vector<16x128xf32>
    %538 = arith.addf %536, %537 : vector<16x128xf32>
    %cst_164 = arith.constant 0.000000e+00 : f32
    %539 = vector.broadcast %cst_164 : f32 to vector<16x128xf32>
    %540 = arith.maximumf %538, %539 : vector<16x128xf32>
    %541 = arith.truncf %540 : vector<16x128xf32> to vector<16x128xbf16>
    %cst_165 = arith.constant dense<0.000000e+00> : vector<16x32xf32>
    %542 = tpu.matmul %541, %531, %cst_165 {dimension_numbers = #tpu.dot_dimension_numbers<[1], [0], [0], [1], [0, 0, 1, 1], [], []>} : vector<16x128xbf16>, vector<128x32xbf16>, vector<16x32xf32> -> vector<16x32xf32>
    %543 = vector.broadcast %533 : vector<1x32xf32> to vector<16x32xf32>
    %544 = arith.addf %542, %543 : vector<16x32xf32>
    %545 = vector.shape_cast %544 : vector<16x32xf32> to vector<2x8x32xf32>
    %546 = vector.extract_strided_slice %315 {offsets = [2, 0], sizes = [1, 32], strides = [1, 1]} : vector<3x32xf32> to vector<1x32xf32>
    %547 = vector.extract_strided_slice %317 {offsets = [2, 0], sizes = [1, 32], strides = [1, 1]} : vector<3x32xf32> to vector<1x32xf32>
    %548 = arith.addf %525, %545 : vector<2x8x32xf32>
    %549 = vector.shape_cast %548 : vector<2x8x32xf32> to vector<16x32xf32>
    %cst_166 = arith.constant dense<0.000000e+00> : vector<16xf32>
    %550 = vector.multi_reduction <add>, %549, %cst_166 [1] : vector<16x32xf32> to vector<16xf32>
    %551 = vector.shape_cast %550 : vector<16xf32> to vector<16x1xf32>
    %cst_167 = arith.constant 3.200000e+01 : f32
    %552 = vector.broadcast %cst_167 : f32 to vector<16x1xf32>
    %553 = arith.divf %551, %552 : vector<16x1xf32>
    %554 = vector.broadcast %553 : vector<16x1xf32> to vector<16x32xf32>
    %555 = arith.subf %549, %554 : vector<16x32xf32>
    %556 = arith.mulf %555, %555 : vector<16x32xf32>
    %cst_168 = arith.constant dense<0.000000e+00> : vector<16xf32>
    %557 = vector.multi_reduction <add>, %556, %cst_168 [1] : vector<16x32xf32> to vector<16xf32>
    %558 = vector.shape_cast %557 : vector<16xf32> to vector<16x1xf32>
    %cst_169 = arith.constant 0.0322580636 : f32
    %559 = vector.broadcast %cst_169 : f32 to vector<16x1xf32>
    %560 = arith.mulf %558, %559 : vector<16x1xf32>
    %561 = math.sqrt %560 : vector<16x1xf32>
    %cst_170 = arith.constant 9.99999997E-7 : f32
    %562 = vector.broadcast %cst_170 : f32 to vector<16x1xf32>
    %563 = arith.addf %561, %562 : vector<16x1xf32>
    %564 = tpu.reciprocal %563 {approx = true} : vector<16x1xf32> -> vector<16x1xf32>
    %565 = vector.broadcast %564 : vector<16x1xf32> to vector<16x32xf32>
    %566 = arith.mulf %555, %565 : vector<16x32xf32>
    %567 = vector.broadcast %546 : vector<1x32xf32> to vector<16x32xf32>
    %568 = arith.mulf %567, %566 : vector<16x32xf32>
    %569 = vector.broadcast %547 : vector<1x32xf32> to vector<16x32xf32>
    %570 = arith.addf %568, %569 : vector<16x32xf32>
    %571 = vector.shape_cast %570 : vector<16x32xf32> to vector<2x8x32xf32>
    %c1_171 = arith.constant 1 : index
    %c0_172 = arith.constant 0 : index
    %c0_173 = arith.constant 0 : index
    %572 = vector.load %arg21[%c1_171, %c0_172, %c0_173] : memref<2x3x32xf32, #tpu.memory_space<vmem>>, vector<1x3x32xf32>
    %573 = vector.shape_cast %572 : vector<1x3x32xf32> to vector<3x32xf32>
    %c1_174 = arith.constant 1 : index
    %c0_175 = arith.constant 0 : index
    %c0_176 = arith.constant 0 : index
    %574 = vector.load %arg22[%c1_174, %c0_175, %c0_176] : memref<2x3x32xf32, #tpu.memory_space<vmem>>, vector<1x3x32xf32>
    %575 = vector.shape_cast %574 : vector<1x3x32xf32> to vector<3x32xf32>
    %c1_177 = arith.constant 1 : index
    %c0_178 = arith.constant 0 : index
    %c0_179 = arith.constant 0 : index
    %c0_180 = arith.constant 0 : index
    %576 = vector.load %arg13[%c1_177, %c0_178, %c0_179, %c0_180] : memref<2x4x32x32xbf16, #tpu.memory_space<vmem>>, vector<1x4x32x32xbf16>
    %577 = vector.shape_cast %576 : vector<1x4x32x32xbf16> to vector<4x32x32xbf16>
    %c1_181 = arith.constant 1 : index
    %c0_182 = arith.constant 0 : index
    %c0_183 = arith.constant 0 : index
    %578 = vector.load %arg14[%c1_181, %c0_182, %c0_183] : memref<2x4x32xf32, #tpu.memory_space<vmem>>, vector<1x4x32xf32>
    %579 = vector.shape_cast %578 : vector<1x4x32xf32> to vector<4x32xf32>
    %580 = vector.shape_cast %571 : vector<2x8x32xf32> to vector<16x32xf32>
    %581 = arith.truncf %580 : vector<16x32xf32> to vector<16x32xbf16>
    %582 = vector.shape_cast %571 : vector<2x8x32xf32> to vector<16x32xf32>
    %583 = arith.truncf %582 : vector<16x32xf32> to vector<16x32xbf16>
    %584 = vector.extract_strided_slice %577 {offsets = [0, 0, 0], sizes = [1, 32, 32], strides = [1, 1, 1]} : vector<4x32x32xbf16> to vector<1x32x32xbf16>
    %585 = vector.shape_cast %584 : vector<1x32x32xbf16> to vector<32x32xbf16>
    %cst_184 = arith.constant dense<0.000000e+00> : vector<16x32xf32>
    %586 = tpu.matmul %581, %585, %cst_184 {dimension_numbers = #tpu.dot_dimension_numbers<[1], [0], [0], [1], [0, 0, 1, 1], [], []>} : vector<16x32xbf16>, vector<32x32xbf16>, vector<16x32xf32> -> vector<16x32xf32>
    %587 = vector.extract_strided_slice %579 {offsets = [0, 0], sizes = [1, 32], strides = [1, 1]} : vector<4x32xf32> to vector<1x32xf32>
    %588 = vector.broadcast %587 : vector<1x32xf32> to vector<16x32xf32>
    %589 = arith.addf %586, %588 : vector<16x32xf32>
    %590 = vector.extract_strided_slice %577 {offsets = [1, 0, 0], sizes = [1, 32, 32], strides = [1, 1, 1]} : vector<4x32x32xbf16> to vector<1x32x32xbf16>
    %591 = vector.shape_cast %590 : vector<1x32x32xbf16> to vector<32x32xbf16>
    %cst_185 = arith.constant dense<0.000000e+00> : vector<16x32xf32>
    %592 = tpu.matmul %583, %591, %cst_185 {dimension_numbers = #tpu.dot_dimension_numbers<[1], [0], [0], [1], [0, 0, 1, 1], [], []>} : vector<16x32xbf16>, vector<32x32xbf16>, vector<16x32xf32> -> vector<16x32xf32>
    %593 = vector.extract_strided_slice %579 {offsets = [1, 0], sizes = [1, 32], strides = [1, 1]} : vector<4x32xf32> to vector<1x32xf32>
    %594 = vector.broadcast %593 : vector<1x32xf32> to vector<16x32xf32>
    %595 = arith.addf %592, %594 : vector<16x32xf32>
    %596 = vector.extract_strided_slice %577 {offsets = [2, 0, 0], sizes = [1, 32, 32], strides = [1, 1, 1]} : vector<4x32x32xbf16> to vector<1x32x32xbf16>
    %597 = vector.shape_cast %596 : vector<1x32x32xbf16> to vector<32x32xbf16>
    %cst_186 = arith.constant dense<0.000000e+00> : vector<16x32xf32>
    %598 = tpu.matmul %583, %597, %cst_186 {dimension_numbers = #tpu.dot_dimension_numbers<[1], [0], [0], [1], [0, 0, 1, 1], [], []>} : vector<16x32xbf16>, vector<32x32xbf16>, vector<16x32xf32> -> vector<16x32xf32>
    %599 = vector.extract_strided_slice %579 {offsets = [2, 0], sizes = [1, 32], strides = [1, 1]} : vector<4x32xf32> to vector<1x32xf32>
    %600 = vector.broadcast %599 : vector<1x32xf32> to vector<16x32xf32>
    %601 = arith.addf %598, %600 : vector<16x32xf32>
    %602 = vector.shape_cast %589 : vector<16x32xf32> to vector<2x8x32xf32>
    %603 = vector.extract_strided_slice %602 {offsets = [0, 0, 0], sizes = [2, 8, 8], strides = [1, 1, 1]} : vector<2x8x32xf32> to vector<2x8x8xf32>
    %604 = vector.extract_strided_slice %602 {offsets = [0, 0, 8], sizes = [2, 8, 8], strides = [1, 1, 1]} : vector<2x8x32xf32> to vector<2x8x8xf32>
    %605 = vector.extract_strided_slice %602 {offsets = [0, 0, 16], sizes = [2, 8, 8], strides = [1, 1, 1]} : vector<2x8x32xf32> to vector<2x8x8xf32>
    %606 = vector.extract_strided_slice %602 {offsets = [0, 0, 24], sizes = [2, 8, 8], strides = [1, 1, 1]} : vector<2x8x32xf32> to vector<2x8x8xf32>
    %607 = tpu.concatenate %603, %604, %605, %606 in 0 : vector<2x8x8xf32>, vector<2x8x8xf32>, vector<2x8x8xf32>, vector<2x8x8xf32> -> vector<8x8x8xf32>
    %608 = arith.truncf %607 : vector<8x8x8xf32> to vector<8x8x8xbf16>
    %609 = vector.shape_cast %595 : vector<16x32xf32> to vector<2x8x32xf32>
    %610 = vector.extract_strided_slice %609 {offsets = [0, 0, 0], sizes = [2, 8, 8], strides = [1, 1, 1]} : vector<2x8x32xf32> to vector<2x8x8xf32>
    %611 = vector.extract_strided_slice %609 {offsets = [0, 0, 8], sizes = [2, 8, 8], strides = [1, 1, 1]} : vector<2x8x32xf32> to vector<2x8x8xf32>
    %612 = vector.extract_strided_slice %609 {offsets = [0, 0, 16], sizes = [2, 8, 8], strides = [1, 1, 1]} : vector<2x8x32xf32> to vector<2x8x8xf32>
    %613 = vector.extract_strided_slice %609 {offsets = [0, 0, 24], sizes = [2, 8, 8], strides = [1, 1, 1]} : vector<2x8x32xf32> to vector<2x8x8xf32>
    %614 = tpu.concatenate %610, %611, %612, %613 in 0 : vector<2x8x8xf32>, vector<2x8x8xf32>, vector<2x8x8xf32>, vector<2x8x8xf32> -> vector<8x8x8xf32>
    %615 = arith.truncf %614 : vector<8x8x8xf32> to vector<8x8x8xbf16>
    %616 = vector.shape_cast %601 : vector<16x32xf32> to vector<2x8x32xf32>
    %617 = vector.extract_strided_slice %616 {offsets = [0, 0, 0], sizes = [2, 8, 8], strides = [1, 1, 1]} : vector<2x8x32xf32> to vector<2x8x8xf32>
    %618 = vector.extract_strided_slice %616 {offsets = [0, 0, 8], sizes = [2, 8, 8], strides = [1, 1, 1]} : vector<2x8x32xf32> to vector<2x8x8xf32>
    %619 = vector.extract_strided_slice %616 {offsets = [0, 0, 16], sizes = [2, 8, 8], strides = [1, 1, 1]} : vector<2x8x32xf32> to vector<2x8x8xf32>
    %620 = vector.extract_strided_slice %616 {offsets = [0, 0, 24], sizes = [2, 8, 8], strides = [1, 1, 1]} : vector<2x8x32xf32> to vector<2x8x8xf32>
    %621 = tpu.concatenate %617, %618, %619, %620 in 0 : vector<2x8x8xf32>, vector<2x8x8xf32>, vector<2x8x8xf32>, vector<2x8x8xf32> -> vector<8x8x8xf32>
    %622 = arith.truncf %621 : vector<8x8x8xf32> to vector<8x8x8xbf16>
    "tpu.trace_start"() <{level = 10 : i32, message = "bqd,bkd->bqk"}> : () -> ()
    %cst_187 = arith.constant dense<0.000000e+00> : vector<8x8x8xf32>
    %623 = tpu.matmul %608, %615, %cst_187 {dimension_numbers = #tpu.dot_dimension_numbers<[2], [2], [1], [1], [0, 0, 0, 1, 1, 1], [0], [0]>} : vector<8x8x8xbf16>, vector<8x8x8xbf16>, vector<8x8x8xf32> -> vector<8x8x8xf32>
    "tpu.trace_stop"() : () -> ()
    %cst_188 = arith.constant 0.353553385 : f32
    %624 = vector.broadcast %cst_188 : f32 to vector<8x8x8xf32>
    %625 = arith.mulf %623, %624 : vector<8x8x8xf32>
    %626 = vector.broadcast %5 : vector<8x1x8xf32> to vector<8x8x8xf32>
    %627 = arith.addf %625, %626 : vector<8x8x8xf32>
    %cst_189 = arith.constant dense<0xFF800000> : vector<8x8xf32>
    %628 = vector.multi_reduction <maximumf>, %627, %cst_189 [2] : vector<8x8x8xf32> to vector<8x8xf32>
    %629 = vector.shape_cast %628 : vector<8x8xf32> to vector<8x8x1xf32>
    %630 = vector.broadcast %629 : vector<8x8x1xf32> to vector<8x8x8xf32>
    %631 = arith.subf %627, %630 : vector<8x8x8xf32>
    %632 = math.exp %631 : vector<8x8x8xf32>
    %cst_190 = arith.constant dense<0.000000e+00> : vector<8x8xf32>
    %633 = vector.multi_reduction <add>, %632, %cst_190 [2] : vector<8x8x8xf32> to vector<8x8xf32>
    %634 = vector.shape_cast %633 : vector<8x8xf32> to vector<8x8x1xf32>
    %635 = tpu.reciprocal %634 {approx = true} : vector<8x8x1xf32> -> vector<8x8x1xf32>
    %636 = vector.broadcast %635 : vector<8x8x1xf32> to vector<8x8x8xf32>
    %637 = arith.mulf %632, %636 : vector<8x8x8xf32>
    %638 = arith.truncf %637 : vector<8x8x8xf32> to vector<8x8x8xbf16>
    "tpu.trace_start"() <{level = 10 : i32, message = "bqk,bkd->bqd"}> : () -> ()
    %cst_191 = arith.constant dense<0.000000e+00> : vector<8x8x8xf32>
    %639 = tpu.matmul %638, %622, %cst_191 {dimension_numbers = #tpu.dot_dimension_numbers<[2], [1], [1], [2], [0, 0, 0, 1, 1, 2], [0], [0]>} : vector<8x8x8xbf16>, vector<8x8x8xbf16>, vector<8x8x8xf32> -> vector<8x8x8xf32>
    "tpu.trace_stop"() : () -> ()
    %640 = vector.extract_strided_slice %639 {offsets = [0, 0, 0], sizes = [2, 8, 8], strides = [1, 1, 1]} : vector<8x8x8xf32> to vector<2x8x8xf32>
    %641 = vector.extract_strided_slice %639 {offsets = [2, 0, 0], sizes = [2, 8, 8], strides = [1, 1, 1]} : vector<8x8x8xf32> to vector<2x8x8xf32>
    %642 = vector.extract_strided_slice %639 {offsets = [4, 0, 0], sizes = [2, 8, 8], strides = [1, 1, 1]} : vector<8x8x8xf32> to vector<2x8x8xf32>
    %643 = vector.extract_strided_slice %639 {offsets = [6, 0, 0], sizes = [2, 8, 8], strides = [1, 1, 1]} : vector<8x8x8xf32> to vector<2x8x8xf32>
    %644 = tpu.concatenate %640, %641, %642, %643 in 2 : vector<2x8x8xf32>, vector<2x8x8xf32>, vector<2x8x8xf32>, vector<2x8x8xf32> -> vector<2x8x32xf32>
    %645 = vector.shape_cast %644 : vector<2x8x32xf32> to vector<16x32xf32>
    %646 = arith.truncf %645 : vector<16x32xf32> to vector<16x32xbf16>
    %647 = vector.extract_strided_slice %577 {offsets = [3, 0, 0], sizes = [1, 32, 32], strides = [1, 1, 1]} : vector<4x32x32xbf16> to vector<1x32x32xbf16>
    %648 = vector.shape_cast %647 : vector<1x32x32xbf16> to vector<32x32xbf16>
    %cst_192 = arith.constant dense<0.000000e+00> : vector<16x32xf32>
    %649 = tpu.matmul %646, %648, %cst_192 {dimension_numbers = #tpu.dot_dimension_numbers<[1], [0], [0], [1], [0, 0, 1, 1], [], []>} : vector<16x32xbf16>, vector<32x32xbf16>, vector<16x32xf32> -> vector<16x32xf32>
    %650 = vector.extract_strided_slice %579 {offsets = [3, 0], sizes = [1, 32], strides = [1, 1]} : vector<4x32xf32> to vector<1x32xf32>
    %651 = vector.broadcast %650 : vector<1x32xf32> to vector<16x32xf32>
    %652 = arith.addf %649, %651 : vector<16x32xf32>
    %653 = vector.shape_cast %652 : vector<16x32xf32> to vector<2x8x32xf32>
    %654 = vector.extract_strided_slice %573 {offsets = [0, 0], sizes = [1, 32], strides = [1, 1]} : vector<3x32xf32> to vector<1x32xf32>
    %655 = vector.extract_strided_slice %575 {offsets = [0, 0], sizes = [1, 32], strides = [1, 1]} : vector<3x32xf32> to vector<1x32xf32>
    %656 = arith.addf %571, %653 : vector<2x8x32xf32>
    %657 = vector.shape_cast %656 : vector<2x8x32xf32> to vector<16x32xf32>
    %cst_193 = arith.constant dense<0.000000e+00> : vector<16xf32>
    %658 = vector.multi_reduction <add>, %657, %cst_193 [1] : vector<16x32xf32> to vector<16xf32>
    %659 = vector.shape_cast %658 : vector<16xf32> to vector<16x1xf32>
    %cst_194 = arith.constant 3.200000e+01 : f32
    %660 = vector.broadcast %cst_194 : f32 to vector<16x1xf32>
    %661 = arith.divf %659, %660 : vector<16x1xf32>
    %662 = vector.broadcast %661 : vector<16x1xf32> to vector<16x32xf32>
    %663 = arith.subf %657, %662 : vector<16x32xf32>
    %664 = arith.mulf %663, %663 : vector<16x32xf32>
    %cst_195 = arith.constant dense<0.000000e+00> : vector<16xf32>
    %665 = vector.multi_reduction <add>, %664, %cst_195 [1] : vector<16x32xf32> to vector<16xf32>
    %666 = vector.shape_cast %665 : vector<16xf32> to vector<16x1xf32>
    %cst_196 = arith.constant 0.0322580636 : f32
    %667 = vector.broadcast %cst_196 : f32 to vector<16x1xf32>
    %668 = arith.mulf %666, %667 : vector<16x1xf32>
    %669 = math.sqrt %668 : vector<16x1xf32>
    %cst_197 = arith.constant 9.99999997E-7 : f32
    %670 = vector.broadcast %cst_197 : f32 to vector<16x1xf32>
    %671 = arith.addf %669, %670 : vector<16x1xf32>
    %672 = tpu.reciprocal %671 {approx = true} : vector<16x1xf32> -> vector<16x1xf32>
    %673 = vector.broadcast %672 : vector<16x1xf32> to vector<16x32xf32>
    %674 = arith.mulf %663, %673 : vector<16x32xf32>
    %675 = vector.broadcast %654 : vector<1x32xf32> to vector<16x32xf32>
    %676 = arith.mulf %675, %674 : vector<16x32xf32>
    %677 = vector.broadcast %655 : vector<1x32xf32> to vector<16x32xf32>
    %678 = arith.addf %676, %677 : vector<16x32xf32>
    %679 = vector.shape_cast %678 : vector<16x32xf32> to vector<2x8x32xf32>
    %c1_198 = arith.constant 1 : index
    %c0_199 = arith.constant 0 : index
    %c0_200 = arith.constant 0 : index
    %c0_201 = arith.constant 0 : index
    %680 = vector.load %arg15[%c1_198, %c0_199, %c0_200, %c0_201] : memref<2x4x32x32xbf16, #tpu.memory_space<vmem>>, vector<1x4x32x32xbf16>
    %681 = vector.shape_cast %680 : vector<1x4x32x32xbf16> to vector<4x32x32xbf16>
    %c1_202 = arith.constant 1 : index
    %c0_203 = arith.constant 0 : index
    %c0_204 = arith.constant 0 : index
    %682 = vector.load %arg16[%c1_202, %c0_203, %c0_204] : memref<2x4x32xf32, #tpu.memory_space<vmem>>, vector<1x4x32xf32>
    %683 = vector.shape_cast %682 : vector<1x4x32xf32> to vector<4x32xf32>
    %684 = vector.shape_cast %679 : vector<2x8x32xf32> to vector<16x32xf32>
    %685 = arith.truncf %684 : vector<16x32xf32> to vector<16x32xbf16>
    %686 = vector.shape_cast %313 : vector<2x8x32xf32> to vector<16x32xf32>
    %687 = arith.truncf %686 : vector<16x32xf32> to vector<16x32xbf16>
    %688 = vector.extract_strided_slice %681 {offsets = [0, 0, 0], sizes = [1, 32, 32], strides = [1, 1, 1]} : vector<4x32x32xbf16> to vector<1x32x32xbf16>
    %689 = vector.shape_cast %688 : vector<1x32x32xbf16> to vector<32x32xbf16>
    %cst_205 = arith.constant dense<0.000000e+00> : vector<16x32xf32>
    %690 = tpu.matmul %685, %689, %cst_205 {dimension_numbers = #tpu.dot_dimension_numbers<[1], [0], [0], [1], [0, 0, 1, 1], [], []>} : vector<16x32xbf16>, vector<32x32xbf16>, vector<16x32xf32> -> vector<16x32xf32>
    %691 = vector.extract_strided_slice %683 {offsets = [0, 0], sizes = [1, 32], strides = [1, 1]} : vector<4x32xf32> to vector<1x32xf32>
    %692 = vector.broadcast %691 : vector<1x32xf32> to vector<16x32xf32>
    %693 = arith.addf %690, %692 : vector<16x32xf32>
    %694 = vector.extract_strided_slice %681 {offsets = [1, 0, 0], sizes = [1, 32, 32], strides = [1, 1, 1]} : vector<4x32x32xbf16> to vector<1x32x32xbf16>
    %695 = vector.shape_cast %694 : vector<1x32x32xbf16> to vector<32x32xbf16>
    %cst_206 = arith.constant dense<0.000000e+00> : vector<16x32xf32>
    %696 = tpu.matmul %687, %695, %cst_206 {dimension_numbers = #tpu.dot_dimension_numbers<[1], [0], [0], [1], [0, 0, 1, 1], [], []>} : vector<16x32xbf16>, vector<32x32xbf16>, vector<16x32xf32> -> vector<16x32xf32>
    %697 = vector.extract_strided_slice %683 {offsets = [1, 0], sizes = [1, 32], strides = [1, 1]} : vector<4x32xf32> to vector<1x32xf32>
    %698 = vector.broadcast %697 : vector<1x32xf32> to vector<16x32xf32>
    %699 = arith.addf %696, %698 : vector<16x32xf32>
    %700 = vector.extract_strided_slice %681 {offsets = [2, 0, 0], sizes = [1, 32, 32], strides = [1, 1, 1]} : vector<4x32x32xbf16> to vector<1x32x32xbf16>
    %701 = vector.shape_cast %700 : vector<1x32x32xbf16> to vector<32x32xbf16>
    %cst_207 = arith.constant dense<0.000000e+00> : vector<16x32xf32>
    %702 = tpu.matmul %687, %701, %cst_207 {dimension_numbers = #tpu.dot_dimension_numbers<[1], [0], [0], [1], [0, 0, 1, 1], [], []>} : vector<16x32xbf16>, vector<32x32xbf16>, vector<16x32xf32> -> vector<16x32xf32>
    %703 = vector.extract_strided_slice %683 {offsets = [2, 0], sizes = [1, 32], strides = [1, 1]} : vector<4x32xf32> to vector<1x32xf32>
    %704 = vector.broadcast %703 : vector<1x32xf32> to vector<16x32xf32>
    %705 = arith.addf %702, %704 : vector<16x32xf32>
    %706 = vector.shape_cast %693 : vector<16x32xf32> to vector<2x8x32xf32>
    %707 = vector.extract_strided_slice %706 {offsets = [0, 0, 0], sizes = [2, 8, 8], strides = [1, 1, 1]} : vector<2x8x32xf32> to vector<2x8x8xf32>
    %708 = vector.extract_strided_slice %706 {offsets = [0, 0, 8], sizes = [2, 8, 8], strides = [1, 1, 1]} : vector<2x8x32xf32> to vector<2x8x8xf32>
    %709 = vector.extract_strided_slice %706 {offsets = [0, 0, 16], sizes = [2, 8, 8], strides = [1, 1, 1]} : vector<2x8x32xf32> to vector<2x8x8xf32>
    %710 = vector.extract_strided_slice %706 {offsets = [0, 0, 24], sizes = [2, 8, 8], strides = [1, 1, 1]} : vector<2x8x32xf32> to vector<2x8x8xf32>
    %711 = tpu.concatenate %707, %708, %709, %710 in 0 : vector<2x8x8xf32>, vector<2x8x8xf32>, vector<2x8x8xf32>, vector<2x8x8xf32> -> vector<8x8x8xf32>
    %712 = arith.truncf %711 : vector<8x8x8xf32> to vector<8x8x8xbf16>
    %713 = vector.shape_cast %699 : vector<16x32xf32> to vector<2x8x32xf32>
    %714 = vector.extract_strided_slice %713 {offsets = [0, 0, 0], sizes = [2, 8, 8], strides = [1, 1, 1]} : vector<2x8x32xf32> to vector<2x8x8xf32>
    %715 = vector.extract_strided_slice %713 {offsets = [0, 0, 8], sizes = [2, 8, 8], strides = [1, 1, 1]} : vector<2x8x32xf32> to vector<2x8x8xf32>
    %716 = vector.extract_strided_slice %713 {offsets = [0, 0, 16], sizes = [2, 8, 8], strides = [1, 1, 1]} : vector<2x8x32xf32> to vector<2x8x8xf32>
    %717 = vector.extract_strided_slice %713 {offsets = [0, 0, 24], sizes = [2, 8, 8], strides = [1, 1, 1]} : vector<2x8x32xf32> to vector<2x8x8xf32>
    %718 = tpu.concatenate %714, %715, %716, %717 in 0 : vector<2x8x8xf32>, vector<2x8x8xf32>, vector<2x8x8xf32>, vector<2x8x8xf32> -> vector<8x8x8xf32>
    %719 = arith.truncf %718 : vector<8x8x8xf32> to vector<8x8x8xbf16>
    %720 = vector.shape_cast %705 : vector<16x32xf32> to vector<2x8x32xf32>
    %721 = vector.extract_strided_slice %720 {offsets = [0, 0, 0], sizes = [2, 8, 8], strides = [1, 1, 1]} : vector<2x8x32xf32> to vector<2x8x8xf32>
    %722 = vector.extract_strided_slice %720 {offsets = [0, 0, 8], sizes = [2, 8, 8], strides = [1, 1, 1]} : vector<2x8x32xf32> to vector<2x8x8xf32>
    %723 = vector.extract_strided_slice %720 {offsets = [0, 0, 16], sizes = [2, 8, 8], strides = [1, 1, 1]} : vector<2x8x32xf32> to vector<2x8x8xf32>
    %724 = vector.extract_strided_slice %720 {offsets = [0, 0, 24], sizes = [2, 8, 8], strides = [1, 1, 1]} : vector<2x8x32xf32> to vector<2x8x8xf32>
    %725 = tpu.concatenate %721, %722, %723, %724 in 0 : vector<2x8x8xf32>, vector<2x8x8xf32>, vector<2x8x8xf32>, vector<2x8x8xf32> -> vector<8x8x8xf32>
    %726 = arith.truncf %725 : vector<8x8x8xf32> to vector<8x8x8xbf16>
    "tpu.trace_start"() <{level = 10 : i32, message = "bqd,bkd->bqk"}> : () -> ()
    %cst_208 = arith.constant dense<0.000000e+00> : vector<8x8x8xf32>
    %727 = tpu.matmul %712, %719, %cst_208 {dimension_numbers = #tpu.dot_dimension_numbers<[2], [2], [1], [1], [0, 0, 0, 1, 1, 1], [0], [0]>} : vector<8x8x8xbf16>, vector<8x8x8xbf16>, vector<8x8x8xf32> -> vector<8x8x8xf32>
    "tpu.trace_stop"() : () -> ()
    %cst_209 = arith.constant 0.353553385 : f32
    %728 = vector.broadcast %cst_209 : f32 to vector<8x8x8xf32>
    %729 = arith.mulf %727, %728 : vector<8x8x8xf32>
    %730 = vector.broadcast %3 : vector<8x1x8xf32> to vector<8x8x8xf32>
    %731 = arith.addf %729, %730 : vector<8x8x8xf32>
    %cst_210 = arith.constant dense<0xFF800000> : vector<8x8xf32>
    %732 = vector.multi_reduction <maximumf>, %731, %cst_210 [2] : vector<8x8x8xf32> to vector<8x8xf32>
    %733 = vector.shape_cast %732 : vector<8x8xf32> to vector<8x8x1xf32>
    %734 = vector.broadcast %733 : vector<8x8x1xf32> to vector<8x8x8xf32>
    %735 = arith.subf %731, %734 : vector<8x8x8xf32>
    %736 = math.exp %735 : vector<8x8x8xf32>
    %cst_211 = arith.constant dense<0.000000e+00> : vector<8x8xf32>
    %737 = vector.multi_reduction <add>, %736, %cst_211 [2] : vector<8x8x8xf32> to vector<8x8xf32>
    %738 = vector.shape_cast %737 : vector<8x8xf32> to vector<8x8x1xf32>
    %739 = tpu.reciprocal %738 {approx = true} : vector<8x8x1xf32> -> vector<8x8x1xf32>
    %740 = vector.broadcast %739 : vector<8x8x1xf32> to vector<8x8x8xf32>
    %741 = arith.mulf %736, %740 : vector<8x8x8xf32>
    %742 = arith.truncf %741 : vector<8x8x8xf32> to vector<8x8x8xbf16>
    "tpu.trace_start"() <{level = 10 : i32, message = "bqk,bkd->bqd"}> : () -> ()
    %cst_212 = arith.constant dense<0.000000e+00> : vector<8x8x8xf32>
    %743 = tpu.matmul %742, %726, %cst_212 {dimension_numbers = #tpu.dot_dimension_numbers<[2], [1], [1], [2], [0, 0, 0, 1, 1, 2], [0], [0]>} : vector<8x8x8xbf16>, vector<8x8x8xbf16>, vector<8x8x8xf32> -> vector<8x8x8xf32>
    "tpu.trace_stop"() : () -> ()
    %744 = vector.extract_strided_slice %743 {offsets = [0, 0, 0], sizes = [2, 8, 8], strides = [1, 1, 1]} : vector<8x8x8xf32> to vector<2x8x8xf32>
    %745 = vector.extract_strided_slice %743 {offsets = [2, 0, 0], sizes = [2, 8, 8], strides = [1, 1, 1]} : vector<8x8x8xf32> to vector<2x8x8xf32>
    %746 = vector.extract_strided_slice %743 {offsets = [4, 0, 0], sizes = [2, 8, 8], strides = [1, 1, 1]} : vector<8x8x8xf32> to vector<2x8x8xf32>
    %747 = vector.extract_strided_slice %743 {offsets = [6, 0, 0], sizes = [2, 8, 8], strides = [1, 1, 1]} : vector<8x8x8xf32> to vector<2x8x8xf32>
    %748 = tpu.concatenate %744, %745, %746, %747 in 2 : vector<2x8x8xf32>, vector<2x8x8xf32>, vector<2x8x8xf32>, vector<2x8x8xf32> -> vector<2x8x32xf32>
    %749 = vector.shape_cast %748 : vector<2x8x32xf32> to vector<16x32xf32>
    %750 = arith.truncf %749 : vector<16x32xf32> to vector<16x32xbf16>
    %751 = vector.extract_strided_slice %681 {offsets = [3, 0, 0], sizes = [1, 32, 32], strides = [1, 1, 1]} : vector<4x32x32xbf16> to vector<1x32x32xbf16>
    %752 = vector.shape_cast %751 : vector<1x32x32xbf16> to vector<32x32xbf16>
    %cst_213 = arith.constant dense<0.000000e+00> : vector<16x32xf32>
    %753 = tpu.matmul %750, %752, %cst_213 {dimension_numbers = #tpu.dot_dimension_numbers<[1], [0], [0], [1], [0, 0, 1, 1], [], []>} : vector<16x32xbf16>, vector<32x32xbf16>, vector<16x32xf32> -> vector<16x32xf32>
    %754 = vector.extract_strided_slice %683 {offsets = [3, 0], sizes = [1, 32], strides = [1, 1]} : vector<4x32xf32> to vector<1x32xf32>
    %755 = vector.broadcast %754 : vector<1x32xf32> to vector<16x32xf32>
    %756 = arith.addf %753, %755 : vector<16x32xf32>
    %757 = vector.shape_cast %756 : vector<16x32xf32> to vector<2x8x32xf32>
    %758 = vector.extract_strided_slice %573 {offsets = [1, 0], sizes = [1, 32], strides = [1, 1]} : vector<3x32xf32> to vector<1x32xf32>
    %759 = vector.extract_strided_slice %575 {offsets = [1, 0], sizes = [1, 32], strides = [1, 1]} : vector<3x32xf32> to vector<1x32xf32>
    %760 = arith.addf %679, %757 : vector<2x8x32xf32>
    %761 = vector.shape_cast %760 : vector<2x8x32xf32> to vector<16x32xf32>
    %cst_214 = arith.constant dense<0.000000e+00> : vector<16xf32>
    %762 = vector.multi_reduction <add>, %761, %cst_214 [1] : vector<16x32xf32> to vector<16xf32>
    %763 = vector.shape_cast %762 : vector<16xf32> to vector<16x1xf32>
    %cst_215 = arith.constant 3.200000e+01 : f32
    %764 = vector.broadcast %cst_215 : f32 to vector<16x1xf32>
    %765 = arith.divf %763, %764 : vector<16x1xf32>
    %766 = vector.broadcast %765 : vector<16x1xf32> to vector<16x32xf32>
    %767 = arith.subf %761, %766 : vector<16x32xf32>
    %768 = arith.mulf %767, %767 : vector<16x32xf32>
    %cst_216 = arith.constant dense<0.000000e+00> : vector<16xf32>
    %769 = vector.multi_reduction <add>, %768, %cst_216 [1] : vector<16x32xf32> to vector<16xf32>
    %770 = vector.shape_cast %769 : vector<16xf32> to vector<16x1xf32>
    %cst_217 = arith.constant 0.0322580636 : f32
    %771 = vector.broadcast %cst_217 : f32 to vector<16x1xf32>
    %772 = arith.mulf %770, %771 : vector<16x1xf32>
    %773 = math.sqrt %772 : vector<16x1xf32>
    %cst_218 = arith.constant 9.99999997E-7 : f32
    %774 = vector.broadcast %cst_218 : f32 to vector<16x1xf32>
    %775 = arith.addf %773, %774 : vector<16x1xf32>
    %776 = tpu.reciprocal %775 {approx = true} : vector<16x1xf32> -> vector<16x1xf32>
    %777 = vector.broadcast %776 : vector<16x1xf32> to vector<16x32xf32>
    %778 = arith.mulf %767, %777 : vector<16x32xf32>
    %779 = vector.broadcast %758 : vector<1x32xf32> to vector<16x32xf32>
    %780 = arith.mulf %779, %778 : vector<16x32xf32>
    %781 = vector.broadcast %759 : vector<1x32xf32> to vector<16x32xf32>
    %782 = arith.addf %780, %781 : vector<16x32xf32>
    %783 = vector.shape_cast %782 : vector<16x32xf32> to vector<2x8x32xf32>
    %c1_219 = arith.constant 1 : index
    %c0_220 = arith.constant 0 : index
    %c0_221 = arith.constant 0 : index
    %784 = vector.load %arg17[%c1_219, %c0_220, %c0_221] : memref<2x32x128xbf16, #tpu.memory_space<vmem>>, vector<1x32x128xbf16>
    %785 = vector.shape_cast %784 : vector<1x32x128xbf16> to vector<32x128xbf16>
    %c1_222 = arith.constant 1 : index
    %c0_223 = arith.constant 0 : index
    %c0_224 = arith.constant 0 : index
    %786 = vector.load %arg18[%c1_222, %c0_223, %c0_224] : memref<2x1x128xf32, #tpu.memory_space<vmem>>, vector<1x1x128xf32>
    %787 = vector.shape_cast %786 : vector<1x1x128xf32> to vector<1x128xf32>
    %c1_225 = arith.constant 1 : index
    %c0_226 = arith.constant 0 : index
    %c0_227 = arith.constant 0 : index
    %788 = vector.load %arg19[%c1_225, %c0_226, %c0_227] : memref<2x128x32xbf16, #tpu.memory_space<vmem>>, vector<1x128x32xbf16>
    %789 = vector.shape_cast %788 : vector<1x128x32xbf16> to vector<128x32xbf16>
    %c1_228 = arith.constant 1 : index
    %c0_229 = arith.constant 0 : index
    %c0_230 = arith.constant 0 : index
    %790 = vector.load %arg20[%c1_228, %c0_229, %c0_230] : memref<2x1x32xf32, #tpu.memory_space<vmem>>, vector<1x1x32xf32>
    %791 = vector.shape_cast %790 : vector<1x1x32xf32> to vector<1x32xf32>
    %792 = vector.shape_cast %783 : vector<2x8x32xf32> to vector<16x32xf32>
    %793 = arith.truncf %792 : vector<16x32xf32> to vector<16x32xbf16>
    %cst_231 = arith.constant dense<0.000000e+00> : vector<16x128xf32>
    %794 = tpu.matmul %793, %785, %cst_231 {dimension_numbers = #tpu.dot_dimension_numbers<[1], [0], [0], [1], [0, 0, 1, 1], [], []>} : vector<16x32xbf16>, vector<32x128xbf16>, vector<16x128xf32> -> vector<16x128xf32>
    %795 = vector.broadcast %787 : vector<1x128xf32> to vector<16x128xf32>
    %796 = arith.addf %794, %795 : vector<16x128xf32>
    %cst_232 = arith.constant 0.000000e+00 : f32
    %797 = vector.broadcast %cst_232 : f32 to vector<16x128xf32>
    %798 = arith.maximumf %796, %797 : vector<16x128xf32>
    %799 = arith.truncf %798 : vector<16x128xf32> to vector<16x128xbf16>
    %cst_233 = arith.constant dense<0.000000e+00> : vector<16x32xf32>
    %800 = tpu.matmul %799, %789, %cst_233 {dimension_numbers = #tpu.dot_dimension_numbers<[1], [0], [0], [1], [0, 0, 1, 1], [], []>} : vector<16x128xbf16>, vector<128x32xbf16>, vector<16x32xf32> -> vector<16x32xf32>
    %801 = vector.broadcast %791 : vector<1x32xf32> to vector<16x32xf32>
    %802 = arith.addf %800, %801 : vector<16x32xf32>
    %803 = vector.shape_cast %802 : vector<16x32xf32> to vector<2x8x32xf32>
    %804 = vector.extract_strided_slice %573 {offsets = [2, 0], sizes = [1, 32], strides = [1, 1]} : vector<3x32xf32> to vector<1x32xf32>
    %805 = vector.extract_strided_slice %575 {offsets = [2, 0], sizes = [1, 32], strides = [1, 1]} : vector<3x32xf32> to vector<1x32xf32>
    %806 = arith.addf %783, %803 : vector<2x8x32xf32>
    %807 = vector.shape_cast %806 : vector<2x8x32xf32> to vector<16x32xf32>
    %cst_234 = arith.constant dense<0.000000e+00> : vector<16xf32>
    %808 = vector.multi_reduction <add>, %807, %cst_234 [1] : vector<16x32xf32> to vector<16xf32>
    %809 = vector.shape_cast %808 : vector<16xf32> to vector<16x1xf32>
    %cst_235 = arith.constant 3.200000e+01 : f32
    %810 = vector.broadcast %cst_235 : f32 to vector<16x1xf32>
    %811 = arith.divf %809, %810 : vector<16x1xf32>
    %812 = vector.broadcast %811 : vector<16x1xf32> to vector<16x32xf32>
    %813 = arith.subf %807, %812 : vector<16x32xf32>
    %814 = arith.mulf %813, %813 : vector<16x32xf32>
    %cst_236 = arith.constant dense<0.000000e+00> : vector<16xf32>
    %815 = vector.multi_reduction <add>, %814, %cst_236 [1] : vector<16x32xf32> to vector<16xf32>
    %816 = vector.shape_cast %815 : vector<16xf32> to vector<16x1xf32>
    %cst_237 = arith.constant 0.0322580636 : f32
    %817 = vector.broadcast %cst_237 : f32 to vector<16x1xf32>
    %818 = arith.mulf %816, %817 : vector<16x1xf32>
    %819 = math.sqrt %818 : vector<16x1xf32>
    %cst_238 = arith.constant 9.99999997E-7 : f32
    %820 = vector.broadcast %cst_238 : f32 to vector<16x1xf32>
    %821 = arith.addf %819, %820 : vector<16x1xf32>
    %822 = tpu.reciprocal %821 {approx = true} : vector<16x1xf32> -> vector<16x1xf32>
    %823 = vector.broadcast %822 : vector<16x1xf32> to vector<16x32xf32>
    %824 = arith.mulf %813, %823 : vector<16x32xf32>
    %825 = vector.broadcast %804 : vector<1x32xf32> to vector<16x32xf32>
    %826 = arith.mulf %825, %824 : vector<16x32xf32>
    %827 = vector.broadcast %805 : vector<1x32xf32> to vector<16x32xf32>
    %828 = arith.addf %826, %827 : vector<16x32xf32>
    %829 = vector.shape_cast %828 : vector<16x32xf32> to vector<2x8x32xf32>
    %c0_239 = arith.constant 0 : index
    %c0_240 = arith.constant 0 : index
    %c0_241 = arith.constant 0 : index
    %830 = vector.load %arg23[%c0_239, %c0_240, %c0_241] : memref<2x8x32xf32, #tpu.memory_space<vmem>>, vector<2x8x32xf32>
    tpu.vector_store %arg23[%c0_239, %c0_240, %c0_241], %313 {strides = array<i32>} : memref<2x8x32xf32, #tpu.memory_space<vmem>>, vector<2x8x32xf32>,
    %c0_242 = arith.constant 0 : index
    %c0_243 = arith.constant 0 : index
    %c0_244 = arith.constant 0 : index
    %831 = vector.load %arg24[%c0_242, %c0_243, %c0_244] : memref<2x8x32xf32, #tpu.memory_space<vmem>>, vector<2x8x32xf32>
    tpu.vector_store %arg24[%c0_242, %c0_243, %c0_244], %829 {strides = array<i32>} : memref<2x8x32xf32, #tpu.memory_space<vmem>>, vector<2x8x32xf32>,
    return
  }
  func.func @transform_0(%arg0: i32) -> (i32, i32, i32) {
    %c0_i32 = arith.constant 0 : i32
    %c0_i32_0 = arith.constant 0 : i32
    %c0_i32_1 = arith.constant 0 : i32
    return %arg0, %c0_i32, %c0_i32_0 : i32, i32, i32
  }
  func.func @transform_1(%arg0: i32) -> (i32, i32, i32) {
    %c0_i32 = arith.constant 0 : i32
    %c0_i32_0 = arith.constant 0 : i32
    %c0_i32_1 = arith.constant 0 : i32
    return %arg0, %c0_i32, %c0_i32_0 : i32, i32, i32
  }
  func.func @transform_2(%arg0: i32) -> (i32, i32, i32) {
    %c0_i32 = arith.constant 0 : i32
    %c0_i32_0 = arith.constant 0 : i32
    %c0_i32_1 = arith.constant 0 : i32
    return %arg0, %c0_i32, %c0_i32_0 : i32, i32, i32
  }
  func.func @transform_3(%arg0: i32) -> (i32, i32, i32) {
    %c0_i32 = arith.constant 0 : i32
    %c0_i32_0 = arith.constant 0 : i32
    %c0_i32_1 = arith.constant 0 : i32
    return %arg0, %c0_i32, %c0_i32_0 : i32, i32, i32
  }
  func.func @transform_4(%arg0: i32) -> (i32, i32, i32, i32) {
    %c0_i32 = arith.constant 0 : i32
    %c0_i32_0 = arith.constant 0 : i32
    %c0_i32_1 = arith.constant 0 : i32
    %c0_i32_2 = arith.constant 0 : i32
    %c0_i32_3 = arith.constant 0 : i32
    return %c0_i32, %c0_i32_0, %c0_i32_1, %c0_i32_2 : i32, i32, i32, i32
  }
  func.func @transform_5(%arg0: i32) -> (i32, i32, i32) {
    %c0_i32 = arith.constant 0 : i32
    %c0_i32_0 = arith.constant 0 : i32
    %c0_i32_1 = arith.constant 0 : i32
    %c0_i32_2 = arith.constant 0 : i32
    return %c0_i32, %c0_i32_0, %c0_i32_1 : i32, i32, i32
  }
  func.func @transform_6(%arg0: i32) -> (i32, i32, i32) {
    %c0_i32 = arith.constant 0 : i32
    %c0_i32_0 = arith.constant 0 : i32
    %c0_i32_1 = arith.constant 0 : i32
    %c0_i32_2 = arith.constant 0 : i32
    return %c0_i32, %c0_i32_0, %c0_i32_1 : i32, i32, i32
  }
  func.func @transform_7(%arg0: i32) -> (i32, i32, i32) {
    %c0_i32 = arith.constant 0 : i32
    %c0_i32_0 = arith.constant 0 : i32
    %c0_i32_1 = arith.constant 0 : i32
    %c0_i32_2 = arith.constant 0 : i32
    return %c0_i32, %c0_i32_0, %c0_i32_1 : i32, i32, i32
  }
  func.func @transform_8(%arg0: i32) -> (i32, i32, i32) {
    %c0_i32 = arith.constant 0 : i32
    %c0_i32_0 = arith.constant 0 : i32
    %c0_i32_1 = arith.constant 0 : i32
    %c0_i32_2 = arith.constant 0 : i32
    return %c0_i32, %c0_i32_0, %c0_i32_1 : i32, i32, i32
  }
  func.func @transform_9(%arg0: i32) -> (i32, i32, i32) {
    %c0_i32 = arith.constant 0 : i32
    %c0_i32_0 = arith.constant 0 : i32
    %c0_i32_1 = arith.constant 0 : i32
    %c0_i32_2 = arith.constant 0 : i32
    return %c0_i32, %c0_i32_0, %c0_i32_1 : i32, i32, i32
  }
  func.func @transform_10(%arg0: i32) -> (i32, i32, i32) {
    %c0_i32 = arith.constant 0 : i32
    %c0_i32_0 = arith.constant 0 : i32
    %c0_i32_1 = arith.constant 0 : i32
    %c0_i32_2 = arith.constant 0 : i32
    return %c0_i32, %c0_i32_0, %c0_i32_1 : i32, i32, i32
  }
  func.func @transform_11(%arg0: i32) -> (i32, i32, i32) {
    %c0_i32 = arith.constant 0 : i32
    %c0_i32_0 = arith.constant 0 : i32
    %c0_i32_1 = arith.constant 0 : i32
    %c0_i32_2 = arith.constant 0 : i32
    return %c0_i32, %c0_i32_0, %c0_i32_1 : i32, i32, i32
  }
  func.func @transform_12(%arg0: i32) -> (i32, i32, i32, i32) {
    %c0_i32 = arith.constant 0 : i32
    %c0_i32_0 = arith.constant 0 : i32
    %c0_i32_1 = arith.constant 0 : i32
    %c0_i32_2 = arith.constant 0 : i32
    %c0_i32_3 = arith.constant 0 : i32
    return %c0_i32, %c0_i32_0, %c0_i32_1, %c0_i32_2 : i32, i32, i32, i32
  }
  func.func @transform_13(%arg0: i32) -> (i32, i32, i32) {
    %c0_i32 = arith.constant 0 : i32
    %c0_i32_0 = arith.constant 0 : i32
    %c0_i32_1 = arith.constant 0 : i32
    %c0_i32_2 = arith.constant 0 : i32
    return %c0_i32, %c0_i32_0, %c0_i32_1 : i32, i32, i32
  }
  func.func @transform_14(%arg0: i32) -> (i32, i32, i32, i32) {
    %c0_i32 = arith.constant 0 : i32
    %c0_i32_0 = arith.constant 0 : i32
    %c0_i32_1 = arith.constant 0 : i32
    %c0_i32_2 = arith.constant 0 : i32
    %c0_i32_3 = arith.constant 0 : i32
    return %c0_i32, %c0_i32_0, %c0_i32_1, %c0_i32_2 : i32, i32, i32, i32
  }
  func.func @transform_15(%arg0: i32) -> (i32, i32, i32) {
    %c0_i32 = arith.constant 0 : i32
    %c0_i32_0 = arith.constant 0 : i32
    %c0_i32_1 = arith.constant 0 : i32
    %c0_i32_2 = arith.constant 0 : i32
    return %c0_i32, %c0_i32_0, %c0_i32_1 : i32, i32, i32
  }
  func.func @transform_16(%arg0: i32) -> (i32, i32, i32) {
    %c0_i32 = arith.constant 0 : i32
    %c0_i32_0 = arith.constant 0 : i32
    %c0_i32_1 = arith.constant 0 : i32
    %c0_i32_2 = arith.constant 0 : i32
    return %c0_i32, %c0_i32_0, %c0_i32_1 : i32, i32, i32
  }
  func.func @transform_17(%arg0: i32) -> (i32, i32, i32) {
    %c0_i32 = arith.constant 0 : i32
    %c0_i32_0 = arith.constant 0 : i32
    %c0_i32_1 = arith.constant 0 : i32
    %c0_i32_2 = arith.constant 0 : i32
    return %c0_i32, %c0_i32_0, %c0_i32_1 : i32, i32, i32
  }
  func.func @transform_18(%arg0: i32) -> (i32, i32, i32) {
    %c0_i32 = arith.constant 0 : i32
    %c0_i32_0 = arith.constant 0 : i32
    %c0_i32_1 = arith.constant 0 : i32
    %c0_i32_2 = arith.constant 0 : i32
    return %c0_i32, %c0_i32_0, %c0_i32_1 : i32, i32, i32
  }
  func.func @transform_19(%arg0: i32) -> (i32, i32, i32) {
    %c0_i32 = arith.constant 0 : i32
    %c0_i32_0 = arith.constant 0 : i32
    %c0_i32_1 = arith.constant 0 : i32
    %c0_i32_2 = arith.constant 0 : i32
    return %c0_i32, %c0_i32_0, %c0_i32_1 : i32, i32, i32
  }
  func.func @transform_20(%arg0: i32) -> (i32, i32, i32) {
    %c0_i32 = arith.constant 0 : i32
    %c0_i32_0 = arith.constant 0 : i32
    %c0_i32_1 = arith.constant 0 : i32
    %c0_i32_2 = arith.constant 0 : i32
    return %c0_i32, %c0_i32_0, %c0_i32_1 : i32, i32, i32
  }
  func.func @transform_21(%arg0: i32) -> (i32, i32, i32) {
    %c0_i32 = arith.constant 0 : i32
    %c0_i32_0 = arith.constant 0 : i32
    %c0_i32_1 = arith.constant 0 : i32
    %c0_i32_2 = arith.constant 0 : i32
    return %c0_i32, %c0_i32_0, %c0_i32_1 : i32, i32, i32
  }
  func.func @transform_22(%arg0: i32) -> (i32, i32, i32) {
    %c0_i32 = arith.constant 0 : i32
    %c0_i32_0 = arith.constant 0 : i32
    %c0_i32_1 = arith.constant 0 : i32
    return %arg0, %c0_i32, %c0_i32_0 : i32, i32, i32
  }
  func.func @transform_23(%arg0: i32) -> (i32, i32, i32) {
    %c0_i32 = arith.constant 0 : i32
    %c0_i32_0 = arith.constant 0 : i32
    %c0_i32_1 = arith.constant 0 : i32
    return %arg0, %c0_i32, %c0_i32_0 : i32, i32, i32
  }
}

</mosaic_0001>

<bundles_post_ra>
// kernel: node_embedding_forward.1
= control target key start
LH: loop header
LB: loop body
LE: loop exit
PB: predicated region body
PF: predicated region fallthrough
CT: control target
= control target key end

     0   :  { %s7947_s0 = inlined_call_operand.vmem [shape: f32[2,8,32], index: 0, kind: input, shape index: {}]   ;;  %s7948_s1 = inlined_call_operand.vmem [shape: f32[2,8,32], index: 1, kind: input, shape index: {}]   ;;  %s7949_s2 = inlined_call_operand.vmem [shape: f32[2,1,8], index: 2, kind: input, shape index: {}]   ;;  %s7950_s3 = inlined_call_operand.vmem [shape: f32[2,1,8], index: 3, kind: input, shape index: {}]   ;;  %s7951_s4 = inlined_call_operand.vmem [shape: bf16[2,4,32,32], index: 4, kind: input, shape index: {}]   ;;  %s7952_s5 = inlined_call_operand.vmem [shape: f32[2,4,32], index: 5, kind: input, shape index: {}]   ;;  %s7953_s6 = inlined_call_operand.vmem [shape: bf16[2,32,128], index: 6, kind: input, shape index: {}]   ;;  %s7954_s7 = inlined_call_operand.vmem [shape: f32[2,1,128], index: 7, kind: input, shape index: {}]   ;;  %s7955_s8 = inlined_call_operand.vmem [shape: bf16[2,128,32], index: 8, kind: input, shape index: {}]   ;;  %s7956_s9 = inlined_call_operand.vmem [shape: f32[2,1,32], index: 9, kind: input, shape index: {}]   ;;  %s7957_s10 = inlined_call_operand.vmem [shape: f32[2,2,32], index: 10, kind: input, shape index: {}]   ;;  %s7958_s11 = inlined_call_operand.vmem [shape: f32[2,2,32], index: 11, kind: input, shape index: {}]   ;;  %s7959_s12 = inlined_call_operand.vmem [shape: bf16[2,4,32,32], index: 12, kind: input, shape index: {}]   ;;  %s7960_s13 = inlined_call_operand.vmem [shape: f32[2,4,32], index: 13, kind: input, shape index: {}]   ;;  %s7961_s14 = inlined_call_operand.vmem [shape: bf16[2,4,32,32], index: 14, kind: input, shape index: {}]   ;;  %s7962_s15 = inlined_call_operand.vmem [shape: f32[2,4,32], index: 15, kind: input, shape index: {}]   ;;  %s7963_s16 = inlined_call_operand.vmem [shape: bf16[2,32,128], index: 16, kind: input, shape index: {}]   ;;  %s7964_s17 = inlined_call_operand.vmem [shape: f32[2,1,128], index: 17, kind: input, shape index: {}]   ;;  %s7965_s18 = inlined_call_operand.vmem [shape: bf16[2,128,32], index: 18, kind: input, shape index: {}]   ;;  %s7966_s19 = inlined_call_operand.vmem [shape: f32[2,1,32], index: 19, kind: input, shape index: {}]   ;;  %s7967_s20 = inlined_call_operand.vmem [shape: f32[2,3,32], index: 20, kind: input, shape index: {}]   ;;  %s7968_s21 = inlined_call_operand.vmem [shape: f32[2,3,32], index: 21, kind: input, shape index: {}]   ;;  %s7969_s22 = inlined_call_operand.hbm [shape: f32[2,8,32], index: 22, kind: output, shape index: {0}]   ;;  %s7970_s23 = inlined_call_operand.hbm [shape: f32[2,8,32], index: 23, kind: output, shape index: {1}]  }
   0x1   :  { %7994 = sst [smem:[#allocation8_spill]] %s7947_s0 }
   0x2   :  { %7995 = sst [smem:[#allocation9_spill]] %s7948_s1 }
   0x3   :  { %7996 = sst [smem:[#allocation10_spill]] %s7949_s2 }
   0x4   :  { %7997 = sst [smem:[#allocation11_spill]] %s7950_s3 }
   0x5   :  { %7998 = sst [smem:[#allocation12_spill]] %s7951_s4 }
   0x6   :  { %7999 = sst [smem:[#allocation13_spill]] %s7952_s5 }
   0x7   :  { %8000 = sst [smem:[#allocation14_spill]] %s7953_s6 }
   0x8   :  { %8001 = sst [smem:[#allocation15_spill]] %s7954_s7 }
   0x9   :  { %8002 = sst [smem:[#allocation16_spill]] %s7964_s17 }
   0xa   :  { %8003 = sst [smem:[#allocation17_spill]] %s7965_s18 }
   0xb   :  { %8004 = sst [smem:[#allocation18_spill]] %s7966_s19 }
   0xc   :  { %8005 = sst [smem:[#allocation19_spill]] %s7969_s22 }
   0xd   :  { %8006 = sst [smem:[#allocation20_spill]] %s7970_s23 }
   0xe   :  { %29 = vsyncpa [#allocation3], 0  ;;  %s8007_s24 = sld [smem:[#allocation12_spill]]  ;;  %vm117_vm0 = vcmask 261120  }
   0xf   :  { %s8008_s28 = sld [smem:[#allocation8_spill]] }
  0x14   :  { %v5804_v0 = vld [vmem:[%s8007_s24 + $0x8] sm:$0xff]  ;;  %v5806_v1 = vld [vmem:[%s8007_s24 + $0x18] sm:$0xff]  ;;  %v5803_v2 = vld [vmem:[%s8007_s24] sm:$0xff] }
  0x15   :  { %v5805_v3 = vld [vmem:[%s8007_s24 + $0x10] sm:$0xff]  ;;  %127 = vmatpush.bf16.msra.mxu0 %v5804_v0  ;;  %154 = vmatpush.bf16.msra.mxu1 %v5806_v1  ;;  %v6677_v4 = vld [vmem:[%s8008_s28] sm:$0xff]  ;;  %v6682_v5 = vld [vmem:[%s8008_s28 + $0x8] sm:$0xff] }
  0x16   :  { %v5808_v6 = vld [vmem:[%s8007_s24 + $0x28] sm:$0xff]  ;;  %v5807_v7 = vld [vmem:[%s8007_s24 + $0x20] sm:$0xff]  ;;  %v103_v8 = vpack.c.bf16 %v6682_v5, %v6677_v4 }
  0x17   :  { %181 = vmatpush.bf16.msra.mxu3 %v5808_v6 }
  0x19   :  { %128 = vmatpush.bf16.msra.mxu0 %v5803_v2  ;;  %155 = vmatpush.bf16.msra.mxu1 %v5805_v3 }
  0x1a   :  { %30 = vsyncpa [#allocation5], 0  ;;  %s8009_s26 = sld [smem:[#allocation13_spill]]  ;;  %vm273_vm1 = vcmask 64512   ;;  %s7989_s2 = smov 112   ;;  %vm547_vm2 = vcmask 1043456  }
  0x1b   :  { %182 = vmatpush.bf16.msra.mxu3 %v5807_v7  ;;  %s7987_s6 = smov 120   ;;  %s7985_s27 = smov 104   ;;  %vm723_vm3 = vcmask 130048   ;;  %vm726_vm4 = vcmask 195584  }
  0x1c   :  { %5236 = vmatmul.msk.bf16.vlgmr.msra.gmra.mxu0 %vm117_vm0, %v103_v8  ;;  %5245 = vmatmul.msk.bf16.vlgmr.msra.gmra.mxu1 %vm117_vm0, %v103_v8  ;;  %s8010_s29 = sld [smem:[#allocation10_spill]]  ;;  %s7983_s4 = smov 8  }
  0x1d   :  { %s7979_s30 = smov 16   ;;  %s7981_s25 = smov 24  }
  0x1e   :  { %5254 = vmatmul.msk.bf16.vlgmr.msra.gmra.mxu3 %vm117_vm0, %v103_v8  ;;  %s8011_s5 = sld [smem:[#allocation14_spill]]  ;;  %s8015_s1 = smov 104  }
  0x1f   :  { %s8012_s3 = sld [smem:[#allocation15_spill]] }
  0x20   :  { %v6698_v9 = vld [vmem:[%s8009_s26] sm:$0xf]  ;;  %s8019_s19 = sld [smem:[#allocation9_spill]] }
  0x21   :  { %v104_v10 = vperm.slane %v6698_v9, 0  ;;  %v135_v11 = vperm.slane %v6698_v9, 1  ;;  %v162_v39 = vperm.slane %v6698_v9, 2  ;;  %s8021_s18 = sld [smem:[#allocation17_spill]] }
  0x22   :  { %v6186_v0 = vld [vmem:[%s8010_s29] ss:$0 sm:$0xff]  ;;  %v6187_v6 = vld [vmem:[%s8010_s29 + $0x1] ss:$0 sm:$0xff]  ;;  %s8025_s23 = sld [smem:[#allocation20_spill]] }
  0x28   :  { %s5211_s7 = sshll.u32 %s8025_s23, 4  ;;  %s5212_s7 = int_to_ptr.hbm [resolvable:$true] %s5211_s7 }
  0x99   :  { %v130_v12 = vpop.f32.mrf.mxu0  ;;  %v157_v13 = vpop.f32.mrf.mxu1 }
  0x9a   :  { %v131_v14 = vadd.f32 %v130_v12, %v104_v10  ;;  %v158_v15 = vadd.f32 %v157_v13, %v135_v11 }
  0x9c   :  { %225 = vrot.lane.b32.xlu1 %v158_v15, %s7989_s2  ;;  %191 = vrot.lane.b32.xlu2 %v131_v14, %s7987_s6  ;;  %v237_v16 = vpack.c.bf16 %v158_v15, %v158_v15  ;;  %v209_v22 = vpack.c.bf16 %v131_v14, %v131_v14 }
  0x9e   :  { %v278_v17 = vsel %vm273_vm1, %v237_v16, 0 }
  0x9f   :  { %287 = vmatpush.bf16.xpose.msrb.mxu3 %v278_v17 }
  0xa1   :  { %v159_v18 = vpop.f32.mrf.mxu1  ;;  %v132_v20 = vpop.f32.mrf.mxu0 }
  0xa2   :  { %v160_v19 = vadd.f32 %v159_v18, %v135_v11  ;;  %v133_v24 = vadd.f32 %v132_v20, %v104_v10  ;;  %v184_v35 = vpop.f32.mrf.mxu3 }
  0xa3   :  { %v6720_v44 = vadd.f32 %v184_v35, %v162_v39 }
  0xa4   :  { %221 = vrot.lane.b32.xlu0 %v160_v19, %s7987_s6  ;;  %233 = vrot.lane.b32.xlu1 %v160_v19, %s7985_s27  ;;  %v5906_v21 = vpack.i.bf16 %v160_v19, %v131_v14  ;;  %v238_v23 = vpack.c.bf16 %v160_v19, %v160_v19  ;;  %v5901_v26 = vpack.i.bf16 %v158_v15, %v133_v24 }
  0xa5   :  { %v210_v27 = vpack.c.bf16 %v133_v24, %v133_v24  ;;  %v265_v51 = vpack.c.bf16 %v6720_v44, %v6720_v44 }
  0xa6   :  { %5907 = vrot.lane.b32.xlu2 %v5906_v21, %s7989_s2  ;;  %5255 = vmatmul.msk.bf16.vlgmr.msrb.gmra.mxu3 %vm273_vm1, %v209_v22  ;;  %v297_v25 = vsel %vm273_vm1, %v238_v23, 0 }
  0xa7   :  { %306 = vmatpush.bf16.xpose.msrb.mxu0 %v297_v25  ;;  %v549_v53 = vsel %vm547_vm2, %v265_v51, 0 }
  0xaa   :  { %v186_v41 = vpop.f32.mrf.mxu3 }
  0xab   :  { %v6722_v48 = vadd.f32 %v186_v41, %v162_v39 }
  0xac   :  { %231 = vrot.lane.b32.xlu1 %v158_v15, %s7985_s27  ;;  %5902 = vrot.lane.b32.xlu0 %v5901_v26, %s7987_s6 }
  0xad   :  { %v266_v52 = vpack.c.bf16 %v6722_v48, %v6722_v48 }
  0xae   :  { %5256 = vmatmul.msk.bf16.vlgmr.msrb.gmra.mxu0 %vm273_vm1, %v210_v27  ;;  %199 = vrot.lane.b32.xlu2 %v133_v24, %s7989_s2 }
  0xaf   :  { %v568_v54 = vsel %vm547_vm2, %v266_v52, 0 }
  0xb4   :  { %205 = vrot.lane.b32.xlu0 %v133_v24, %s7985_s27 }
  0xbc   :  { %203 = vrot.lane.b32.xlu0 %v131_v14, %s7985_s27 }
  0xf6   :  { %v192_v28 = vpop.permute.xlu2 %191 }
  0xf7   :  { %v211_v1 = vpack.c.bf16 %v192_v28, %v192_v28 }
 0x100   :  { %v5908_v29 = vpop.permute.xlu2 %5907 }
 0x101   :  { %v5910_v30 = vunpack.i.h.bf16 %v5908_v29  ;;  %v5909_v40 = vunpack.i.l.bf16 %v5908_v29 }
 0x103   :  { %v242_v31 = vpack.c.bf16 %v5910_v30, %v5910_v30  ;;  %v213_v45 = vpack.c.bf16 %v5909_v40, %v5909_v40 }
 0x105   :  { %v373_v32 = vsel %vm273_vm1, %v242_v31, 0 }
 0x106   :  { %382 = vmatpush.bf16.xpose.msra.mxu0 %v373_v32 }
 0x108   :  { %v200_v33 = vpop.permute.xlu2 %199 }
 0x109   :  { %v214_v34 = vpack.c.bf16 %v200_v33, %v200_v33 }
 0x10d   :  { %5260 = vmatmul.msk.bf16.vlgmr.msra.gmra.mxu0 %vm273_vm1, %v214_v34 }
 0x10e   :  { %v226_v36 = vpop.permute.xlu1 %225  ;;  %577 = vmatpush.bf16.msrb.mxu0 %v568_v54 }
 0x10f   :  { %v241_v37 = vpack.c.bf16 %v226_v36, %v226_v36 }
 0x111   :  { %v354_v38 = vsel %vm273_vm1, %v241_v37, 0 }
 0x112   :  { %363 = vmatpush.bf16.xpose.msra.mxu3 %v354_v38 }
 0x116   :  { %v222_v42 = vpop.permute.xlu0 %221  ;;  %v234_v43 = vpop.permute.xlu1 %233 }
 0x117   :  { %v244_v46 = vpack.c.bf16 %v234_v43, %v234_v43  ;;  %v240_v47 = vpack.c.bf16 %v222_v42, %v222_v42 }
 0x119   :  { %5259 = vmatmul.msk.bf16.vlgmr.msra.gmra.mxu3 %vm273_vm1, %v213_v45  ;;  %v335_v49 = vsel %vm273_vm1, %v240_v47, 0  ;;  %v411_v50 = vsel %vm273_vm1, %v244_v46, 0 }
 0x11a   :  { %344 = vmatpush.bf16.xpose.msra.mxu2 %v335_v49  ;;  %558 = vmatpush.bf16.msrb.mxu3 %v549_v53 }
 0x11e   :  { %v232_v55 = vpop.permute.xlu1 %231  ;;  %v5903_v56 = vpop.permute.xlu0 %5902 }
 0x11f   :  { %v5904_v57 = vunpack.i.l.bf16 %v5903_v56  ;;  %v5905_v58 = vunpack.i.h.bf16 %v5903_v56  ;;  %v243_v59 = vpack.c.bf16 %v232_v55, %v232_v55 }
 0x121   :  { %v212_v60 = vpack.c.bf16 %v5904_v57, %v5904_v57  ;;  %v239_v61 = vpack.c.bf16 %v5905_v58, %v5905_v58  ;;  %v392_v63 = vsel %vm273_vm1, %v243_v59, 0 }
 0x122   :  { %420 = vmatpush.bf16.xpose.msrb.mxu2 %v411_v50 }
 0x123   :  { %5258 = vmatmul.msk.bf16.vlgmr.msra.gmra.mxu2 %vm273_vm1, %v212_v60  ;;  %v316_v62 = vsel %vm273_vm1, %v239_v61, 0 }
 0x124   :  { %325 = vmatpush.bf16.xpose.msrb.mxu1 %v316_v62  ;;  %v5911_v62 = vpack.i.bf16 %v6720_v44, %v6722_v48 }
 0x126   :  { %v206_v8 = vpop.permute.xlu0 %205 }
 0x127   :  { %v216_v15 = vpack.c.bf16 %v206_v8, %v206_v8 }
 0x129   :  { %v289_v2 = vpop.f32.mrf.mxu3 }
 0x12a   :  { %v426_v3 = vmul.f32 0.35355338, %v289_v2 }
 0x12b   :  { %v308_v7 = vpop.f32.mrf.mxu0  ;;  %5257 = vmatmul.msk.bf16.vlgmr.msrb.gmra.mxu1 %vm273_vm1, %v211_v1 }
 0x12c   :  { %401 = vmatpush.bf16.xpose.msra.mxu1 %v392_v63  ;;  %v427_v10 = vmul.f32 0.35355338, %v308_v7  ;;  %v440_v11 = vadd.f32 %v6186_v0, %v426_v3 }
 0x12e   :  { %v448_v12 = vsel %vm273_vm1, %v440_v11, -inf  ;;  %v441_v13 = vadd.f32 %v6187_v6, %v427_v10  ;;  %v204_v18 = vpop.permute.xlu0 %203 }
 0x12f   :  { %449 = vmax.xlane.f32.xlu1 %v448_v12  ;;  %v215_v19 = vpack.c.bf16 %v204_v18, %v204_v18 }
 0x130   :  { %v451_v14 = vsel %vm273_vm1, %v441_v13, -inf }
 0x131   :  { %452 = vmax.xlane.f32.xlu0 %v451_v14  ;;  %v291_v16 = vpop.f32.mrf.mxu3 }
 0x133   :  { %v310_v17 = vpop.f32.mrf.mxu0  ;;  %5262 = vmatmul.msk.bf16.vlgmr.msrb.gmra.mxu2 %vm273_vm1, %v216_v15 }
 0x13b   :  { %5261 = vmatmul.msk.bf16.vlgmr.msra.gmra.mxu1 %vm273_vm1, %v215_v19 }
 0x18a   :  { %v384_v20 = vpop.f32.mrf.mxu0 }
 0x18b   :  { %v431_v21 = vmul.f32 0.35355338, %v384_v20 }
 0x18d   :  { %v6747_v22 = vadd.f32 %v6187_v6, %v431_v21 }
 0x18f   :  { %v463_v23 = vsel %vm273_vm1, %v6747_v22, -inf }
 0x190   :  { %464 = vmax.xlane.f32.xlu0 %v463_v23 }
 0x192   :  { %v386_v24 = vpop.f32.mrf.mxu0 }
 0x193   :  { %v5916_v24 = vpack.i.bf16 %v6722_v48, %v6720_v44 }
 0x19c   :  { %v365_v25 = vpop.f32.mrf.mxu3 }
 0x19d   :  { %v430_v26 = vmul.f32 0.35355338, %v365_v25 }
 0x19f   :  { %v444_v27 = vadd.f32 %v6186_v0, %v430_v26 }
 0x1a1   :  { %v460_v28 = vsel %vm273_vm1, %v444_v27, -inf }
 0x1a2   :  { %461 = vmax.xlane.f32.xlu1 %v460_v28  ;;  %v450_v37 = vpop.xlane.xlu1 %449 }
 0x1a3   :  { %v472_v41 = vsub.f32 %v440_v11, %v450_v37 }
 0x1a4   :  { %v367_v29 = vpop.f32.mrf.mxu3  ;;  %v453_v40 = vpop.xlane.xlu0 %452 }
 0x1a5   :  { %v473_v43 = vsub.f32 %v441_v13, %v453_v40  ;;  %v480_v45 = vmul.f32 1.442695, %v472_v41 }
 0x1a6   :  { %v346_v30 = vpop.f32.mrf.mxu2 }
 0x1a7   :  { %v429_v31 = vmul.f32 0.35355338, %v346_v30  ;;  %v482_v49 = vmul.f32 1.442695, %v473_v43  ;;  %6198 = vpow2.f32 %v480_v45 }
 0x1a8   :  { %v327_v32 = vpop.f32.mrf.mxu1 }
 0x1a9   :  { %v443_v33 = vadd.f32 %v6187_v6, %v429_v31  ;;  %v428_v34 = vmul.f32 0.35355338, %v327_v32  ;;  %6200 = vpow2.f32 %v482_v49 }
 0x1ab   :  { %v457_v35 = vsel %vm273_vm1, %v443_v33, -inf  ;;  %v442_v38 = vadd.f32 %v6186_v0, %v428_v34 }
 0x1ac   :  { %458 = vmax.xlane.f32.xlu2 %v457_v35 }
 0x1ad   :  { %v454_v42 = vsel %vm273_vm1, %v442_v38, -inf  ;;  %v6199_v57 = vpop.eup %6198 }
 0x1ae   :  { %v348_v36 = vpop.f32.mrf.mxu2  ;;  %v496_v60 = vsel %vm273_vm1, %v6199_v57, 0.0 }
 0x1af   :  { %v6201_v59 = vpop.eup %6200 }
 0x1b0   :  { %v329_v39 = vpop.f32.mrf.mxu1  ;;  %v499_v61 = vsel %vm273_vm1, %v6201_v59, 0.0 }
 0x1b4   :  { %455 = vmax.xlane.f32.xlu2 %v454_v42 }
 0x1b6   :  { %v422_v46 = vpop.f32.mrf.mxu2 }
 0x1b7   :  { %v433_v47 = vmul.f32 0.35355338, %v422_v46 }
 0x1b8   :  { %v403_v50 = vpop.f32.mrf.mxu1 }
 0x1b9   :  { %v432_v51 = vmul.f32 0.35355338, %v403_v50  ;;  %v447_v52 = vadd.f32 %v6187_v6, %v433_v47 }
 0x1bb   :  { %v469_v53 = vsel %vm273_vm1, %v447_v52, -inf  ;;  %v6755_v54 = vadd.f32 %v6186_v0, %v432_v51 }
 0x1bc   :  { %470 = vmax.xlane.f32.xlu2 %v469_v53 }
 0x1bd   :  { %v466_v55 = vsel %vm273_vm1, %v6755_v54, -inf }
 0x1be   :  { %v424_v56 = vpop.f32.mrf.mxu2  ;;  %467 = vmax.xlane.f32.xlu1 %v466_v55 }
 0x1c0   :  { %v405_v58 = vpop.f32.mrf.mxu1 }
 0x1c4   :  { %497 = vadd.xlane.f32.xlu2 %v496_v60 }
 0x1c6   :  { %500 = vadd.xlane.f32.xlu1 %v499_v61 }
 0x1dc   :  { %5912 = vrot.lane.b32.xlu2 %v5911_v62, %s7987_s6  ;;  %s8023_s6 = sld [smem:[#allocation18_spill]] }
 0x1e4   :  { %261 = vrot.lane.b32.xlu2 %v6722_v48, %s7985_s27 }
 0x1ec   :  { %259 = vrot.lane.b32.xlu2 %v6720_v44, %s7985_s27  ;;  %s8016_s27 = smov 8  }
 0x203   :  { %v465_v12 = vpop.xlane.xlu0 %464 }
 0x204   :  { %v477_v15 = vsub.f32 %v6747_v22, %v465_v12 }
 0x206   :  { %v490_v19 = vmul.f32 1.442695, %v477_v15 }
 0x215   :  { %v462_v63 = vpop.xlane.xlu1 %461 }
 0x216   :  { %v476_v0 = vsub.f32 %v444_v27, %v462_v63 }
 0x218   :  { %v488_v1 = vmul.f32 1.442695, %v476_v0 }
 0x21a   :  { %6202 = vpow2.f32 %v488_v1 }
 0x21f   :  { %v459_v2 = vpop.xlane.xlu2 %458 }
 0x220   :  { %v6768_v3 = vpop.eup %6202  ;;  %v475_v10 = vsub.f32 %v443_v33, %v459_v2 }
 0x221   :  { %v508_v6 = vsel %vm273_vm1, %v6768_v3, 0.0 }
 0x222   :  { %509 = vadd.xlane.f32.xlu1 %v508_v6  ;;  %v486_v13 = vmul.f32 1.442695, %v475_v10 }
 0x227   :  { %v456_v7 = vpop.xlane.xlu2 %455 }
 0x228   :  { %v474_v8 = vsub.f32 %v442_v38, %v456_v7 }
 0x22a   :  { %v484_v11 = vmul.f32 1.442695, %v474_v8 }
 0x22c   :  { %6204 = vpow2.f32 %v484_v11 }
 0x22d   :  { %6206 = vpow2.f32 %v486_v13 }
 0x22f   :  { %v471_v14 = vpop.xlane.xlu2 %470 }
 0x230   :  { %v479_v25 = vsub.f32 %v447_v52, %v471_v14 }
 0x231   :  { %v468_v16 = vpop.xlane.xlu1 %467 }
 0x232   :  { %v6773_v17 = vpop.eup %6204  ;;  %v494_v27 = vmul.f32 1.442695, %v479_v25  ;;  %v478_v44 = vsub.f32 %v6755_v54, %v468_v16 }
 0x233   :  { %v502_v18 = vsel %vm273_vm1, %v6773_v17, 0.0  ;;  %v6777_v21 = vpop.eup %6206 }
 0x234   :  { %503 = vadd.xlane.f32.xlu0 %v502_v18  ;;  %v505_v22 = vsel %vm273_vm1, %v6777_v21, 0.0  ;;  %v492_v41 = vmul.f32 1.442695, %v478_v44 }
 0x237   :  { %v498_v20 = vpop.xlane.xlu2 %497 }
 0x238   :  { %6208 = vrcp.f32 %v498_v20 }
 0x239   :  { %6210 = vpow2.f32 %v490_v19  ;;  %v501_v23 = vpop.xlane.xlu1 %500 }
 0x23a   :  { %6212 = vrcp.f32 %v501_v23 }
 0x23b   :  { %5917 = vrot.lane.b32.xlu1 %v5916_v24, %s7989_s2  ;;  %6214 = vpow2.f32 %v494_v27  ;;  %s8018_s2 = smov 16  }
 0x23c   :  { %506 = vadd.xlane.f32.xlu0 %v505_v22  ;;  %6216 = vpow2.f32 %v492_v41  ;;  %v5810_v41 = vld [vmem:[%s8007_s24 + $0x38] sm:$0xff] }
 0x23e   :  { %v6209_v26 = vpop.eup %6208 }
 0x23f   :  { %v6784_v28 = vpop.eup %6210  ;;  %v528_v29 = vmul.f32 %v6209_v26, %v6199_v57  ;;  %v5913_v30 = vpop.permute.xlu2 %5912 }
 0x240   :  { %v6213_v31 = vpop.eup %6212  ;;  %v5915_v32 = vunpack.i.h.bf16 %v5913_v30  ;;  %v5914_v33 = vunpack.i.l.bf16 %v5913_v30  ;;  %v511_v38 = vsel %vm273_vm1, %v6784_v28, 0.0 }
 0x241   :  { %v536_v34 = vpack.c.bf16 %v528_v29, %v528_v29  ;;  %v529_v35 = vmul.f32 %v6213_v31, %v6201_v59  ;;  %v6215_v43 = vpop.eup %6214 }
 0x242   :  { %v267_v48 = vpack.c.bf16 %v5915_v32, %v5915_v32  ;;  %v268_v36 = vpack.c.bf16 %v5914_v33, %v5914_v33  ;;  %v517_v47 = vsel %vm273_vm1, %v6215_v43, 0.0  ;;  %v6217_v50 = vpop.eup %6216 }
 0x243   :  { %v537_v37 = vpack.c.bf16 %v529_v35, %v529_v35  ;;  %5263 = vmatmul.msk.bf16.vlgmr.msrb.gmra.mxu3 %vm273_vm1, %v536_v34  ;;  %v514_v53 = vsel %vm273_vm1, %v6217_v50, 0.0 }
 0x244   :  { %512 = vadd.xlane.f32.xlu0 %v511_v38  ;;  %v587_v39 = vsel %vm547_vm2, %v267_v48, 0  ;;  %v606_v40 = vsel %vm547_vm2, %v268_v36, 0 }
 0x245   :  { %5264 = vmatmul.msk.bf16.vlgmr.msrb.gmra.mxu0 %vm273_vm1, %v537_v37  ;;  %596 = vmatpush.bf16.msrb.mxu1 %v587_v39 }
 0x246   :  { %615 = vmatpush.bf16.msra.mxu2 %v606_v40 }
 0x247   :  { %v262_v42 = vpop.permute.xlu2 %261 }
 0x248   :  { %v272_v45 = vpack.c.bf16 %v262_v42, %v262_v42  ;;  %v5809_v42 = vld [vmem:[%s8007_s24 + $0x30] sm:$0xff] }
 0x24a   :  { %v682_v46 = vsel %vm547_vm2, %v272_v45, 0 }
 0x24b   :  { %691 = vmatpush.bf16.msrb.mxu2 %v682_v46 }
 0x24c   :  { %518 = vadd.xlane.f32.xlu0 %v517_v47 }
 0x24f   :  { %v260_v49 = vpop.permute.xlu2 %259 }
 0x250   :  { %v271_v51 = vpack.c.bf16 %v260_v49, %v260_v49 }
 0x252   :  { %v663_v52 = vsel %vm547_vm2, %v271_v51, 0 }
 0x253   :  { %672 = vmatpush.bf16.msra.mxu1 %v663_v52 }
 0x254   :  { %515 = vadd.xlane.f32.xlu0 %v514_v53 }
 0x295   :  { %v510_v54 = vpop.xlane.xlu1 %509 }
 0x296   :  { %6218 = vrcp.f32 %v510_v54 }
 0x29c   :  { %v6219_v56 = vpop.eup %6218 }
 0x29d   :  { %v532_v63 = vmul.f32 %v6219_v56, %v6768_v3 }
 0x29f   :  { %v540_v8 = vpack.c.bf16 %v532_v63, %v532_v63 }
 0x2a7   :  { %v504_v55 = vpop.xlane.xlu0 %503 }
 0x2a8   :  { %6220 = vrcp.f32 %v504_v55 }
 0x2ad   :  { %v5918_v57 = vpop.permute.xlu1 %5917 }
 0x2ae   :  { %v6221_v58 = vpop.eup %6220  ;;  %v5920_v59 = vunpack.i.h.bf16 %v5918_v57  ;;  %v5919_v60 = vunpack.i.l.bf16 %v5918_v57 }
 0x2af   :  { %v530_v61 = vmul.f32 %v6221_v58, %v6773_v17  ;;  %v507_v62 = vpop.xlane.xlu0 %506 }
 0x2b0   :  { %v270_v0 = vpack.c.bf16 %v5920_v59, %v5920_v59  ;;  %v269_v1 = vpack.c.bf16 %v5919_v60, %v5919_v60  ;;  %6222 = vrcp.f32 %v507_v62 }
 0x2b1   :  { %v538_v2 = vpack.c.bf16 %v530_v61, %v530_v61  ;;  %v730_v61 = vperm.slane %v6698_v9, 3 }
 0x2b2   :  { %v625_v6 = vsel %vm547_vm2, %v269_v1, 0  ;;  %v644_v7 = vsel %vm547_vm2, %v270_v0, 0 }
 0x2b3   :  { %5265 = vmatmul.msk.bf16.vlgmr.msrb.gmra.mxu1 %vm273_vm1, %v538_v2  ;;  %634 = vmatpush.bf16.msra.mxu3 %v625_v6 }
 0x2b4   :  { %653 = vmatpush.bf16.msra.mxu0 %v644_v7 }
 0x2b6   :  { %v6223_v10 = vpop.eup %6222  ;;  %5267 = vmatmul.msk.bf16.vlgmr.msra.gmra.mxu3 %vm273_vm1, %v540_v8 }
 0x2b7   :  { %v531_v11 = vmul.f32 %v6223_v10, %v6777_v21  ;;  %v513_v12 = vpop.xlane.xlu0 %512  ;;  %752 = vmatpush.bf16.msrb.mxu3 %v5810_v41  ;;  %v6538_v10 = vmov 32.0  }
 0x2b8   :  { %6224 = vrcp.f32 %v513_v12 }
 0x2b9   :  { %v539_v3 = vpack.c.bf16 %v531_v11, %v531_v11 }
 0x2bb   :  { %5266 = vmatmul.msk.bf16.vlgmr.msra.gmra.mxu2 %vm273_vm1, %v539_v3  ;;  %753 = vmatpush.bf16.msrb.mxu3 %v5809_v42 }
 0x2be   :  { %v6225_v13 = vpop.eup %6224 }
 0x2bf   :  { %v533_v14 = vmul.f32 %v6225_v13, %v6784_v28  ;;  %v519_v15 = vpop.xlane.xlu0 %518 }
 0x2c0   :  { %6226 = vrcp.f32 %v519_v15 }
 0x2c1   :  { %v541_v16 = vpack.c.bf16 %v533_v14, %v533_v14 }
 0x2c2   :  { %v579_v17 = vpop.f32.mrf.mxu0 }
 0x2c3   :  { %5268 = vmatmul.msk.bf16.vlgmr.msra.gmra.mxu0 %vm273_vm1, %v541_v16 }
 0x2c6   :  { %v6227_v18 = vpop.eup %6226  ;;  %v560_v19 = vpop.f32.mrf.mxu3 }
 0x2c7   :  { %v535_v20 = vmul.f32 %v6227_v18, %v6215_v43  ;;  %v516_v23 = vpop.xlane.xlu0 %515 }
 0x2c8   :  { %6228 = vrcp.f32 %v516_v23 }
 0x2c9   :  { %v543_v21 = vpack.c.bf16 %v535_v20, %v535_v20  ;;  %6230 = vrcp.f32 %v6538_v10  ;;  %v5814_v10 = vld [vmem:[%s7955_s8 + $0x8] sm:$0xff] }
 0x2ca   :  { %v581_v24 = vpop.f32.mrf.mxu0 }
 0x2cb   :  { %5270 = vmatmul.msk.bf16.vlgmr.msrb.gmra.mxu2 %vm273_vm1, %v543_v21  ;;  %v5812_v24 = vld [vmem:[%s8011_s5 + $0x8] sm:$0xff] }
 0x2cc   :  { %872 = vmatpush.bf16.msrb.mxu0 %v5812_v24 }
 0x2ce   :  { %v6229_v25 = vpop.eup %6228  ;;  %v562_v22 = vpop.f32.mrf.mxu3 }
 0x2cf   :  { %v534_v26 = vmul.f32 %v6229_v25, %v6217_v50  ;;  %v6231_v11 = vpop.eup %6230  ;;  %v5811_v22 = vld [vmem:[%s8011_s5] sm:$0xff] }
 0x2d0   :  { %v769_v12 = vmul.f32 32.0, %v6231_v11  ;;  %vm773_vm5 = vweird.f32 %v6231_v11  ;;  %873 = vmatpush.bf16.msrb.mxu0 %v5811_v22 }
 0x2d1   :  { %v542_v27 = vpack.c.bf16 %v534_v26, %v534_v26 }
 0x2d2   :  { %v770_v3 = vsub.f32 1.0, %v769_v12 }
 0x2d3   :  { %5269 = vmatmul.msk.bf16.vlgmr.msra.gmra.mxu1 %vm273_vm1, %v542_v27 }
 0x2d4   :  { %v771_v9 = vmul.f32 %v6231_v11, %v770_v3  ;;  %v6188_v3 = vld [vmem:[%s8012_s3] ss:$0 sm:$0xff] }
 0x2d6   :  { %v772_v13 = vadd.f32 %v6231_v11, %v771_v9 }
 0x2d8   :  { %v6830_v14 = vsel %vm773_vm5, %v6231_v11, %v772_v13  ;;  %v5813_v11 = vld [vmem:[%s7955_s8] sm:$0xff] }
 0x330   :  { %v598_v28 = vpop.f32.mrf.mxu1 }
 0x338   :  { %v600_v29 = vpop.f32.mrf.mxu1 }
 0x339   :  { %v636_v30 = vpop.f32.mrf.mxu3 }
 0x33e   :  { %v617_v31 = vpop.f32.mrf.mxu2 }
 0x33f   :  { %v5921_v32 = vpack.i.bf16 %v617_v31, %v598_v28 }
 0x340   :  { %v655_v33 = vpop.f32.mrf.mxu0 }
 0x341   :  { %v5926_v34 = vpack.i.bf16 %v655_v33, %v636_v30  ;;  %5922 = vrot.lane.b32.xlu0 %v5921_v32, %s7983_s4  ;;  %v638_v35 = vpop.f32.mrf.mxu3  ;;  %s8017_s4 = smov 24  }
 0x342   :  { %v5820_v35 = vld [vmem:[%s7955_s8 + $0x38] sm:$0xff] }
 0x343   :  { %5927 = vrot.lane.b32.xlu1 %v5926_v34, %s7979_s30  ;;  %934 = vmatpush.bf16.msrb.mxu1 %v5820_v35 }
 0x346   :  { %v619_v44 = vpop.f32.mrf.mxu2 }
 0x348   :  { %v657_v48 = vpop.f32.mrf.mxu0 }
 0x34e   :  { %v693_v36 = vpop.f32.mrf.mxu2 }
 0x350   :  { %v674_v37 = vpop.f32.mrf.mxu1 }
 0x351   :  { %v5931_v38 = vpack.i.bf16 %v693_v36, %v674_v37  ;;  %v5819_v36 = vld [vmem:[%s7955_s8 + $0x30] sm:$0xff] }
 0x352   :  { %935 = vmatpush.bf16.msrb.mxu1 %v5819_v36  ;;  %v5826_v36 = vld [vmem:[%s8007_s24 + $0x68] sm:$0xff] }
 0x353   :  { %5932 = vrot.lane.b32.xlu2 %v5931_v38, %s7981_s25  ;;  %1106 = vmatpush.bf16.msra.mxu0 %v5826_v36  ;;  %s8014_s25 = smov 120  }
 0x356   :  { %v695_v39 = vpop.f32.mrf.mxu2 }
 0x358   :  { %v676_v40 = vpop.f32.mrf.mxu1 }
 0x3ad   :  { %v5933_v45 = vpop.permute.xlu2 %5932 }
 0x3ae   :  { %v5935_v54 = vunpack.i.h.bf16 %v5933_v45  ;;  %v5934_v55 = vunpack.i.l.bf16 %v5933_v45 }
 0x3b3   :  { %v5923_v43 = vpop.permute.xlu0 %5922 }
 0x3b4   :  { %v5925_v46 = vunpack.i.h.bf16 %v5923_v43  ;;  %v5924_v47 = vunpack.i.l.bf16 %v5923_v43  ;;  %v5818_v43 = vld [vmem:[%s7955_s8 + $0x28] sm:$0xff] }
 0x3b5   :  { %v5928_v49 = vpop.permute.xlu1 %5927  ;;  %936 = vmatpush.bf16.msrb.mxu1 %v5818_v43 }
 0x3b6   :  { %v721_v50 = vsel %vm273_vm1, %v560_v19, %v5924_v47  ;;  %v722_v51 = vsel %vm273_vm1, %v579_v17, %v5925_v46  ;;  %v5930_v52 = vunpack.i.h.bf16 %v5928_v49  ;;  %v5929_v53 = vunpack.i.l.bf16 %v5928_v49  ;;  %v5817_v49 = vld [vmem:[%s7955_s8 + $0x20] sm:$0xff] }
 0x3b8   :  { %v725_v56 = vsel %vm723_vm3, %v722_v51, %v5930_v52  ;;  %v724_v57 = vsel %vm723_vm3, %v721_v50, %v5929_v53 }
 0x3b9   :  { %v728_v58 = vsel %vm726_vm4, %v725_v56, %v5935_v54  ;;  %v727_v59 = vsel %vm726_vm4, %v724_v57, %v5934_v55  ;;  %937 = vmatpush.bf16.msrb.mxu1 %v5817_v49  ;;  %v6857_v56 = vld [vmem:[%s7957_s10] sm:$0x3] }
 0x3ba   :  { %v729_v60 = vpack.c.bf16 %v728_v58, %v727_v59  ;;  %v819_v58 = vperm.slane %v6857_v56, 0  ;;  %v6863_v59 = vld [vmem:[%s7958_s11] sm:$0x3] }
 0x3bc   :  { %5279 = vmatmul.msk.bf16.vlgmr.msrb.gmra.mxu3 %vm117_vm0, %v729_v60 }
 0x43f   :  { %v755_v62 = vpop.f32.mrf.mxu3 }
 0x440   :  { %v756_v63 = vadd.f32 %v755_v62, %v730_v61 }
 0x442   :  { %v760_v0 = vadd.f32 %v756_v63, %v6677_v4  ;;  %v822_v63 = vperm.slane %v6863_v59, 0 }
 0x444   :  { %v762_v1 = vsel %vm117_vm0, %v760_v0, 0.0 }
 0x445   :  { %763 = vadd.xlane.f32.xlu1 %v762_v1 }
 0x447   :  { %v757_v2 = vpop.f32.mrf.mxu3 }
 0x448   :  { %v758_v6 = vadd.f32 %v757_v2, %v730_v61 }
 0x44a   :  { %v761_v7 = vadd.f32 %v758_v6, %v6682_v5 }
 0x44c   :  { %v765_v8 = vsel %vm117_vm0, %v761_v7, 0.0 }
 0x44d   :  { %766 = vadd.xlane.f32.xlu2 %v765_v8  ;;  %v5815_v8 = vld [vmem:[%s7955_s8 + $0x10] sm:$0xff] }
 0x4b8   :  { %v764_v4 = vpop.xlane.xlu1 %763 }
 0x4b9   :  { %v775_v15 = vmul.f32 %v6830_v14, %v764_v4 }
 0x4bb   :  { %v777_v16 = vsub.f32 %v760_v0, %v775_v15 }
 0x4bd   :  { %v779_v17 = vmul.f32 %v777_v16, %v777_v16 }
 0x4bf   :  { %v781_v5 = vsel %vm117_vm0, %v779_v17, 0.0 }
 0x4c0   :  { %v767_v18 = vpop.xlane.xlu2 %766  ;;  %782 = vadd.xlane.f32.xlu0 %v781_v5  ;;  %v6189_v5 = vld [vmem:[%s7956_s9] ss:$0 sm:$0xff] }
 0x4c1   :  { %v776_v19 = vmul.f32 %v6830_v14, %v767_v18 }
 0x4c3   :  { %v778_v20 = vsub.f32 %v761_v7, %v776_v19  ;;  %v5816_v7 = vld [vmem:[%s7955_s8 + $0x18] sm:$0xff] }
 0x4c4   :  { %938 = vmatpush.bf16.msrb.mxu1 %v5816_v7 }
 0x4c5   :  { %v780_v23 = vmul.f32 %v778_v20, %v778_v20 }
 0x4c7   :  { %v784_v21 = vsel %vm117_vm0, %v780_v23, 0.0 }
 0x4c8   :  { %785 = vadd.xlane.f32.xlu1 %v784_v21  ;;  %939 = vmatpush.bf16.msrb.mxu1 %v5815_v8 }
 0x4cc   :  { %940 = vmatpush.bf16.msrb.mxu1 %v5814_v10 }
 0x4d0   :  { %941 = vmatpush.bf16.msrb.mxu1 %v5813_v11 }
 0x533   :  { %v783_v25 = vpop.xlane.xlu0 %782 }
 0x534   :  { %v787_v26 = vmul.f32 0.032258064, %v783_v25 }
 0x536   :  { %6232 = vrsqrt.f32 %v787_v26  ;;  %vm796_vm6 = vcmp.eq.f32.partialorder %v787_v26, inf  ;;  %v799_v39 = vand.u32 2147483648, %v787_v26  ;;  %vm798_vm7 = vcmp.eq.f32.partialorder %v787_v26, 0.0 }
 0x53b   :  { %v786_v27 = vpop.xlane.xlu1 %785 }
 0x53c   :  { %v6233_v28 = vpop.eup %6232  ;;  %v788_v29 = vmul.f32 0.032258064, %v786_v27 }
 0x53d   :  { %v790_v30 = vmul.f32 %v6233_v28, %v787_v26 }
 0x53e   :  { %6234 = vrsqrt.f32 %v788_v29  ;;  %vm808_vm8 = vcmp.eq.f32.partialorder %v788_v29, inf  ;;  %v811_v51 = vand.u32 2147483648, %v788_v29  ;;  %vm810_vm9 = vcmp.eq.f32.partialorder %v788_v29, 0.0 }
 0x53f   :  { %v791_v31 = vmul.f32 %v6233_v28, %v790_v30 }
 0x541   :  { %v792_v32 = vmul.f32 0.5, %v791_v31 }
 0x543   :  { %v793_v33 = vsub.f32 1.5, %v792_v32 }
 0x544   :  { %v6235_v34 = vpop.eup %6234 }
 0x545   :  { %v794_v44 = vmul.f32 %v6233_v28, %v793_v33  ;;  %v802_v48 = vmul.f32 %v6235_v34, %v788_v29 }
 0x547   :  { %v795_v37 = vmul.f32 %v794_v44, %v787_v26  ;;  %v803_v38 = vmul.f32 %v6235_v34, %v802_v48  ;;  %v5822_v44 = vld [vmem:[%s8007_s24 + $0x48] sm:$0xff]  ;;  %v5824_v48 = vld [vmem:[%s8007_s24 + $0x58] sm:$0xff] }
 0x548   :  { %1052 = vmatpush.bf16.msra.mxu2 %v5822_v44  ;;  %1079 = vmatpush.bf16.msra.mxu3 %v5824_v48 }
 0x549   :  { %v797_v40 = vsel %vm796_vm6, %v787_v26, %v795_v37  ;;  %v804_v41 = vmul.f32 0.5, %v803_v38  ;;  %v5821_v38 = vld [vmem:[%s8007_s24 + $0x40] sm:$0xff] }
 0x54a   :  { %v800_v42 = vsel %vm798_vm7, %v799_v39, %v797_v40  ;;  %v5823_v39 = vld [vmem:[%s8007_s24 + $0x50] sm:$0xff] }
 0x54b   :  { %v805_v45 = vsub.f32 1.5, %v804_v41  ;;  %v813_v46 = vadd.f32 1e-06, %v800_v42  ;;  %v5825_v41 = vld [vmem:[%s8007_s24 + $0x60] sm:$0xff] }
 0x54c   :  { %1053 = vmatpush.bf16.msra.mxu2 %v5821_v38  ;;  %1080 = vmatpush.bf16.msra.mxu3 %v5823_v39 }
 0x54d   :  { %v806_v47 = vmul.f32 %v6235_v34, %v805_v45  ;;  %6236 = vrcp.f32 %v813_v46  ;;  %1107 = vmatpush.bf16.msra.mxu0 %v5825_v41 }
 0x54f   :  { %v807_v50 = vmul.f32 %v806_v47, %v788_v29 }
 0x551   :  { %v809_v52 = vsel %vm808_vm8, %v788_v29, %v807_v50 }
 0x552   :  { %v812_v53 = vsel %vm810_vm9, %v811_v51, %v809_v52 }
 0x553   :  { %v814_v54 = vadd.f32 1e-06, %v812_v53  ;;  %v6237_v55 = vpop.eup %6236 }
 0x554   :  { %v817_v57 = vmul.f32 %v6237_v55, %v777_v16 }
 0x555   :  { %6238 = vrcp.f32 %v814_v54 }
 0x556   :  { %v820_v62 = vmul.f32 %v819_v58, %v817_v57 }
 0x558   :  { %v823_v1 = vadd.f32 %v822_v63, %v820_v62 }
 0x55b   :  { %v6239_v60 = vpop.eup %6238 }
 0x55c   :  { %v818_v61 = vmul.f32 %v6239_v60, %v778_v20 }
 0x55e   :  { %v821_v0 = vmul.f32 %v819_v58, %v818_v61 }
 0x560   :  { %v824_v2 = vadd.f32 %v822_v63, %v821_v0 }
 0x562   :  { %v847_v6 = vpack.c.bf16 %v824_v2, %v823_v1 }
 0x564   :  { %5288 = vmatmul.msk.bf16.vlgmr.msrb.gmra.mxu0 %vm117_vm0, %v847_v6 }
 0x5e1   :  { %v875_v12 = vpop.f32.mrf.mxu0 }
 0x5e2   :  { %v876_v9 = vadd.f32 %v6188_v3, %v875_v12  ;;  %v1000_v12 = vperm.slane %v6857_v56, 1 }
 0x5e4   :  { %v880_v15 = vmax.f32 %v876_v9, 0.0 }
 0x5e9   :  { %v877_v13 = vpop.f32.mrf.mxu0 }
 0x5ea   :  { %v878_v4 = vadd.f32 %v6188_v3, %v877_v13 }
 0x5ec   :  { %v881_v16 = vmax.f32 %v878_v4, 0.0  ;;  %v1003_v4 = vperm.slane %v6863_v59, 1 }
 0x5ee   :  { %v882_v17 = vpack.c.bf16 %v881_v16, %v880_v15 }
 0x5f0   :  { %942 = vmatmul.bf16.vlgmr.msrb.gmra.mxu1 %v882_v17 }
 0x66d   :  { %v943_v18 = vpop.f32.mrf.mxu1 }
 0x66e   :  { %v944_v19 = vadd.f32 %v6189_v5, %v943_v18  ;;  %v6923_v18 = vld [vmem:[%s8009_s26 + $0x4] sm:$0xf]  ;;  %s8013_s26 = smov 112  }
 0x66f   :  { %v1060_v59 = vperm.slane %v6923_v18, 1 }
 0x670   :  { %v948_v20 = vadd.f32 %v944_v19, %v823_v1  ;;  %v1087_v19 = vperm.slane %v6923_v18, 2 }
 0x672   :  { %v950_v23 = vsel %vm117_vm0, %v948_v20, 0.0 }
 0x673   :  { %951 = vadd.xlane.f32.xlu2 %v950_v23 }
 0x675   :  { %v945_v21 = vpop.f32.mrf.mxu1 }
 0x676   :  { %v946_v24 = vadd.f32 %v6189_v5, %v945_v21 }
 0x678   :  { %v949_v25 = vadd.f32 %v946_v24, %v824_v2 }
 0x67a   :  { %v953_v22 = vsel %vm117_vm0, %v949_v25, 0.0 }
 0x67b   :  { %954 = vadd.xlane.f32.xlu1 %v953_v22 }
 0x6e6   :  { %v952_v26 = vpop.xlane.xlu2 %951 }
 0x6e7   :  { %v956_v27 = vmul.f32 %v952_v26, %v6830_v14  ;;  %v1030_v26 = vperm.slane %v6923_v18, 0 }
 0x6e9   :  { %v958_v28 = vsub.f32 %v948_v20, %v956_v27 }
 0x6eb   :  { %v960_v29 = vmul.f32 %v958_v28, %v958_v28 }
 0x6ed   :  { %v962_v30 = vsel %vm117_vm0, %v960_v29, 0.0 }
 0x6ee   :  { %v955_v31 = vpop.xlane.xlu1 %954  ;;  %963 = vadd.xlane.f32.xlu0 %v962_v30 }
 0x6ef   :  { %v957_v32 = vmul.f32 %v955_v31, %v6830_v14 }
 0x6f1   :  { %v959_v33 = vsub.f32 %v949_v25, %v957_v32 }
 0x6f3   :  { %v961_v34 = vmul.f32 %v959_v33, %v959_v33 }
 0x6f5   :  { %v965_v35 = vsel %vm117_vm0, %v961_v34, 0.0 }
 0x6f6   :  { %966 = vadd.xlane.f32.xlu2 %v965_v35 }
 0x761   :  { %v964_v37 = vpop.xlane.xlu0 %963 }
 0x762   :  { %v968_v40 = vmul.f32 0.032258064, %v964_v37 }
 0x764   :  { %6240 = vrsqrt.f32 %v968_v40  ;;  %vm977_vm10 = vcmp.eq.f32.partialorder %v968_v40, inf  ;;  %v980_v57 = vand.u32 2147483648, %v968_v40  ;;  %vm979_vm11 = vcmp.eq.f32.partialorder %v968_v40, 0.0 }
 0x769   :  { %v967_v42 = vpop.xlane.xlu2 %966 }
 0x76a   :  { %v6241_v43 = vpop.eup %6240  ;;  %v969_v45 = vmul.f32 0.032258064, %v967_v42 }
 0x76b   :  { %v971_v46 = vmul.f32 %v6241_v43, %v968_v40 }
 0x76c   :  { %6242 = vrsqrt.f32 %v969_v45  ;;  %vm989_vm12 = vcmp.eq.f32.partialorder %v969_v45, inf  ;;  %v992_v2 = vand.u32 2147483648, %v969_v45  ;;  %vm991_vm13 = vcmp.eq.f32.partialorder %v969_v45, 0.0 }
 0x76d   :  { %v972_v47 = vmul.f32 %v6241_v43, %v971_v46 }
 0x76f   :  { %v973_v49 = vmul.f32 0.5, %v972_v47 }
 0x771   :  { %v974_v50 = vsub.f32 1.5, %v973_v49 }
 0x772   :  { %v6243_v51 = vpop.eup %6242 }
 0x773   :  { %v975_v52 = vmul.f32 %v6241_v43, %v974_v50  ;;  %v983_v53 = vmul.f32 %v6243_v51, %v969_v45 }
 0x775   :  { %v976_v54 = vmul.f32 %v975_v52, %v968_v40  ;;  %v984_v55 = vmul.f32 %v6243_v51, %v983_v53 }
 0x777   :  { %v978_v58 = vsel %vm977_vm10, %v968_v40, %v976_v54  ;;  %v985_v60 = vmul.f32 0.5, %v984_v55 }
 0x778   :  { %v981_v61 = vsel %vm979_vm11, %v980_v57, %v978_v58 }
 0x779   :  { %v986_v62 = vsub.f32 1.5, %v985_v60  ;;  %v994_v63 = vadd.f32 1e-06, %v981_v61 }
 0x77b   :  { %v987_v0 = vmul.f32 %v6243_v51, %v986_v62  ;;  %6244 = vrcp.f32 %v994_v63 }
 0x77d   :  { %v988_v1 = vmul.f32 %v987_v0, %v969_v45 }
 0x77f   :  { %v990_v6 = vsel %vm989_vm12, %v969_v45, %v988_v1 }
 0x780   :  { %v993_v7 = vsel %vm991_vm13, %v992_v2, %v990_v6 }
 0x781   :  { %v995_v8 = vadd.f32 1e-06, %v993_v7  ;;  %v6245_v10 = vpop.eup %6244 }
 0x782   :  { %v998_v11 = vmul.f32 %v6245_v10, %v958_v28 }
 0x783   :  { %6246 = vrcp.f32 %v995_v8 }
 0x784   :  { %v1001_v13 = vmul.f32 %v1000_v12, %v998_v11 }
 0x786   :  { %v6911_v16 = vadd.f32 %v1003_v4, %v1001_v13 }
 0x789   :  { %v6247_v3 = vpop.eup %6246 }
 0x78a   :  { %v999_v9 = vmul.f32 %v6247_v3, %v959_v33 }
 0x78c   :  { %v1002_v15 = vmul.f32 %v1000_v12, %v999_v9 }
 0x78e   :  { %v6913_v17 = vadd.f32 %v1003_v4, %v1002_v15 }
 0x790   :  { %v1029_v5 = vpack.c.bf16 %v6913_v17, %v6911_v16 }
 0x792   :  { %5348 = vmatmul.msk.bf16.vlgmr.msra.gmra.mxu2 %vm117_vm0, %v1029_v5  ;;  %5357 = vmatmul.msk.bf16.vlgmr.msra.gmra.mxu3 %vm117_vm0, %v1029_v5 }
 0x793   :  { %5366 = vmatmul.msk.bf16.vlgmr.msra.gmra.mxu0 %vm117_vm0, %v1029_v5 }
 0x810   :  { %v1109_v56 = vpop.f32.mrf.mxu0 }
 0x811   :  { %v1110_v22 = vadd.f32 %v1109_v56, %v1087_v19 }
 0x813   :  { %v1190_v46 = vpack.c.bf16 %v1110_v22, %v1110_v22 }
 0x815   :  { %v1055_v20 = vpop.f32.mrf.mxu2  ;;  %v1082_v23 = vpop.f32.mrf.mxu3  ;;  %v1466_v62 = vsel %vm547_vm2, %v1190_v46, 0 }
 0x816   :  { %v1083_v21 = vadd.f32 %v1082_v23, %v1060_v59  ;;  %v1056_v30 = vadd.f32 %v1055_v20, %v1030_v26 }
 0x818   :  { %v1111_v24 = vpop.f32.mrf.mxu0  ;;  %v1162_v25 = vpack.c.bf16 %v1083_v21, %v1083_v21  ;;  %v1134_v48 = vpack.c.bf16 %v1056_v30, %v1056_v30 }
 0x819   :  { %v1112_v27 = vadd.f32 %v1111_v24, %v1087_v19  ;;  %v6472_v19 = vld [vmem:[%s8010_s29] ss:$0 sm:$0xff] }
 0x81a   :  { %v1202_v28 = vsel %vm273_vm1, %v1162_v25, 0 }
 0x81b   :  { %1211 = vmatpush.bf16.xpose.msrb.mxu2 %v1202_v28  ;;  %v6929_v29 = vpack.i.bf16 %v1112_v27, %v1110_v22  ;;  %v1191_v47 = vpack.c.bf16 %v1112_v27, %v1112_v27 }
 0x81d   :  { %v1057_v31 = vpop.f32.mrf.mxu2  ;;  %v1084_v32 = vpop.f32.mrf.mxu3  ;;  %v1485_v63 = vsel %vm547_vm2, %v1191_v47, 0 }
 0x81e   :  { %v1058_v33 = vadd.f32 %v1057_v31, %v1030_v26  ;;  %v1085_v34 = vadd.f32 %v1084_v32, %v1060_v59 }
 0x820   :  { %v5941_v35 = vpack.i.bf16 %v1085_v34, %v1083_v21  ;;  %v5946_v44 = vpack.i.bf16 %v1058_v33, %v1056_v30  ;;  %v1163_v36 = vpack.c.bf16 %v1085_v34, %v1085_v34  ;;  %v1135_v38 = vpack.c.bf16 %v1058_v33, %v1058_v33  ;;  %v6473_v30 = vld [vmem:[%s8010_s29 + $0x1] ss:$0 sm:$0xff] }
 0x822   :  { %5942 = vrot.lane.b32.xlu0 %v5941_v35, %s8013_s26  ;;  %5937 = vrot.lane.b32.xlu1 %v5941_v35, %s8014_s25  ;;  %v1221_v37 = vsel %vm273_vm1, %v1163_v36, 0 }
 0x823   :  { %5947 = vrot.lane.b32.xlu2 %v5946_v44, %s8014_s25  ;;  %5367 = vmatmul.msk.bf16.vlgmr.msrb.gmra.mxu2 %vm273_vm1, %v1134_v48 }
 0x824   :  { %1230 = vmatpush.bf16.xpose.msrb.mxu3 %v1221_v37 }
 0x82a   :  { %5957 = vrot.lane.b32.xlu1 %v5941_v35, %s8015_s1  ;;  %5952 = vrot.lane.b32.xlu0 %v5946_v44, %s8013_s26 }
 0x82b   :  { %5368 = vmatmul.msk.bf16.vlgmr.msrb.gmra.mxu3 %vm273_vm1, %v1135_v38  ;;  %5962 = vrot.lane.b32.xlu2 %v5946_v44, %s8015_s1 }
 0x87d   :  { %v5948_v49 = vpop.permute.xlu2 %5947 }
 0x87e   :  { %v5950_v60 = vunpack.i.h.bf16 %v5948_v49  ;;  %v5949_v61 = vunpack.i.l.bf16 %v5948_v49 }
 0x880   :  { %v1137_v10 = vpack.c.bf16 %v5950_v60, %v5950_v60  ;;  %v1136_v11 = vpack.c.bf16 %v5949_v61, %v5949_v61 }
 0x885   :  { %v5963_v59 = vpop.permute.xlu2 %5962 }
 0x886   :  { %v5965_v23 = vunpack.i.h.bf16 %v5963_v59  ;;  %v5964_v21 = vunpack.i.l.bf16 %v5963_v59 }
 0x888   :  { %v1141_v26 = vpack.c.bf16 %v5965_v23, %v5965_v23  ;;  %v1140_v27 = vpack.c.bf16 %v5964_v21, %v5964_v21 }
 0x894   :  { %v5943_v39 = vpop.permute.xlu0 %5942  ;;  %v5938_v40 = vpop.permute.xlu1 %5937 }
 0x895   :  { %v5945_v41 = vunpack.i.h.bf16 %v5943_v39  ;;  %v5944_v42 = vunpack.i.l.bf16 %v5943_v39  ;;  %v5940_v43 = vunpack.i.h.bf16 %v5938_v40  ;;  %v5939_v45 = vunpack.i.l.bf16 %v5938_v40 }
 0x897   :  { %v1167_v50 = vpack.c.bf16 %v5945_v41, %v5945_v41  ;;  %v1166_v51 = vpack.c.bf16 %v5944_v42, %v5944_v42  ;;  %v1165_v52 = vpack.c.bf16 %v5940_v43, %v5940_v43  ;;  %v1164_v53 = vpack.c.bf16 %v5939_v45, %v5939_v45 }
 0x899   :  { %v1240_v54 = vsel %vm273_vm1, %v1164_v53, 0  ;;  %v1259_v55 = vsel %vm273_vm1, %v1165_v52, 0  ;;  %v1278_v57 = vsel %vm273_vm1, %v1166_v51, 0  ;;  %v1297_v58 = vsel %vm273_vm1, %v1167_v50, 0 }
 0x89a   :  { %1249 = vmatpush.bf16.xpose.msrb.mxu0 %v1240_v54  ;;  %1268 = vmatpush.bf16.xpose.msra.mxu1 %v1259_v55 }
 0x89b   :  { %1287 = vmatpush.bf16.xpose.msra.mxu2 %v1278_v57  ;;  %1306 = vmatpush.bf16.xpose.msra.mxu3 %v1297_v58 }
 0x89c   :  { %v5958_v0 = vpop.permute.xlu1 %5957  ;;  %v5953_v1 = vpop.permute.xlu0 %5952 }
 0x89d   :  { %v5960_v2 = vunpack.i.h.bf16 %v5958_v0  ;;  %v5959_v6 = vunpack.i.l.bf16 %v5958_v0  ;;  %v5955_v7 = vunpack.i.h.bf16 %v5953_v1  ;;  %v5954_v8 = vunpack.i.l.bf16 %v5953_v1 }
 0x89f   :  { %v1169_v12 = vpack.c.bf16 %v5960_v2, %v5960_v2  ;;  %v1168_v3 = vpack.c.bf16 %v5959_v6, %v5959_v6  ;;  %v1139_v9 = vpack.c.bf16 %v5955_v7, %v5955_v7  ;;  %v1138_v13 = vpack.c.bf16 %v5954_v8, %v5954_v8 }
 0x8a1   :  { %5369 = vmatmul.msk.bf16.vlgmr.msrb.gmra.mxu0 %vm273_vm1, %v1136_v11  ;;  %5370 = vmatmul.msk.bf16.vlgmr.msra.gmra.mxu1 %vm273_vm1, %v1137_v10  ;;  %v1316_v4 = vsel %vm273_vm1, %v1168_v3, 0  ;;  %v1335_v15 = vsel %vm273_vm1, %v1169_v12, 0 }
 0x8a2   :  { %5371 = vmatmul.msk.bf16.vlgmr.msra.gmra.mxu2 %vm273_vm1, %v1138_v13  ;;  %5372 = vmatmul.msk.bf16.vlgmr.msra.gmra.mxu3 %vm273_vm1, %v1139_v9 }
 0x8a3   :  { %1475 = vmatpush.bf16.msrb.mxu2 %v1466_v62  ;;  %1494 = vmatpush.bf16.msrb.mxu3 %v1485_v63 }
 0x8a4   :  { %1325 = vmatpush.bf16.xpose.msra.mxu0 %v1316_v4  ;;  %1344 = vmatpush.bf16.xpose.msrb.mxu1 %v1335_v15 }
 0x8a6   :  { %v1213_v5 = vpop.f32.mrf.mxu2 }
 0x8a7   :  { %v1350_v56 = vmul.f32 0.35355338, %v1213_v5 }
 0x8a9   :  { %v1358_v20 = vadd.f32 %v6472_v19, %v1350_v56 }
 0x8ab   :  { %v1366_v24 = vsel %vm273_vm1, %v1358_v20, -inf }
 0x8ac   :  { %1367 = vmax.xlane.f32.xlu0 %v1366_v24 }
 0x8ae   :  { %v1215_v25 = vpop.f32.mrf.mxu2  ;;  %v1232_v22 = vpop.f32.mrf.mxu3 }
 0x8af   :  { %v1351_v28 = vmul.f32 0.35355338, %v1232_v22 }
 0x8b1   :  { %5373 = vmatmul.msk.bf16.vlgmr.msra.gmra.mxu0 %vm273_vm1, %v1140_v27  ;;  %5374 = vmatmul.msk.bf16.vlgmr.msrb.gmra.mxu1 %vm273_vm1, %v1141_v26  ;;  %v1359_v31 = vadd.f32 %v6473_v30, %v1351_v28 }
 0x8b3   :  { %v1369_v32 = vsel %vm273_vm1, %v1359_v31, -inf }
 0x8b4   :  { %1370 = vmax.xlane.f32.xlu1 %v1369_v32 }
 0x8b6   :  { %v1234_v33 = vpop.f32.mrf.mxu3 }
 0x91e   :  { %v1251_v34 = vpop.f32.mrf.mxu0  ;;  %v1270_v35 = vpop.f32.mrf.mxu1 }
 0x91f   :  { %v1352_v44 = vmul.f32 0.35355338, %v1251_v34  ;;  %v1353_v48 = vmul.f32 0.35355338, %v1270_v35  ;;  %v1368_v36 = vpop.xlane.xlu0 %1367 }
 0x920   :  { %v1390_v39 = vsub.f32 %v1358_v20, %v1368_v36 }
 0x921   :  { %v1360_v37 = vadd.f32 %v6472_v19, %v1352_v44  ;;  %v1361_v38 = vadd.f32 %v6473_v30, %v1353_v48 }
 0x922   :  { %v1398_v45 = vmul.f32 1.442695, %v1390_v39 }
 0x923   :  { %v1372_v40 = vsel %vm273_vm1, %v1360_v37, -inf  ;;  %v1375_v41 = vsel %vm273_vm1, %v1361_v38, -inf }
 0x924   :  { %1373 = vmax.xlane.f32.xlu2 %v1372_v40  ;;  %1376 = vmax.xlane.f32.xlu0 %v1375_v41  ;;  %6248 = vpow2.f32 %v1398_v45 }
 0x925   :  { %v1308_v42 = vpop.f32.mrf.mxu3  ;;  %v1289_v43 = vpop.f32.mrf.mxu2 }
 0x926   :  { %v1355_v46 = vmul.f32 0.35355338, %v1308_v42  ;;  %v1354_v47 = vmul.f32 0.35355338, %v1289_v43  ;;  %v1253_v49 = vpop.f32.mrf.mxu0  ;;  %v1272_v50 = vpop.f32.mrf.mxu1 }
 0x927   :  { %v1371_v51 = vpop.xlane.xlu1 %1370 }
 0x928   :  { %v1362_v52 = vadd.f32 %v6472_v19, %v1354_v47  ;;  %v1363_v53 = vadd.f32 %v6473_v30, %v1355_v46  ;;  %v1391_v54 = vsub.f32 %v1359_v31, %v1371_v51 }
 0x92a   :  { %v1378_v55 = vsel %vm273_vm1, %v1362_v52, -inf  ;;  %v1381_v57 = vsel %vm273_vm1, %v1363_v53, -inf  ;;  %v1400_v61 = vmul.f32 1.442695, %v1391_v54  ;;  %v6249_v2 = vpop.eup %6248 }
 0x92b   :  { %1379 = vmax.xlane.f32.xlu1 %v1378_v55  ;;  %v1414_v10 = vsel %vm273_vm1, %v6249_v2, 0.0 }
 0x92c   :  { %1382 = vmax.xlane.f32.xlu2 %v1381_v57  ;;  %6250 = vpow2.f32 %v1400_v61 }
 0x92d   :  { %v1310_v58 = vpop.f32.mrf.mxu3  ;;  %v1291_v60 = vpop.f32.mrf.mxu2 }
 0x92e   :  { %v1327_v62 = vpop.f32.mrf.mxu0  ;;  %v1346_v63 = vpop.f32.mrf.mxu1 }
 0x92f   :  { %v1356_v0 = vmul.f32 0.35355338, %v1327_v62  ;;  %v1357_v1 = vmul.f32 0.35355338, %v1346_v63 }
 0x931   :  { %v1364_v6 = vadd.f32 %v6472_v19, %v1356_v0  ;;  %v1365_v7 = vadd.f32 %v6473_v30, %v1357_v1 }
 0x932   :  { %v6251_v9 = vpop.eup %6250 }
 0x933   :  { %v1384_v8 = vsel %vm273_vm1, %v1364_v6, -inf  ;;  %v1387_v11 = vsel %vm273_vm1, %v1365_v7, -inf  ;;  %v1417_v13 = vsel %vm273_vm1, %v6251_v9, 0.0 }
 0x934   :  { %1385 = vmax.xlane.f32.xlu0 %v1384_v8  ;;  %1415 = vadd.xlane.f32.xlu2 %v1414_v10 }
 0x935   :  { %1388 = vmax.xlane.f32.xlu1 %v1387_v11 }
 0x936   :  { %v1329_v12 = vpop.f32.mrf.mxu0  ;;  %v1348_v3 = vpop.f32.mrf.mxu1 }
 0x93c   :  { %1418 = vadd.xlane.f32.xlu0 %v1417_v13 }
 0x950   :  { %5967 = vrot.lane.b32.xlu0 %v6929_v29, %s8014_s25 }
 0x997   :  { %v1374_v4 = vpop.xlane.xlu2 %1373  ;;  %v1377_v15 = vpop.xlane.xlu0 %1376 }
 0x998   :  { %v1392_v5 = vsub.f32 %v1360_v37, %v1374_v4  ;;  %v1393_v56 = vsub.f32 %v1361_v38, %v1377_v15 }
 0x99a   :  { %v1402_v59 = vmul.f32 1.442695, %v1392_v5  ;;  %v1404_v19 = vmul.f32 1.442695, %v1393_v56 }
 0x99c   :  { %6252 = vpow2.f32 %v1402_v59 }
 0x99d   :  { %6254 = vpow2.f32 %v1404_v19 }
 0x99e   :  { %v1380_v20 = vpop.xlane.xlu1 %1379 }
 0x99f   :  { %v1394_v23 = vsub.f32 %v1362_v52, %v1380_v20  ;;  %v1383_v21 = vpop.xlane.xlu2 %1382 }
 0x9a0   :  { %v1395_v24 = vsub.f32 %v1363_v53, %v1383_v21 }
 0x9a1   :  { %v1406_v25 = vmul.f32 1.442695, %v1394_v23 }
 0x9a2   :  { %v6253_v22 = vpop.eup %6252  ;;  %v1408_v26 = vmul.f32 1.442695, %v1395_v24 }
 0x9a3   :  { %v6255_v27 = vpop.eup %6254  ;;  %6256 = vpow2.f32 %v1406_v25  ;;  %v1420_v28 = vsel %vm273_vm1, %v6253_v22, 0.0 }
 0x9a4   :  { %6258 = vpow2.f32 %v1408_v26  ;;  %v1423_v30 = vsel %vm273_vm1, %v6255_v27, 0.0  ;;  %1421 = vadd.xlane.f32.xlu1 %v1420_v28 }
 0x9a5   :  { %1424 = vadd.xlane.f32.xlu2 %v1423_v30 }
 0x9a7   :  { %v1416_v31 = vpop.xlane.xlu2 %1415  ;;  %v1386_v32 = vpop.xlane.xlu0 %1385 }
 0x9a8   :  { %6260 = vrcp.f32 %v1416_v31  ;;  %v1396_v33 = vsub.f32 %v1364_v6, %v1386_v32  ;;  %v1389_v34 = vpop.xlane.xlu1 %1388 }
 0x9a9   :  { %v6974_v35 = vpop.eup %6256  ;;  %v1397_v44 = vsub.f32 %v1365_v7, %v1389_v34 }
 0x9aa   :  { %v6976_v48 = vpop.eup %6258  ;;  %v1410_v36 = vmul.f32 1.442695, %v1396_v33  ;;  %v1426_v39 = vsel %vm273_vm1, %v6974_v35, 0.0 }
 0x9ab   :  { %v1412_v37 = vmul.f32 1.442695, %v1397_v44  ;;  %v1429_v38 = vsel %vm273_vm1, %v6976_v48, 0.0 }
 0x9ac   :  { %6262 = vpow2.f32 %v1410_v36  ;;  %1427 = vadd.xlane.f32.xlu1 %v1426_v39 }
 0x9ad   :  { %6264 = vpow2.f32 %v1412_v37  ;;  %1430 = vadd.xlane.f32.xlu2 %v1429_v38 }
 0x9ae   :  { %v6261_v40 = vpop.eup %6260 }
 0x9af   :  { %v1446_v41 = vmul.f32 %v6261_v40, %v6249_v2  ;;  %v1419_v42 = vpop.xlane.xlu0 %1418 }
 0x9b0   :  { %6266 = vrcp.f32 %v1419_v42 }
 0x9b1   :  { %v1454_v43 = vpack.c.bf16 %v1446_v41, %v1446_v41 }
 0x9b2   :  { %v6263_v45 = vpop.eup %6262 }
 0x9b3   :  { %v6265_v46 = vpop.eup %6264  ;;  %5375 = vmatmul.msk.bf16.vlgmr.msrb.gmra.mxu2 %vm273_vm1, %v1454_v43  ;;  %v1432_v47 = vsel %vm273_vm1, %v6263_v45, 0.0 }
 0x9b4   :  { %v1435_v49 = vsel %vm273_vm1, %v6265_v46, 0.0 }
 0x9b5   :  { %1433 = vadd.xlane.f32.xlu2 %v1432_v47  ;;  %1436 = vadd.xlane.f32.xlu0 %v1435_v49 }
 0x9b6   :  { %v6267_v50 = vpop.eup %6266 }
 0x9b7   :  { %v1447_v51 = vmul.f32 %v6267_v50, %v6251_v9 }
 0x9b9   :  { %v1455_v52 = vpack.c.bf16 %v1447_v51, %v1447_v51 }
 0x9bb   :  { %5376 = vmatmul.msk.bf16.vlgmr.msrb.gmra.mxu3 %vm273_vm1, %v1455_v52 }
 0x9c2   :  { %v5968_v53 = vpop.permute.xlu0 %5967 }
 0x9c3   :  { %v5970_v54 = vunpack.i.h.bf16 %v5968_v53  ;;  %v5969_v55 = vunpack.i.l.bf16 %v5968_v53 }
 0x9c5   :  { %v1193_v57 = vpack.c.bf16 %v5970_v54, %v5970_v54  ;;  %v1192_v58 = vpack.c.bf16 %v5969_v55, %v5969_v55  ;;  %5972 = vrot.lane.b32.xlu1 %v6929_v29, %s8013_s26 }
 0x9c7   :  { %v1504_v60 = vsel %vm547_vm2, %v1192_v58, 0  ;;  %v1523_v61 = vsel %vm547_vm2, %v1193_v57, 0  ;;  %v5828_v58 = vld [vmem:[%s8007_s24 + $0x78] sm:$0xff] }
 0x9c8   :  { %1513 = vmatpush.bf16.msrb.mxu0 %v1504_v60  ;;  %1532 = vmatpush.bf16.msra.mxu1 %v1523_v61  ;;  %v5827_v60 = vld [vmem:[%s8007_s24 + $0x70] sm:$0xff] }
 0x9cd   :  { %5977 = vrot.lane.b32.xlu2 %v6929_v29, %s8015_s1 }
 0xa17   :  { %v1422_v62 = vpop.xlane.xlu1 %1421 }
 0xa18   :  { %v1425_v63 = vpop.xlane.xlu2 %1424  ;;  %6268 = vrcp.f32 %v1422_v62 }
 0xa19   :  { %6270 = vrcp.f32 %v1425_v63 }
 0xa1e   :  { %v6269_v0 = vpop.eup %6268 }
 0xa1f   :  { %v6271_v1 = vpop.eup %6270  ;;  %v1448_v2 = vmul.f32 %v6269_v0, %v6253_v22  ;;  %v1428_v29 = vpop.xlane.xlu1 %1427 }
 0xa20   :  { %v1449_v6 = vmul.f32 %v6271_v1, %v6255_v27  ;;  %v1431_v7 = vpop.xlane.xlu2 %1430 }
 0xa21   :  { %v1456_v8 = vpack.c.bf16 %v1448_v2, %v1448_v2 }
 0xa22   :  { %v1457_v10 = vpack.c.bf16 %v1449_v6, %v1449_v6 }
 0xa23   :  { %5377 = vmatmul.msk.bf16.vlgmr.msrb.gmra.mxu0 %vm273_vm1, %v1456_v8 }
 0xa24   :  { %5378 = vmatmul.msk.bf16.vlgmr.msra.gmra.mxu1 %vm273_vm1, %v1457_v10 }
 0xa28   :  { %v1434_v11 = vpop.xlane.xlu2 %1433  ;;  %v1437_v12 = vpop.xlane.xlu0 %1436 }
 0xa29   :  { %6272 = vrcp.f32 %v1434_v11 }
 0xa2a   :  { %6274 = vrcp.f32 %v1437_v12 }
 0xa2b   :  { %6276 = vrcp.f32 %v1428_v29 }
 0xa2c   :  { %6278 = vrcp.f32 %v1431_v7 }
 0xa2f   :  { %v6273_v3 = vpop.eup %6272 }
 0xa30   :  { %v6275_v9 = vpop.eup %6274  ;;  %v5978_v13 = vpop.permute.xlu2 %5977  ;;  %v1452_v5 = vmul.f32 %v6273_v3, %v6263_v45 }
 0xa31   :  { %v5980_v4 = vunpack.i.h.bf16 %v5978_v13  ;;  %v5979_v15 = vunpack.i.l.bf16 %v5978_v13  ;;  %v1453_v56 = vmul.f32 %v6275_v9, %v6265_v46  ;;  %v6277_v21 = vpop.eup %6276 }
 0xa32   :  { %v6279_v25 = vpop.eup %6278  ;;  %v1460_v22 = vpack.c.bf16 %v1452_v5, %v1452_v5  ;;  %v1450_v32 = vmul.f32 %v6277_v21, %v6974_v35  ;;  %v5841_v5 = vld [vmem:[%s7959_s12 + $0x10] sm:$0xff] }
 0xa33   :  { %v1197_v59 = vpack.c.bf16 %v5980_v4, %v5980_v4  ;;  %v1196_v19 = vpack.c.bf16 %v5979_v15, %v5979_v15  ;;  %v1461_v26 = vpack.c.bf16 %v1453_v56, %v1453_v56  ;;  %v1451_v31 = vmul.f32 %v6279_v25, %v6976_v48  ;;  %v5842_v4 = vld [vmem:[%s7959_s12 + $0x18] sm:$0xff]  ;;  %v5840_v15 = vld [vmem:[%s7959_s12 + $0x8] sm:$0xff]  ;;  %v7032_v56 = vld [vmem:[%s8019_s19] sm:$0xff] }
 0xa34   :  { %v1458_v38 = vpack.c.bf16 %v1450_v32, %v1450_v32 }
 0xa35   :  { %v1580_v20 = vsel %vm547_vm2, %v1196_v19, 0  ;;  %v1599_v23 = vsel %vm547_vm2, %v1197_v59, 0  ;;  %v1459_v37 = vpack.c.bf16 %v1451_v31, %v1451_v31  ;;  %v7037_v59 = vld [vmem:[%s8019_s19 + $0x8] sm:$0xff]  ;;  %v5839_v19 = vld [vmem:[%s7959_s12] sm:$0xff]  ;;  %s8020_s19 = sld [smem:[#allocation11_spill]] }
 0xa36   :  { %1589 = vmatpush.bf16.msra.mxu0 %v1580_v20  ;;  %1608 = vmatpush.bf16.msrb.mxu1 %v1599_v23  ;;  %v1477_v24 = vpop.f32.mrf.mxu2  ;;  %v7044_v20 = vpack.c.bf16 %v7037_v59, %v7032_v56  ;;  %v1645_v23 = vperm.slane %v6923_v18, 3 }
 0xa37   :  { %v5973_v27 = vpop.permute.xlu1 %5972 }
 0xa38   :  { %v5975_v28 = vunpack.i.h.bf16 %v5973_v27  ;;  %v5974_v30 = vunpack.i.l.bf16 %v5973_v27 }
 0xa39   :  { %5381 = vmatmul.msk.bf16.vlgmr.msra.gmra.mxu0 %vm273_vm1, %v1460_v22  ;;  %5382 = vmatmul.msk.bf16.vlgmr.msrb.gmra.mxu1 %vm273_vm1, %v1461_v26 }
 0xa3a   :  { %v1195_v33 = vpack.c.bf16 %v5975_v28, %v5975_v28  ;;  %v1194_v34 = vpack.c.bf16 %v5974_v30, %v5974_v30  ;;  %1960 = vmatpush.bf16.msra.mxu1 %v5840_v15 }
 0xa3c   :  { %v1542_v44 = vsel %vm547_vm2, %v1194_v34, 0  ;;  %v1561_v36 = vsel %vm547_vm2, %v1195_v33, 0 }
 0xa3d   :  { %1551 = vmatpush.bf16.msra.mxu2 %v1542_v44  ;;  %1570 = vmatpush.bf16.msra.mxu3 %v1561_v36 }
 0xa3e   :  { %v1479_v39 = vpop.f32.mrf.mxu2  ;;  %v1496_v40 = vpop.f32.mrf.mxu3  ;;  %1961 = vmatpush.bf16.msra.mxu1 %v5839_v19 }
 0xa3f   :  { %v7070_v39 = vld [vmem:[%s7960_s13] sm:$0xf] }
 0xa40   :  { %5379 = vmatmul.msk.bf16.vlgmr.msra.gmra.mxu2 %vm273_vm1, %v1458_v38  ;;  %5380 = vmatmul.msk.bf16.vlgmr.msra.gmra.mxu3 %vm273_vm1, %v1459_v37 }
 0xa41   :  { %1667 = vmatpush.bf16.msrb.mxu2 %v5828_v58  ;;  %v5830_v58 = vld [vmem:[%s8011_s5 + $0x18] sm:$0xff] }
 0xa42   :  { %1784 = vmatpush.bf16.msrb.mxu3 %v5830_v58 }
 0xa45   :  { %1668 = vmatpush.bf16.msrb.mxu2 %v5827_v60 }
 0xa46   :  { %v1498_v41 = vpop.f32.mrf.mxu3 }
 0xa49   :  { %1987 = vmatpush.bf16.msra.mxu2 %v5842_v4  ;;  %5463 = vmatmul.msk.bf16.vlgmr.msra.gmra.mxu1 %vm117_vm0, %v7044_v20 }
 0xa4d   :  { %1988 = vmatpush.bf16.msra.mxu2 %v5841_v5  ;;  %v5843_v5 = vld [vmem:[%s7959_s12 + $0x20] sm:$0xff] }
 0xaa0   :  { %v1515_v48 = vpop.f32.mrf.mxu0 }
 0xaa1   :  { %v1534_v42 = vpop.f32.mrf.mxu1 }
 0xaa2   :  { %v5981_v35 = vpack.i.bf16 %v1534_v42, %v1515_v48 }
 0xaa4   :  { %5982 = vrot.lane.b32.xlu1 %v5981_v35, %s8016_s27 }
 0xaa8   :  { %v1517_v43 = vpop.f32.mrf.mxu0 }
 0xaa9   :  { %v1536_v45 = vpop.f32.mrf.mxu1  ;;  %v1938_v43 = vperm.slane %v7070_v39, 0 }
 0xab6   :  { %v1591_v46 = vpop.f32.mrf.mxu0  ;;  %v1610_v47 = vpop.f32.mrf.mxu1 }
 0xab7   :  { %v5991_v49 = vpack.i.bf16 %v1610_v47, %v1591_v46 }
 0xab9   :  { %5992 = vrot.lane.b32.xlu2 %v5991_v49, %s8017_s4 }
 0xabe   :  { %v1593_v50 = vpop.f32.mrf.mxu0  ;;  %v1612_v51 = vpop.f32.mrf.mxu1 }
 0xac3   :  { %v1553_v52 = vpop.f32.mrf.mxu2  ;;  %v1572_v53 = vpop.f32.mrf.mxu3 }
 0xac4   :  { %v5986_v54 = vpack.i.bf16 %v1572_v53, %v1553_v52 }
 0xac6   :  { %5987 = vrot.lane.b32.xlu1 %v5986_v54, %s8018_s2  ;;  %v1963_v41 = vpop.f32.mrf.mxu1 }
 0xac7   :  { %v1964_v49 = vadd.f32 %v1963_v41, %v1938_v43 }
 0xac9   :  { %v2042_v53 = vpack.c.bf16 %v1964_v49, %v1964_v49 }
 0xacb   :  { %v1555_v55 = vpop.f32.mrf.mxu2  ;;  %v1574_v57 = vpop.f32.mrf.mxu3 }
 0xace   :  { %v1965_v47 = vpop.f32.mrf.mxu1 }
 0xacf   :  { %v1966_v52 = vadd.f32 %v1965_v47, %v1938_v43 }
 0xad1   :  { %v2043_v54 = vpack.c.bf16 %v1966_v52, %v1966_v52 }
 0xb13   :  { %v5993_v0 = vpop.permute.xlu2 %5992 }
 0xb14   :  { %v5995_v7 = vunpack.i.h.bf16 %v5993_v0  ;;  %v5994_v8 = vunpack.i.l.bf16 %v5993_v0 }
 0xb16   :  { %v5983_v61 = vpop.permute.xlu1 %5982 }
 0xb17   :  { %v5985_v62 = vunpack.i.h.bf16 %v5983_v61  ;;  %v5984_v63 = vunpack.i.l.bf16 %v5983_v61 }
 0xb19   :  { %v1639_v10 = vsel %vm273_vm1, %v1496_v40, %v5985_v62  ;;  %v1638_v11 = vsel %vm273_vm1, %v1477_v24, %v5984_v63  ;;  %v1968_v40 = vperm.slane %v7070_v39, 1  ;;  %v5829_v62 = vld [vmem:[%s8011_s5 + $0x10] sm:$0xff] }
 0xb1a   :  { %1785 = vmatpush.bf16.msrb.mxu3 %v5829_v62 }
 0xb38   :  { %v5988_v1 = vpop.permute.xlu1 %5987 }
 0xb39   :  { %v5990_v2 = vunpack.i.h.bf16 %v5988_v1  ;;  %v5989_v6 = vunpack.i.l.bf16 %v5988_v1 }
 0xb3b   :  { %v1641_v12 = vsel %vm723_vm3, %v1639_v10, %v5990_v2  ;;  %v1640_v29 = vsel %vm723_vm3, %v1638_v11, %v5989_v6  ;;  %v5844_v11 = vld [vmem:[%s7959_s12 + $0x28] sm:$0xff] }
 0xb3c   :  { %v1643_v3 = vsel %vm726_vm4, %v1641_v12, %v5995_v7  ;;  %v1642_v9 = vsel %vm726_vm4, %v1640_v29, %v5994_v8  ;;  %2014 = vmatpush.bf16.msra.mxu3 %v5844_v11 }
 0xb3d   :  { %v1644_v13 = vpack.c.bf16 %v1643_v3, %v1642_v9 }
 0xb3f   :  { %5391 = vmatmul.msk.bf16.vlgmr.msrb.gmra.mxu2 %vm117_vm0, %v1644_v13 }
 0xb40   :  { %2015 = vmatpush.bf16.msra.mxu3 %v5843_v5 }
 0xb4f   :  { %5472 = vmatmul.msk.bf16.vlgmr.msra.gmra.mxu2 %vm117_vm0, %v7044_v20 }
 0xbc2   :  { %v1670_v21 = vpop.f32.mrf.mxu2 }
 0xbc3   :  { %v1671_v24 = vadd.f32 %v1670_v21, %v1645_v23 }
 0xbc5   :  { %v1675_v25 = vadd.f32 %v1671_v24, %v6911_v16 }
 0xbc7   :  { %v1677_v22 = vsel %vm117_vm0, %v1675_v25, 0.0 }
 0xbc8   :  { %1678 = vadd.xlane.f32.xlu1 %v1677_v22 }
 0xbca   :  { %v1672_v26 = vpop.f32.mrf.mxu2 }
 0xbcb   :  { %v1673_v27 = vadd.f32 %v1672_v26, %v1645_v23 }
 0xbcd   :  { %v1676_v28 = vadd.f32 %v1673_v27, %v6913_v17 }
 0xbcf   :  { %v1680_v30 = vsel %vm117_vm0, %v1676_v28, 0.0 }
 0xbd0   :  { %1681 = vadd.xlane.f32.xlu2 %v1680_v30 }
 0xbd2   :  { %v1990_v17 = vpop.f32.mrf.mxu2 }
 0xbd3   :  { %v1991_v35 = vadd.f32 %v1990_v17, %v1968_v40 }
 0xbd5   :  { %v2070_v45 = vpack.c.bf16 %v1991_v35, %v1991_v35  ;;  %v6001_v57 = vpack.i.bf16 %v1991_v35, %v1966_v52 }
 0xbd7   :  { %v2110_v50 = vsel %vm273_vm1, %v2070_v45, 0 }
 0xbd8   :  { %2119 = vmatpush.bf16.xpose.msrb.mxu1 %v2110_v50 }
 0xbda   :  { %v1992_v48 = vpop.f32.mrf.mxu2 }
 0xbdb   :  { %v1993_v42 = vadd.f32 %v1992_v48, %v1968_v40 }
 0xbdd   :  { %v2071_v46 = vpack.c.bf16 %v1993_v42, %v1993_v42  ;;  %v5996_v55 = vpack.i.bf16 %v1993_v42, %v1964_v49 }
 0xbdf   :  { %v2129_v51 = vsel %vm273_vm1, %v2071_v46, 0  ;;  %5482 = vmatmul.msk.bf16.vlgmr.msrb.gmra.mxu1 %vm273_vm1, %v2042_v53  ;;  %v5838_v53 = vld [vmem:[%s7955_s8 + $0x78] sm:$0xff] }
 0xbe0   :  { %2138 = vmatpush.bf16.xpose.msrb.mxu2 %v2129_v51  ;;  %v7128_v51 = vld [vmem:[%s8020_s19] ss:$0 sm:$0xff]  ;;  %1846 = vmatpush.bf16.msrb.mxu0 %v5838_v53 }
 0xbe1   :  { %5997 = vrot.lane.b32.xlu1 %v5996_v55, %s8014_s25 }
 0xbe7   :  { %5483 = vmatmul.msk.bf16.vlgmr.msrb.gmra.mxu2 %vm273_vm1, %v2043_v54 }
 0xbe8   :  { %2060 = vrot.lane.b32.xlu2 %v1993_v42, %s8013_s26 }
 0xbe9   :  { %2036 = vrot.lane.b32.xlu1 %v1964_v49, %s8015_s1 }
 0xbf0   :  { %2066 = vrot.lane.b32.xlu2 %v1993_v42, %s8015_s1 }
 0xbf1   :  { %2038 = vrot.lane.b32.xlu1 %v1966_v52, %s8015_s1 }
 0xc3b   :  { %v1679_v31 = vpop.xlane.xlu1 %1678 }
 0xc3c   :  { %v1683_v32 = vmul.f32 %v1679_v31, %v6830_v14 }
 0xc3e   :  { %v7056_v33 = vsub.f32 %v1675_v25, %v1683_v32 }
 0xc40   :  { %v1687_v18 = vmul.f32 %v7056_v33, %v7056_v33 }
 0xc42   :  { %v1689_v16 = vsel %vm117_vm0, %v1687_v18, 0.0  ;;  %v7103_v18 = vld [vmem:[%s7957_s10 + $0x2] sm:$0x3] }
 0xc43   :  { %v1682_v34 = vpop.xlane.xlu2 %1681  ;;  %1690 = vadd.xlane.f32.xlu0 %v1689_v16 }
 0xc44   :  { %v1684_v44 = vmul.f32 %v1682_v34, %v6830_v14 }
 0xc46   :  { %v7062_v36 = vsub.f32 %v1676_v28, %v1684_v44 }
 0xc48   :  { %v1688_v37 = vmul.f32 %v7062_v36, %v7062_v36 }
 0xc4a   :  { %v1692_v38 = vsel %vm117_vm0, %v1688_v37, 0.0  ;;  %v1727_v37 = vperm.slane %v7103_v18, 0 }
 0xc4b   :  { %1693 = vadd.xlane.f32.xlu0 %v1692_v38  ;;  %v2061_v31 = vpop.permute.xlu2 %2060  ;;  %v7111_v38 = vld [vmem:[%s7958_s11 + $0x2] sm:$0x3]  ;;  %s8022_s11 = sld [smem:[#allocation16_spill]] }
 0xc4c   :  { %v2075_v16 = vpack.c.bf16 %v2061_v31, %v2061_v31  ;;  %v1730_v42 = vperm.slane %v7111_v38, 0 }
 0xc4e   :  { %v2205_v44 = vsel %vm273_vm1, %v2075_v16, 0 }
 0xc4f   :  { %2214 = vmatpush.bf16.xpose.msra.mxu2 %v2205_v44 }
 0xc53   :  { %v5998_v5 = vpop.permute.xlu1 %5997  ;;  %v2067_v16 = vpop.permute.xlu2 %2066 }
 0xc5c   :  { %v2121_v50 = vpop.f32.mrf.mxu1 }
 0xc5d   :  { %v2258_v54 = vmul.f32 0.35355338, %v2121_v50 }
 0xc5f   :  { %2052 = vrot.lane.b32.xlu0 %v1991_v35, %s8014_s25 }
 0xc67   :  { %2064 = vrot.lane.b32.xlu0 %v1991_v35, %s8015_s1 }
 0xc6f   :  { %2026 = vrot.lane.b32.xlu0 %v1966_v52, %s8014_s25  ;;  %v7133_v52 = vld [vmem:[%s8020_s19 + $0x1] ss:$0 sm:$0xff] }
 0xc77   :  { %6002 = vrot.lane.b32.xlu0 %v6001_v57, %s8013_s26 }
 0xc7f   :  { %2030 = vrot.lane.b32.xlu0 %v1964_v49, %s8013_s26 }
 0xcb6   :  { %v1691_v60 = vpop.xlane.xlu0 %1690 }
 0xcb7   :  { %v1695_v61 = vmul.f32 0.032258064, %v1691_v60 }
 0xcb9   :  { %6280 = vrsqrt.f32 %v1695_v61  ;;  %vm1704_vm14 = vcmp.eq.f32.partialorder %v1695_v61, inf  ;;  %v1707_v13 = vand.u32 2147483648, %v1695_v61  ;;  %vm1706_vm15 = vcmp.eq.f32.partialorder %v1695_v61, 0.0 }
 0xcbe   :  { %v1694_v63 = vpop.xlane.xlu0 %1693 }
 0xcbf   :  { %v6281_v0 = vpop.eup %6280  ;;  %v1696_v1 = vmul.f32 0.032258064, %v1694_v63  ;;  %v5837_v63 = vld [vmem:[%s7955_s8 + $0x70] sm:$0xff] }
 0xcc0   :  { %v1698_v2 = vmul.f32 %v6281_v0, %v1695_v61  ;;  %1847 = vmatpush.bf16.msrb.mxu0 %v5837_v63 }
 0xcc1   :  { %6282 = vrsqrt.f32 %v1696_v1  ;;  %vm1716_vm5 = vcmp.eq.f32.partialorder %v1696_v1, inf  ;;  %v1719_v26 = vand.u32 2147483648, %v1696_v1  ;;  %vm1718_vm6 = vcmp.eq.f32.partialorder %v1696_v1, 0.0 }
 0xcc2   :  { %v1699_v6 = vmul.f32 %v6281_v0, %v1698_v2 }
 0xcc4   :  { %v1700_v7 = vmul.f32 0.5, %v1699_v6 }
 0xcc6   :  { %v1701_v8 = vsub.f32 1.5, %v1700_v7 }
 0xcc7   :  { %v6283_v10 = vpop.eup %6282 }
 0xcc8   :  { %v1702_v12 = vmul.f32 %v6281_v0, %v1701_v8  ;;  %v1710_v29 = vmul.f32 %v6283_v10, %v1696_v1  ;;  %v5836_v8 = vld [vmem:[%s7955_s8 + $0x68] sm:$0xff] }
 0xcc9   :  { %1848 = vmatpush.bf16.msrb.mxu0 %v5836_v8 }
 0xcca   :  { %v1703_v3 = vmul.f32 %v1702_v12, %v1695_v61  ;;  %v1711_v9 = vmul.f32 %v6283_v10, %v1710_v29 }
 0xccc   :  { %v1705_v4 = vsel %vm1704_vm14, %v1695_v61, %v1703_v3  ;;  %v1712_v15 = vmul.f32 0.5, %v1711_v9  ;;  %v7139_v61 = vadd.f32 %v7128_v51, %v2258_v54  ;;  %v5835_v9 = vld [vmem:[%s7955_s8 + $0x60] sm:$0xff] }
 0xccd   :  { %v1708_v19 = vsel %vm1706_vm15, %v1707_v13, %v1705_v4  ;;  %1849 = vmatpush.bf16.msrb.mxu0 %v5835_v9  ;;  %v5834_v4 = vld [vmem:[%s7955_s8 + $0x58] sm:$0xff] }
 0xcce   :  { %v1713_v23 = vsub.f32 1.5, %v1712_v15  ;;  %v1721_v21 = vadd.f32 1e-06, %v1708_v19  ;;  %v2280_v2 = vsel %vm273_vm1, %v7139_v61, -inf  ;;  %v5833_v15 = vld [vmem:[%s7955_s8 + $0x50] sm:$0xff]  ;;  %v5999_v19 = vunpack.i.l.bf16 %v5998_v5 }
 0xccf   :  { %2281 = vmax.xlane.f32.xlu1 %v2280_v2 }
 0xcd0   :  { %v1714_v24 = vmul.f32 %v6283_v10, %v1713_v23  ;;  %6284 = vrcp.f32 %v1721_v21  ;;  %v2123_v10 = vpop.f32.mrf.mxu1  ;;  %v2044_v23 = vpack.c.bf16 %v5999_v19, %v5999_v19  ;;  %v2037_v21 = vpop.permute.xlu1 %2036 }
 0xcd1   :  { %v2053_v25 = vpop.permute.xlu0 %2052  ;;  %1850 = vmatpush.bf16.msrb.mxu0 %v5834_v4 }
 0xcd2   :  { %v1715_v22 = vmul.f32 %v1714_v24, %v1696_v1  ;;  %v2072_v35 = vpack.c.bf16 %v2053_v25, %v2053_v25  ;;  %v2048_v24 = vpack.c.bf16 %v2037_v21, %v2037_v21  ;;  %v6000_v25 = vunpack.i.h.bf16 %v5998_v5 }
 0xcd4   :  { %v1717_v27 = vsel %vm1716_vm5, %v1696_v1, %v1715_v22  ;;  %v2148_v49 = vsel %vm273_vm1, %v2072_v35, 0  ;;  %v2073_v22 = vpack.c.bf16 %v6000_v25, %v6000_v25 }
 0xcd5   :  { %v1720_v28 = vsel %vm1718_vm6, %v1719_v26, %v1717_v27  ;;  %1851 = vmatpush.bf16.msrb.mxu0 %v5833_v15  ;;  %v5831_v26 = vld [vmem:[%s7955_s8 + $0x40] sm:$0xff] }
 0xcd6   :  { %v1722_v30 = vadd.f32 1e-06, %v1720_v28  ;;  %v6285_v32 = vpop.eup %6284  ;;  %v2167_v27 = vsel %vm273_vm1, %v2073_v22, 0 }
 0xcd7   :  { %v1725_v17 = vmul.f32 %v6285_v32, %v7056_v33 }
 0xcd8   :  { %6286 = vrcp.f32 %v1722_v30  ;;  %v6192_v30 = vld [vmem:[%s8012_s3 + $0x1] ss:$0 sm:$0xff] }
 0xcd9   :  { %v2065_v34 = vpop.permute.xlu0 %2064  ;;  %v1728_v48 = vmul.f32 %v1727_v37, %v1725_v17 }
 0xcda   :  { %v2076_v12 = vpack.c.bf16 %v2065_v34, %v2065_v34 }
 0xcdb   :  { %v7117_v46 = vadd.f32 %v1730_v42, %v1728_v48 }
 0xcdc   :  { %v2224_v13 = vsel %vm273_vm1, %v2076_v12, 0 }
 0xcde   :  { %v6287_v40 = vpop.eup %6286 }
 0xcdf   :  { %v1726_v41 = vmul.f32 %v6287_v40, %v7062_v36  ;;  %v2140_v36 = vpop.f32.mrf.mxu2  ;;  %v2077_v40 = vpack.c.bf16 %v2067_v16, %v2067_v16 }
 0xce0   :  { %v2259_v55 = vmul.f32 0.35355338, %v2140_v36 }
 0xce1   :  { %v1729_v43 = vmul.f32 %v1727_v37, %v1726_v41  ;;  %v7115_v45 = vpop.permute.xlu0 %2026 }
 0xce2   :  { %v7142_v62 = vadd.f32 %v7133_v52, %v2259_v55 }
 0xce3   :  { %v7119_v33 = vadd.f32 %v1730_v42, %v1729_v43  ;;  %v1995_v43 = vperm.slane %v7070_v39, 2 }
 0xce4   :  { %v2283_v6 = vsel %vm273_vm1, %v7142_v62, -inf }
 0xce5   :  { %v1759_v47 = vpack.c.bf16 %v7119_v33, %v7117_v46  ;;  %2284 = vmax.xlane.f32.xlu2 %v2283_v6 }
 0xce7   :  { %5422 = vmatmul.msk.bf16.vlgmr.msrb.gmra.mxu3 %vm117_vm0, %v1759_v47  ;;  %v2142_v11 = vpop.f32.mrf.mxu2 }
 0xce8   :  { %2157 = vmatpush.bf16.xpose.msrb.mxu3 %v2148_v49  ;;  %v2243_v49 = vsel %vm273_vm1, %v2077_v40, 0 }
 0xce9   :  { %v6003_v57 = vpop.permute.xlu0 %6002 }
 0xcea   :  { %v6005_v58 = vunpack.i.h.bf16 %v6003_v57  ;;  %v6004_v60 = vunpack.i.l.bf16 %v6003_v57 }
 0xcec   :  { %v2074_v0 = vpack.c.bf16 %v6005_v58, %v6005_v58  ;;  %v2047_v1 = vpack.c.bf16 %v6004_v60, %v6004_v60 }
 0xcee   :  { %v2186_v7 = vsel %vm273_vm1, %v2074_v0, 0  ;;  %5487 = vmatmul.msk.bf16.vlgmr.msra.gmra.mxu2 %vm273_vm1, %v2047_v1  ;;  %v2045_v0 = vpack.c.bf16 %v7115_v45, %v7115_v45 }
 0xcef   :  { %2195 = vmatpush.bf16.xpose.msra.mxu1 %v2186_v7 }
 0xcf1   :  { %v2031_v29 = vpop.permute.xlu0 %2030 }
 0xcf2   :  { %v2046_v3 = vpack.c.bf16 %v2031_v29, %v2031_v29  ;;  %v2039_v29 = vpop.permute.xlu1 %2038 }
 0xcf3   :  { %v2049_v45 = vpack.c.bf16 %v2039_v29, %v2039_v29 }
 0xcf6   :  { %5486 = vmatmul.msk.bf16.vlgmr.msra.gmra.mxu1 %vm273_vm1, %v2046_v3 }
 0xcf7   :  { %5481 = vmatmul.msk.bf16.vlgmr.msra.gmra.mxu3 %vm117_vm0, %v7044_v20  ;;  %v5832_v20 = vld [vmem:[%s7955_s8 + $0x48] sm:$0xff] }
 0xcf8   :  { %2233 = vmatpush.bf16.xpose.msra.mxu3 %v2224_v13  ;;  %1852 = vmatpush.bf16.msrb.mxu0 %v5832_v20 }
 0xcfc   :  { %1853 = vmatpush.bf16.msrb.mxu0 %v5831_v26 }
 0xd00   :  { %2176 = vmatpush.bf16.xpose.msra.mxu0 %v2167_v27 }
 0xd07   :  { %5484 = vmatmul.msk.bf16.vlgmr.msrb.gmra.mxu3 %vm273_vm1, %v2044_v23 }
 0xd17   :  { %5488 = vmatmul.msk.bf16.vlgmr.msra.gmra.mxu3 %vm273_vm1, %v2048_v24 }
 0xd58   :  { %v2285_v24 = vpop.xlane.xlu2 %2284 }
 0xd59   :  { %v2305_v20 = vsub.f32 %v7142_v62, %v2285_v24 }
 0xd6a   :  { %v1787_v28 = vpop.f32.mrf.mxu3 }
 0xd6b   :  { %v1788_v31 = vadd.f32 %v6192_v30, %v1787_v28 }
 0xd6d   :  { %v1792_v41 = vmax.f32 %v1788_v31, 0.0 }
 0xd71   :  { %v2216_v32 = vpop.f32.mrf.mxu2 }
 0xd72   :  { %v1789_v34 = vpop.f32.mrf.mxu3  ;;  %v2263_v8 = vmul.f32 0.35355338, %v2216_v32  ;;  %v2282_v32 = vpop.xlane.xlu1 %2281 }
 0xd73   :  { %v1790_v44 = vadd.f32 %v6192_v30, %v1789_v34  ;;  %v2197_v17 = vpop.f32.mrf.mxu1  ;;  %v2314_v30 = vmul.f32 1.442695, %v2305_v20 }
 0xd74   :  { %v2262_v37 = vmul.f32 0.35355338, %v2197_v17  ;;  %v2277_v11 = vadd.f32 %v7133_v52, %v2263_v8 }
 0xd75   :  { %v1793_v48 = vmax.f32 %v1790_v44, 0.0  ;;  %v2304_v44 = vsub.f32 %v7139_v61, %v2282_v32 }
 0xd76   :  { %v7182_v42 = vadd.f32 %v7128_v51, %v2262_v37  ;;  %v2295_v3 = vsel %vm273_vm1, %v2277_v11, -inf }
 0xd77   :  { %v1794_v35 = vpack.c.bf16 %v1793_v48, %v1792_v41  ;;  %v2312_v17 = vmul.f32 1.442695, %v2304_v44 }
 0xd78   :  { %v2292_v47 = vsel %vm273_vm1, %v7182_v42, -inf }
 0xd79   :  { %1854 = vmatmul.bf16.vlgmr.msrb.gmra.mxu0 %v1794_v35  ;;  %2293 = vmax.xlane.f32.xlu1 %v2292_v47  ;;  %v2218_v50 = vpop.f32.mrf.mxu2 }
 0xd7a   :  { %2252 = vmatpush.bf16.xpose.msrb.mxu0 %v2243_v49  ;;  %v2017_v36 = vpop.f32.mrf.mxu3 }
 0xd7b   :  { %v7188_v53 = vadd.f32 %v2017_v36, %v1995_v43  ;;  %v2199_v54 = vpop.f32.mrf.mxu1 }
 0xd7d   :  { %v2098_v55 = vpack.c.bf16 %v7188_v53, %v7188_v53 }
 0xd7f   :  { %v2380_v57 = vsel %vm547_vm2, %v2098_v55, 0 }
 0xd80   :  { %2389 = vmatpush.bf16.msrb.mxu1 %v2380_v57 }
 0xd82   :  { %v2019_v58 = vpop.f32.mrf.mxu3 }
 0xd83   :  { %v7193_v60 = vadd.f32 %v2019_v58, %v1995_v43 }
 0xd85   :  { %v2099_v63 = vpack.c.bf16 %v7193_v60, %v7193_v60  ;;  %v6006_v55 = vpack.i.bf16 %v7193_v60, %v7188_v53  ;;  %v6011_v57 = vpack.i.bf16 %v7188_v53, %v7193_v60 }
 0xd87   :  { %v2399_v1 = vsel %vm547_vm2, %v2099_v63, 0 }
 0xd88   :  { %2408 = vmatpush.bf16.msrb.mxu2 %v2399_v1 }
 0xd89   :  { %5485 = vmatmul.msk.bf16.vlgmr.msra.gmra.mxu0 %vm273_vm1, %v2045_v0 }
 0xd8a   :  { %v2159_v2 = vpop.f32.mrf.mxu3 }
 0xd8b   :  { %v2260_v6 = vmul.f32 0.35355338, %v2159_v2 }
 0xd8d   :  { %v2274_v7 = vadd.f32 %v7128_v51, %v2260_v6 }
 0xd8f   :  { %v2286_v10 = vsel %vm273_vm1, %v2274_v7, -inf }
 0xd90   :  { %2287 = vmax.xlane.f32.xlu0 %v2286_v10 }
 0xd92   :  { %v2161_v12 = vpop.f32.mrf.mxu3 }
 0xd98   :  { %2296 = vmax.xlane.f32.xlu0 %v2295_v3 }
 0xd99   :  { %5489 = vmatmul.msk.bf16.vlgmr.msrb.gmra.mxu0 %vm273_vm1, %v2049_v45 }
 0xd9a   :  { %v2235_v9 = vpop.f32.mrf.mxu3 }
 0xd9b   :  { %v2264_v26 = vmul.f32 0.35355338, %v2235_v9 }
 0xd9d   :  { %v2278_v34 = vadd.f32 %v7128_v51, %v2264_v26 }
 0xd9f   :  { %v2298_v62 = vsel %vm273_vm1, %v2278_v34, -inf }
 0xda2   :  { %v2237_v13 = vpop.f32.mrf.mxu3 }
 0xdec   :  { %v2294_v63 = vpop.xlane.xlu1 %2293 }
 0xded   :  { %v2308_v12 = vsub.f32 %v7182_v42, %v2294_v63 }
 0xdef   :  { %v2320_v29 = vmul.f32 1.442695, %v2308_v12 }
 0xdf6   :  { %v7206_v4 = vpop.f32.mrf.mxu0 }
 0xdfe   :  { %v7208_v15 = vpop.f32.mrf.mxu0 }
 0xe03   :  { %v2288_v5 = vpop.xlane.xlu0 %2287 }
 0xe04   :  { %v2306_v19 = vsub.f32 %v2274_v7, %v2288_v5 }
 0xe06   :  { %v2316_v23 = vmul.f32 1.442695, %v2306_v19  ;;  %v2178_v21 = vpop.f32.mrf.mxu0 }
 0xe07   :  { %v2261_v25 = vmul.f32 0.35355338, %v2178_v21 }
 0xe08   :  { %6288 = vpow2.f32 %v2316_v23 }
 0xe09   :  { %v2275_v22 = vadd.f32 %v7133_v52, %v2261_v25  ;;  %6290 = vpow2.f32 %v2314_v30 }
 0xe0a   :  { %6292 = vpow2.f32 %v2312_v17 }
 0xe0b   :  { %v2289_v27 = vsel %vm273_vm1, %v2275_v22, -inf  ;;  %v2297_v40 = vpop.xlane.xlu0 %2296 }
 0xe0c   :  { %2290 = vmax.xlane.f32.xlu2 %v2289_v27  ;;  %v2309_v43 = vsub.f32 %v2277_v11, %v2297_v40 }
 0xe0e   :  { %v7213_v28 = vpop.eup %6288  ;;  %v2180_v31 = vpop.f32.mrf.mxu0  ;;  %v2322_v61 = vmul.f32 1.442695, %v2309_v43 }
 0xe0f   :  { %v2334_v16 = vsel %vm273_vm1, %v7213_v28, 0.0  ;;  %v6291_v48 = vpop.eup %6290 }
 0xe10   :  { %2335 = vadd.xlane.f32.xlu1 %v2334_v16  ;;  %v2331_v47 = vsel %vm273_vm1, %v6291_v48, 0.0  ;;  %v6293_v50 = vpop.eup %6292  ;;  %6294 = vpow2.f32 %v2322_v61 }
 0xe11   :  { %v2328_v36 = vsel %vm273_vm1, %v6293_v50, 0.0 }
 0xe14   :  { %2299 = vmax.xlane.f32.xlu2 %v2298_v62 }
 0xe16   :  { %v2254_v37 = vpop.f32.mrf.mxu0  ;;  %v7227_v54 = vpop.eup %6294 }
 0xe17   :  { %v2265_v41 = vmul.f32 0.35355338, %v2254_v37 }
 0xe19   :  { %v7221_v35 = vadd.f32 %v7133_v52, %v2265_v41  ;;  %v2343_v52 = vsel %vm273_vm1, %v7227_v54, 0.0 }
 0xe1b   :  { %v2301_v51 = vsel %vm273_vm1, %v7221_v35, -inf }
 0xe1c   :  { %2302 = vmax.xlane.f32.xlu0 %v2301_v51  ;;  %2332 = vadd.xlane.f32.xlu2 %v2331_v47 }
 0xe1e   :  { %v2256_v49 = vpop.f32.mrf.mxu0 }
 0xe24   :  { %2329 = vadd.xlane.f32.xlu0 %v2328_v36 }
 0xe2c   :  { %2344 = vadd.xlane.f32.xlu0 %v2343_v52 }
 0xe34   :  { %6007 = vrot.lane.b32.xlu2 %v6006_v55, %s8014_s25 }
 0xe3c   :  { %2092 = vrot.lane.b32.xlu2 %v7188_v53, %s8015_s1 }
 0xe40   :  { %6012 = vrot.lane.b32.xlu0 %v6011_v57, %s8013_s26 }
 0xe44   :  { %2094 = vrot.lane.b32.xlu2 %v7193_v60, %s8015_s1 }
 0xe7f   :  { %v2291_v58 = vpop.xlane.xlu2 %2290 }
 0xe80   :  { %v2307_v2 = vsub.f32 %v2275_v22, %v2291_v58 }
 0xe82   :  { %v2318_v7 = vmul.f32 1.442695, %v2307_v2 }
 0xe83   :  { %v2336_v8 = vpop.xlane.xlu1 %2335 }
 0xe87   :  { %v2300_v0 = vpop.xlane.xlu2 %2299 }
 0xe88   :  { %v2310_v1 = vsub.f32 %v2278_v34, %v2300_v0 }
 0xe8a   :  { %v2324_v6 = vmul.f32 1.442695, %v2310_v1 }
 0xe8c   :  { %6296 = vpow2.f32 %v2324_v6 }
 0xe8f   :  { %v2303_v10 = vpop.xlane.xlu0 %2302  ;;  %v2333_v11 = vpop.xlane.xlu2 %2332 }
 0xe90   :  { %6298 = vrcp.f32 %v2333_v11  ;;  %v2311_v25 = vsub.f32 %v7221_v35, %v2303_v10 }
 0xe91   :  { %6300 = vrcp.f32 %v2336_v8 }
 0xe92   :  { %v7242_v53 = vpop.eup %6296  ;;  %6302 = vpow2.f32 %v2318_v7  ;;  %v2326_v16 = vmul.f32 1.442695, %v2311_v25 }
 0xe93   :  { %v2346_v60 = vsel %vm273_vm1, %v7242_v53, 0.0 }
 0xe94   :  { %2347 = vadd.xlane.f32.xlu1 %v2346_v60 }
 0xe96   :  { %v6299_v3 = vpop.eup %6298 }
 0xe97   :  { %v6301_v45 = vpop.eup %6300  ;;  %v2361_v9 = vmul.f32 %v6299_v3, %v6291_v48  ;;  %v2330_v13 = vpop.xlane.xlu0 %2329 }
 0xe98   :  { %v6008_v5 = vpop.permute.xlu2 %6007  ;;  %v7246_v19 = vpop.eup %6302  ;;  %6304 = vrcp.f32 %v2330_v13  ;;  %v2362_v24 = vmul.f32 %v6301_v45, %v7213_v28 }
 0xe99   :  { %v6010_v23 = vunpack.i.h.bf16 %v6008_v5  ;;  %v6009_v21 = vunpack.i.l.bf16 %v6008_v5  ;;  %6306 = vpow2.f32 %v2320_v29  ;;  %v2369_v42 = vpack.c.bf16 %v2361_v9, %v2361_v9 }
 0xe9a   :  { %v2337_v26 = vsel %vm273_vm1, %v7246_v19, 0.0  ;;  %v2370_v32 = vpack.c.bf16 %v2362_v24, %v2362_v24  ;;  %6308 = vpow2.f32 %v2326_v16 }
 0xe9b   :  { %v2101_v22 = vpack.c.bf16 %v6010_v23, %v6010_v23  ;;  %v2100_v20 = vpack.c.bf16 %v6009_v21, %v6009_v21  ;;  %5491 = vmatmul.msk.bf16.vlgmr.msrb.gmra.mxu2 %vm273_vm1, %v2369_v42 }
 0xe9c   :  { %2338 = vadd.xlane.f32.xlu1 %v2337_v26 }
 0xe9d   :  { %v2418_v27 = vsel %vm547_vm2, %v2100_v20, 0  ;;  %v2437_v30 = vsel %vm547_vm2, %v2101_v22, 0 }
 0xe9e   :  { %2427 = vmatpush.bf16.msrb.mxu3 %v2418_v27  ;;  %2446 = vmatpush.bf16.msra.mxu0 %v2437_v30  ;;  %v6305_v31 = vpop.eup %6304 }
 0xe9f   :  { %v6307_v28 = vpop.eup %6306  ;;  %v2360_v34 = vmul.f32 %v6305_v31, %v6293_v50  ;;  %v2345_v43 = vpop.xlane.xlu0 %2344 }
 0xea0   :  { %v2093_v44 = vpop.permute.xlu2 %2092  ;;  %v2340_v40 = vsel %vm273_vm1, %v6307_v28, 0.0  ;;  %v6309_v48 = vpop.eup %6308  ;;  %6310 = vrcp.f32 %v2345_v43 }
 0xea1   :  { %v2104_v62 = vpack.c.bf16 %v2093_v44, %v2093_v44  ;;  %5492 = vmatmul.msk.bf16.vlgmr.msrb.gmra.mxu3 %vm273_vm1, %v2370_v32  ;;  %v2368_v17 = vpack.c.bf16 %v2360_v34, %v2360_v34  ;;  %v2349_v47 = vsel %vm273_vm1, %v6309_v48, 0.0 }
 0xea3   :  { %v2494_v37 = vsel %vm547_vm2, %v2104_v62, 0  ;;  %5490 = vmatmul.msk.bf16.vlgmr.msrb.gmra.mxu1 %vm273_vm1, %v2368_v17  ;;  %v6193_v17 = vld [vmem:[%s7956_s9 + $0x1] ss:$0 sm:$0xff] }
 0xea4   :  { %2503 = vmatpush.bf16.msra.mxu3 %v2494_v37  ;;  %2341 = vadd.xlane.f32.xlu1 %v2340_v40  ;;  %v1856_v37 = vadd.f32 %v6193_v17, %v7206_v4  ;;  %v5845_v4 = vld [vmem:[%s7959_s12 + $0x30] sm:$0xff] }
 0xea6   :  { %v6311_v61 = vpop.eup %6310  ;;  %v1860_v40 = vadd.f32 %v1856_v37, %v7117_v46 }
 0xea7   :  { %v2365_v52 = vmul.f32 %v6311_v61, %v7227_v54 }
 0xea8   :  { %v2095_v41 = vpop.permute.xlu2 %2094 }
 0xea9   :  { %v2105_v35 = vpack.c.bf16 %v2095_v41, %v2095_v41  ;;  %v2373_v0 = vpack.c.bf16 %v2365_v52, %v2365_v52  ;;  %v1862_v41 = vsel %vm117_vm0, %v1860_v40, 0.0 }
 0xeab   :  { %v2513_v51 = vsel %vm547_vm2, %v2105_v35, 0 }
 0xeac   :  { %2522 = vmatpush.bf16.msrb.mxu0 %v2513_v51  ;;  %2350 = vadd.xlane.f32.xlu1 %v2349_v47  ;;  %v5846_v51 = vld [vmem:[%s7959_s12 + $0x38] sm:$0xff] }
 0xeb2   :  { %v6013_v49 = vpop.permute.xlu0 %6012 }
 0xeb3   :  { %v6015_v50 = vunpack.i.h.bf16 %v6013_v49  ;;  %v6014_v36 = vunpack.i.l.bf16 %v6013_v49 }
 0xeb5   :  { %v2102_v55 = vpack.c.bf16 %v6015_v50, %v6015_v50  ;;  %v2103_v57 = vpack.c.bf16 %v6014_v36, %v6014_v36 }
 0xeb7   :  { %v2456_v58 = vsel %vm547_vm2, %v2102_v55, 0  ;;  %v2475_v63 = vsel %vm547_vm2, %v2103_v57, 0 }
 0xeb8   :  { %2465 = vmatpush.bf16.msra.mxu1 %v2456_v58  ;;  %2484 = vmatpush.bf16.msra.mxu2 %v2475_v63 }
 0xebb   :  { %5495 = vmatmul.msk.bf16.vlgmr.msra.gmra.mxu2 %vm273_vm1, %v2373_v0 }
 0xebc   :  { %2581 = vmatpush.bf16.msrb.mxu1 %v5846_v51 }
 0xec0   :  { %2582 = vmatpush.bf16.msrb.mxu1 %v5845_v4  ;;  %v5852_v4 = vld [vmem:[%s7961_s14 + $0x28] sm:$0xff] }
 0xf07   :  { %v2348_v1 = vpop.xlane.xlu1 %2347 }
 0xf08   :  { %6312 = vrcp.f32 %v2348_v1 }
 0xf0e   :  { %v6313_v2 = vpop.eup %6312 }
 0xf0f   :  { %v2366_v6 = vmul.f32 %v6313_v2, %v7242_v53  ;;  %v2339_v7 = vpop.xlane.xlu1 %2338 }
 0xf10   :  { %6314 = vrcp.f32 %v2339_v7 }
 0xf11   :  { %v2374_v8 = vpack.c.bf16 %v2366_v6, %v2366_v6 }
 0xf13   :  { %5496 = vmatmul.msk.bf16.vlgmr.msra.gmra.mxu3 %vm273_vm1, %v2374_v8 }
 0xf16   :  { %v6315_v54 = vpop.eup %6314 }
 0xf17   :  { %v2363_v10 = vmul.f32 %v6315_v54, %v7246_v19  ;;  %v2342_v11 = vpop.xlane.xlu1 %2341 }
 0xf18   :  { %6316 = vrcp.f32 %v2342_v11  ;;  %v2559_v11 = vperm.slane %v7070_v39, 3 }
 0xf19   :  { %v2371_v12 = vpack.c.bf16 %v2363_v10, %v2363_v10 }
 0xf1b   :  { %5493 = vmatmul.msk.bf16.vlgmr.msra.gmra.mxu0 %vm273_vm1, %v2371_v12 }
 0xf1c   :  { %2745 = vmatpush.bf16.msra.mxu0 %v5852_v4 }
 0xf1e   :  { %v6317_v60 = vpop.eup %6316  ;;  %v2410_v29 = vpop.f32.mrf.mxu2 }
 0xf1f   :  { %v2364_v3 = vmul.f32 %v6317_v60, %v6307_v28  ;;  %v2351_v45 = vpop.xlane.xlu1 %2350 }
 0xf20   :  { %6318 = vrcp.f32 %v2351_v45  ;;  %v2391_v9 = vpop.f32.mrf.mxu1 }
 0xf21   :  { %v2372_v53 = vpack.c.bf16 %v2364_v3, %v2364_v3 }
 0xf23   :  { %5494 = vmatmul.msk.bf16.vlgmr.msra.gmra.mxu1 %vm273_vm1, %v2372_v53 }
 0xf24   :  { %v2429_v13 = vpop.f32.mrf.mxu3 }
 0xf26   :  { %v6319_v5 = vpop.eup %6318  ;;  %v2412_v23 = vpop.f32.mrf.mxu2 }
 0xf27   :  { %v2367_v21 = vmul.f32 %v6319_v5, %v6309_v48  ;;  %v1858_v48 = vadd.f32 %v6193_v17, %v7208_v15 }
 0xf28   :  { %v2393_v42 = vpop.f32.mrf.mxu1 }
 0xf29   :  { %v2375_v19 = vpack.c.bf16 %v2367_v21, %v2367_v21  ;;  %v1861_v35 = vadd.f32 %v1858_v48, %v7119_v33 }
 0xf2b   :  { %5497 = vmatmul.msk.bf16.vlgmr.msrb.gmra.mxu0 %vm273_vm1, %v2375_v19  ;;  %v1865_v43 = vsel %vm117_vm0, %v1861_v35, 0.0 }
 0xf2c   :  { %v2431_v24 = vpop.f32.mrf.mxu3 }
 0xf3e   :  { %v2486_v25 = vpop.f32.mrf.mxu2 }
 0xf46   :  { %v2488_v22 = vpop.f32.mrf.mxu2 }
 0xf96   :  { %v2505_v20 = vpop.f32.mrf.mxu3 }
 0xf98   :  { %v2448_v26 = vpop.f32.mrf.mxu0 }
 0xf99   :  { %v6016_v27 = vpack.i.bf16 %v2448_v26, %v2429_v13 }
 0xf9b   :  { %6017 = vrot.lane.b32.xlu0 %v6016_v27, %s8016_s27 }
 0xf9e   :  { %v2507_v30 = vpop.f32.mrf.mxu3 }
 0xfa0   :  { %v2450_v31 = vpop.f32.mrf.mxu0  ;;  %v2467_v32 = vpop.f32.mrf.mxu1 }
 0xfa1   :  { %v6021_v16 = vpack.i.bf16 %v2486_v25, %v2467_v32 }
 0xfa3   :  { %6022 = vrot.lane.b32.xlu1 %v6021_v16, %s8018_s2 }
 0xfa8   :  { %v2469_v28 = vpop.f32.mrf.mxu1  ;;  %v2524_v34 = vpop.f32.mrf.mxu0 }
 0xfa9   :  { %v6026_v44 = vpack.i.bf16 %v2524_v34, %v2505_v20  ;;  %v1912_v28 = vperm.slane %v7103_v18, 1 }
 0xfab   :  { %6027 = vrot.lane.b32.xlu2 %v6026_v44, %s8017_s4  ;;  %v1915_v44 = vperm.slane %v7111_v38, 1  ;;  %v5850_v38 = vld [vmem:[%s7961_s14 + $0x18] sm:$0xff] }
 0xfac   :  { %2718 = vmatpush.bf16.msrb.mxu3 %v5850_v38 }
 0xfb0   :  { %v2526_v62 = vpop.f32.mrf.mxu0 }
 0xfc5   :  { %1863 = vadd.xlane.f32.xlu0 %v1862_v41 }
 0xfd4   :  { %1866 = vadd.xlane.f32.xlu2 %v1865_v43 }
0x1005   :  { %v6028_v49 = vpop.permute.xlu2 %6027 }
0x1006   :  { %v6030_v36 = vunpack.i.h.bf16 %v6028_v49  ;;  %v6029_v52 = vunpack.i.l.bf16 %v6028_v49  ;;  %v5851_v49 = vld [vmem:[%s7961_s14 + $0x20] sm:$0xff] }
0x1007   :  { %2746 = vmatpush.bf16.msra.mxu0 %v5851_v49 }
0x100d   :  { %v6018_v46 = vpop.permute.xlu0 %6017 }
0x100e   :  { %v6020_v47 = vunpack.i.h.bf16 %v6018_v46  ;;  %v6019_v61 = vunpack.i.l.bf16 %v6018_v46 }
0x1010   :  { %v2553_v55 = vsel %vm273_vm1, %v2410_v29, %v6020_v47  ;;  %v2552_v57 = vsel %vm273_vm1, %v2391_v9, %v6019_v61  ;;  %v5849_v47 = vld [vmem:[%s7961_s14 + $0x10] sm:$0xff] }
0x1011   :  { %2719 = vmatpush.bf16.msrb.mxu3 %v5849_v47 }
0x1015   :  { %v6023_v15 = vpop.permute.xlu1 %6022 }
0x1016   :  { %v6025_v50 = vunpack.i.h.bf16 %v6023_v15  ;;  %v6024_v33 = vunpack.i.l.bf16 %v6023_v15 }
0x1018   :  { %v2554_v58 = vsel %vm723_vm3, %v2552_v57, %v6024_v33  ;;  %v2555_v63 = vsel %vm723_vm3, %v2553_v55, %v6025_v50 }
0x1019   :  { %v2556_v0 = vsel %vm726_vm4, %v2554_v58, %v6029_v52  ;;  %v2557_v1 = vsel %vm726_vm4, %v2555_v63, %v6030_v36 }
0x101a   :  { %v2558_v2 = vpack.c.bf16 %v2557_v1, %v2556_v0 }
0x101c   :  { %5506 = vmatmul.msk.bf16.vlgmr.msrb.gmra.mxu1 %vm117_vm0, %v2558_v2 }
0x1038   :  { %v1864_v6 = vpop.xlane.xlu0 %1863 }
0x1039   :  { %v1868_v7 = vmul.f32 %v1864_v6, %v6830_v14 }
0x103b   :  { %v1870_v8 = vsub.f32 %v1860_v40, %v1868_v7 }
0x103d   :  { %v1872_v54 = vmul.f32 %v1870_v8, %v1870_v8 }
0x103f   :  { %v1874_v10 = vsel %vm117_vm0, %v1872_v54, 0.0 }
0x1040   :  { %1875 = vadd.xlane.f32.xlu2 %v1874_v10 }
0x1047   :  { %v1867_v45 = vpop.xlane.xlu2 %1866 }
0x1048   :  { %v1869_v53 = vmul.f32 %v1867_v45, %v6830_v14  ;;  %v5847_v45 = vld [vmem:[%s7961_s14] sm:$0xff] }
0x104a   :  { %v7303_v23 = vsub.f32 %v1861_v35, %v1869_v53 }
0x104c   :  { %v1873_v39 = vmul.f32 %v7303_v23, %v7303_v23 }
0x1099   :  { %v2584_v12 = vpop.f32.mrf.mxu1 }
0x109a   :  { %v2585_v60 = vadd.f32 %v2584_v12, %v2559_v11 }
0x109c   :  { %v2589_v29 = vadd.f32 %v2585_v60, %v7032_v56  ;;  %v1877_v56 = vsel %vm117_vm0, %v1873_v39, 0.0 }
0x109e   :  { %v2591_v3 = vsel %vm117_vm0, %v2589_v29, 0.0 }
0x109f   :  { %2592 = vadd.xlane.f32.xlu1 %v2591_v3  ;;  %v5848_v3 = vld [vmem:[%s7961_s14 + $0x8] sm:$0xff] }
0x10a0   :  { %2688 = vmatpush.bf16.msrb.mxu2 %v5848_v3 }
0x10a1   :  { %v2586_v9 = vpop.f32.mrf.mxu1 }
0x10a2   :  { %v2587_v13 = vadd.f32 %v2586_v9, %v2559_v11 }
0x10a4   :  { %v2590_v5 = vadd.f32 %v2587_v13, %v7037_v59  ;;  %2689 = vmatpush.bf16.msrb.mxu2 %v5847_v45 }
0x10a6   :  { %v2594_v21 = vsel %vm117_vm0, %v2590_v5, 0.0 }
0x10a7   :  { %2595 = vadd.xlane.f32.xlu0 %v2594_v21 }
0x10af   :  { %1878 = vadd.xlane.f32.xlu0 %v1877_v56 }
0x10b3   :  { %v1876_v42 = vpop.xlane.xlu2 %1875 }
0x10b4   :  { %v1880_v19 = vmul.f32 0.032258064, %v1876_v42 }
0x10b6   :  { %6320 = vrsqrt.f32 %v1880_v19  ;;  %vm1889_vm7 = vcmp.eq.f32.partialorder %v1880_v19, inf  ;;  %v1892_v30 = vand.u32 2147483648, %v1880_v19  ;;  %vm1891_vm8 = vcmp.eq.f32.partialorder %v1880_v19, 0.0 }
0x10bc   :  { %v6321_v24 = vpop.eup %6320 }
0x10bd   :  { %v1883_v25 = vmul.f32 %v6321_v24, %v1880_v19 }
0x10bf   :  { %v1884_v22 = vmul.f32 %v6321_v24, %v1883_v25 }
0x10c1   :  { %v1885_v20 = vmul.f32 0.5, %v1884_v22 }
0x10c3   :  { %v1886_v26 = vsub.f32 1.5, %v1885_v20 }
0x10c5   :  { %v1887_v59 = vmul.f32 %v6321_v24, %v1886_v26 }
0x10c7   :  { %v1888_v27 = vmul.f32 %v1887_v59, %v1880_v19 }
0x10c9   :  { %v1890_v31 = vsel %vm1889_vm7, %v1880_v19, %v1888_v27 }
0x10ca   :  { %v1893_v32 = vsel %vm1891_vm8, %v1892_v30, %v1890_v31 }
0x10cb   :  { %v1906_v16 = vadd.f32 1e-06, %v1893_v32 }
0x10cd   :  { %6322 = vrcp.f32 %v1906_v16 }
0x10d3   :  { %v6323_v34 = vpop.eup %6322 }
0x10d4   :  { %v1910_v62 = vmul.f32 %v6323_v34, %v1870_v8 }
0x10d6   :  { %v1913_v17 = vmul.f32 %v1912_v28, %v1910_v62 }
0x10d8   :  { %v1916_v37 = vadd.f32 %v1915_v44, %v1913_v17  ;;  %v7353_v17 = vld [vmem:[%s7967_s20] sm:$0x7] }
0x10da   :  { %5188 = vst.msk [vmem:[#allocation2] sm:$0xff] %vm117_vm0, %v1916_v37 }
0x1112   :  { %v2593_v40 = vpop.xlane.xlu1 %2592 }
0x1113   :  { %v2597_v41 = vmul.f32 %v2593_v40, %v6830_v14  ;;  %v2641_v40 = vperm.slane %v7353_v17, 0 }
0x1115   :  { %v7313_v48 = vsub.f32 %v2589_v29, %v2597_v41  ;;  %v7360_v41 = vld [vmem:[%s7968_s21] sm:$0x7] }
0x1117   :  { %v2601_v35 = vmul.f32 %v7313_v48, %v7313_v48 }
0x1119   :  { %v2603_v43 = vsel %vm117_vm0, %v2601_v35, 0.0 }
0x111a   :  { %v2596_v51 = vpop.xlane.xlu0 %2595  ;;  %2604 = vadd.xlane.f32.xlu2 %v2603_v43 }
0x111b   :  { %v2598_v18 = vmul.f32 %v2596_v51, %v6830_v14 }
0x111d   :  { %v7325_v46 = vsub.f32 %v2590_v5, %v2598_v18  ;;  %v2644_v18 = vperm.slane %v7360_v41, 0 }
0x111f   :  { %v2602_v61 = vmul.f32 %v7325_v46, %v7325_v46 }
0x1121   :  { %v2606_v15 = vsel %vm117_vm0, %v2602_v61, 0.0  ;;  %v7374_v61 = vld [vmem:[%s7962_s15] sm:$0xf] }
0x1122   :  { %2607 = vadd.xlane.f32.xlu0 %v2606_v15  ;;  %v1879_v50 = vpop.xlane.xlu0 %1878 }
0x1123   :  { %v1881_v33 = vmul.f32 0.032258064, %v1879_v50  ;;  %v2696_v50 = vperm.slane %v7374_v61, 1 }
0x1125   :  { %6324 = vrsqrt.f32 %v1881_v33  ;;  %vm1901_vm9 = vcmp.eq.f32.partialorder %v1881_v33, inf  ;;  %v1904_v1 = vand.u32 2147483648, %v1881_v33  ;;  %vm1903_vm10 = vcmp.eq.f32.partialorder %v1881_v33, 0.0 }
0x112b   :  { %v6325_v36 = vpop.eup %6324 }
0x112c   :  { %v1895_v52 = vmul.f32 %v6325_v36, %v1881_v33 }
0x112e   :  { %v1896_v55 = vmul.f32 %v6325_v36, %v1895_v52 }
0x1130   :  { %v1897_v57 = vmul.f32 0.5, %v1896_v55 }
0x1132   :  { %v1898_v58 = vsub.f32 1.5, %v1897_v57 }
0x1134   :  { %v1899_v63 = vmul.f32 %v6325_v36, %v1898_v58 }
0x1136   :  { %v1900_v0 = vmul.f32 %v1899_v63, %v1881_v33 }
0x1138   :  { %v1902_v2 = vsel %vm1901_vm9, %v1881_v33, %v1900_v0 }
0x1139   :  { %v1905_v6 = vsel %vm1903_vm10, %v1904_v1, %v1902_v2  ;;  %v2666_v1 = vperm.slane %v7374_v61, 0 }
0x113a   :  { %v1907_v7 = vadd.f32 1e-06, %v1905_v6 }
0x113c   :  { %6326 = vrcp.f32 %v1907_v7 }
0x1142   :  { %v6327_v8 = vpop.eup %6326 }
0x1143   :  { %v1911_v54 = vmul.f32 %v6327_v8, %v7303_v23 }
0x1145   :  { %v1914_v10 = vmul.f32 %v1912_v28, %v1911_v54 }
0x1147   :  { %v1917_v11 = vadd.f32 %v1915_v44, %v1914_v10 }
0x1149   :  { %v7337_v12 = vpack.c.bf16 %v1917_v11, %v1916_v37  ;;  %5189 = vst.msk [vmem:[#allocation2 + $0x8] sm:$0xff] %vm117_vm0, %v1917_v11 }
0x114b   :  { %5524 = vmatmul.msk.bf16.vlgmr.msrb.gmra.mxu3 %vm117_vm0, %v7337_v12  ;;  %5533 = vmatmul.msk.bf16.vlgmr.msra.gmra.mxu0 %vm117_vm0, %v7337_v12 }
0x118d   :  { %v2605_v60 = vpop.xlane.xlu2 %2604 }
0x118e   :  { %v2609_v29 = vmul.f32 0.032258064, %v2605_v60 }
0x1190   :  { %6328 = vrsqrt.f32 %v2609_v29  ;;  %vm2618_vm11 = vcmp.eq.f32.partialorder %v2609_v29, inf  ;;  %v2621_v22 = vand.u32 2147483648, %v2609_v29  ;;  %vm2620_vm12 = vcmp.eq.f32.partialorder %v2609_v29, 0.0 }
0x1195   :  { %v2608_v9 = vpop.xlane.xlu0 %2607 }
0x1196   :  { %v6329_v53 = vpop.eup %6328  ;;  %v2610_v13 = vmul.f32 0.032258064, %v2608_v9 }
0x1197   :  { %v2612_v5 = vmul.f32 %v6329_v53, %v2609_v29 }
0x1198   :  { %6330 = vrsqrt.f32 %v2610_v13  ;;  %vm2630_vm13 = vcmp.eq.f32.partialorder %v2610_v13, inf  ;;  %v2633_v16 = vand.u32 2147483648, %v2610_v13  ;;  %vm2632_vm14 = vcmp.eq.f32.partialorder %v2610_v13, 0.0 }
0x1199   :  { %v2613_v23 = vmul.f32 %v6329_v53, %v2612_v5 }
0x119b   :  { %v2614_v21 = vmul.f32 0.5, %v2613_v23 }
0x119d   :  { %v2615_v39 = vsub.f32 1.5, %v2614_v21 }
0x119e   :  { %v6331_v56 = vpop.eup %6330 }
0x119f   :  { %v2616_v42 = vmul.f32 %v6329_v53, %v2615_v39  ;;  %v2624_v19 = vmul.f32 %v6331_v56, %v2610_v13 }
0x11a1   :  { %v2617_v24 = vmul.f32 %v2616_v42, %v2609_v29  ;;  %v2625_v25 = vmul.f32 %v6331_v56, %v2624_v19 }
0x11a3   :  { %v2619_v20 = vsel %vm2618_vm11, %v2609_v29, %v2617_v24  ;;  %v2626_v26 = vmul.f32 0.5, %v2625_v25 }
0x11a4   :  { %v2622_v59 = vsel %vm2620_vm12, %v2621_v22, %v2619_v20 }
0x11a5   :  { %v2635_v27 = vadd.f32 1e-06, %v2622_v59  ;;  %v2627_v30 = vsub.f32 1.5, %v2626_v26 }
0x11a7   :  { %v2628_v31 = vmul.f32 %v6331_v56, %v2627_v30  ;;  %6332 = vrcp.f32 %v2635_v27 }
0x11a9   :  { %v2629_v32 = vmul.f32 %v2628_v31, %v2610_v13 }
0x11ab   :  { %v2631_v28 = vsel %vm2630_vm13, %v2610_v13, %v2629_v32 }
0x11ac   :  { %v2634_v34 = vsel %vm2632_vm14, %v2633_v16, %v2631_v28 }
0x11ad   :  { %v2636_v44 = vadd.f32 1e-06, %v2634_v34  ;;  %v6333_v62 = vpop.eup %6332 }
0x11ae   :  { %v2639_v37 = vmul.f32 %v6333_v62, %v7313_v48 }
0x11af   :  { %6334 = vrcp.f32 %v2636_v44 }
0x11b0   :  { %v2642_v51 = vmul.f32 %v2641_v40, %v2639_v37 }
0x11b2   :  { %v7364_v4 = vadd.f32 %v2644_v18, %v2642_v51 }
0x11b5   :  { %v6335_v35 = vpop.eup %6334 }
0x11b6   :  { %v2640_v43 = vmul.f32 %v6335_v35, %v7325_v46  ;;  %v2726_v46 = vperm.slane %v7374_v61, 2 }
0x11b8   :  { %v2643_v38 = vmul.f32 %v2641_v40, %v2640_v43 }
0x11ba   :  { %v7366_v47 = vadd.f32 %v2644_v18, %v2643_v38 }
0x11bc   :  { %v2664_v48 = vpack.c.bf16 %v7366_v47, %v7364_v4 }
0x11be   :  { %5515 = vmatmul.msk.bf16.vlgmr.msrb.gmra.mxu2 %vm117_vm0, %v2664_v48 }
0x11c8   :  { %v2748_v49 = vpop.f32.mrf.mxu0 }
0x11c9   :  { %v7377_v15 = vadd.f32 %v2748_v49, %v2726_v46 }
0x11cb   :  { %v2829_v32 = vpack.c.bf16 %v7377_v15, %v7377_v15 }
0x11cd   :  { %v3105_v44 = vsel %vm547_vm2, %v2829_v32, 0 }
0x11ce   :  { %v2721_v33 = vpop.f32.mrf.mxu3 }
0x11cf   :  { %v2722_v36 = vadd.f32 %v2721_v33, %v2696_v50 }
0x11d0   :  { %v2750_v8 = vpop.f32.mrf.mxu0 }
0x11d1   :  { %2783 = vrot.lane.b32.xlu1 %v2722_v36, %s8014_s25  ;;  %v2801_v52 = vpack.c.bf16 %v2722_v36, %v2722_v36  ;;  %v7390_v29 = vadd.f32 %v2750_v8, %v2726_v46  ;;  %v6474_v46 = vld [vmem:[%s8010_s29] ss:$0 sm:$0xff] }
0x11d3   :  { %v2841_v55 = vsel %vm273_vm1, %v2801_v52, 0  ;;  %v2830_v13 = vpack.c.bf16 %v7390_v29, %v7390_v29 }
0x11d4   :  { %2850 = vmatpush.bf16.xpose.msra.mxu1 %v2841_v55 }
0x11d5   :  { %v3124_v19 = vsel %vm547_vm2, %v2830_v13, 0 }
0x11d6   :  { %v2723_v57 = vpop.f32.mrf.mxu3 }
0x11d7   :  { %v2724_v58 = vadd.f32 %v2723_v57, %v2696_v50 }
0x11d9   :  { %2791 = vrot.lane.b32.xlu0 %v2724_v58, %s8013_s26  ;;  %2795 = vrot.lane.b32.xlu1 %v2722_v36, %s8015_s1  ;;  %v2802_v63 = vpack.c.bf16 %v2724_v58, %v2724_v58 }
0x11db   :  { %v2860_v0 = vsel %vm273_vm1, %v2802_v63, 0 }
0x11dc   :  { %2869 = vmatpush.bf16.xpose.msra.mxu2 %v2860_v0  ;;  %v6475_v0 = vld [vmem:[%s8010_s29 + $0x1] ss:$0 sm:$0xff] }
0x1241   :  { %v2691_v2 = vpop.f32.mrf.mxu2 }
0x1242   :  { %v2692_v6 = vadd.f32 %v2691_v2, %v2666_v1 }
0x1243   :  { %v2784_v7 = vpop.permute.xlu1 %2783 }
0x1244   :  { %v2773_v54 = vpack.c.bf16 %v2692_v6, %v2692_v6  ;;  %v2803_v10 = vpack.c.bf16 %v2784_v7, %v2784_v7  ;;  %2767 = vrot.lane.b32.xlu1 %v2692_v6, %s8015_s1  ;;  %v6031_v11 = vpack.i.bf16 %v2724_v58, %v2692_v6 }
0x1246   :  { %v2879_v60 = vsel %vm273_vm1, %v2803_v10, 0  ;;  %6032 = vrot.lane.b32.xlu2 %v6031_v11, %s8014_s25  ;;  %5534 = vmatmul.msk.bf16.vlgmr.msra.gmra.mxu1 %vm273_vm1, %v2773_v54 }
0x1247   :  { %2888 = vmatpush.bf16.xpose.msra.mxu3 %v2879_v60 }
0x1249   :  { %v2693_v3 = vpop.f32.mrf.mxu2 }
0x124a   :  { %v2694_v45 = vadd.f32 %v2693_v3, %v2666_v1 }
0x124b   :  { %v2792_v9 = vpop.permute.xlu0 %2791  ;;  %v2796_v53 = vpop.permute.xlu1 %2795 }
0x124c   :  { %v2774_v5 = vpack.c.bf16 %v2694_v45, %v2694_v45  ;;  %v2806_v23 = vpack.c.bf16 %v2792_v9, %v2792_v9  ;;  %v2807_v21 = vpack.c.bf16 %v2796_v53, %v2796_v53  ;;  %2757 = vrot.lane.b32.xlu0 %v2694_v45, %s8014_s25  ;;  %2769 = vrot.lane.b32.xlu1 %v2694_v45, %s8015_s1 }
0x124d   :  { %v6036_v39 = vpack.i.bf16 %v2722_v36, %v2694_v45 }
0x124e   :  { %v2936_v56 = vsel %vm273_vm1, %v2806_v23, 0  ;;  %v2955_v42 = vsel %vm273_vm1, %v2807_v21, 0  ;;  %5535 = vmatmul.msk.bf16.vlgmr.msra.gmra.mxu2 %vm273_vm1, %v2774_v5 }
0x124f   :  { %6037 = vrot.lane.b32.xlu2 %v6036_v39, %s8013_s26  ;;  %2945 = vmatpush.bf16.xpose.msrb.mxu2 %v2936_v56 }
0x1250   :  { %2964 = vmatpush.bf16.xpose.msrb.mxu3 %v2955_v42 }
0x1254   :  { %2797 = vrot.lane.b32.xlu0 %v2724_v58, %s8015_s1 }
0x1257   :  { %3133 = vmatpush.bf16.msra.mxu2 %v3124_v19  ;;  %2761 = vrot.lane.b32.xlu2 %v2692_v6, %s8013_s26 }
0x12a0   :  { %v6033_v24 = vpop.permute.xlu2 %6032 }
0x12a1   :  { %v6035_v25 = vunpack.i.h.bf16 %v6033_v24  ;;  %v6034_v22 = vunpack.i.l.bf16 %v6033_v24 }
0x12a3   :  { %v2804_v20 = vpack.c.bf16 %v6035_v25, %v6035_v25  ;;  %v2775_v26 = vpack.c.bf16 %v6034_v22, %v6034_v22 }
0x12a5   :  { %5536 = vmatmul.msk.bf16.vlgmr.msra.gmra.mxu3 %vm273_vm1, %v2775_v26  ;;  %v2898_v59 = vsel %vm273_vm1, %v2804_v20, 0 }
0x12a6   :  { %2907 = vmatpush.bf16.xpose.msrb.mxu0 %v2898_v59 }
0x12a9   :  { %v6038_v27 = vpop.permute.xlu2 %6037 }
0x12aa   :  { %v6040_v30 = vunpack.i.h.bf16 %v6038_v27  ;;  %v6039_v31 = vunpack.i.l.bf16 %v6038_v27 }
0x12ac   :  { %v2805_v16 = vpack.c.bf16 %v6040_v30, %v6040_v30  ;;  %v2778_v28 = vpack.c.bf16 %v6039_v31, %v6039_v31 }
0x12ae   :  { %5539 = vmatmul.msk.bf16.vlgmr.msrb.gmra.mxu2 %vm273_vm1, %v2778_v28  ;;  %v2917_v34 = vsel %vm273_vm1, %v2805_v16, 0 }
0x12af   :  { %2926 = vmatpush.bf16.xpose.msrb.mxu1 %v2917_v34 }
0x12b1   :  { %v2762_v62 = vpop.permute.xlu2 %2761 }
0x12b2   :  { %v2777_v37 = vpack.c.bf16 %v2762_v62, %v2762_v62 }
0x12b6   :  { %5538 = vmatmul.msk.bf16.vlgmr.msrb.gmra.mxu1 %vm273_vm1, %v2777_v37  ;;  %v2768_v40 = vpop.permute.xlu1 %2767 }
0x12b7   :  { %3114 = vmatpush.bf16.msra.mxu1 %v3105_v44  ;;  %v2779_v35 = vpack.c.bf16 %v2768_v40, %v2768_v40  ;;  %v6041_v40 = vpack.i.bf16 %v7390_v29, %v7377_v15 }
0x12b9   :  { %5540 = vmatmul.msk.bf16.vlgmr.msrb.gmra.mxu3 %vm273_vm1, %v2779_v35 }
0x12be   :  { %v2758_v43 = vpop.permute.xlu0 %2757  ;;  %v2770_v55 = vpop.permute.xlu1 %2769 }
0x12bf   :  { %v2776_v51 = vpack.c.bf16 %v2758_v43, %v2758_v43  ;;  %v2780_v57 = vpack.c.bf16 %v2770_v55, %v2770_v55 }
0x12c1   :  { %5537 = vmatmul.msk.bf16.vlgmr.msrb.gmra.mxu0 %vm273_vm1, %v2776_v51 }
0x12c3   :  { %v2852_v18 = vpop.f32.mrf.mxu1 }
0x12c4   :  { %v2989_v38 = vmul.f32 0.35355338, %v2852_v18 }
0x12c6   :  { %v2798_v48 = vpop.permute.xlu0 %2797  ;;  %v2997_v49 = vadd.f32 %v6474_v46, %v2989_v38 }
0x12c7   :  { %v2808_v50 = vpack.c.bf16 %v2798_v48, %v2798_v48 }
0x12c8   :  { %v3005_v33 = vsel %vm273_vm1, %v2997_v49, -inf }
0x12c9   :  { %v2974_v36 = vsel %vm273_vm1, %v2808_v50, 0  ;;  %3006 = vmax.xlane.f32.xlu1 %v3005_v33 }
0x12ca   :  { %2983 = vmatpush.bf16.xpose.msra.mxu0 %v2974_v36 }
0x12cb   :  { %v2854_v52 = vpop.f32.mrf.mxu1 }
0x12d1   :  { %v2871_v58 = vpop.f32.mrf.mxu2  ;;  %5541 = vmatmul.msk.bf16.vlgmr.msra.gmra.mxu0 %vm273_vm1, %v2780_v57 }
0x12d2   :  { %v2990_v63 = vmul.f32 0.35355338, %v2871_v58 }
0x12d4   :  { %v2998_v1 = vadd.f32 %v6475_v0, %v2990_v63 }
0x12d6   :  { %v3008_v2 = vsel %vm273_vm1, %v2998_v1, -inf }
0x12d7   :  { %3009 = vmax.xlane.f32.xlu0 %v3008_v2 }
0x12d9   :  { %v2873_v6 = vpop.f32.mrf.mxu2 }
0x1328   :  { %v2890_v7 = vpop.f32.mrf.mxu3 }
0x1329   :  { %v2991_v8 = vmul.f32 0.35355338, %v2890_v7 }
0x132b   :  { %v2999_v54 = vadd.f32 %v6474_v46, %v2991_v8 }
0x132d   :  { %v3011_v10 = vsel %vm273_vm1, %v2999_v54, -inf }
0x132e   :  { %3012 = vmax.xlane.f32.xlu2 %v3011_v10 }
0x1330   :  { %v2892_v11 = vpop.f32.mrf.mxu3 }
0x1331   :  { %v2947_v60 = vpop.f32.mrf.mxu2 }
0x1332   :  { %v2994_v3 = vmul.f32 0.35355338, %v2947_v60 }
0x1333   :  { %v2928_v45 = vpop.f32.mrf.mxu1 }
0x1334   :  { %v3002_v9 = vadd.f32 %v6475_v0, %v2994_v3  ;;  %v2993_v25 = vmul.f32 0.35355338, %v2928_v45 }
0x1336   :  { %v3020_v53 = vsel %vm273_vm1, %v3002_v9, -inf  ;;  %v3001_v27 = vadd.f32 %v6474_v46, %v2993_v25 }
0x1337   :  { %3021 = vmax.xlane.f32.xlu2 %v3020_v53 }
0x1338   :  { %v3017_v31 = vsel %vm273_vm1, %v3001_v27, -inf }
0x1339   :  { %v2949_v13 = vpop.f32.mrf.mxu2 }
0x133b   :  { %v2930_v5 = vpop.f32.mrf.mxu1 }
0x133c   :  { %v2966_v23 = vpop.f32.mrf.mxu3  ;;  %v3007_v59 = vpop.xlane.xlu1 %3006 }
0x133d   :  { %v2995_v21 = vmul.f32 0.35355338, %v2966_v23  ;;  %v3029_v30 = vsub.f32 %v2997_v49, %v3007_v59  ;;  %v6046_v23 = vpack.i.bf16 %v7377_v15, %v7390_v29 }
0x133e   :  { %v2909_v39 = vpop.f32.mrf.mxu0 }
0x133f   :  { %v2992_v56 = vmul.f32 0.35355338, %v2909_v39  ;;  %v7425_v42 = vadd.f32 %v6474_v46, %v2995_v21  ;;  %v3037_v32 = vmul.f32 1.442695, %v3029_v30 }
0x1341   :  { %v3023_v19 = vsel %vm273_vm1, %v7425_v42, -inf  ;;  %v3000_v24 = vadd.f32 %v6475_v0, %v2992_v56  ;;  %6336 = vpow2.f32 %v3037_v32 }
0x1342   :  { %3024 = vmax.xlane.f32.xlu1 %v3023_v19 }
0x1343   :  { %v3014_v22 = vsel %vm273_vm1, %v3000_v24, -inf }
0x1344   :  { %3015 = vmax.xlane.f32.xlu0 %v3014_v22  ;;  %v2968_v20 = vpop.f32.mrf.mxu3 }
0x1346   :  { %v2911_v26 = vpop.f32.mrf.mxu0 }
0x1347   :  { %v7432_v37 = vpop.eup %6336 }
0x1348   :  { %v3053_v35 = vsel %vm273_vm1, %v7432_v37, 0.0 }
0x134a   :  { %v3010_v43 = vpop.xlane.xlu0 %3009 }
0x134b   :  { %v3030_v51 = vsub.f32 %v2998_v1, %v3010_v43 }
0x134c   :  { %3018 = vmax.xlane.f32.xlu0 %v3017_v31 }
0x134d   :  { %v3039_v18 = vmul.f32 1.442695, %v3030_v51 }
0x134e   :  { %v2985_v16 = vpop.f32.mrf.mxu0 }
0x134f   :  { %v2996_v28 = vmul.f32 0.35355338, %v2985_v16  ;;  %6338 = vpow2.f32 %v3039_v18 }
0x1351   :  { %v3004_v34 = vadd.f32 %v6475_v0, %v2996_v28 }
0x1353   :  { %v3026_v44 = vsel %vm273_vm1, %v3004_v34, -inf }
0x1354   :  { %3027 = vmax.xlane.f32.xlu2 %v3026_v44 }
0x1355   :  { %v7439_v38 = vpop.eup %6338 }
0x1356   :  { %v2987_v62 = vpop.f32.mrf.mxu0  ;;  %v3056_v48 = vsel %vm273_vm1, %v7439_v38, 0.0 }
0x135b   :  { %6042 = vrot.lane.b32.xlu1 %v6041_v40, %s8014_s25 }
0x135c   :  { %3054 = vadd.xlane.f32.xlu2 %v3053_v35 }
0x1385   :  { %3057 = vadd.xlane.f32.xlu1 %v3056_v48 }
0x139e   :  { %2823 = vrot.lane.b32.xlu1 %v7377_v15, %s8015_s1 }
0x13a1   :  { %v3013_v46 = vpop.xlane.xlu2 %3012 }
0x13a2   :  { %v3031_v49 = vsub.f32 %v2999_v54, %v3013_v46 }
0x13a4   :  { %v3041_v50 = vmul.f32 1.442695, %v3031_v49 }
0x13a6   :  { %6340 = vpow2.f32 %v3041_v50  ;;  %2825 = vrot.lane.b32.xlu1 %v7390_v29, %s8015_s1 }
0x13aa   :  { %v3022_v33 = vpop.xlane.xlu2 %3021 }
0x13ab   :  { %v3034_v36 = vsub.f32 %v3002_v9, %v3022_v33 }
0x13ac   :  { %v7447_v52 = vpop.eup %6340 }
0x13ad   :  { %v3047_v55 = vmul.f32 1.442695, %v3034_v36  ;;  %v3059_v57 = vsel %vm273_vm1, %v7447_v52, 0.0 }
0x13ae   :  { %3060 = vadd.xlane.f32.xlu0 %v3059_v57 }
0x13af   :  { %6342 = vpow2.f32 %v3047_v55 }
0x13b5   :  { %v7451_v58 = vpop.eup %6342  ;;  %v3025_v6 = vpop.xlane.xlu1 %3024 }
0x13b6   :  { %v3068_v63 = vsel %vm273_vm1, %v7451_v58, 0.0  ;;  %v3035_v10 = vsub.f32 %v7425_v42, %v3025_v6 }
0x13b7   :  { %3069 = vadd.xlane.f32.xlu2 %v3068_v63  ;;  %v3016_v0 = vpop.xlane.xlu0 %3015 }
0x13b8   :  { %v3032_v1 = vsub.f32 %v3000_v24, %v3016_v0  ;;  %v3049_v3 = vmul.f32 1.442695, %v3035_v10 }
0x13ba   :  { %v3043_v2 = vmul.f32 1.442695, %v3032_v1 }
0x13bc   :  { %6344 = vpow2.f32 %v3043_v2 }
0x13bf   :  { %v3019_v7 = vpop.xlane.xlu0 %3018 }
0x13c0   :  { %v3033_v8 = vsub.f32 %v3001_v27, %v3019_v7 }
0x13c2   :  { %v7455_v54 = vpop.eup %6344  ;;  %v3045_v11 = vmul.f32 1.442695, %v3033_v8 }
0x13c3   :  { %v3062_v60 = vsel %vm273_vm1, %v7455_v54, 0.0 }
0x13c4   :  { %6346 = vpow2.f32 %v3045_v11  ;;  %3063 = vadd.xlane.f32.xlu0 %v3062_v60 }
0x13c5   :  { %6348 = vpow2.f32 %v3049_v3 }
0x13c7   :  { %v3028_v45 = vpop.xlane.xlu2 %3027 }
0x13c8   :  { %v3036_v53 = vsub.f32 %v3004_v34, %v3028_v45 }
0x13ca   :  { %v7460_v9 = vpop.eup %6346  ;;  %v3051_v21 = vmul.f32 1.442695, %v3036_v53 }
0x13cb   :  { %v3065_v13 = vsel %vm273_vm1, %v7460_v9, 0.0  ;;  %v7467_v19 = vpop.eup %6348 }
0x13cc   :  { %3066 = vadd.xlane.f32.xlu0 %v3065_v13  ;;  %v3071_v15 = vsel %vm273_vm1, %v7467_v19, 0.0 }
0x13cd   :  { %v6043_v5 = vpop.permute.xlu1 %6042 }
0x13ce   :  { %v6045_v39 = vunpack.i.h.bf16 %v6043_v5  ;;  %v6044_v56 = vunpack.i.l.bf16 %v6043_v5 }
0x13cf   :  { %6047 = vrot.lane.b32.xlu2 %v6046_v23, %s8013_s26  ;;  %v3055_v42 = vpop.xlane.xlu2 %3054 }
0x13d0   :  { %v2832_v24 = vpack.c.bf16 %v6045_v39, %v6045_v39  ;;  %v2831_v25 = vpack.c.bf16 %v6044_v56, %v6044_v56  ;;  %6350 = vrcp.f32 %v3055_v42 }
0x13d1   :  { %6352 = vpow2.f32 %v3051_v21 }
0x13d2   :  { %v3143_v22 = vsel %vm547_vm2, %v2831_v25, 0  ;;  %v3162_v20 = vsel %vm547_vm2, %v2832_v24, 0 }
0x13d3   :  { %3152 = vmatpush.bf16.msra.mxu3 %v3143_v22  ;;  %3171 = vmatpush.bf16.msrb.mxu0 %v3162_v20 }
0x13d4   :  { %3072 = vadd.xlane.f32.xlu0 %v3071_v15 }
0x13d6   :  { %v6351_v29 = vpop.eup %6350 }
0x13d7   :  { %v3085_v26 = vmul.f32 %v6351_v29, %v7432_v37  ;;  %v6353_v59 = vpop.eup %6352 }
0x13d8   :  { %v3074_v30 = vsel %vm273_vm1, %v6353_v59, 0.0 }
0x13d9   :  { %v3093_v27 = vpack.c.bf16 %v3085_v26, %v3085_v26 }
0x13db   :  { %5542 = vmatmul.msk.bf16.vlgmr.msra.gmra.mxu1 %vm273_vm1, %v3093_v27 }
0x13dc   :  { %3075 = vadd.xlane.f32.xlu0 %v3074_v30 }
0x13f8   :  { %v3058_v31 = vpop.xlane.xlu1 %3057 }
0x13f9   :  { %6354 = vrcp.f32 %v3058_v31 }
0x13ff   :  { %v6355_v32 = vpop.eup %6354 }
0x1400   :  { %v3086_v16 = vmul.f32 %v6355_v32, %v7439_v38 }
0x1402   :  { %v3094_v28 = vpack.c.bf16 %v3086_v16, %v3086_v16 }
0x1404   :  { %5543 = vmatmul.msk.bf16.vlgmr.msra.gmra.mxu2 %vm273_vm1, %v3094_v28  ;;  %v5854_v28 = vld [vmem:[%s7961_s14 + $0x38] sm:$0xff] }
0x1410   :  { %v2824_v34 = vpop.permute.xlu1 %2823 }
0x1411   :  { %v2835_v44 = vpack.c.bf16 %v2824_v34, %v2824_v34  ;;  %v5853_v34 = vld [vmem:[%s7961_s14 + $0x30] sm:$0xff] }
0x1413   :  { %v3219_v62 = vsel %vm547_vm2, %v2835_v44, 0 }
0x1414   :  { %3228 = vmatpush.bf16.msrb.mxu3 %v3219_v62 }
0x1418   :  { %v2826_v37 = vpop.permute.xlu1 %2825 }
0x1419   :  { %v2836_v40 = vpack.c.bf16 %v2826_v37, %v2826_v37 }
0x141b   :  { %v3238_v35 = vsel %vm547_vm2, %v2836_v40, 0 }
0x141c   :  { %3247 = vmatpush.bf16.msra.mxu0 %v3238_v35 }
0x1421   :  { %v3061_v43 = vpop.xlane.xlu0 %3060 }
0x1422   :  { %6356 = vrcp.f32 %v3061_v43 }
0x1428   :  { %v6357_v51 = vpop.eup %6356 }
0x1429   :  { %v3087_v18 = vmul.f32 %v6357_v51, %v7447_v52 }
0x142a   :  { %v3070_v48 = vpop.xlane.xlu2 %3069 }
0x142b   :  { %v3095_v38 = vpack.c.bf16 %v3087_v18, %v3087_v18  ;;  %6358 = vrcp.f32 %v3070_v48 }
0x142d   :  { %5544 = vmatmul.msk.bf16.vlgmr.msra.gmra.mxu3 %vm273_vm1, %v3095_v38 }
0x1431   :  { %v6359_v46 = vpop.eup %6358 }
0x1432   :  { %v6048_v49 = vpop.permute.xlu2 %6047  ;;  %v3090_v36 = vmul.f32 %v6359_v46, %v7451_v58 }
0x1433   :  { %v6050_v50 = vunpack.i.h.bf16 %v6048_v49  ;;  %v6049_v33 = vunpack.i.l.bf16 %v6048_v49 }
0x1434   :  { %v3098_v52 = vpack.c.bf16 %v3090_v36, %v3090_v36 }
0x1435   :  { %v2833_v55 = vpack.c.bf16 %v6050_v50, %v6050_v50  ;;  %v2834_v57 = vpack.c.bf16 %v6049_v33, %v6049_v33 }
0x1437   :  { %v3181_v63 = vsel %vm547_vm2, %v2833_v55, 0  ;;  %v3200_v0 = vsel %vm547_vm2, %v2834_v57, 0  ;;  %v3064_v1 = vpop.xlane.xlu0 %3063  ;;  %v3284_v57 = vperm.slane %v7374_v61, 3 }
0x1438   :  { %3190 = vmatpush.bf16.msrb.mxu1 %v3181_v63  ;;  %3209 = vmatpush.bf16.msrb.mxu2 %v3200_v0  ;;  %6360 = vrcp.f32 %v3064_v1 }
0x143b   :  { %5547 = vmatmul.msk.bf16.vlgmr.msrb.gmra.mxu2 %vm273_vm1, %v3098_v52 }
0x143c   :  { %3306 = vmatpush.bf16.msra.mxu1 %v5854_v28 }
0x143e   :  { %v6361_v2 = vpop.eup %6360 }
0x143f   :  { %v3088_v6 = vmul.f32 %v6361_v2, %v7455_v54  ;;  %v3067_v7 = vpop.xlane.xlu0 %3066 }
0x1440   :  { %6362 = vrcp.f32 %v3067_v7  ;;  %3307 = vmatpush.bf16.msra.mxu1 %v5853_v34 }
0x1441   :  { %v3096_v8 = vpack.c.bf16 %v3088_v6, %v3088_v6 }
0x1443   :  { %5545 = vmatmul.msk.bf16.vlgmr.msrb.gmra.mxu0 %vm273_vm1, %v3096_v8 }
0x1446   :  { %v6363_v58 = vpop.eup %6362 }
0x1447   :  { %v3089_v10 = vmul.f32 %v6363_v58, %v7460_v9  ;;  %v3073_v11 = vpop.xlane.xlu0 %3072 }
0x1448   :  { %6364 = vrcp.f32 %v3073_v11 }
0x1449   :  { %v3097_v60 = vpack.c.bf16 %v3089_v10, %v3089_v10 }
0x144b   :  { %5546 = vmatmul.msk.bf16.vlgmr.msrb.gmra.mxu1 %vm273_vm1, %v3097_v60 }
0x144e   :  { %v6365_v3 = vpop.eup %6364 }
0x144f   :  { %v3091_v45 = vmul.f32 %v6365_v3, %v7467_v19  ;;  %v3076_v53 = vpop.xlane.xlu0 %3075 }
0x1450   :  { %6366 = vrcp.f32 %v3076_v53 }
0x1451   :  { %v3099_v13 = vpack.c.bf16 %v3091_v45, %v3091_v45 }
0x1453   :  { %5548 = vmatmul.msk.bf16.vlgmr.msrb.gmra.mxu3 %vm273_vm1, %v3099_v13 }
0x1456   :  { %v6367_v54 = vpop.eup %6366 }
0x1457   :  { %v3092_v5 = vmul.f32 %v6367_v54, %v6353_v59 }
0x1458   :  { %v3116_v23 = vpop.f32.mrf.mxu1 }
0x1459   :  { %v3100_v21 = vpack.c.bf16 %v3092_v5, %v3092_v5  ;;  %v5856_v5 = vld [vmem:[%s7963_s16 + $0x8] sm:$0xff] }
0x145a   :  { %3419 = vmatpush.bf16.msra.mxu2 %v5856_v5 }
0x145b   :  { %5549 = vmatmul.msk.bf16.vlgmr.msra.gmra.mxu0 %vm273_vm1, %v3100_v21 }
0x1460   :  { %v3118_v9 = vpop.f32.mrf.mxu1 }
0x1487   :  { %v3135_v39 = vpop.f32.mrf.mxu2 }
0x148f   :  { %v3137_v56 = vpop.f32.mrf.mxu2 }
0x14b0   :  { %v3154_v42 = vpop.f32.mrf.mxu3 }
0x14b8   :  { %v3156_v24 = vpop.f32.mrf.mxu3 }
0x14be   :  { %v3211_v25 = vpop.f32.mrf.mxu2 }
0x14c0   :  { %v3173_v22 = vpop.f32.mrf.mxu0 }
0x14c1   :  { %v6051_v20 = vpack.i.bf16 %v3173_v22, %v3154_v42 }
0x14c3   :  { %6052 = vrot.lane.b32.xlu0 %v6051_v20, %s8016_s27  ;;  %v5864_v20 = vld [vmem:[%s8021_s18 + $0x38] sm:$0xff] }
0x14c4   :  { %3481 = vmatpush.bf16.msra.mxu3 %v5864_v20 }
0x14c6   :  { %v3213_v19 = vpop.f32.mrf.mxu2 }
0x14c8   :  { %v3175_v15 = vpop.f32.mrf.mxu0  ;;  %v3192_v29 = vpop.f32.mrf.mxu1 }
0x14c9   :  { %v6056_v26 = vpack.i.bf16 %v3211_v25, %v3192_v29  ;;  %v5863_v29 = vld [vmem:[%s8021_s18 + $0x30] sm:$0xff] }
0x14ca   :  { %3482 = vmatpush.bf16.msra.mxu3 %v5863_v29 }
0x14cb   :  { %6057 = vrot.lane.b32.xlu2 %v6056_v26, %s8018_s2 }
0x14d0   :  { %v3194_v59 = vpop.f32.mrf.mxu1 }
0x14d6   :  { %v3230_v27 = vpop.f32.mrf.mxu3 }
0x14d8   :  { %v3249_v30 = vpop.f32.mrf.mxu0 }
0x14d9   :  { %v6061_v31 = vpack.i.bf16 %v3249_v30, %v3230_v27 }
0x14db   :  { %6062 = vrot.lane.b32.xlu1 %v6061_v31, %s8017_s4 }
0x14de   :  { %v3232_v32 = vpop.f32.mrf.mxu3 }
0x14e0   :  { %v3251_v16 = vpop.f32.mrf.mxu0 }
0x14e1   :  { %v5862_v16 = vld [vmem:[%s8021_s18 + $0x28] sm:$0xff] }
0x14e2   :  { %3483 = vmatpush.bf16.msra.mxu3 %v5862_v16 }
0x1525   :  { %v6058_v40 = vpop.permute.xlu2 %6057 }
0x1526   :  { %v6060_v51 = vunpack.i.h.bf16 %v6058_v40  ;;  %v6059_v18 = vunpack.i.l.bf16 %v6058_v40 }
0x1535   :  { %v6053_v44 = vpop.permute.xlu0 %6052 }
0x1536   :  { %v6055_v62 = vunpack.i.h.bf16 %v6053_v44  ;;  %v6054_v37 = vunpack.i.l.bf16 %v6053_v44 }
0x1538   :  { %v3278_v35 = vsel %vm273_vm1, %v3135_v39, %v6055_v62  ;;  %v3277_v43 = vsel %vm273_vm1, %v3116_v23, %v6054_v37  ;;  %v5855_v23 = vld [vmem:[%s7963_s16] sm:$0xff] }
0x1539   :  { %v3279_v49 = vsel %vm723_vm3, %v3277_v43, %v6059_v18  ;;  %v3280_v50 = vsel %vm723_vm3, %v3278_v35, %v6060_v51  ;;  %3420 = vmatpush.bf16.msra.mxu2 %v5855_v23  ;;  %v5861_v62 = vld [vmem:[%s8021_s18 + $0x20] sm:$0xff] }
0x153a   :  { %3484 = vmatpush.bf16.msra.mxu3 %v5861_v62 }
0x154d   :  { %v6063_v48 = vpop.permute.xlu1 %6062 }
0x154e   :  { %v6065_v38 = vunpack.i.h.bf16 %v6063_v48  ;;  %v6064_v46 = vunpack.i.l.bf16 %v6063_v48 }
0x1550   :  { %v3281_v33 = vsel %vm726_vm4, %v3279_v49, %v6064_v46  ;;  %v3282_v36 = vsel %vm726_vm4, %v3280_v50, %v6065_v38  ;;  %v3366_v38 = vperm.slane %v7353_v17, 1 }
0x1551   :  { %v3283_v55 = vpack.c.bf16 %v3282_v36, %v3281_v33  ;;  %v3369_v33 = vperm.slane %v7360_v41, 1 }
0x1553   :  { %5558 = vmatmul.msk.bf16.vlgmr.msra.gmra.mxu1 %vm117_vm0, %v3283_v55 }
0x15d0   :  { %v3309_v63 = vpop.f32.mrf.mxu1 }
0x15d1   :  { %v3310_v0 = vadd.f32 %v3309_v63, %v3284_v57 }
0x15d3   :  { %v3314_v1 = vadd.f32 %v3310_v0, %v7364_v4  ;;  %v5860_v0 = vld [vmem:[%s8021_s18 + $0x18] sm:$0xff] }
0x15d4   :  { %3485 = vmatpush.bf16.msra.mxu3 %v5860_v0 }
0x15d5   :  { %v3316_v52 = vsel %vm117_vm0, %v3314_v1, 0.0 }
0x15d6   :  { %3317 = vadd.xlane.f32.xlu2 %v3316_v52  ;;  %v5858_v52 = vld [vmem:[%s8021_s18 + $0x8] sm:$0xff] }
0x15d8   :  { %v3311_v2 = vpop.f32.mrf.mxu1 }
0x15d9   :  { %v3312_v6 = vadd.f32 %v3311_v2, %v3284_v57  ;;  %v5857_v2 = vld [vmem:[%s8021_s18] sm:$0xff] }
0x15db   :  { %v3315_v7 = vadd.f32 %v3312_v6, %v7366_v47 }
0x15dd   :  { %v3319_v8 = vsel %vm117_vm0, %v3315_v7, 0.0 }
0x15de   :  { %3320 = vadd.xlane.f32.xlu1 %v3319_v8 }
0x1649   :  { %v3318_v58 = vpop.xlane.xlu2 %3317 }
0x164a   :  { %v3322_v10 = vmul.f32 %v3318_v58, %v6830_v14 }
0x164c   :  { %v3324_v11 = vsub.f32 %v3314_v1, %v3322_v10  ;;  %v5859_v1 = vld [vmem:[%s8021_s18 + $0x10] sm:$0xff] }
0x164d   :  { %3486 = vmatpush.bf16.msra.mxu3 %v5859_v1 }
0x164e   :  { %v3326_v60 = vmul.f32 %v3324_v11, %v3324_v11 }
0x1650   :  { %v3328_v61 = vsel %vm117_vm0, %v3326_v60, 0.0 }
0x1651   :  { %v3321_v3 = vpop.xlane.xlu1 %3320  ;;  %3329 = vadd.xlane.f32.xlu0 %v3328_v61  ;;  %3487 = vmatpush.bf16.msra.mxu3 %v5858_v52 }
0x1652   :  { %v3323_v4 = vmul.f32 %v3321_v3, %v6830_v14  ;;  %v6195_v3 = vld [vmem:[%s8023_s6] ss:$0 sm:$0xff] }
0x1654   :  { %v3325_v45 = vsub.f32 %v3315_v7, %v3323_v4  ;;  %v6194_v7 = vld [vmem:[%s8022_s11] ss:$0 sm:$0xff] }
0x1655   :  { %3488 = vmatpush.bf16.msra.mxu3 %v5857_v2 }
0x1656   :  { %v3327_v53 = vmul.f32 %v3325_v45, %v3325_v45 }
0x1658   :  { %v3331_v13 = vsel %vm117_vm0, %v3327_v53, 0.0 }
0x1659   :  { %3332 = vadd.xlane.f32.xlu2 %v3331_v13 }
0x16c4   :  { %v3330_v47 = vpop.xlane.xlu0 %3329 }
0x16c5   :  { %v3334_v54 = vmul.f32 0.032258064, %v3330_v47 }
0x16c7   :  { %6368 = vrsqrt.f32 %v3334_v54  ;;  %vm3343_vm15 = vcmp.eq.f32.partialorder %v3334_v54, inf  ;;  %v3346_v27 = vand.u32 2147483648, %v3334_v54  ;;  %vm3345_vm5 = vcmp.eq.f32.partialorder %v3334_v54, 0.0 }
0x16cc   :  { %v3333_v21 = vpop.xlane.xlu2 %3332 }
0x16cd   :  { %v6369_v9 = vpop.eup %6368  ;;  %v3335_v39 = vmul.f32 0.032258064, %v3333_v21 }
0x16ce   :  { %v3337_v56 = vmul.f32 %v6369_v9, %v3334_v54 }
0x16cf   :  { %6370 = vrsqrt.f32 %v3335_v39  ;;  %vm3355_vm6 = vcmp.eq.f32.partialorder %v3335_v39, inf  ;;  %v3358_v40 = vand.u32 2147483648, %v3335_v39  ;;  %vm3357_vm7 = vcmp.eq.f32.partialorder %v3335_v39, 0.0 }
0x16d0   :  { %v3338_v42 = vmul.f32 %v6369_v9, %v3337_v56 }
0x16d2   :  { %v3339_v24 = vmul.f32 0.5, %v3338_v42 }
0x16d4   :  { %v3340_v25 = vsub.f32 1.5, %v3339_v24 }
0x16d5   :  { %v6371_v22 = vpop.eup %6370 }
0x16d6   :  { %v3341_v19 = vmul.f32 %v6369_v9, %v3340_v25  ;;  %v3349_v15 = vmul.f32 %v6371_v22, %v3335_v39 }
0x16d8   :  { %v3342_v26 = vmul.f32 %v3341_v19, %v3334_v54  ;;  %v3350_v59 = vmul.f32 %v6371_v22, %v3349_v15 }
0x16da   :  { %v3344_v30 = vsel %vm3343_vm15, %v3334_v54, %v3342_v26  ;;  %v3351_v31 = vmul.f32 0.5, %v3350_v59  ;;  %v5866_v26 = vld [vmem:[%s7959_s12 + $0x48] sm:$0xff]  ;;  %v5868_v59 = vld [vmem:[%s7959_s12 + $0x58] sm:$0xff] }
0x16db   :  { %v3347_v32 = vsel %vm3345_vm5, %v3346_v27, %v3344_v30  ;;  %v5870_v27 = vld [vmem:[%s7959_s12 + $0x68] sm:$0xff]  ;;  %3599 = vmatpush.bf16.msrb.mxu0 %v5866_v26  ;;  %3626 = vmatpush.bf16.msrb.mxu1 %v5868_v59  ;;  %v5865_v30 = vld [vmem:[%s7959_s12 + $0x40] sm:$0xff] }
0x16dc   :  { %v3360_v28 = vadd.f32 1e-06, %v3347_v32  ;;  %v3352_v34 = vsub.f32 1.5, %v3351_v31  ;;  %v5867_v31 = vld [vmem:[%s7959_s12 + $0x50] sm:$0xff]  ;;  %3653 = vmatpush.bf16.msrb.mxu2 %v5870_v27  ;;  %v5869_v32 = vld [vmem:[%s7959_s12 + $0x60] sm:$0xff] }
0x16de   :  { %v3353_v44 = vmul.f32 %v6371_v22, %v3352_v34  ;;  %6372 = vrcp.f32 %v3360_v28 }
0x16df   :  { %3600 = vmatpush.bf16.msrb.mxu0 %v5865_v30  ;;  %3627 = vmatpush.bf16.msrb.mxu1 %v5867_v31 }
0x16e0   :  { %v3354_v37 = vmul.f32 %v3353_v44, %v3335_v39  ;;  %3654 = vmatpush.bf16.msrb.mxu2 %v5869_v32 }
0x16e2   :  { %v3356_v35 = vsel %vm3355_vm6, %v3335_v39, %v3354_v37 }
0x16e3   :  { %v3359_v43 = vsel %vm3357_vm7, %v3358_v40, %v3356_v35 }
0x16e4   :  { %v3361_v51 = vadd.f32 1e-06, %v3359_v43  ;;  %v6373_v18 = vpop.eup %6372 }
0x16e5   :  { %v3364_v48 = vmul.f32 %v6373_v18, %v3324_v11 }
0x16e6   :  { %6374 = vrcp.f32 %v3361_v51 }
0x16e7   :  { %v3367_v50 = vmul.f32 %v3366_v38, %v3364_v48 }
0x16e9   :  { %v3370_v55 = vadd.f32 %v3369_v33, %v3367_v50 }
0x16ec   :  { %v6375_v46 = vpop.eup %6374 }
0x16ed   :  { %v3365_v49 = vmul.f32 %v6375_v46, %v3325_v45 }
0x16ef   :  { %v3368_v36 = vmul.f32 %v3366_v38, %v3365_v49 }
0x16f1   :  { %v3371_v57 = vadd.f32 %v3369_v33, %v3368_v36 }
0x16f3   :  { %v3394_v63 = vpack.c.bf16 %v3371_v57, %v3370_v55 }
0x16f5   :  { %5567 = vmatmul.msk.bf16.vlgmr.msra.gmra.mxu2 %vm117_vm0, %v3394_v63 }
0x1778   :  { %v3422_v6 = vpop.f32.mrf.mxu2 }
0x1779   :  { %v3423_v8 = vadd.f32 %v6194_v7, %v3422_v6 }
0x177b   :  { %v3427_v11 = vmax.f32 %v3423_v8, 0.0 }
0x1780   :  { %v3424_v58 = vpop.f32.mrf.mxu2 }
0x1781   :  { %v3425_v10 = vadd.f32 %v6194_v7, %v3424_v58  ;;  %v3547_v7 = vperm.slane %v7353_v17, 2  ;;  %v7595_v17 = vld [vmem:[%s7960_s13 + $0x4] sm:$0xf] }
0x1783   :  { %v3428_v60 = vmax.f32 %v3425_v10, 0.0 }
0x1785   :  { %v3429_v61 = vpack.c.bf16 %v3428_v60, %v3427_v11  ;;  %v3550_v11 = vperm.slane %v7360_v41, 2  ;;  %v3607_v41 = vperm.slane %v7595_v17, 1 }
0x1787   :  { %3489 = vmatmul.bf16.vlgmr.msra.gmra.mxu3 %v3429_v61 }
0x180a   :  { %v3490_v4 = vpop.f32.mrf.mxu3 }
0x180b   :  { %v3491_v45 = vadd.f32 %v6195_v3, %v3490_v4 }
0x180d   :  { %v3495_v53 = vadd.f32 %v3491_v45, %v3370_v55 }
0x180f   :  { %v3497_v13 = vsel %vm117_vm0, %v3495_v53, 0.0 }
0x1810   :  { %3498 = vadd.xlane.f32.xlu1 %v3497_v13 }
0x1812   :  { %v3492_v47 = vpop.f32.mrf.mxu3 }
0x1813   :  { %v3493_v54 = vadd.f32 %v6195_v3, %v3492_v47 }
0x1815   :  { %v3496_v5 = vadd.f32 %v3493_v54, %v3371_v57  ;;  %v3577_v54 = vperm.slane %v7595_v17, 0 }
0x1817   :  { %v3500_v23 = vsel %vm117_vm0, %v3496_v5, 0.0 }
0x1818   :  { %3501 = vadd.xlane.f32.xlu2 %v3500_v23 }
0x1883   :  { %v3499_v21 = vpop.xlane.xlu1 %3498 }
0x1884   :  { %v3503_v9 = vmul.f32 %v3499_v21, %v6830_v14 }
0x1886   :  { %v3505_v39 = vsub.f32 %v3495_v53, %v3503_v9 }
0x1888   :  { %v3507_v56 = vmul.f32 %v3505_v39, %v3505_v39 }
0x188a   :  { %v3509_v42 = vsel %vm117_vm0, %v3507_v56, 0.0 }
0x188b   :  { %v3502_v24 = vpop.xlane.xlu2 %3501  ;;  %3510 = vadd.xlane.f32.xlu0 %v3509_v42 }
0x188c   :  { %v3504_v25 = vmul.f32 %v3502_v24, %v6830_v14 }
0x188e   :  { %v3506_v22 = vsub.f32 %v3496_v5, %v3504_v25 }
0x1890   :  { %v3508_v20 = vmul.f32 %v3506_v22, %v3506_v22 }
0x1892   :  { %v3512_v19 = vsel %vm117_vm0, %v3508_v20, 0.0  ;;  %v3634_v20 = vperm.slane %v7595_v17, 2 }
0x1893   :  { %3513 = vadd.xlane.f32.xlu1 %v3512_v19 }
0x18fe   :  { %v3511_v15 = vpop.xlane.xlu0 %3510 }
0x18ff   :  { %v3515_v29 = vmul.f32 0.032258064, %v3511_v15 }
0x1901   :  { %6376 = vrsqrt.f32 %v3515_v29  ;;  %vm3524_vm8 = vcmp.eq.f32.partialorder %v3515_v29, inf  ;;  %v3527_v38 = vand.u32 2147483648, %v3515_v29  ;;  %vm3526_vm9 = vcmp.eq.f32.partialorder %v3515_v29, 0.0 }
0x1906   :  { %v3514_v16 = vpop.xlane.xlu1 %3513 }
0x1907   :  { %v6377_v28 = vpop.eup %6376  ;;  %v3516_v34 = vmul.f32 0.032258064, %v3514_v16 }
0x1908   :  { %v3518_v44 = vmul.f32 %v6377_v28, %v3515_v29 }
0x1909   :  { %6378 = vrsqrt.f32 %v3516_v34  ;;  %vm3536_vm10 = vcmp.eq.f32.partialorder %v3516_v34, inf  ;;  %v3539_v63 = vand.u32 2147483648, %v3516_v34  ;;  %vm3538_vm11 = vcmp.eq.f32.partialorder %v3516_v34, 0.0 }
0x190a   :  { %v3519_v62 = vmul.f32 %v6377_v28, %v3518_v44 }
0x190c   :  { %v3520_v37 = vmul.f32 0.5, %v3519_v62 }
0x190e   :  { %v3521_v40 = vsub.f32 1.5, %v3520_v37 }
0x190f   :  { %v6379_v35 = vpop.eup %6378 }
0x1910   :  { %v3522_v43 = vmul.f32 %v6377_v28, %v3521_v40  ;;  %v3530_v51 = vmul.f32 %v6379_v35, %v3516_v34 }
0x1912   :  { %v3523_v18 = vmul.f32 %v3522_v43, %v3515_v29  ;;  %v3531_v48 = vmul.f32 %v6379_v35, %v3530_v51 }
0x1914   :  { %v3525_v46 = vsel %vm3524_vm8, %v3515_v29, %v3523_v18  ;;  %v3532_v49 = vmul.f32 0.5, %v3531_v48 }
0x1915   :  { %v3528_v50 = vsel %vm3526_vm9, %v3527_v38, %v3525_v46 }
0x1916   :  { %v3541_v33 = vadd.f32 1e-06, %v3528_v50  ;;  %v3533_v36 = vsub.f32 1.5, %v3532_v49 }
0x1918   :  { %v3534_v55 = vmul.f32 %v6379_v35, %v3533_v36  ;;  %6380 = vrcp.f32 %v3541_v33 }
0x191a   :  { %v3535_v57 = vmul.f32 %v3534_v55, %v3516_v34 }
0x191c   :  { %v3537_v0 = vsel %vm3536_vm10, %v3516_v34, %v3535_v57 }
0x191d   :  { %v3540_v1 = vsel %vm3538_vm11, %v3539_v63, %v3537_v0 }
0x191e   :  { %v3542_v52 = vadd.f32 1e-06, %v3540_v1  ;;  %v6381_v2 = vpop.eup %6380 }
0x191f   :  { %v3545_v6 = vmul.f32 %v6381_v2, %v3505_v39 }
0x1920   :  { %6382 = vrcp.f32 %v3542_v52 }
0x1921   :  { %v3548_v10 = vmul.f32 %v3547_v7, %v3545_v6 }
0x1923   :  { %v7583_v61 = vadd.f32 %v3550_v11, %v3548_v10 }
0x1926   :  { %v6383_v8 = vpop.eup %6382 }
0x1927   :  { %v3546_v58 = vmul.f32 %v6383_v8, %v3506_v22 }
0x1929   :  { %v3549_v60 = vmul.f32 %v3547_v7, %v3546_v58 }
0x192b   :  { %v7585_v3 = vadd.f32 %v3550_v11, %v3549_v60  ;;  %v6476_v60 = vld [vmem:[%s8020_s19] ss:$0 sm:$0xff] }
0x192d   :  { %v3576_v4 = vpack.c.bf16 %v7585_v3, %v7583_v61 }
0x192f   :  { %5627 = vmatmul.msk.bf16.vlgmr.msrb.gmra.mxu0 %vm117_vm0, %v3576_v4  ;;  %5636 = vmatmul.msk.bf16.vlgmr.msrb.gmra.mxu1 %vm117_vm0, %v3576_v4 }
0x1930   :  { %5645 = vmatmul.msk.bf16.vlgmr.msrb.gmra.mxu2 %vm117_vm0, %v3576_v4 }
0x19ac   :  { %v3602_v45 = vpop.f32.mrf.mxu0  ;;  %v3629_v53 = vpop.f32.mrf.mxu1 }
0x19ad   :  { %v3630_v13 = vadd.f32 %v3629_v53, %v3607_v41  ;;  %v3603_v21 = vadd.f32 %v3602_v45, %v3577_v54 }
0x19af   :  { %v3709_v47 = vpack.c.bf16 %v3630_v13, %v3630_v13  ;;  %v3681_v22 = vpack.c.bf16 %v3603_v21, %v3603_v21 }
0x19b1   :  { %v3749_v5 = vsel %vm273_vm1, %v3709_v47, 0 }
0x19b2   :  { %3758 = vmatpush.bf16.xpose.msra.mxu0 %v3749_v5 }
0x19b3   :  { %v3656_v23 = vpop.f32.mrf.mxu2 }
0x19b4   :  { %v3604_v9 = vpop.f32.mrf.mxu0  ;;  %v3631_v39 = vpop.f32.mrf.mxu1  ;;  %v3657_v26 = vadd.f32 %v3656_v23, %v3634_v20 }
0x19b5   :  { %v3605_v56 = vadd.f32 %v3604_v9, %v3577_v54  ;;  %v3632_v42 = vadd.f32 %v3631_v39, %v3607_v41 }
0x19b6   :  { %v3737_v43 = vpack.c.bf16 %v3657_v26, %v3657_v26 }
0x19b7   :  { %v6076_v24 = vpack.i.bf16 %v3632_v42, %v3630_v13  ;;  %v6071_v25 = vpack.i.bf16 %v3605_v56, %v3603_v21  ;;  %v3710_v19 = vpack.c.bf16 %v3632_v42, %v3632_v42  ;;  %v3682_v30 = vpack.c.bf16 %v3605_v56, %v3605_v56 }
0x19b8   :  { %v4013_v49 = vsel %vm547_vm2, %v3737_v43, 0 }
0x19b9   :  { %6077 = vrot.lane.b32.xlu1 %v6076_v24, %s8015_s1  ;;  %6067 = vrot.lane.b32.xlu2 %v6076_v24, %s8014_s25  ;;  %v3768_v15 = vsel %vm273_vm1, %v3710_v19, 0 }
0x19ba   :  { %6072 = vrot.lane.b32.xlu0 %v6071_v25, %s8014_s25  ;;  %5646 = vmatmul.msk.bf16.vlgmr.msra.gmra.mxu0 %vm273_vm1, %v3681_v22 }
0x19bb   :  { %v3658_v29 = vpop.f32.mrf.mxu2  ;;  %3777 = vmatpush.bf16.xpose.msra.mxu1 %v3768_v15  ;;  %v6477_v15 = vld [vmem:[%s8020_s19 + $0x1] ss:$0 sm:$0xff] }
0x19bc   :  { %v3659_v59 = vadd.f32 %v3658_v29, %v3634_v20 }
0x19be   :  { %v7606_v27 = vpack.i.bf16 %v3659_v59, %v3657_v26  ;;  %v3738_v51 = vpack.c.bf16 %v3659_v59, %v3659_v59 }
0x19c0   :  { %v4032_v50 = vsel %vm547_vm2, %v3738_v51, 0 }
0x19c1   :  { %6087 = vrot.lane.b32.xlu2 %v6076_v24, %s8013_s26 }
0x19c2   :  { %5647 = vmatmul.msk.bf16.vlgmr.msra.gmra.mxu1 %vm273_vm1, %v3682_v30  ;;  %6082 = vrot.lane.b32.xlu0 %v6071_v25, %s8015_s1 }
0x19ca   :  { %6092 = vrot.lane.b32.xlu0 %v6071_v25, %s8013_s26 }
0x1a13   :  { %v6068_v31 = vpop.permute.xlu2 %6067 }
0x1a14   :  { %v6070_v32 = vunpack.i.h.bf16 %v6068_v31  ;;  %v6069_v16 = vunpack.i.l.bf16 %v6068_v31 }
0x1a16   :  { %v3712_v28 = vpack.c.bf16 %v6070_v32, %v6070_v32  ;;  %v3711_v34 = vpack.c.bf16 %v6069_v16, %v6069_v16 }
0x1a18   :  { %v3787_v44 = vsel %vm273_vm1, %v3711_v34, 0  ;;  %v3806_v62 = vsel %vm273_vm1, %v3712_v28, 0 }
0x1a19   :  { %3796 = vmatpush.bf16.xpose.msra.mxu2 %v3787_v44  ;;  %3815 = vmatpush.bf16.xpose.msrb.mxu3 %v3806_v62 }
0x1a1b   :  { %v6088_v37 = vpop.permute.xlu2 %6087 }
0x1a1c   :  { %v6090_v40 = vunpack.i.h.bf16 %v6088_v37  ;;  %v6089_v35 = vunpack.i.l.bf16 %v6088_v37 }
0x1a1e   :  { %v3714_v18 = vpack.c.bf16 %v6090_v40, %v6090_v40  ;;  %v3713_v48 = vpack.c.bf16 %v6089_v35, %v6089_v35 }
0x1a20   :  { %v3825_v38 = vsel %vm273_vm1, %v3713_v48, 0  ;;  %v3844_v46 = vsel %vm273_vm1, %v3714_v18, 0 }
0x1a21   :  { %3834 = vmatpush.bf16.xpose.msrb.mxu0 %v3825_v38  ;;  %3853 = vmatpush.bf16.xpose.msrb.mxu1 %v3844_v46 }
0x1a29   :  { %4022 = vmatpush.bf16.msra.mxu0 %v4013_v49  ;;  %4041 = vmatpush.bf16.msra.mxu1 %v4032_v50 }
0x1a2b   :  { %v6078_v33 = vpop.permute.xlu1 %6077 }
0x1a2c   :  { %v6080_v36 = vunpack.i.h.bf16 %v6078_v33  ;;  %v6079_v55 = vunpack.i.l.bf16 %v6078_v33  ;;  %v6073_v57 = vpop.permute.xlu0 %6072 }
0x1a2d   :  { %v6075_v63 = vunpack.i.h.bf16 %v6073_v57  ;;  %v6074_v0 = vunpack.i.l.bf16 %v6073_v57 }
0x1a2e   :  { %v3716_v1 = vpack.c.bf16 %v6080_v36, %v6080_v36  ;;  %v3715_v52 = vpack.c.bf16 %v6079_v55, %v6079_v55 }
0x1a2f   :  { %v3684_v2 = vpack.c.bf16 %v6075_v63, %v6075_v63  ;;  %v3683_v6 = vpack.c.bf16 %v6074_v0, %v6074_v0 }
0x1a30   :  { %v3863_v7 = vsel %vm273_vm1, %v3715_v52, 0  ;;  %v3882_v8 = vsel %vm273_vm1, %v3716_v1, 0 }
0x1a31   :  { %5648 = vmatmul.msk.bf16.vlgmr.msra.gmra.mxu2 %vm273_vm1, %v3683_v6  ;;  %5649 = vmatmul.msk.bf16.vlgmr.msrb.gmra.mxu3 %vm273_vm1, %v3684_v2 }
0x1a32   :  { %3872 = vmatpush.bf16.xpose.msrb.mxu2 %v3863_v7  ;;  %3891 = vmatpush.bf16.xpose.msra.mxu3 %v3882_v8 }
0x1a34   :  { %v6083_v58 = vpop.permute.xlu0 %6082 }
0x1a35   :  { %v6085_v41 = vunpack.i.h.bf16 %v6083_v58  ;;  %v6084_v45 = vunpack.i.l.bf16 %v6083_v58 }
0x1a37   :  { %v3760_v10 = vpop.f32.mrf.mxu0  ;;  %v3688_v39 = vpack.c.bf16 %v6085_v41, %v6085_v41  ;;  %v3687_v56 = vpack.c.bf16 %v6084_v45, %v6084_v45 }
0x1a38   :  { %v3897_v11 = vmul.f32 0.35355338, %v3760_v10 }
0x1a3a   :  { %v3905_v4 = vadd.f32 %v6476_v60, %v3897_v11 }
0x1a3c   :  { %v6093_v53 = vpop.permute.xlu0 %6092  ;;  %v3913_v13 = vsel %vm273_vm1, %v3905_v4, -inf }
0x1a3d   :  { %v6095_v47 = vunpack.i.h.bf16 %v6093_v53  ;;  %v6094_v54 = vunpack.i.l.bf16 %v6093_v53  ;;  %3914 = vmax.xlane.f32.xlu0 %v3913_v13 }
0x1a3f   :  { %v3686_v5 = vpack.c.bf16 %v6095_v47, %v6095_v47  ;;  %v3685_v23 = vpack.c.bf16 %v6094_v54, %v6094_v54  ;;  %v3762_v21 = vpop.f32.mrf.mxu0  ;;  %v3779_v9 = vpop.f32.mrf.mxu1 }
0x1a40   :  { %v3898_v26 = vmul.f32 0.35355338, %v3779_v9 }
0x1a41   :  { %5650 = vmatmul.msk.bf16.vlgmr.msrb.gmra.mxu0 %vm273_vm1, %v3685_v23  ;;  %5651 = vmatmul.msk.bf16.vlgmr.msrb.gmra.mxu1 %vm273_vm1, %v3686_v5 }
0x1a42   :  { %5652 = vmatmul.msk.bf16.vlgmr.msrb.gmra.mxu2 %vm273_vm1, %v3687_v56  ;;  %5653 = vmatmul.msk.bf16.vlgmr.msra.gmra.mxu3 %vm273_vm1, %v3688_v39  ;;  %v3906_v16 = vadd.f32 %v6477_v15, %v3898_v26 }
0x1a44   :  { %v3916_v37 = vsel %vm273_vm1, %v3906_v16, -inf }
0x1a47   :  { %v3781_v42 = vpop.f32.mrf.mxu1 }
0x1ab0   :  { %v3915_v35 = vpop.xlane.xlu0 %3914 }
0x1ab1   :  { %v3937_v33 = vsub.f32 %v3905_v4, %v3915_v35 }
0x1ab3   :  { %v3945_v63 = vmul.f32 1.442695, %v3937_v33 }
0x1ab4   :  { %v3798_v24 = vpop.f32.mrf.mxu2  ;;  %v3817_v25 = vpop.f32.mrf.mxu3 }
0x1ab5   :  { %v3899_v22 = vmul.f32 0.35355338, %v3798_v24  ;;  %v3900_v20 = vmul.f32 0.35355338, %v3817_v25  ;;  %6384 = vpow2.f32 %v3945_v63 }
0x1ab7   :  { %v3907_v19 = vadd.f32 %v6476_v60, %v3899_v22  ;;  %v3908_v29 = vadd.f32 %v6477_v15, %v3900_v20 }
0x1ab9   :  { %v3922_v59 = vsel %vm273_vm1, %v3908_v29, -inf  ;;  %v3919_v30 = vsel %vm273_vm1, %v3907_v19, -inf }
0x1aba   :  { %3923 = vmax.xlane.f32.xlu2 %v3922_v59  ;;  %3920 = vmax.xlane.f32.xlu1 %v3919_v30 }
0x1abb   :  { %v7640_v6 = vpop.eup %6384 }
0x1abc   :  { %v3800_v31 = vpop.f32.mrf.mxu2  ;;  %v3819_v32 = vpop.f32.mrf.mxu3  ;;  %v3961_v7 = vsel %vm273_vm1, %v7640_v6, 0.0 }
0x1abe   :  { %v3836_v28 = vpop.f32.mrf.mxu0  ;;  %v3855_v34 = vpop.f32.mrf.mxu1 }
0x1abf   :  { %v3901_v44 = vmul.f32 0.35355338, %v3836_v28  ;;  %v3902_v36 = vmul.f32 0.35355338, %v3855_v34 }
0x1ac1   :  { %v3909_v62 = vadd.f32 %v6476_v60, %v3901_v44  ;;  %v3910_v52 = vadd.f32 %v6477_v15, %v3902_v36 }
0x1ac2   :  { %3917 = vmax.xlane.f32.xlu2 %v3916_v37 }
0x1ac3   :  { %v3925_v40 = vsel %vm273_vm1, %v3909_v62, -inf  ;;  %v3928_v2 = vsel %vm273_vm1, %v3910_v52, -inf }
0x1ac4   :  { %3926 = vmax.xlane.f32.xlu0 %v3925_v40 }
0x1ac5   :  { %v3874_v43 = vpop.f32.mrf.mxu2  ;;  %v3893_v51 = vpop.f32.mrf.mxu3 }
0x1ac6   :  { %v3903_v18 = vmul.f32 0.35355338, %v3874_v43  ;;  %v3904_v48 = vmul.f32 0.35355338, %v3893_v51  ;;  %v3838_v38 = vpop.f32.mrf.mxu0  ;;  %v3857_v46 = vpop.f32.mrf.mxu1 }
0x1ac8   :  { %v3911_v49 = vadd.f32 %v6476_v60, %v3903_v18  ;;  %v3912_v50 = vadd.f32 %v6477_v15, %v3904_v48 }
0x1aca   :  { %v3934_v55 = vsel %vm273_vm1, %v3912_v50, -inf  ;;  %v3931_v57 = vsel %vm273_vm1, %v3911_v49, -inf }
0x1acb   :  { %3935 = vmax.xlane.f32.xlu2 %v3934_v55  ;;  %3932 = vmax.xlane.f32.xlu1 %v3931_v57 }
0x1acd   :  { %v3876_v0 = vpop.f32.mrf.mxu2  ;;  %v3895_v1 = vpop.f32.mrf.mxu3 }
0x1ad3   :  { %3929 = vmax.xlane.f32.xlu1 %v3928_v2 }
0x1ad8   :  { %6097 = vrot.lane.b32.xlu0 %v7606_v27, %s8014_s25 }
0x1adb   :  { %3962 = vadd.xlane.f32.xlu1 %v3961_v7 }
0x1b2d   :  { %v3924_v8 = vpop.xlane.xlu2 %3923  ;;  %v3921_v58 = vpop.xlane.xlu1 %3920 }
0x1b2e   :  { %v3940_v10 = vsub.f32 %v3908_v29, %v3924_v8  ;;  %v3939_v11 = vsub.f32 %v3907_v19, %v3921_v58 }
0x1b30   :  { %v3951_v60 = vmul.f32 1.442695, %v3940_v10  ;;  %v3949_v4 = vmul.f32 1.442695, %v3939_v11 }
0x1b32   :  { %6386 = vpow2.f32 %v3951_v60 }
0x1b33   :  { %6388 = vpow2.f32 %v3949_v4 }
0x1b35   :  { %v3918_v41 = vpop.xlane.xlu2 %3917 }
0x1b36   :  { %v3938_v45 = vsub.f32 %v3906_v16, %v3918_v41 }
0x1b37   :  { %v3927_v53 = vpop.xlane.xlu0 %3926 }
0x1b38   :  { %v6387_v13 = vpop.eup %6386  ;;  %v3947_v47 = vmul.f32 1.442695, %v3938_v45  ;;  %v3941_v54 = vsub.f32 %v3909_v62, %v3927_v53 }
0x1b39   :  { %v6389_v5 = vpop.eup %6388  ;;  %v3970_v23 = vsel %vm273_vm1, %v6387_v13, 0.0 }
0x1b3a   :  { %6390 = vpow2.f32 %v3947_v47  ;;  %v3953_v21 = vmul.f32 1.442695, %v3941_v54  ;;  %v3967_v9 = vsel %vm273_vm1, %v6389_v5, 0.0  ;;  %3971 = vadd.xlane.f32.xlu0 %v3970_v23 }
0x1b3b   :  { %3968 = vadd.xlane.f32.xlu2 %v3967_v9 }
0x1b3c   :  { %6392 = vpow2.f32 %v3953_v21 }
0x1b3e   :  { %v3936_v39 = vpop.xlane.xlu2 %3935  ;;  %v3933_v56 = vpop.xlane.xlu1 %3932 }
0x1b3f   :  { %v3944_v42 = vsub.f32 %v3912_v50, %v3936_v39  ;;  %v3943_v24 = vsub.f32 %v3911_v49, %v3933_v56 }
0x1b40   :  { %v6391_v25 = vpop.eup %6390 }
0x1b41   :  { %v3959_v22 = vmul.f32 1.442695, %v3944_v42  ;;  %v3957_v20 = vmul.f32 1.442695, %v3943_v24  ;;  %v3964_v19 = vsel %vm273_vm1, %v6391_v25, 0.0 }
0x1b42   :  { %v6393_v15 = vpop.eup %6392 }
0x1b43   :  { %6394 = vpow2.f32 %v3959_v22  ;;  %3965 = vadd.xlane.f32.xlu2 %v3964_v19  ;;  %v3973_v29 = vsel %vm273_vm1, %v6393_v15, 0.0 }
0x1b44   :  { %6396 = vpow2.f32 %v3957_v20  ;;  %3974 = vadd.xlane.f32.xlu1 %v3973_v29 }
0x1b46   :  { %v3930_v26 = vpop.xlane.xlu1 %3929 }
0x1b47   :  { %v3942_v59 = vsub.f32 %v3910_v52, %v3930_v26  ;;  %v5876_v26 = vld [vmem:[%s7961_s14 + $0x58] sm:$0xff] }
0x1b49   :  { %v7650_v30 = vpop.eup %6394  ;;  %v3955_v31 = vmul.f32 1.442695, %v3942_v59  ;;  %v5878_v59 = vld [vmem:[%s7961_s14 + $0x68] sm:$0xff] }
0x1b4a   :  { %v7652_v32 = vpop.eup %6396  ;;  %v3982_v16 = vsel %vm273_vm1, %v7650_v30, 0.0  ;;  %v6098_v28 = vpop.permute.xlu0 %6097 }
0x1b4b   :  { %6398 = vpow2.f32 %v3955_v31  ;;  %3983 = vadd.xlane.f32.xlu2 %v3982_v16  ;;  %v6100_v34 = vunpack.i.h.bf16 %v6098_v28  ;;  %v6099_v44 = vunpack.i.l.bf16 %v6098_v28  ;;  %v3979_v62 = vsel %vm273_vm1, %v7652_v32, 0.0 }
0x1b4c   :  { %3980 = vadd.xlane.f32.xlu1 %v3979_v62 }
0x1b4d   :  { %v3740_v37 = vpack.c.bf16 %v6100_v34, %v6100_v34  ;;  %v3739_v40 = vpack.c.bf16 %v6099_v44, %v6099_v44  ;;  %v5877_v34 = vld [vmem:[%s7961_s14 + $0x60] sm:$0xff] }
0x1b4e   :  { %v3963_v35 = vpop.xlane.xlu1 %3962  ;;  %6107 = vrot.lane.b32.xlu0 %v7606_v27, %s8013_s26 }
0x1b4f   :  { %6400 = vrcp.f32 %v3963_v35  ;;  %v4051_v43 = vsel %vm547_vm2, %v3739_v40, 0  ;;  %v4070_v51 = vsel %vm547_vm2, %v3740_v37, 0 }
0x1b50   :  { %4060 = vmatpush.bf16.msra.mxu2 %v4051_v43  ;;  %4079 = vmatpush.bf16.msrb.mxu3 %v4070_v51 }
0x1b51   :  { %v6399_v18 = vpop.eup %6398 }
0x1b52   :  { %v3976_v48 = vsel %vm273_vm1, %v6399_v18, 0.0 }
0x1b53   :  { %3977 = vadd.xlane.f32.xlu2 %v3976_v48 }
0x1b55   :  { %v6401_v38 = vpop.eup %6400 }
0x1b56   :  { %v3993_v46 = vmul.f32 %v6401_v38, %v7640_v6 }
0x1b58   :  { %v4001_v49 = vpack.c.bf16 %v3993_v46, %v3993_v46 }
0x1b5a   :  { %5654 = vmatmul.msk.bf16.vlgmr.msra.gmra.mxu0 %vm273_vm1, %v4001_v49 }
0x1b65   :  { %6102 = vrot.lane.b32.xlu1 %v7606_v27, %s8015_s1 }
0x1bad   :  { %v3972_v50 = vpop.xlane.xlu0 %3971 }
0x1bae   :  { %v3969_v33 = vpop.xlane.xlu2 %3968  ;;  %6402 = vrcp.f32 %v3972_v50  ;;  %v5872_v50 = vld [vmem:[%s7959_s12 + $0x78] sm:$0xff] }
0x1baf   :  { %6404 = vrcp.f32 %v3969_v33 }
0x1bb4   :  { %v6403_v36 = vpop.eup %6402 }
0x1bb5   :  { %v6405_v55 = vpop.eup %6404  ;;  %v3996_v57 = vmul.f32 %v6403_v36, %v6387_v13  ;;  %v5874_v36 = vld [vmem:[%s7961_s14 + $0x48] sm:$0xff] }
0x1bb6   :  { %v3995_v63 = vmul.f32 %v6405_v55, %v6389_v5  ;;  %v3966_v0 = vpop.xlane.xlu2 %3965  ;;  %v5873_v55 = vld [vmem:[%s7961_s14 + $0x40] sm:$0xff] }
0x1bb7   :  { %v4004_v1 = vpack.c.bf16 %v3996_v57, %v3996_v57  ;;  %6406 = vrcp.f32 %v3966_v0  ;;  %v3975_v52 = vpop.xlane.xlu1 %3974 }
0x1bb8   :  { %v4003_v2 = vpack.c.bf16 %v3995_v63, %v3995_v63  ;;  %6408 = vrcp.f32 %v3975_v52 }
0x1bb9   :  { %5657 = vmatmul.msk.bf16.vlgmr.msrb.gmra.mxu3 %vm273_vm1, %v4004_v1 }
0x1bba   :  { %5656 = vmatmul.msk.bf16.vlgmr.msra.gmra.mxu2 %vm273_vm1, %v4003_v2  ;;  %v7716_v2 = vld [vmem:[%s7962_s15 + $0x4] sm:$0xf] }
0x1bbd   :  { %v6407_v6 = vpop.eup %6406 }
0x1bbe   :  { %v3994_v27 = vmul.f32 %v6407_v6, %v6391_v25  ;;  %v3984_v7 = vpop.xlane.xlu2 %3983  ;;  %v6409_v8 = vpop.eup %6408  ;;  %v4330_v6 = vperm.slane %v7716_v2, 1 }
0x1bbf   :  { %v3997_v4 = vmul.f32 %v6409_v8, %v6393_v15  ;;  %v3981_v23 = vpop.xlane.xlu1 %3980 }
0x1bc0   :  { %v4002_v58 = vpack.c.bf16 %v3994_v27, %v3994_v27  ;;  %v6108_v10 = vpop.permute.xlu0 %6107 }
0x1bc1   :  { %v6110_v11 = vunpack.i.h.bf16 %v6108_v10  ;;  %v6109_v60 = vunpack.i.l.bf16 %v6108_v10  ;;  %v4005_v54 = vpack.c.bf16 %v3997_v4, %v3997_v4 }
0x1bc2   :  { %5655 = vmatmul.msk.bf16.vlgmr.msra.gmra.mxu1 %vm273_vm1, %v4002_v58 }
0x1bc3   :  { %v3742_v41 = vpack.c.bf16 %v6110_v11, %v6110_v11  ;;  %v3741_v45 = vpack.c.bf16 %v6109_v60, %v6109_v60  ;;  %v4357_v11 = vperm.slane %v7716_v2, 2 }
0x1bc5   :  { %v4089_v53 = vsel %vm547_vm2, %v3741_v45, 0  ;;  %v4108_v13 = vsel %vm547_vm2, %v3742_v41, 0 }
0x1bc6   :  { %v3978_v47 = vpop.xlane.xlu2 %3977  ;;  %4098 = vmatpush.bf16.msrb.mxu0 %v4089_v53  ;;  %4117 = vmatpush.bf16.msrb.mxu1 %v4108_v13 }
0x1bc7   :  { %6410 = vrcp.f32 %v3978_v47 }
0x1bc8   :  { %6412 = vrcp.f32 %v3984_v7 }
0x1bc9   :  { %5658 = vmatmul.msk.bf16.vlgmr.msrb.gmra.mxu0 %vm273_vm1, %v4005_v54  ;;  %6414 = vrcp.f32 %v3981_v23 }
0x1bca   :  { %4214 = vmatpush.bf16.msra.mxu0 %v5872_v50  ;;  %4322 = vmatpush.bf16.msra.mxu1 %v5874_v36 }
0x1bcd   :  { %v6411_v5 = vpop.eup %6410 }
0x1bce   :  { %v3998_v21 = vmul.f32 %v6411_v5, %v6399_v18  ;;  %v6413_v39 = vpop.eup %6412  ;;  %4323 = vmatpush.bf16.msra.mxu1 %v5873_v55 }
0x1bcf   :  { %v6415_v56 = vpop.eup %6414  ;;  %v4000_v20 = vmul.f32 %v6413_v39, %v7650_v30 }
0x1bd0   :  { %v4006_v9 = vpack.c.bf16 %v3998_v21, %v3998_v21  ;;  %v3999_v19 = vmul.f32 %v6415_v56, %v7652_v32  ;;  %v5875_v32 = vld [vmem:[%s7961_s14 + $0x50] sm:$0xff] }
0x1bd1   :  { %v4008_v28 = vpack.c.bf16 %v4000_v20, %v4000_v20 }
0x1bd2   :  { %5659 = vmatmul.msk.bf16.vlgmr.msrb.gmra.mxu1 %vm273_vm1, %v4006_v9  ;;  %v4007_v30 = vpack.c.bf16 %v3999_v19, %v3999_v19 }
0x1bd7   :  { %v7674_v42 = vpop.f32.mrf.mxu0  ;;  %v6103_v24 = vpop.permute.xlu1 %6102 }
0x1bd8   :  { %v6105_v25 = vunpack.i.h.bf16 %v6103_v24  ;;  %v6104_v22 = vunpack.i.l.bf16 %v6103_v24 }
0x1bda   :  { %v3744_v15 = vpack.c.bf16 %v6105_v25, %v6105_v25  ;;  %v3743_v29 = vpack.c.bf16 %v6104_v22, %v6104_v22 }
0x1bdc   :  { %v4127_v31 = vsel %vm547_vm2, %v3743_v29, 0  ;;  %v4146_v16 = vsel %vm547_vm2, %v3744_v15, 0 }
0x1bdd   :  { %4136 = vmatpush.bf16.msrb.mxu2 %v4127_v31  ;;  %4155 = vmatpush.bf16.msra.mxu3 %v4146_v16 }
0x1bdf   :  { %v4026_v44 = vpop.f32.mrf.mxu0 }
0x1be0   :  { %5660 = vmatmul.msk.bf16.vlgmr.msrb.gmra.mxu2 %vm273_vm1, %v4007_v30  ;;  %5661 = vmatmul.msk.bf16.vlgmr.msra.gmra.mxu3 %vm273_vm1, %v4008_v28  ;;  %v4192_v28 = vperm.slane %v7595_v17, 3 }
0x1be1   :  { %4349 = vmatpush.bf16.msra.mxu2 %v5876_v26  ;;  %4376 = vmatpush.bf16.msrb.mxu3 %v5878_v59 }
0x1be5   :  { %4350 = vmatpush.bf16.msra.mxu2 %v5875_v32  ;;  %4377 = vmatpush.bf16.msrb.mxu3 %v5877_v34 }
0x1bf0   :  { %5705 = vmatmul.msk.bf16.vlgmr.msra.gmra.mxu2 %vm117_vm0, %v7337_v12  ;;  %5714 = vmatmul.msk.bf16.vlgmr.msrb.gmra.mxu3 %vm117_vm0, %v7337_v12  ;;  %v5871_v12 = vld [vmem:[%s7959_s12 + $0x70] sm:$0xff] }
0x1bf1   :  { %4215 = vmatpush.bf16.msra.mxu0 %v5871_v12 }
0x1c3c   :  { %v4081_v62 = vpop.f32.mrf.mxu3 }
0x1c3d   :  { %v4062_v37 = vpop.f32.mrf.mxu2 }
0x1c3e   :  { %v6111_v40 = vpack.i.bf16 %v4081_v62, %v4062_v37 }
0x1c3f   :  { %v4043_v35 = vpop.f32.mrf.mxu1 }
0x1c40   :  { %6112 = vrot.lane.b32.xlu2 %v6111_v40, %s8016_s27 }
0x1c44   :  { %v4083_v43 = vpop.f32.mrf.mxu3 }
0x1c45   :  { %v4064_v51 = vpop.f32.mrf.mxu2 }
0x1c46   :  { %v4100_v18 = vpop.f32.mrf.mxu0 }
0x1c47   :  { %v4045_v48 = vpop.f32.mrf.mxu1 }
0x1c4e   :  { %v4102_v38 = vpop.f32.mrf.mxu0 }
0x1c4f   :  { %v4119_v46 = vpop.f32.mrf.mxu1 }
0x1c50   :  { %v6116_v49 = vpack.i.bf16 %v4119_v46, %v4100_v18 }
0x1c52   :  { %6117 = vrot.lane.b32.xlu0 %v6116_v49, %s8018_s2 }
0x1c57   :  { %v4121_v33 = vpop.f32.mrf.mxu1 }
0x1c63   :  { %v4138_v57 = vpop.f32.mrf.mxu2  ;;  %v4157_v63 = vpop.f32.mrf.mxu3 }
0x1c64   :  { %v6121_v0 = vpack.i.bf16 %v4157_v63, %v4138_v57 }
0x1c66   :  { %6122 = vrot.lane.b32.xlu0 %v6121_v0, %s8017_s4 }
0x1c6b   :  { %v4140_v1 = vpop.f32.mrf.mxu2  ;;  %v4159_v52 = vpop.f32.mrf.mxu3 }
0x1c73   :  { %v4352_v27 = vpop.f32.mrf.mxu2  ;;  %v4379_v7 = vpop.f32.mrf.mxu3 }
0x1c74   :  { %v4353_v8 = vadd.f32 %v4352_v27, %v4330_v6  ;;  %v7723_v53 = vadd.f32 %v4379_v7, %v4357_v11 }
0x1c76   :  { %v4432_v58 = vpack.c.bf16 %v4353_v8, %v4353_v8 }
0x1c78   :  { %v4472_v10 = vsel %vm273_vm1, %v4432_v58, 0 }
0x1c79   :  { %4481 = vmatpush.bf16.xpose.msrb.mxu0 %v4472_v10 }
0x1c7b   :  { %v4354_v60 = vpop.f32.mrf.mxu2  ;;  %v4381_v4 = vpop.f32.mrf.mxu3 }
0x1c7c   :  { %v4355_v41 = vadd.f32 %v4354_v60, %v4330_v6  ;;  %v7721_v45 = vadd.f32 %v4381_v4, %v4357_v11 }
0x1c7e   :  { %v4433_v13 = vpack.c.bf16 %v4355_v41, %v4355_v41  ;;  %v7725_v47 = vpack.i.bf16 %v4355_v41, %v4353_v8  ;;  %v7729_v54 = vpack.i.bf16 %v7721_v45, %v7723_v53 }
0x1c80   :  { %v4491_v5 = vsel %vm273_vm1, %v4433_v13, 0 }
0x1c81   :  { %4500 = vmatpush.bf16.xpose.msrb.mxu1 %v4491_v5 }
0x1c9a   :  { %v6113_v21 = vpop.permute.xlu2 %6112 }
0x1c9b   :  { %v6115_v9 = vunpack.i.h.bf16 %v6113_v21  ;;  %v6114_v39 = vunpack.i.l.bf16 %v6113_v21 }
0x1c9d   :  { %v4186_v22 = vsel %vm273_vm1, %v4043_v35, %v6115_v9  ;;  %v4185_v20 = vsel %vm273_vm1, %v7674_v42, %v6114_v39 }
0x1cc4   :  { %v6118_v23 = vpop.permute.xlu0 %6117 }
0x1cc5   :  { %v6120_v56 = vunpack.i.h.bf16 %v6118_v23  ;;  %v6119_v24 = vunpack.i.l.bf16 %v6118_v23 }
0x1cc7   :  { %v4188_v29 = vsel %vm723_vm3, %v4186_v22, %v6120_v56  ;;  %v4187_v26 = vsel %vm723_vm3, %v4185_v20, %v6119_v24 }
0x1cd8   :  { %v6123_v25 = vpop.permute.xlu0 %6122 }
0x1cd9   :  { %v6125_v19 = vunpack.i.h.bf16 %v6123_v25  ;;  %v6124_v15 = vunpack.i.l.bf16 %v6123_v25 }
0x1cdb   :  { %v4189_v59 = vsel %vm726_vm4, %v4187_v26, %v6124_v15  ;;  %v4190_v31 = vsel %vm726_vm4, %v4188_v29, %v6125_v19 }
0x1cdc   :  { %v4191_v16 = vpack.c.bf16 %v4190_v31, %v4189_v59  ;;  %v7766_v31 = vld [vmem:[%s7967_s20 + $0x4] sm:$0x7] }
0x1cde   :  { %5670 = vmatmul.msk.bf16.vlgmr.msra.gmra.mxu0 %vm117_vm0, %v4191_v16 }
0x1d5b   :  { %v4217_v30 = vpop.f32.mrf.mxu0 }
0x1d5c   :  { %v4218_v32 = vadd.f32 %v4217_v30, %v4192_v28 }
0x1d5e   :  { %v4222_v34 = vadd.f32 %v4218_v32, %v7583_v61 }
0x1d60   :  { %v4224_v42 = vsel %vm117_vm0, %v4222_v34, 0.0 }
0x1d61   :  { %4225 = vadd.xlane.f32.xlu1 %v4224_v42  ;;  %v4274_v42 = vperm.slane %v7766_v31, 0 }
0x1d63   :  { %v4219_v44 = vpop.f32.mrf.mxu0 }
0x1d64   :  { %v4220_v62 = vadd.f32 %v4219_v44, %v4192_v28  ;;  %v7775_v44 = vld [vmem:[%s7968_s21 + $0x4] sm:$0x7] }
0x1d66   :  { %v4223_v37 = vadd.f32 %v4220_v62, %v7585_v3 }
0x1d68   :  { %v4227_v40 = vsel %vm117_vm0, %v4223_v37, 0.0 }
0x1d69   :  { %4228 = vadd.xlane.f32.xlu0 %v4227_v40 }
0x1d7d   :  { %6127 = vrot.lane.b32.xlu0 %v7725_v47, %s8014_s25 }
0x1dd4   :  { %v4226_v35 = vpop.xlane.xlu1 %4225 }
0x1dd5   :  { %v4230_v17 = vmul.f32 %v4226_v35, %v6830_v14  ;;  %v4277_v35 = vperm.slane %v7775_v44, 0 }
0x1dd7   :  { %v7748_v43 = vsub.f32 %v4222_v34, %v4230_v17 }
0x1dd9   :  { %v4234_v61 = vmul.f32 %v7748_v43, %v7748_v43 }
0x1ddb   :  { %v4236_v51 = vsel %vm117_vm0, %v4234_v61, 0.0 }
0x1ddc   :  { %v4229_v18 = vpop.xlane.xlu0 %4228  ;;  %4237 = vadd.xlane.f32.xlu2 %v4236_v51 }
0x1ddd   :  { %v4231_v3 = vmul.f32 %v4229_v18, %v6830_v14  ;;  %v4300_v18 = vperm.slane %v7716_v2, 0 }
0x1ddf   :  { %v7754_v48 = vsub.f32 %v4223_v37, %v4231_v3 }
0x1de1   :  { %v4235_v38 = vmul.f32 %v7754_v48, %v7754_v48 }
0x1de3   :  { %v4239_v46 = vsel %vm117_vm0, %v4235_v38, 0.0 }
0x1de4   :  { %4240 = vadd.xlane.f32.xlu1 %v4239_v46 }
0x1def   :  { %v6128_v49 = vpop.permute.xlu0 %6127 }
0x1df0   :  { %v6130_v50 = vunpack.i.h.bf16 %v6128_v49  ;;  %v6129_v12 = vunpack.i.l.bf16 %v6128_v49 }
0x1df2   :  { %v4435_v33 = vpack.c.bf16 %v6130_v50, %v6130_v50  ;;  %v4434_v36 = vpack.c.bf16 %v6129_v12, %v6129_v12 }
0x1df4   :  { %v4510_v55 = vsel %vm273_vm1, %v4434_v36, 0  ;;  %v4529_v57 = vsel %vm273_vm1, %v4435_v33, 0 }
0x1df5   :  { %4519 = vmatpush.bf16.xpose.msrb.mxu2 %v4510_v55  ;;  %4538 = vmatpush.bf16.xpose.msra.mxu3 %v4529_v57 }
0x1dfd   :  { %6137 = vrot.lane.b32.xlu1 %v7725_v47, %s8015_s1 }
0x1e4f   :  { %v4238_v63 = vpop.xlane.xlu2 %4237 }
0x1e50   :  { %v4242_v0 = vmul.f32 0.032258064, %v4238_v63 }
0x1e52   :  { %6416 = vrsqrt.f32 %v4242_v0  ;;  %vm4251_vm12 = vcmp.eq.f32.partialorder %v4242_v0, inf  ;;  %v4254_v13 = vand.u32 2147483648, %v4242_v0  ;;  %vm4253_vm13 = vcmp.eq.f32.partialorder %v4242_v0, 0.0 }
0x1e57   :  { %v4241_v1 = vpop.xlane.xlu1 %4240 }
0x1e58   :  { %v6417_v52 = vpop.eup %6416  ;;  %v4243_v6 = vmul.f32 0.032258064, %v4241_v1 }
0x1e59   :  { %v4245_v27 = vmul.f32 %v6417_v52, %v4242_v0 }
0x1e5a   :  { %6418 = vrsqrt.f32 %v4243_v6  ;;  %vm4263_vm14 = vcmp.eq.f32.partialorder %v4243_v6, inf  ;;  %v4266_v25 = vand.u32 2147483648, %v4243_v6  ;;  %vm4265_vm15 = vcmp.eq.f32.partialorder %v4243_v6, 0.0 }
0x1e5b   :  { %v4246_v7 = vmul.f32 %v6417_v52, %v4245_v27  ;;  %v4461_v27 = vpack.c.bf16 %v7721_v45, %v7721_v45 }
0x1e5d   :  { %v4247_v8 = vmul.f32 0.5, %v4246_v7 }
0x1e5f   :  { %v4248_v58 = vsub.f32 1.5, %v4247_v8 }
0x1e60   :  { %v6419_v10 = vpop.eup %6418 }
0x1e61   :  { %v4249_v11 = vmul.f32 %v6417_v52, %v4248_v58  ;;  %v4257_v60 = vmul.f32 %v6419_v10, %v4243_v6 }
0x1e63   :  { %v4250_v4 = vmul.f32 %v4249_v11, %v4242_v0  ;;  %v4258_v41 = vmul.f32 %v6419_v10, %v4257_v60  ;;  %v4755_v11 = vsel %vm547_vm2, %v4461_v27, 0 }
0x1e65   :  { %v4252_v5 = vsel %vm4251_vm12, %v4242_v0, %v4250_v4  ;;  %v4259_v23 = vmul.f32 0.5, %v4258_v41 }
0x1e66   :  { %v4255_v21 = vsel %vm4253_vm13, %v4254_v13, %v4252_v5 }
0x1e67   :  { %v4268_v9 = vadd.f32 1e-06, %v4255_v21  ;;  %v4260_v39 = vsub.f32 1.5, %v4259_v23  ;;  %v6478_v23 = vld [vmem:[%s8010_s29] ss:$0 sm:$0xff] }
0x1e69   :  { %v4261_v56 = vmul.f32 %v6419_v10, %v4260_v39  ;;  %6420 = vrcp.f32 %v4268_v9 }
0x1e6b   :  { %v4262_v24 = vmul.f32 %v4261_v56, %v4243_v6 }
0x1e6d   :  { %v4264_v22 = vsel %vm4263_vm14, %v4243_v6, %v4262_v24  ;;  %v4460_v6 = vpack.c.bf16 %v7723_v53, %v7723_v53 }
0x1e6e   :  { %v4267_v20 = vsel %vm4265_vm15, %v4266_v25, %v4264_v22 }
0x1e6f   :  { %v4269_v19 = vadd.f32 1e-06, %v4267_v20  ;;  %v6138_v15 = vpop.permute.xlu1 %6137  ;;  %v6421_v59 = vpop.eup %6420  ;;  %v4736_v10 = vsel %vm547_vm2, %v4460_v6, 0 }
0x1e70   :  { %v6140_v29 = vunpack.i.h.bf16 %v6138_v15  ;;  %v6139_v26 = vunpack.i.l.bf16 %v6138_v15  ;;  %v4272_v34 = vmul.f32 %v6421_v59, %v7748_v43 }
0x1e71   :  { %6422 = vrcp.f32 %v4269_v19 }
0x1e72   :  { %v4439_v16 = vpack.c.bf16 %v6140_v29, %v6140_v29  ;;  %v4438_v28 = vpack.c.bf16 %v6139_v26, %v6139_v26  ;;  %v4275_v40 = vmul.f32 %v4274_v42, %v4272_v34  ;;  %v6479_v29 = vld [vmem:[%s8010_s29 + $0x1] ss:$0 sm:$0xff] }
0x1e74   :  { %v4586_v30 = vsel %vm273_vm1, %v4438_v28, 0  ;;  %v4605_v32 = vsel %vm273_vm1, %v4439_v16, 0  ;;  %v7779_v61 = vadd.f32 %v4277_v35, %v4275_v40 }
0x1e75   :  { %4595 = vmatpush.bf16.xpose.msra.mxu2 %v4586_v30  ;;  %4614 = vmatpush.bf16.xpose.msrb.mxu3 %v4605_v32 }
0x1e77   :  { %v6423_v62 = vpop.eup %6422 }
0x1e78   :  { %v4273_v37 = vmul.f32 %v6423_v62, %v7754_v48 }
0x1e7a   :  { %v4276_v17 = vmul.f32 %v4274_v42, %v4273_v37 }
0x1e7c   :  { %v7781_v51 = vadd.f32 %v4277_v35, %v4276_v17 }
0x1e7e   :  { %v4299_v43 = vpack.c.bf16 %v7781_v51, %v7779_v61 }
0x1e80   :  { %5696 = vmatmul.msk.bf16.vlgmr.msra.gmra.mxu1 %vm117_vm0, %v4299_v43 }
0x1efd   :  { %v4325_v3 = vpop.f32.mrf.mxu1 }
0x1efe   :  { %v4326_v38 = vadd.f32 %v4325_v3, %v4300_v18 }
0x1f00   :  { %v4404_v46 = vpack.c.bf16 %v4326_v38, %v4326_v38 }
0x1f02   :  { %5715 = vmatmul.msk.bf16.vlgmr.msrb.gmra.mxu0 %vm273_vm1, %v4404_v46 }
0x1f05   :  { %v4327_v48 = vpop.f32.mrf.mxu1 }
0x1f06   :  { %v4328_v49 = vadd.f32 %v4327_v48, %v4300_v18 }
0x1f08   :  { %v4405_v50 = vpack.c.bf16 %v4328_v49, %v4328_v49  ;;  %v6141_v12 = vpack.i.bf16 %v4328_v49, %v4326_v38 }
0x1f0a   :  { %5716 = vmatmul.msk.bf16.vlgmr.msrb.gmra.mxu1 %vm273_vm1, %v4405_v50  ;;  %6142 = vrot.lane.b32.xlu0 %v6141_v12, %s8015_s1 }
0x1f0b   :  { %6132 = vrot.lane.b32.xlu2 %v6141_v12, %s8014_s25 }
0x1f12   :  { %6152 = vrot.lane.b32.xlu0 %v6141_v12, %s8013_s26 }
0x1f13   :  { %6147 = vrot.lane.b32.xlu2 %v7725_v47, %s8013_s26 }
0x1f65   :  { %v6133_v33 = vpop.permute.xlu2 %6132 }
0x1f66   :  { %v6135_v36 = vunpack.i.h.bf16 %v6133_v33  ;;  %v6134_v55 = vunpack.i.l.bf16 %v6133_v33 }
0x1f68   :  { %v4407_v57 = vpack.c.bf16 %v6135_v36, %v6135_v36  ;;  %v4406_v63 = vpack.c.bf16 %v6134_v55, %v6134_v55 }
0x1f6a   :  { %5717 = vmatmul.msk.bf16.vlgmr.msrb.gmra.mxu2 %vm273_vm1, %v4406_v63  ;;  %5718 = vmatmul.msk.bf16.vlgmr.msra.gmra.mxu3 %vm273_vm1, %v4407_v57 }
0x1f6d   :  { %v6148_v0 = vpop.permute.xlu2 %6147 }
0x1f6e   :  { %v6150_v1 = vunpack.i.h.bf16 %v6148_v0  ;;  %v6149_v52 = vunpack.i.l.bf16 %v6148_v0 }
0x1f70   :  { %v4437_v7 = vpack.c.bf16 %v6150_v1, %v6150_v1  ;;  %v4436_v47 = vpack.c.bf16 %v6149_v52, %v6149_v52 }
0x1f72   :  { %v4548_v8 = vsel %vm273_vm1, %v4436_v47, 0  ;;  %v4567_v58 = vsel %vm273_vm1, %v4437_v7, 0 }
0x1f73   :  { %4557 = vmatpush.bf16.xpose.msra.mxu0 %v4548_v8  ;;  %4576 = vmatpush.bf16.xpose.msra.mxu1 %v4567_v58 }
0x1f7b   :  { %4745 = vmatpush.bf16.msrb.mxu0 %v4736_v10  ;;  %4764 = vmatpush.bf16.msrb.mxu1 %v4755_v11 }
0x1f7c   :  { %v6143_v60 = vpop.permute.xlu0 %6142 }
0x1f7d   :  { %v6145_v4 = vunpack.i.h.bf16 %v6143_v60  ;;  %v6144_v53 = vunpack.i.l.bf16 %v6143_v60 }
0x1f7f   :  { %v4411_v41 = vpack.c.bf16 %v6145_v4, %v6145_v4  ;;  %v4410_v13 = vpack.c.bf16 %v6144_v53, %v6144_v53  ;;  %v4483_v45 = vpop.f32.mrf.mxu0 }
0x1f80   :  { %v4620_v5 = vmul.f32 0.35355338, %v4483_v45 }
0x1f81   :  { %5721 = vmatmul.msk.bf16.vlgmr.msra.gmra.mxu2 %vm273_vm1, %v4410_v13  ;;  %5722 = vmatmul.msk.bf16.vlgmr.msrb.gmra.mxu3 %vm273_vm1, %v4411_v41 }
0x1f82   :  { %v4628_v21 = vadd.f32 %v6478_v23, %v4620_v5 }
0x1f84   :  { %v6153_v9 = vpop.permute.xlu0 %6152  ;;  %v4636_v39 = vsel %vm273_vm1, %v4628_v21, -inf }
0x1f85   :  { %v6155_v56 = vunpack.i.h.bf16 %v6153_v9  ;;  %v6154_v24 = vunpack.i.l.bf16 %v6153_v9  ;;  %4637 = vmax.xlane.f32.xlu0 %v4636_v39 }
0x1f87   :  { %v4409_v25 = vpack.c.bf16 %v6155_v56, %v6155_v56  ;;  %v4408_v22 = vpack.c.bf16 %v6154_v24, %v6154_v24  ;;  %v4485_v20 = vpop.f32.mrf.mxu0  ;;  %v4502_v19 = vpop.f32.mrf.mxu1 }
0x1f88   :  { %v4621_v15 = vmul.f32 0.35355338, %v4502_v19 }
0x1f89   :  { %5719 = vmatmul.msk.bf16.vlgmr.msra.gmra.mxu0 %vm273_vm1, %v4408_v22  ;;  %5720 = vmatmul.msk.bf16.vlgmr.msra.gmra.mxu1 %vm273_vm1, %v4409_v25 }
0x1f8a   :  { %v4629_v26 = vadd.f32 %v6479_v29, %v4621_v15 }
0x1f8c   :  { %v4639_v59 = vsel %vm273_vm1, %v4629_v26, -inf }
0x1f8d   :  { %4640 = vmax.xlane.f32.xlu1 %v4639_v59 }
0x1f8f   :  { %v4504_v16 = vpop.f32.mrf.mxu1 }
0x1fed   :  { %v4521_v28 = vpop.f32.mrf.mxu2  ;;  %v4540_v30 = vpop.f32.mrf.mxu3 }
0x1fee   :  { %v4622_v32 = vmul.f32 0.35355338, %v4521_v28  ;;  %v4623_v34 = vmul.f32 0.35355338, %v4540_v30 }
0x1ff0   :  { %v4630_v42 = vadd.f32 %v6478_v23, %v4622_v32  ;;  %v4631_v62 = vadd.f32 %v6479_v29, %v4623_v34 }
0x1ff2   :  { %v4645_v37 = vsel %vm273_vm1, %v4631_v62, -inf  ;;  %v4642_v40 = vsel %vm273_vm1, %v4630_v42, -inf }
0x1ff3   :  { %4646 = vmax.xlane.f32.xlu2 %v4645_v37  ;;  %4643 = vmax.xlane.f32.xlu1 %v4642_v40 }
0x1ff5   :  { %v4523_v35 = vpop.f32.mrf.mxu2  ;;  %v4542_v17 = vpop.f32.mrf.mxu3 }
0x1ff8   :  { %v4638_v50 = vpop.xlane.xlu0 %4637 }
0x1ff9   :  { %v4660_v57 = vsub.f32 %v4628_v21, %v4638_v50 }
0x1ffb   :  { %v4668_v8 = vmul.f32 1.442695, %v4660_v57 }
0x2000   :  { %v4641_v43 = vpop.xlane.xlu1 %4640 }
0x2001   :  { %v4661_v18 = vsub.f32 %v4629_v26, %v4641_v43 }
0x2003   :  { %v4670_v3 = vmul.f32 1.442695, %v4661_v18 }
0x2004   :  { %v4597_v38 = vpop.f32.mrf.mxu2  ;;  %v4616_v46 = vpop.f32.mrf.mxu3 }
0x2005   :  { %6424 = vpow2.f32 %v4670_v3  ;;  %v4626_v0 = vmul.f32 0.35355338, %v4597_v38  ;;  %v4627_v6 = vmul.f32 0.35355338, %v4616_v46 }
0x2006   :  { %v4559_v48 = vpop.f32.mrf.mxu0  ;;  %v4578_v49 = vpop.f32.mrf.mxu1  ;;  %6426 = vpow2.f32 %v4668_v8 }
0x2007   :  { %v4624_v12 = vmul.f32 0.35355338, %v4559_v48  ;;  %v4625_v33 = vmul.f32 0.35355338, %v4578_v49  ;;  %v4634_v11 = vadd.f32 %v6478_v23, %v4626_v0  ;;  %v4635_v60 = vadd.f32 %v6479_v29, %v4627_v6 }
0x2009   :  { %v4632_v36 = vadd.f32 %v6478_v23, %v4624_v12  ;;  %v4633_v55 = vadd.f32 %v6479_v29, %v4625_v33  ;;  %v4654_v4 = vsel %vm273_vm1, %v4634_v11, -inf  ;;  %v4657_v53 = vsel %vm273_vm1, %v4635_v60, -inf }
0x200b   :  { %v6425_v63 = vpop.eup %6424  ;;  %v4651_v1 = vsel %vm273_vm1, %v4633_v55, -inf  ;;  %v4648_v52 = vsel %vm273_vm1, %v4632_v36, -inf }
0x200c   :  { %4652 = vmax.xlane.f32.xlu2 %v4651_v1  ;;  %4649 = vmax.xlane.f32.xlu1 %v4648_v52  ;;  %v4599_v27 = vpop.f32.mrf.mxu2  ;;  %v4618_v7 = vpop.f32.mrf.mxu3  ;;  %v4687_v47 = vsel %vm273_vm1, %v6425_v63, 0.0 }
0x200d   :  { %4688 = vadd.xlane.f32.xlu0 %v4687_v47  ;;  %v6427_v41 = vpop.eup %6426 }
0x200e   :  { %v4561_v58 = vpop.f32.mrf.mxu0  ;;  %v4580_v10 = vpop.f32.mrf.mxu1  ;;  %v4684_v13 = vsel %vm273_vm1, %v6427_v41, 0.0 }
0x2014   :  { %4655 = vmax.xlane.f32.xlu2 %v4654_v4 }
0x2015   :  { %4658 = vmax.xlane.f32.xlu0 %v4657_v53 }
0x201c   :  { %4685 = vadd.xlane.f32.xlu2 %v4684_v13 }
0x2066   :  { %v4647_v45 = vpop.xlane.xlu2 %4646  ;;  %v4644_v5 = vpop.xlane.xlu1 %4643 }
0x2067   :  { %v4663_v21 = vsub.f32 %v4631_v62, %v4647_v45  ;;  %v4662_v9 = vsub.f32 %v4630_v42, %v4644_v5 }
0x2069   :  { %v4674_v39 = vmul.f32 1.442695, %v4663_v21  ;;  %v4672_v56 = vmul.f32 1.442695, %v4662_v9 }
0x206b   :  { %6428 = vpow2.f32 %v4674_v39 }
0x206c   :  { %6430 = vpow2.f32 %v4672_v56 }
0x2071   :  { %v6429_v23 = vpop.eup %6428 }
0x2072   :  { %v6431_v24 = vpop.eup %6430  ;;  %v4693_v25 = vsel %vm273_vm1, %v6429_v23, 0.0 }
0x2073   :  { %4694 = vadd.xlane.f32.xlu1 %v4693_v25  ;;  %v4690_v22 = vsel %vm273_vm1, %v6431_v24, 0.0 }
0x2074   :  { %4691 = vadd.xlane.f32.xlu0 %v4690_v22 }
0x207f   :  { %v4653_v20 = vpop.xlane.xlu2 %4652  ;;  %v4650_v19 = vpop.xlane.xlu1 %4649 }
0x2080   :  { %v4665_v15 = vsub.f32 %v4633_v55, %v4653_v20  ;;  %v4664_v29 = vsub.f32 %v4632_v36, %v4650_v19  ;;  %v4689_v26 = vpop.xlane.xlu0 %4688 }
0x2081   :  { %6432 = vrcp.f32 %v4689_v26 }
0x2082   :  { %v4678_v59 = vmul.f32 1.442695, %v4665_v15  ;;  %v4676_v16 = vmul.f32 1.442695, %v4664_v29 }
0x2084   :  { %6434 = vpow2.f32 %v4678_v59 }
0x2085   :  { %6436 = vpow2.f32 %v4676_v16 }
0x2087   :  { %v6433_v28 = vpop.eup %6432  ;;  %v4656_v30 = vpop.xlane.xlu2 %4655 }
0x2088   :  { %v4717_v32 = vmul.f32 %v6433_v28, %v6425_v63  ;;  %v4666_v34 = vsub.f32 %v4634_v11, %v4656_v30  ;;  %v4659_v42 = vpop.xlane.xlu0 %4658 }
0x2089   :  { %v4667_v62 = vsub.f32 %v4635_v60, %v4659_v42 }
0x208a   :  { %v7826_v37 = vpop.eup %6434  ;;  %v4725_v40 = vpack.c.bf16 %v4717_v32, %v4717_v32  ;;  %v4680_v35 = vmul.f32 1.442695, %v4666_v34 }
0x208b   :  { %v7828_v17 = vpop.eup %6436  ;;  %v4682_v43 = vmul.f32 1.442695, %v4667_v62  ;;  %v4699_v18 = vsel %vm273_vm1, %v7826_v37, 0.0 }
0x208c   :  { %6438 = vpow2.f32 %v4680_v35  ;;  %6157 = vrot.lane.b32.xlu1 %v7729_v54, %s8014_s25  ;;  %5724 = vmatmul.msk.bf16.vlgmr.msrb.gmra.mxu1 %vm273_vm1, %v4725_v40  ;;  %v4696_v3 = vsel %vm273_vm1, %v7828_v17, 0.0  ;;  %s6539_s25 = smov [#allocation2]  }
0x208d   :  { %6440 = vpow2.f32 %v4682_v43  ;;  %4700 = vadd.xlane.f32.xlu0 %v4699_v18  ;;  %4697 = vadd.xlane.f32.xlu2 %v4696_v3 }
0x208f   :  { %v4686_v38 = vpop.xlane.xlu2 %4685 }
0x2090   :  { %6442 = vrcp.f32 %v4686_v38 }
0x2092   :  { %v6439_v46 = vpop.eup %6438 }
0x2093   :  { %v6441_v48 = vpop.eup %6440  ;;  %v4702_v49 = vsel %vm273_vm1, %v6439_v46, 0.0 }
0x2094   :  { %v4705_v50 = vsel %vm273_vm1, %v6441_v48, 0.0 }
0x2095   :  { %4703 = vadd.xlane.f32.xlu2 %v4702_v49  ;;  %4706 = vadd.xlane.f32.xlu0 %v4705_v50 }
0x2096   :  { %v6443_v12 = vpop.eup %6442 }
0x2097   :  { %v4716_v33 = vmul.f32 %v6443_v12, %v6427_v41 }
0x2099   :  { %v4724_v36 = vpack.c.bf16 %v4716_v33, %v4716_v33 }
0x209b   :  { %5723 = vmatmul.msk.bf16.vlgmr.msrb.gmra.mxu0 %vm273_vm1, %v4724_v36 }
0x20a9   :  { %6167 = vrot.lane.b32.xlu0 %v7729_v54, %s8013_s26 }
0x20ad   :  { %6162 = vrot.lane.b32.xlu2 %v7729_v54, %s8015_s1  ;;  %s5196_s1 = sshll.u32 %s6539_s25, 4  ;;  %s5197_s1 = int_to_ptr.vmem [resolvable:$true] %s5196_s1 }
0x20e6   :  { %v4695_v55 = vpop.xlane.xlu1 %4694 }
0x20e7   :  { %v4692_v57 = vpop.xlane.xlu0 %4691  ;;  %6444 = vrcp.f32 %v4695_v55 }
0x20e8   :  { %6446 = vrcp.f32 %v4692_v57 }
0x20ed   :  { %v6445_v63 = vpop.eup %6444 }
0x20ee   :  { %v6447_v0 = vpop.eup %6446  ;;  %v4719_v47 = vmul.f32 %v6445_v63, %v6429_v23 }
0x20ef   :  { %v4718_v8 = vmul.f32 %v6447_v0, %v6431_v24 }
0x20f0   :  { %v4727_v54 = vpack.c.bf16 %v4719_v47, %v4719_v47 }
0x20f1   :  { %v4726_v4 = vpack.c.bf16 %v4718_v8, %v4718_v8 }
0x20fe   :  { %v6158_v1 = vpop.permute.xlu1 %6157 }
0x20ff   :  { %v6160_v52 = vunpack.i.h.bf16 %v6158_v1  ;;  %v6159_v6 = vunpack.i.l.bf16 %v6158_v1 }
0x2100   :  { %v4701_v27 = vpop.xlane.xlu0 %4700  ;;  %v4698_v7 = vpop.xlane.xlu2 %4697 }
0x2101   :  { %v4463_v58 = vpack.c.bf16 %v6160_v52, %v6160_v52  ;;  %v4462_v10 = vpack.c.bf16 %v6159_v6, %v6159_v6  ;;  %v5880_v6 = vld [vmem:[%s7961_s14 + $0x78] sm:$0xff] }
0x2103   :  { %v4774_v11 = vsel %vm547_vm2, %v4462_v10, 0  ;;  %v4793_v60 = vsel %vm547_vm2, %v4463_v58, 0 }
0x2104   :  { %4783 = vmatpush.bf16.msrb.mxu2 %v4774_v11  ;;  %4802 = vmatpush.bf16.msra.mxu3 %v4793_v60 }
0x2107   :  { %5725 = vmatmul.msk.bf16.vlgmr.msrb.gmra.mxu2 %vm273_vm1, %v4726_v4  ;;  %5726 = vmatmul.msk.bf16.vlgmr.msra.gmra.mxu3 %vm273_vm1, %v4727_v54 }
0x2108   :  { %v4704_v53 = vpop.xlane.xlu2 %4703  ;;  %v4707_v41 = vpop.xlane.xlu0 %4706 }
0x2109   :  { %6448 = vrcp.f32 %v4704_v53  ;;  %v7848_v13 = vpop.f32.mrf.mxu1 }
0x210a   :  { %6450 = vrcp.f32 %v4707_v41 }
0x210b   :  { %6452 = vrcp.f32 %v4701_v27  ;;  %v5879_v27 = vld [vmem:[%s7961_s14 + $0x70] sm:$0xff]  ;;  %s6540_s14 = smov 128  }
0x210c   :  { %6454 = vrcp.f32 %v4698_v7 }
0x210f   :  { %v6449_v45 = vpop.eup %6448 }
0x2110   :  { %v6451_v5 = vpop.eup %6450  ;;  %v6163_v21 = vpop.permute.xlu2 %6162  ;;  %v4722_v23 = vmul.f32 %v6449_v45, %v6439_v46 }
0x2111   :  { %v6165_v9 = vunpack.i.h.bf16 %v6163_v21  ;;  %v6164_v39 = vunpack.i.l.bf16 %v6163_v21  ;;  %v4768_v56 = vpop.f32.mrf.mxu1  ;;  %v4723_v24 = vmul.f32 %v6451_v5, %v6441_v48  ;;  %v6453_v59 = vpop.eup %6452 }
0x2112   :  { %v4730_v15 = vpack.c.bf16 %v4722_v23, %v4722_v23  ;;  %v6455_v16 = vpop.eup %6454  ;;  %v4721_v34 = vmul.f32 %v6453_v59, %v7826_v37 }
0x2113   :  { %v4467_v25 = vpack.c.bf16 %v6165_v9, %v6165_v9  ;;  %v4466_v22 = vpack.c.bf16 %v6164_v39, %v6164_v39  ;;  %v4731_v29 = vpack.c.bf16 %v4723_v24, %v4723_v24  ;;  %v4720_v42 = vmul.f32 %v6455_v16, %v7828_v17 }
0x2114   :  { %v4729_v3 = vpack.c.bf16 %v4721_v34, %v4721_v34 }
0x2115   :  { %v4850_v20 = vsel %vm547_vm2, %v4466_v22, 0  ;;  %v4869_v19 = vsel %vm547_vm2, %v4467_v25, 0  ;;  %v4728_v38 = vpack.c.bf16 %v4720_v42, %v4720_v42 }
0x2116   :  { %4859 = vmatpush.bf16.msra.mxu2 %v4850_v20  ;;  %4878 = vmatpush.bf16.msrb.mxu3 %v4869_v19 }
0x2118   :  { %v4747_v26 = vpop.f32.mrf.mxu0 }
0x2119   :  { %5729 = vmatmul.msk.bf16.vlgmr.msra.gmra.mxu2 %vm273_vm1, %v4730_v15  ;;  %5730 = vmatmul.msk.bf16.vlgmr.msrb.gmra.mxu3 %vm273_vm1, %v4731_v29 }
0x211b   :  { %v6168_v28 = vpop.permute.xlu0 %6167 }
0x211c   :  { %v6170_v30 = vunpack.i.h.bf16 %v6168_v28  ;;  %v6169_v32 = vunpack.i.l.bf16 %v6168_v28 }
0x211e   :  { %v4465_v62 = vpack.c.bf16 %v6170_v30, %v6170_v30  ;;  %v4464_v40 = vpack.c.bf16 %v6169_v32, %v6169_v32 }
0x2120   :  { %v4749_v35 = vpop.f32.mrf.mxu0  ;;  %v4812_v43 = vsel %vm547_vm2, %v4464_v40, 0  ;;  %v4831_v18 = vsel %vm547_vm2, %v4465_v62, 0  ;;  %v5882_v62 = vld [vmem:[%s7963_s16 + $0x18] sm:$0xff]  ;;  %v5881_v40 = vld [vmem:[%s7963_s16 + $0x10] sm:$0xff] }
0x2121   :  { %4821 = vmatpush.bf16.msra.mxu0 %v4812_v43  ;;  %4840 = vmatpush.bf16.msra.mxu1 %v4831_v18 }
0x2124   :  { %5727 = vmatmul.msk.bf16.vlgmr.msra.gmra.mxu0 %vm273_vm1, %v4728_v38  ;;  %5728 = vmatmul.msk.bf16.vlgmr.msra.gmra.mxu1 %vm273_vm1, %v4729_v3 }
0x2125   :  { %4937 = vmatpush.bf16.msrb.mxu0 %v5880_v6  ;;  %5054 = vmatpush.bf16.msrb.mxu1 %v5882_v62 }
0x2129   :  { %4938 = vmatpush.bf16.msrb.mxu0 %v5879_v27  ;;  %5055 = vmatpush.bf16.msrb.mxu1 %v5881_v40 }
0x218a   :  { %v4785_v46 = vpop.f32.mrf.mxu2  ;;  %v4804_v48 = vpop.f32.mrf.mxu3 }
0x218b   :  { %v6176_v1 = vpack.i.bf16 %v4804_v48, %v4785_v46 }
0x2192   :  { %v4787_v37 = vpop.f32.mrf.mxu2  ;;  %v4806_v49 = vpop.f32.mrf.mxu3 }
0x2193   :  { %v5890_v49 = vld [vmem:[%s8021_s18 + $0x78] sm:$0xff] }
0x2194   :  { %5116 = vmatpush.bf16.msrb.mxu2 %v5890_v49 }
0x219c   :  { %v4861_v17 = vpop.f32.mrf.mxu2  ;;  %v4880_v50 = vpop.f32.mrf.mxu3 }
0x219d   :  { %v6181_v52 = vpack.i.bf16 %v4880_v50, %v4861_v17 }
0x21a1   :  { %v4823_v12 = vpop.f32.mrf.mxu0  ;;  %v4842_v33 = vpop.f32.mrf.mxu1 }
0x21a2   :  { %v6171_v36 = vpack.i.bf16 %v4842_v33, %v4823_v12  ;;  %v5889_v12 = vld [vmem:[%s8021_s18 + $0x70] sm:$0xff] }
0x21a3   :  { %5117 = vmatpush.bf16.msrb.mxu2 %v5889_v12 }
0x21a4   :  { %v4863_v55 = vpop.f32.mrf.mxu2  ;;  %v4882_v57 = vpop.f32.mrf.mxu3  ;;  %6172 = vrot.lane.b32.xlu1 %v6171_v36, %s8018_s2 }
0x21a9   :  { %v4825_v63 = vpop.f32.mrf.mxu0  ;;  %v4844_v0 = vpop.f32.mrf.mxu1 }
0x21ac   :  { %6177 = vrot.lane.b32.xlu1 %v6176_v1, %s8016_s27  ;;  %v5888_v1 = vld [vmem:[%s8021_s18 + $0x68] sm:$0xff] }
0x21ad   :  { %5118 = vmatpush.bf16.msrb.mxu2 %v5888_v1 }
0x21b4   :  { %6182 = vrot.lane.b32.xlu1 %v6181_v52, %s8017_s4  ;;  %s6541_s4 = smov [#allocation4]  }
0x21b5   :  { %s5209_s2 = sshll.u32 %s6541_s4, 4  ;;  %s5210_s2 = int_to_ptr.vmem [resolvable:$true] %s5209_s2 }
0x2216   :  { %v6173_v7 = vpop.permute.xlu1 %6172 }
0x2217   :  { %v6175_v60 = vunpack.i.h.bf16 %v6173_v7  ;;  %v6174_v54 = vunpack.i.l.bf16 %v6173_v7  ;;  %v5887_v7 = vld [vmem:[%s8021_s18 + $0x60] sm:$0xff] }
0x2218   :  { %5119 = vmatpush.bf16.msrb.mxu2 %v5887_v7 }
0x221e   :  { %v6178_v47 = vpop.permute.xlu1 %6177 }
0x221f   :  { %v6180_v8 = vunpack.i.h.bf16 %v6178_v47  ;;  %v6179_v58 = vunpack.i.l.bf16 %v6178_v47 }
0x2221   :  { %v4909_v10 = vsel %vm273_vm1, %v7848_v13, %v6180_v8  ;;  %v4908_v11 = vsel %vm273_vm1, %v4747_v26, %v6179_v58  ;;  %v4915_v13 = vperm.slane %v7716_v2, 3 }
0x2222   :  { %v4910_v45 = vsel %vm723_vm3, %v4908_v11, %v6174_v54  ;;  %v4911_v5 = vsel %vm723_vm3, %v4909_v10, %v6175_v60 }
0x2226   :  { %v6183_v4 = vpop.permute.xlu1 %6182 }
0x2227   :  { %v6185_v53 = vunpack.i.h.bf16 %v6183_v4  ;;  %v6184_v41 = vunpack.i.l.bf16 %v6183_v4  ;;  %v4997_v4 = vperm.slane %v7766_v31, 1 }
0x2229   :  { %v4913_v21 = vsel %vm726_vm4, %v4911_v5, %v6185_v53  ;;  %v4912_v9 = vsel %vm726_vm4, %v4910_v45, %v6184_v41  ;;  %v5000_v5 = vperm.slane %v7775_v44, 1 }
0x222a   :  { %v4914_v39 = vpack.c.bf16 %v4913_v21, %v4912_v9 }
0x222c   :  { %5739 = vmatmul.msk.bf16.vlgmr.msrb.gmra.mxu0 %vm117_vm0, %v4914_v39 }
0x22a9   :  { %v4940_v56 = vpop.f32.mrf.mxu0 }
0x22aa   :  { %v4941_v23 = vadd.f32 %v4940_v56, %v4915_v13  ;;  %v5886_v56 = vld [vmem:[%s8021_s18 + $0x58] sm:$0xff] }
0x22ab   :  { %5120 = vmatpush.bf16.msrb.mxu2 %v5886_v56 }
0x22ac   :  { %v4945_v24 = vadd.f32 %v4941_v23, %v7779_v61  ;;  %v5885_v23 = vld [vmem:[%s8021_s18 + $0x50] sm:$0xff] }
0x22ae   :  { %v4947_v25 = vsel %vm117_vm0, %v4945_v24, 0.0 }
0x22af   :  { %4948 = vadd.xlane.f32.xlu0 %v4947_v25  ;;  %5121 = vmatpush.bf16.msrb.mxu2 %v5885_v23  ;;  %v5883_v25 = vld [vmem:[%s8021_s18 + $0x40] sm:$0xff] }
0x22b1   :  { %v4942_v22 = vpop.f32.mrf.mxu0 }
0x22b2   :  { %v4943_v20 = vadd.f32 %v4942_v22, %v4915_v13 }
0x22b4   :  { %v4946_v19 = vadd.f32 %v4943_v20, %v7781_v51  ;;  %v6196_v20 = vld [vmem:[%s8022_s11 + $0x1] ss:$0 sm:$0xff] }
0x22b6   :  { %v4950_v15 = vsel %vm117_vm0, %v4946_v19, 0.0 }
0x22b7   :  { %4951 = vadd.xlane.f32.xlu2 %v4950_v15 }
0x2322   :  { %v4949_v29 = vpop.xlane.xlu0 %4948 }
0x2323   :  { %v4953_v26 = vmul.f32 %v4949_v29, %v6830_v14 }
0x2325   :  { %v4955_v59 = vsub.f32 %v4945_v24, %v4953_v26  ;;  %v5884_v24 = vld [vmem:[%s8021_s18 + $0x48] sm:$0xff] }
0x2326   :  { %5122 = vmatpush.bf16.msrb.mxu2 %v5884_v24 }
0x2327   :  { %v4957_v16 = vmul.f32 %v4955_v59, %v4955_v59 }
0x2329   :  { %v4959_v2 = vsel %vm117_vm0, %v4957_v16, 0.0 }
0x232a   :  { %v4952_v28 = vpop.xlane.xlu2 %4951  ;;  %4960 = vadd.xlane.f32.xlu1 %v4959_v2  ;;  %5123 = vmatpush.bf16.msrb.mxu2 %v5883_v25  ;;  %v6197_v2 = vld [vmem:[%s8023_s6 + $0x1] ss:$0 sm:$0xff]  ;;  %s8024_s6 = sld [smem:[#allocation19_spill]] }
0x232b   :  { %v4954_v61 = vmul.f32 %v4952_v28, %v6830_v14 }
0x232d   :  { %v4956_v30 = vsub.f32 %v4946_v19, %v4954_v61 }
0x232f   :  { %v4958_v32 = vmul.f32 %v4956_v30, %v4956_v30 }
0x2330   :  { %s5198_s26 = sshll.u32 %s8024_s6, 4  ;;  %s5199_s26 = int_to_ptr.hbm [resolvable:$true] %s5198_s26 }
0x2331   :  { %v4962_v34 = vsel %vm117_vm0, %v4958_v32, 0.0  ;;  %5204 = dma.vmem_to_hbm [thread:$0]  %s5197_s1, 256, %s5199_s26, [#allocation3], %s6540_s14, %s6540_s14, %s8016_s27  }
0x2332   :  { %4963 = vadd.xlane.f32.xlu0 %v4962_v34 }
0x239d   :  { %v4961_v51 = vpop.xlane.xlu1 %4960 }
0x239e   :  { %v4965_v42 = vmul.f32 0.032258064, %v4961_v51 }
0x23a0   :  { %6456 = vrsqrt.f32 %v4965_v42  ;;  %vm4974_vm1 = vcmp.eq.f32.partialorder %v4965_v42, inf  ;;  %v4977_v55 = vand.u32 2147483648, %v4965_v42  ;;  %vm4976_vm2 = vcmp.eq.f32.partialorder %v4965_v42, 0.0 }
0x23a5   :  { %v4964_v35 = vpop.xlane.xlu0 %4963 }
0x23a6   :  { %v6457_v43 = vpop.eup %6456  ;;  %v4966_v18 = vmul.f32 0.032258064, %v4964_v35 }
0x23a7   :  { %v4968_v3 = vmul.f32 %v6457_v43, %v4965_v42 }
0x23a8   :  { %6458 = vrsqrt.f32 %v4966_v18  ;;  %vm4986_vm3 = vcmp.eq.f32.partialorder %v4966_v18, inf  ;;  %v4989_v8 = vand.u32 2147483648, %v4966_v18  ;;  %vm4988_vm4 = vcmp.eq.f32.partialorder %v4966_v18, 0.0 }
0x23a9   :  { %v4969_v38 = vmul.f32 %v6457_v43, %v4968_v3 }
0x23ab   :  { %v4970_v46 = vmul.f32 0.5, %v4969_v38 }
0x23ad   :  { %v4971_v48 = vsub.f32 1.5, %v4970_v46 }
0x23ae   :  { %v6459_v37 = vpop.eup %6458 }
0x23af   :  { %v4972_v17 = vmul.f32 %v6457_v43, %v4971_v48  ;;  %v4980_v50 = vmul.f32 %v6459_v37, %v4966_v18 }
0x23b1   :  { %v4973_v33 = vmul.f32 %v4972_v17, %v4965_v42  ;;  %v4981_v36 = vmul.f32 %v6459_v37, %v4980_v50 }
0x23b3   :  { %v4975_v57 = vsel %vm4974_vm1, %v4965_v42, %v4973_v33  ;;  %v4982_v63 = vmul.f32 0.5, %v4981_v36 }
0x23b4   :  { %v4978_v0 = vsel %vm4976_vm2, %v4977_v55, %v4975_v57 }
0x23b5   :  { %v4991_v52 = vadd.f32 1e-06, %v4978_v0  ;;  %v4983_v6 = vsub.f32 1.5, %v4982_v63 }
0x23b7   :  { %v4984_v27 = vmul.f32 %v6459_v37, %v4983_v6  ;;  %6460 = vrcp.f32 %v4991_v52 }
0x23b9   :  { %v4985_v47 = vmul.f32 %v4984_v27, %v4966_v18 }
0x23bb   :  { %v4987_v58 = vsel %vm4986_vm3, %v4966_v18, %v4985_v47 }
0x23bc   :  { %v4990_v10 = vsel %vm4988_vm4, %v4989_v8, %v4987_v58 }
0x23bd   :  { %v4992_v11 = vadd.f32 1e-06, %v4990_v10  ;;  %v6461_v60 = vpop.eup %6460 }
0x23be   :  { %v4995_v54 = vmul.f32 %v6461_v60, %v4955_v59 }
0x23bf   :  { %6462 = vrcp.f32 %v4992_v11 }
0x23c0   :  { %v4998_v45 = vmul.f32 %v4997_v4, %v4995_v54 }
0x23c2   :  { %v5001_v9 = vadd.f32 %v5000_v5, %v4998_v45  ;;  %v5182_v45 = vperm.slane %v7766_v31, 2 }
0x23c5   :  { %v6463_v53 = vpop.eup %6462 }
0x23c6   :  { %v4996_v41 = vmul.f32 %v6463_v53, %v4956_v30 }
0x23c8   :  { %v4999_v21 = vmul.f32 %v4997_v4, %v4996_v41 }
0x23ca   :  { %v5002_v39 = vadd.f32 %v5000_v5, %v4999_v21 }
0x23cc   :  { %v5029_v13 = vpack.c.bf16 %v5002_v39, %v5001_v9 }
0x23ce   :  { %5770 = vmatmul.msk.bf16.vlgmr.msrb.gmra.mxu1 %vm117_vm0, %v5029_v13 }
0x244b   :  { %v5057_v22 = vpop.f32.mrf.mxu1 }
0x244c   :  { %v5058_v19 = vadd.f32 %v6196_v20, %v5057_v22 }
0x244e   :  { %v5062_v26 = vmax.f32 %v5058_v19, 0.0 }
0x2453   :  { %v5059_v15 = vpop.f32.mrf.mxu1 }
0x2454   :  { %v5060_v29 = vadd.f32 %v6196_v20, %v5059_v15 }
0x2456   :  { %v5063_v59 = vmax.f32 %v5060_v29, 0.0 }
0x2458   :  { %v5064_v16 = vpack.c.bf16 %v5063_v59, %v5062_v26 }
0x245a   :  { %5124 = vmatmul.bf16.vlgmr.msrb.gmra.mxu2 %v5064_v16 }
0x24dd   :  { %v5125_v28 = vpop.f32.mrf.mxu2 }
0x24de   :  { %v5126_v61 = vadd.f32 %v6197_v2, %v5125_v28 }
0x24e0   :  { %v5130_v30 = vadd.f32 %v5126_v61, %v5001_v9 }
0x24e2   :  { %v5132_v32 = vsel %vm117_vm0, %v5130_v30, 0.0 }
0x24e3   :  { %5133 = vadd.xlane.f32.xlu2 %v5132_v32 }
0x24e5   :  { %v5127_v34 = vpop.f32.mrf.mxu2 }
0x24e6   :  { %v5128_v51 = vadd.f32 %v6197_v2, %v5127_v34 }
0x24e8   :  { %v5131_v42 = vadd.f32 %v5128_v51, %v5002_v39  ;;  %v5185_v39 = vperm.slane %v7775_v44, 2 }
0x24ea   :  { %v5135_v62 = vsel %vm117_vm0, %v5131_v42, 0.0 }
0x24eb   :  { %5136 = vadd.xlane.f32.xlu1 %v5135_v62 }
0x2556   :  { %v5134_v40 = vpop.xlane.xlu2 %5133 }
0x2557   :  { %v5138_v35 = vmul.f32 %v5134_v40, %v6830_v14 }
0x2559   :  { %v5140_v43 = vsub.f32 %v5130_v30, %v5138_v35 }
0x255b   :  { %v5142_v18 = vmul.f32 %v5140_v43, %v5140_v43 }
0x255d   :  { %v5144_v3 = vsel %vm117_vm0, %v5142_v18, 0.0 }
0x255e   :  { %v5137_v38 = vpop.xlane.xlu1 %5136  ;;  %5145 = vadd.xlane.f32.xlu0 %v5144_v3 }
0x255f   :  { %v5139_v46 = vmul.f32 %v5137_v38, %v6830_v14 }
0x2561   :  { %v5141_v48 = vsub.f32 %v5131_v42, %v5139_v46 }
0x2563   :  { %v5143_v37 = vmul.f32 %v5141_v48, %v5141_v48 }
0x2565   :  { %v5147_v49 = vsel %vm117_vm0, %v5143_v37, 0.0 }
0x2566   :  { %5148 = vadd.xlane.f32.xlu2 %v5147_v49 }
0x25d1   :  { %v5146_v17 = vpop.xlane.xlu0 %5145 }
0x25d2   :  { %v5150_v14 = vmul.f32 0.032258064, %v5146_v17 }
0x25d4   :  { %6464 = vrsqrt.f32 %v5150_v14  ;;  %vm5159_vm5 = vcmp.eq.f32.partialorder %v5150_v14, inf  ;;  %v5162_v7 = vand.u32 2147483648, %v5150_v14  ;;  %vm5161_vm6 = vcmp.eq.f32.partialorder %v5150_v14, 0.0 }
0x25d9   :  { %v5149_v50 = vpop.xlane.xlu2 %5148 }
0x25da   :  { %v6465_v12 = vpop.eup %6464  ;;  %v5151_v33 = vmul.f32 0.032258064, %v5149_v50 }
0x25db   :  { %v5153_v36 = vmul.f32 %v6465_v12, %v5150_v14 }
0x25dc   :  { %6466 = vrsqrt.f32 %v5151_v33  ;;  %vm5171_vm7 = vcmp.eq.f32.partialorder %v5151_v33, inf  ;;  %v5174_v4 = vand.u32 2147483648, %v5151_v33  ;;  %vm5173_vm8 = vcmp.eq.f32.partialorder %v5151_v33, 0.0 }
0x25dd   :  { %v5154_v55 = vmul.f32 %v6465_v12, %v5153_v36 }
0x25df   :  { %v5155_v57 = vmul.f32 0.5, %v5154_v55 }
0x25e1   :  { %v5156_v63 = vsub.f32 1.5, %v5155_v57 }
0x25e2   :  { %v6467_v0 = vpop.eup %6466 }
0x25e3   :  { %v5157_v1 = vmul.f32 %v6465_v12, %v5156_v63  ;;  %v5165_v52 = vmul.f32 %v6467_v0, %v5151_v33 }
0x25e5   :  { %v5158_v6 = vmul.f32 %v5157_v1, %v5150_v14  ;;  %v5166_v27 = vmul.f32 %v6467_v0, %v5165_v52 }
0x25e7   :  { %v5160_v47 = vsel %vm5159_vm5, %v5150_v14, %v5158_v6  ;;  %v5167_v8 = vmul.f32 0.5, %v5166_v27 }
0x25e8   :  { %v5163_v58 = vsel %vm5161_vm6, %v5162_v7, %v5160_v47 }
0x25e9   :  { %v5168_v10 = vsub.f32 1.5, %v5167_v8  ;;  %v5176_v11 = vadd.f32 1e-06, %v5163_v58 }
0x25eb   :  { %v5169_v60 = vmul.f32 %v6467_v0, %v5168_v10  ;;  %6468 = vrcp.f32 %v5176_v11 }
0x25ed   :  { %v5170_v54 = vmul.f32 %v5169_v60, %v5151_v33 }
0x25ef   :  { %v5172_v53 = vsel %vm5171_vm7, %v5151_v33, %v5170_v54 }
0x25f0   :  { %v5175_v41 = vsel %vm5173_vm8, %v5174_v4, %v5172_v53 }
0x25f1   :  { %v6469_v5 = vpop.eup %6468  ;;  %v5177_v21 = vadd.f32 1e-06, %v5175_v41 }
0x25f2   :  { %v5180_v9 = vmul.f32 %v6469_v5, %v5140_v43 }
0x25f3   :  { %6470 = vrcp.f32 %v5177_v21 }
0x25f4   :  { %v5183_v13 = vmul.f32 %v5182_v45, %v5180_v9 }
0x25f6   :  { %v5186_v56 = vadd.f32 %v5185_v39, %v5183_v13 }
0x25f8   :  { %5190 = vst.msk [vmem:[#allocation4] sm:$0xff] %vm117_vm0, %v5186_v56 }
0x25f9   :  { %v6471_v23 = vpop.eup %6470 }
0x25fa   :  { %v5181_v24 = vmul.f32 %v6471_v23, %v5141_v48 }
0x25fc   :  { %v5184_v25 = vmul.f32 %v5182_v45, %v5181_v24 }
0x25fe   :  { %v5187_v31 = vadd.f32 %v5185_v39, %v5184_v25 }
0x2600   :  { %5191 = vst.msk [vmem:[#allocation4 + $0x8] sm:$0xff] %vm117_vm0, %v5187_v31 }
0x2601   :  { %5217 = dma.vmem_to_hbm [thread:$0]  %s5210_s2, 256, %s5212_s7, [#allocation5], %s6540_s14, %s6540_s14, %s8016_s27  }
0x2602   :  { %6528 = dma.done.wait [#allocation3], 256  }
0x2603   :  { %6529 = vsyncadd [#allocation3], 4294967040 }
0x2604   :  { %6530 = dma.done.wait [#allocation5], 256  }
0x2605   :  { %6531 = vsyncadd [#allocation5], 4294967040 }
0x2606   :  { %5226 = vsyncpa [#allocation3], 1 }
0x2607   :  { %5227 = vsyncpa [#allocation5], 1 }

</bundles_post_ra>
